<compile_context>
chip_gen: v5e
topology: v5e:2x2
jax: 0.10.0
libtpu: 0.0.40
codegen_flags: <defaults>
</compile_context>

<pallas_src>
import jax
import jax.numpy as jnp
import numpy as np
from jax import lax
from jax.experimental import pallas as pl
from jax.experimental.pallas import tpu as pltpu

EMBEDS_DIM = 16   # E
SEQ_LEN    = 16   # L (must equal E for the module's transpose+LayerNorm to be shape-valid)
HIDDEN     = 32   # H
NUM_LAYER  = 2    # torch LSTM num_layers (hard-coded 2), bidirectional
NUM_WORD   = 20000
BATCH      = 2    # per-sentence batch


def _full_spec(shape):
    nd = len(shape)
    return pl.BlockSpec(shape, lambda i, _nd=nd: (0,) * _nd)


# ----------------------------------------------------------------------------
# Fused kernel: LayerNorm (over the sequence axis — exactly what the reference's
# transpose + LayerNorm computes) + 2-layer bi-LSTM + exp(-L2) similarity,
# for BOTH sentences at once.  Everything resident in VMEM; one launch.
# ----------------------------------------------------------------------------
def siagru_kernel(x_ref, smat_ref, tmat_ref, gam_ref, bet_ref,
                  w0_ref, b0_ref, whh0f_ref, whh0b_ref,
                  w1_ref, b1_ref, whh1f_ref, whh1b_ref,
                  sim_ref,
                  proj0_sc, seq0_sc, proj1_sc):
    NB = smat_ref.shape[0]            # combined batch = 2 * BATCH
    L = x_ref.shape[0] // NB
    H = whh0f_ref.shape[0]
    B = NB // 2
    G = 4 * H                         # per-direction gate width

    # --- 1) LayerNorm over the sequence axis -------------------------------
    # Rows of x are time-major: row r = t*NB + q.  The reference normalizes
    # embeds(x).transpose(1,2) over its last axis, i.e. over time for each
    # (batch, feature).  smat (NB, L*NB) averages rows with equal q; tmat
    # (L*NB, NB) scatters the per-(q, feature) stats back to every row.
    # Indicator matmuls keep everything 2D / MXU-friendly with no reshapes.
    x = x_ref[...]                                                      # (L*NB, E)
    smat = smat_ref[...]
    tmat = tmat_ref[...]
    mean = jnp.dot(smat, x, preferred_element_type=jnp.float32)         # (NB, E)
    xc = x - jnp.dot(tmat, mean, preferred_element_type=jnp.float32)
    var = jnp.dot(smat, xc * xc, preferred_element_type=jnp.float32)    # biased, torch-style
    inv = lax.rsqrt(var + 1e-5)                                         # torch LayerNorm eps
    xln = xc * jnp.dot(tmat, inv, preferred_element_type=jnp.float32)
    xln = xln * gam_ref[...] + bet_ref[...]                             # per-timestep affine

    # --- 2) Hoisted layer-0 input projections (both directions, bias folded in).
    # One (L*NB, E) @ (E, 8H) matmul replaces 2*L tiny matmuls on the serial path.
    # Columns [0:4H] = forward-direction gates, [4H:8H] = backward-direction gates.
    proj0_sc[...] = (jnp.dot(xln, w0_ref[...], preferred_element_type=jnp.float32)
                     + b0_ref[...])

    def lstm_step(inp, h, c, whh):
        # Gate columns were pre-permuted to (i, f, o, g): one sigmoid slab over
        # 3H lanes + one tanh over H lanes instead of four separate activations.
        gates = inp + jnp.dot(h, whh, preferred_element_type=jnp.float32)   # (NB, 4H)
        ifo = jax.nn.sigmoid(gates[:, :3 * H])
        g = jnp.tanh(gates[:, 3 * H:])
        i = ifo[:, :H]
        f = ifo[:, H:2 * H]
        o = ifo[:, 2 * H:]
        c_new = f * c + i * g
        h_new = o * jnp.tanh(c_new)
        return h_new, c_new

    zero = jnp.zeros((NB, H), jnp.float32)

    # --- 3) Layer 0: forward and backward directions advance in the SAME
    # fully-unrolled loop (independent states), so the serial step count is L
    # (not 2L) and the only h-dependent matmul per direction is h @ W_hh.
    # All slice offsets are compile-time constants (static unroll -> LLO visibility).
    whh0f = whh0f_ref[...]
    whh0b = whh0b_ref[...]
    hf, cf, hb, cb = zero, zero, zero, zero
    for s in range(L):
        rf = s * NB
        rb = (L - 1 - s) * NB
        hf, cf = lstm_step(proj0_sc[rf:rf + NB, :G], hf, cf, whh0f)
        hb, cb = lstm_step(proj0_sc[rb:rb + NB, G:], hb, cb, whh0b)
        seq0_sc[rf:rf + NB, :H] = hf         # layer-0 output sequence, [h_fwd | h_bwd] lanes
        seq0_sc[rb:rb + NB, H:] = hb
    h0f, h0b = hf, hb                        # == torch h_n[0], h_n[1]

    # --- 4) Hoisted layer-1 input projections: a single K=2H matmul over the
    # whole concatenated layer-0 output scratch, bias folded in once.
    proj1_sc[...] = (jnp.dot(seq0_sc[...], w1_ref[...], preferred_element_type=jnp.float32)
                     + b1_ref[...])

    # --- 5) Layer 1: no per-step input matmuls remain at all.
    whh1f = whh1f_ref[...]
    whh1b = whh1b_ref[...]
    hf, cf, hb, cb = zero, zero, zero, zero
    for s in range(L):
        rf = s * NB
        rb = (L - 1 - s) * NB
        hf, cf = lstm_step(proj1_sc[rf:rf + NB, :G], hf, cf, whh1f)
        hb, cb = lstm_step(proj1_sc[rb:rb + NB, G:], hb, cb, whh1b)
    h1f, h1b = hf, hb                        # == torch h_n[2], h_n[3]

    # --- 6) sim = exp(-||enc1 - enc2||_2) over the hidden axis, computed in-kernel.
    # Rows 0:B of every h_n slice belong to sentence 1, rows B:2B to sentence 2.
    # Assemble the four (B,1) results in registers and do ONE (2*num_layer*B, 1) store.
    sims = []
    for h in (h0f, h0b, h1f, h1b):
        d = h[:B, :] - h[B:, :]
        ss = jnp.sum(d * d, axis=-1, keepdims=True)                     # (B, 1)
        sims.append(jnp.exp(-jnp.sqrt(ss)))
    sim_ref[...] = jnp.concatenate(sims, axis=0)                        # single store


def siagru_pallas(x2d, kp):
    L, H, B = SEQ_LEN, HIDDEN, BATCH
    NB = 2 * B
    G = 4 * H
    args = (x2d, kp["smat"], kp["tmat"], kp["gamma_rows"], kp["beta_rows"],
            kp["w0"], kp["b0"], kp["whh0f"], kp["whh0b"],
            kp["w1"], kp["b1"], kp["whh1f"], kp["whh1b"])
    return pl.pallas_call(
        siagru_kernel,
        out_shape=jax.ShapeDtypeStruct((2 * NUM_LAYER * B, 1), jnp.float32),
        grid=(1,),
        in_specs=[_full_spec(a.shape) for a in args],
        out_specs=_full_spec((2 * NUM_LAYER * B, 1)),
        scratch_shapes=[pltpu.VMEM((L * NB, 2 * G), jnp.float32),   # layer-0 input projections
                        pltpu.VMEM((L * NB, 2 * H), jnp.float32),   # layer-0 outputs [fwd|bwd]
                        pltpu.VMEM((L * NB, 2 * G), jnp.float32)],  # layer-1 input projections
    )(*args)


# ----------------------------------------------------------------------------
# Parameter construction (PyTorch layout) and conversion to the kernel layout.
# ----------------------------------------------------------------------------
def init_params(key):
    keys = jax.random.split(key, 1 + 2 * NUM_LAYER)
    params = {
        "embed": jax.random.normal(keys[0], (NUM_WORD, EMBEDS_DIM), jnp.float32),
        "ln_gamma": jnp.ones((EMBEDS_DIM,), jnp.float32),   # torch LayerNorm default init
        "ln_beta": jnp.zeros((EMBEDS_DIM,), jnp.float32),
    }
    bound = 1.0 / (HIDDEN ** 0.5)                           # torch LSTM default uniform init
    lstm = []
    kidx = 1
    for layer in range(NUM_LAYER):
        in_size = EMBEDS_DIM if layer == 0 else 2 * HIDDEN
        for _direction in range(2):
            k1, k2, k3, k4 = jax.random.split(keys[kidx], 4)
            kidx += 1
            w_ih = jax.random.uniform(k1, (4 * HIDDEN, in_size), jnp.float32, -bound, bound)
            w_hh = jax.random.uniform(k2, (4 * HIDDEN, HIDDEN), jnp.float32, -bound, bound)
            b_ih = jax.random.uniform(k3, (4 * HIDDEN,), jnp.float32, -bound, bound)
            b_hh = jax.random.uniform(k4, (4 * HIDDEN,), jnp.float32, -bound, bound)
            lstm.append((w_ih, w_hh, b_ih, b_hh))
    params["lstm"] = lstm   # [l0_fwd, l0_bwd, l1_fwd, l1_bwd], PyTorch gate order i|f|g|o
    # NOTE: the module's self.h0 parameter is never used in forward().
    return params


def prepare_kernel_params(raw, batch):
    """Convert PyTorch-layout params into the fused-kernel layout."""
    E, H, L = EMBEDS_DIM, HIDDEN, SEQ_LEN
    NB = 2 * batch

    def reorder(w):   # last-axis gate order: torch (i, f, g, o) -> kernel (i, f, o, g)
        i, f, g, o = jnp.split(w, 4, axis=-1)
        return jnp.concatenate([i, f, o, g], axis=-1)

    def prep_dir(w_ih, w_hh, b_ih, b_hh):
        wi = reorder(w_ih.T)                                   # (in, 4H)
        wh = reorder(w_hh.T)                                   # (H, 4H)
        b = reorder((b_ih + b_hh).reshape(1, 4 * H))           # (1, 4H)
        return wi, wh, b

    wi0f, wh0f, b0f = prep_dir(*raw["lstm"][0])
    wi0b, wh0b, b0b = prep_dir(*raw["lstm"][1])
    wi1f, wh1f, b1f = prep_dir(*raw["lstm"][2])
    wi1b, wh1b, b1b = prep_dir(*raw["lstm"][3])

    kp = {
        "embed": raw["embed"],
        "w0": jnp.concatenate([wi0f, wi0b], axis=1),           # (E, 8H)
        "b0": jnp.concatenate([b0f, b0b], axis=1),             # (1, 8H)
        "whh0f": wh0f, "whh0b": wh0b,                          # (H, 4H) each
        "w1": jnp.concatenate([wi1f, wi1b], axis=1),           # (2H, 8H)
        "b1": jnp.concatenate([b1f, b1b], axis=1),             # (1, 8H)
        "whh1f": wh1f, "whh1b": wh1b,
    }

    # LayerNorm-over-sequence helpers for the time-major 2D layout (row r = t*NB + q):
    #   smat averages rows with equal q, tmat scatters per-q stats back to all rows,
    #   gamma/beta are expanded to per-row (i.e. per-timestep) values.
    r = jnp.arange(L * NB)
    q = jnp.arange(NB)
    sel = (r[None, :] % NB) == q[:, None]                      # (NB, L*NB) indicator
    kp["smat"] = sel.astype(jnp.float32) / L
    kp["tmat"] = sel.T.astype(jnp.float32)                     # (L*NB, NB)
    kp["gamma_rows"] = jnp.broadcast_to(
        jnp.repeat(raw["ln_gamma"], NB)[:, None], (L * NB, E)).astype(jnp.float32)
    kp["beta_rows"] = jnp.broadcast_to(
        jnp.repeat(raw["ln_beta"], NB)[:, None], (L * NB, E)).astype(jnp.float32)
    return kp


# ----------------------------------------------------------------------------
# Full forward pass: one XLA gather for the embedding lookup, then ONE fused
# Pallas kernel for LayerNorm + bi-LSTM (both sentences batched) + similarity.
# ----------------------------------------------------------------------------
def sia_gru_forward(kparams, sent1, sent2):
    B, L = sent1.shape
    tokens = jnp.concatenate([sent1, sent2], axis=0)           # (2B, L)
    ids = tokens.T.reshape(-1)                                 # time-major flat: r = t*2B + q
    # TODO(synk): the embedding gather stays as a single XLA gather; pulling it in-kernel
    #             (scalar-prefetch ids + per-row DMA from the HBM table) is possible but
    #             would issue 64 tiny DMAs for no net win at this size.
    x2d = jnp.take(kparams["embed"], ids, axis=0)              # (L*2B, E) float32
    sim = siagru_pallas(x2d, kparams)                          # (2*num_layer*B, 1)
    # TODO(synk): reference forward() calls self.fc(sim) but self.fc is never defined; return sim.
    return sim.reshape(2 * NUM_LAYER, B, 1)


# ----------------------------------------------------------------------------
# Pure-JAX reference of the PyTorch module (no Pallas) for numerical validation.
# ----------------------------------------------------------------------------
def _ref_lstm_dir(inp, w_ih, w_hh, b_ih, b_hh, reverse):
    Bsz, T, _ = inp.shape
    H = w_hh.shape[1]
    h = jnp.zeros((Bsz, H), jnp.float32)
    c = jnp.zeros((Bsz, H), jnp.float32)
    outs = [None] * T
    order = range(T - 1, -1, -1) if reverse else range(T)
    for t in order:
        z = inp[:, t, :] @ w_ih.T + b_ih + h @ w_hh.T + b_hh
        i, f, g, o = jnp.split(z, 4, axis=-1)
        i, f, o, g = jax.nn.sigmoid(i), jax.nn.sigmoid(f), jax.nn.sigmoid(o), jnp.tanh(g)
        c = f * c + i * g
        h = o * jnp.tanh(c)
        outs[t] = h
    return jnp.stack(outs, axis=1), h


def _ref_encode(raw, tokens):
    x = raw["embed"][tokens]                                   # (B, L, E)
    # LayerNorm applied to the (B, E, L) transpose == normalize over time, affine per time.
    mean = x.mean(axis=1, keepdims=True)
    var = jnp.mean((x - mean) ** 2, axis=1, keepdims=True)
    xln = (x - mean) / jnp.sqrt(var + 1e-5)
    xln = xln * raw["ln_gamma"][None, :, None] + raw["ln_beta"][None, :, None]
    of, hf = _ref_lstm_dir(xln, *raw["lstm"][0], reverse=False)
    ob, hb = _ref_lstm_dir(xln, *raw["lstm"][1], reverse=True)
    l0 = jnp.concatenate([of, ob], axis=-1)
    _, hf1 = _ref_lstm_dir(l0, *raw["lstm"][2], reverse=False)
    _, hb1 = _ref_lstm_dir(l0, *raw["lstm"][3], reverse=True)
    return jnp.stack([hf, hb, hf1, hb1], axis=0)               # (4, B, H) == torch h_n


def reference_forward(raw, sent1, sent2):
    e1 = _ref_encode(raw, sent1)
    e2 = _ref_encode(raw, sent2)
    d = e1 - e2
    return jnp.exp(-jnp.sqrt(jnp.sum(d * d, axis=-1, keepdims=True)))   # (4, B, 1)


if __name__ == "__main__":
    key = jax.random.PRNGKey(0)
    pkey, k1, k2 = jax.random.split(key, 3)
    raw_params = init_params(pkey)
    kparams = prepare_kernel_params(raw_params, BATCH)
    sent1 = jax.random.randint(k1, (BATCH, SEQ_LEN), 0, NUM_WORD, dtype=jnp.int32)
    sent2 = jax.random.randint(k2, (BATCH, SEQ_LEN), 0, NUM_WORD, dtype=jnp.int32)

    out = jax.jit(sia_gru_forward)(kparams, sent1, sent2)
    jax.block_until_ready(out)
    assert out.shape == (2 * NUM_LAYER, BATCH, 1), out.shape

    ref = reference_forward(raw_params, sent1, sent2)
    np.testing.assert_allclose(np.asarray(out), np.asarray(ref), rtol=1e-3, atol=1e-3)
    print("KERNEL_OK")
</pallas_src>

<mosaic_0001>
module attributes {stable_mosaic.version = 11 : i64} {
  func.func @siagru_kernel(%arg0: i32, %arg1: memref<64x16xf32, #tpu.memory_space<vmem>>, %arg2: memref<4x64xf32, #tpu.memory_space<vmem>>, %arg3: memref<64x4xf32, #tpu.memory_space<vmem>>, %arg4: memref<64x16xf32, #tpu.memory_space<vmem>>, %arg5: memref<64x16xf32, #tpu.memory_space<vmem>>, %arg6: memref<16x256xf32, #tpu.memory_space<vmem>>, %arg7: memref<1x256xf32, #tpu.memory_space<vmem>>, %arg8: memref<32x128xf32, #tpu.memory_space<vmem>>, %arg9: memref<32x128xf32, #tpu.memory_space<vmem>>, %arg10: memref<64x256xf32, #tpu.memory_space<vmem>>, %arg11: memref<1x256xf32, #tpu.memory_space<vmem>>, %arg12: memref<32x128xf32, #tpu.memory_space<vmem>>, %arg13: memref<32x128xf32, #tpu.memory_space<vmem>>, %arg14: memref<8x1xf32, #tpu.memory_space<vmem>>, %arg15: memref<64x256xf32, #tpu.memory_space<vmem>>, %arg16: memref<64x64xf32, #tpu.memory_space<vmem>>, %arg17: memref<64x256xf32, #tpu.memory_space<vmem>>) attributes {dimension_semantics = [#tpu.dimension_semantics<arbitrary>], iteration_bounds = array<i64: 1>, scalar_prefetch = 0 : i64, scratch_operands = 3 : i64, tpu.core_type = #tpu.core_type<tc>, window_params = [{pipeline_mode = #tpu.pipeline_mode<synchronous>, transform_indices = @transform_0, window_bounds = array<i64: 64, 16>}, {pipeline_mode = #tpu.pipeline_mode<synchronous>, transform_indices = @transform_1, window_bounds = array<i64: 4, 64>}, {pipeline_mode = #tpu.pipeline_mode<synchronous>, transform_indices = @transform_2, window_bounds = array<i64: 64, 4>}, {pipeline_mode = #tpu.pipeline_mode<synchronous>, transform_indices = @transform_3, window_bounds = array<i64: 64, 16>}, {pipeline_mode = #tpu.pipeline_mode<synchronous>, transform_indices = @transform_4, window_bounds = array<i64: 64, 16>}, {pipeline_mode = #tpu.pipeline_mode<synchronous>, transform_indices = @transform_5, window_bounds = array<i64: 16, 256>}, {pipeline_mode = #tpu.pipeline_mode<synchronous>, transform_indices = @transform_6, window_bounds = array<i64: 1, 256>}, {pipeline_mode = #tpu.pipeline_mode<synchronous>, transform_indices = @transform_7, window_bounds = array<i64: 32, 128>}, {pipeline_mode = #tpu.pipeline_mode<synchronous>, transform_indices = @transform_8, window_bounds = array<i64: 32, 128>}, {pipeline_mode = #tpu.pipeline_mode<synchronous>, transform_indices = @transform_9, window_bounds = array<i64: 64, 256>}, {pipeline_mode = #tpu.pipeline_mode<synchronous>, transform_indices = @transform_10, window_bounds = array<i64: 1, 256>}, {pipeline_mode = #tpu.pipeline_mode<synchronous>, transform_indices = @transform_11, window_bounds = array<i64: 32, 128>}, {pipeline_mode = #tpu.pipeline_mode<synchronous>, transform_indices = @transform_12, window_bounds = array<i64: 32, 128>}, {pipeline_mode = #tpu.pipeline_mode<synchronous>, transform_indices = @transform_13, window_bounds = array<i64: 8, 1>}]} {
    %c0 = arith.constant 0 : index
    %c0_0 = arith.constant 0 : index
    %0 = vector.load %arg1[%c0, %c0_0] : memref<64x16xf32, #tpu.memory_space<vmem>>, vector<64x16xf32>
    %c0_1 = arith.constant 0 : index
    %c0_2 = arith.constant 0 : index
    %1 = vector.load %arg2[%c0_1, %c0_2] : memref<4x64xf32, #tpu.memory_space<vmem>>, vector<4x64xf32>
    %c0_3 = arith.constant 0 : index
    %c0_4 = arith.constant 0 : index
    %2 = vector.load %arg3[%c0_3, %c0_4] : memref<64x4xf32, #tpu.memory_space<vmem>>, vector<64x4xf32>
    %cst = arith.constant dense<0.000000e+00> : vector<4x16xf32>
    %3 = tpu.matmul %1, %0, %cst {dimension_numbers = #tpu.dot_dimension_numbers<[1], [0], [0], [1], [0, 0, 1, 1], [], []>} : vector<4x64xf32>, vector<64x16xf32>, vector<4x16xf32> -> vector<4x16xf32>
    %cst_5 = arith.constant dense<0.000000e+00> : vector<64x16xf32>
    %4 = tpu.matmul %2, %3, %cst_5 {dimension_numbers = #tpu.dot_dimension_numbers<[1], [0], [0], [1], [0, 0, 1, 1], [], []>} : vector<64x4xf32>, vector<4x16xf32>, vector<64x16xf32> -> vector<64x16xf32>
    %5 = arith.subf %0, %4 : vector<64x16xf32>
    %6 = arith.mulf %5, %5 : vector<64x16xf32>
    %cst_6 = arith.constant dense<0.000000e+00> : vector<4x16xf32>
    %7 = tpu.matmul %1, %6, %cst_6 {dimension_numbers = #tpu.dot_dimension_numbers<[1], [0], [0], [1], [0, 0, 1, 1], [], []>} : vector<4x64xf32>, vector<64x16xf32>, vector<4x16xf32> -> vector<4x16xf32>
    %cst_7 = arith.constant 9.99999974E-6 : f32
    %8 = vector.broadcast %cst_7 : f32 to vector<4x16xf32>
    %9 = arith.addf %7, %8 : vector<4x16xf32>
    %10 = math.rsqrt %9 : vector<4x16xf32>
    %cst_8 = arith.constant dense<0.000000e+00> : vector<64x16xf32>
    %11 = tpu.matmul %2, %10, %cst_8 {dimension_numbers = #tpu.dot_dimension_numbers<[1], [0], [0], [1], [0, 0, 1, 1], [], []>} : vector<64x4xf32>, vector<4x16xf32>, vector<64x16xf32> -> vector<64x16xf32>
    %12 = arith.mulf %5, %11 : vector<64x16xf32>
    %c0_9 = arith.constant 0 : index
    %c0_10 = arith.constant 0 : index
    %13 = vector.load %arg4[%c0_9, %c0_10] : memref<64x16xf32, #tpu.memory_space<vmem>>, vector<64x16xf32>
    %14 = arith.mulf %12, %13 : vector<64x16xf32>
    %c0_11 = arith.constant 0 : index
    %c0_12 = arith.constant 0 : index
    %15 = vector.load %arg5[%c0_11, %c0_12] : memref<64x16xf32, #tpu.memory_space<vmem>>, vector<64x16xf32>
    %16 = arith.addf %14, %15 : vector<64x16xf32>
    %c0_13 = arith.constant 0 : index
    %c0_14 = arith.constant 0 : index
    %17 = vector.load %arg6[%c0_13, %c0_14] : memref<16x256xf32, #tpu.memory_space<vmem>>, vector<16x256xf32>
    %cst_15 = arith.constant dense<0.000000e+00> : vector<64x256xf32>
    %18 = tpu.matmul %16, %17, %cst_15 {dimension_numbers = #tpu.dot_dimension_numbers<[1], [0], [0], [1], [0, 0, 1, 1], [], []>} : vector<64x16xf32>, vector<16x256xf32>, vector<64x256xf32> -> vector<64x256xf32>
    %c0_16 = arith.constant 0 : index
    %c0_17 = arith.constant 0 : index
    %19 = vector.load %arg7[%c0_16, %c0_17] : memref<1x256xf32, #tpu.memory_space<vmem>>, vector<1x256xf32>
    %20 = vector.broadcast %19 : vector<1x256xf32> to vector<64x256xf32>
    %21 = arith.addf %18, %20 : vector<64x256xf32>
    %c0_18 = arith.constant 0 : index
    %c0_19 = arith.constant 0 : index
    %22 = vector.load %arg15[%c0_18, %c0_19] : memref<64x256xf32, #tpu.memory_space<vmem>>, vector<64x256xf32>
    tpu.vector_store %arg15[%c0_18, %c0_19], %21 {strides = array<i32>} : memref<64x256xf32, #tpu.memory_space<vmem>>, vector<64x256xf32>,
    %cst_20 = arith.constant 0.000000e+00 : f32
    %23 = vector.broadcast %cst_20 : f32 to vector<4x32xf32>
    %c0_21 = arith.constant 0 : index
    %c0_22 = arith.constant 0 : index
    %24 = vector.load %arg8[%c0_21, %c0_22] : memref<32x128xf32, #tpu.memory_space<vmem>>, vector<32x128xf32>
    %c0_23 = arith.constant 0 : index
    %c0_24 = arith.constant 0 : index
    %25 = vector.load %arg9[%c0_23, %c0_24] : memref<32x128xf32, #tpu.memory_space<vmem>>, vector<32x128xf32>
    %c0_25 = arith.constant 0 : index
    %c0_26 = arith.constant 0 : index
    %26 = vector.load %arg15[%c0_25, %c0_26] : memref<64x256xf32, #tpu.memory_space<vmem>>, vector<4x128xf32>
    %cst_27 = arith.constant dense<0.000000e+00> : vector<4x128xf32>
    %27 = tpu.matmul %23, %24, %cst_27 {dimension_numbers = #tpu.dot_dimension_numbers<[1], [0], [0], [1], [0, 0, 1, 1], [], []>} : vector<4x32xf32>, vector<32x128xf32>, vector<4x128xf32> -> vector<4x128xf32>
    %28 = arith.addf %26, %27 : vector<4x128xf32>
    %29 = vector.extract_strided_slice %28 {offsets = [0, 0], sizes = [4, 96], strides = [1, 1]} : vector<4x128xf32> to vector<4x96xf32>
    %30 = arith.negf %29 : vector<4x96xf32>
    %31 = math.exp %30 : vector<4x96xf32>
    %cst_28 = arith.constant 1.000000e+00 : f32
    %32 = vector.broadcast %cst_28 : f32 to vector<4x96xf32>
    %33 = arith.addf %32, %31 : vector<4x96xf32>
    %34 = arith.divf %32, %33 : vector<4x96xf32>
    %35 = vector.extract_strided_slice %28 {offsets = [0, 96], sizes = [4, 32], strides = [1, 1]} : vector<4x128xf32> to vector<4x32xf32>
    %36 = math.tanh %35 : vector<4x32xf32>
    %37 = vector.extract_strided_slice %34 {offsets = [0, 0], sizes = [4, 32], strides = [1, 1]} : vector<4x96xf32> to vector<4x32xf32>
    %38 = vector.extract_strided_slice %34 {offsets = [0, 32], sizes = [4, 32], strides = [1, 1]} : vector<4x96xf32> to vector<4x32xf32>
    %39 = vector.extract_strided_slice %34 {offsets = [0, 64], sizes = [4, 32], strides = [1, 1]} : vector<4x96xf32> to vector<4x32xf32>
    %40 = arith.mulf %38, %23 : vector<4x32xf32>
    %41 = arith.mulf %37, %36 : vector<4x32xf32>
    %42 = arith.addf %40, %41 : vector<4x32xf32>
    %43 = math.tanh %42 : vector<4x32xf32>
    %44 = arith.mulf %39, %43 : vector<4x32xf32>
    %c60 = arith.constant 60 : index
    %c128 = arith.constant 128 : index
    %45 = vector.load %arg15[%c60, %c128] : memref<64x256xf32, #tpu.memory_space<vmem>>, vector<4x128xf32>
    %cst_29 = arith.constant dense<0.000000e+00> : vector<4x128xf32>
    %46 = tpu.matmul %23, %25, %cst_29 {dimension_numbers = #tpu.dot_dimension_numbers<[1], [0], [0], [1], [0, 0, 1, 1], [], []>} : vector<4x32xf32>, vector<32x128xf32>, vector<4x128xf32> -> vector<4x128xf32>
    %47 = arith.addf %45, %46 : vector<4x128xf32>
    %48 = vector.extract_strided_slice %47 {offsets = [0, 0], sizes = [4, 96], strides = [1, 1]} : vector<4x128xf32> to vector<4x96xf32>
    %49 = arith.negf %48 : vector<4x96xf32>
    %50 = math.exp %49 : vector<4x96xf32>
    %cst_30 = arith.constant 1.000000e+00 : f32
    %51 = vector.broadcast %cst_30 : f32 to vector<4x96xf32>
    %52 = arith.addf %51, %50 : vector<4x96xf32>
    %53 = arith.divf %51, %52 : vector<4x96xf32>
    %54 = vector.extract_strided_slice %47 {offsets = [0, 96], sizes = [4, 32], strides = [1, 1]} : vector<4x128xf32> to vector<4x32xf32>
    %55 = math.tanh %54 : vector<4x32xf32>
    %56 = vector.extract_strided_slice %53 {offsets = [0, 0], sizes = [4, 32], strides = [1, 1]} : vector<4x96xf32> to vector<4x32xf32>
    %57 = vector.extract_strided_slice %53 {offsets = [0, 32], sizes = [4, 32], strides = [1, 1]} : vector<4x96xf32> to vector<4x32xf32>
    %58 = vector.extract_strided_slice %53 {offsets = [0, 64], sizes = [4, 32], strides = [1, 1]} : vector<4x96xf32> to vector<4x32xf32>
    %59 = arith.mulf %57, %23 : vector<4x32xf32>
    %60 = arith.mulf %56, %55 : vector<4x32xf32>
    %61 = arith.addf %59, %60 : vector<4x32xf32>
    %62 = math.tanh %61 : vector<4x32xf32>
    %63 = arith.mulf %58, %62 : vector<4x32xf32>
    %c0_31 = arith.constant 0 : index
    %c0_32 = arith.constant 0 : index
    %64 = vector.load %arg16[%c0_31, %c0_32] : memref<64x64xf32, #tpu.memory_space<vmem>>, vector<4x32xf32>
    tpu.vector_store %arg16[%c0_31, %c0_32], %44 {strides = array<i32>} : memref<64x64xf32, #tpu.memory_space<vmem>>, vector<4x32xf32>,
    %c60_33 = arith.constant 60 : index
    %c32 = arith.constant 32 : index
    %65 = vector.load %arg16[%c60_33, %c32] : memref<64x64xf32, #tpu.memory_space<vmem>>, vector<4x32xf32>
    tpu.vector_store %arg16[%c60_33, %c32], %63 {strides = array<i32>} : memref<64x64xf32, #tpu.memory_space<vmem>>, vector<4x32xf32>,
    %c4 = arith.constant 4 : index
    %c0_34 = arith.constant 0 : index
    %66 = vector.load %arg15[%c4, %c0_34] : memref<64x256xf32, #tpu.memory_space<vmem>>, vector<4x128xf32>
    %cst_35 = arith.constant dense<0.000000e+00> : vector<4x128xf32>
    %67 = tpu.matmul %44, %24, %cst_35 {dimension_numbers = #tpu.dot_dimension_numbers<[1], [0], [0], [1], [0, 0, 1, 1], [], []>} : vector<4x32xf32>, vector<32x128xf32>, vector<4x128xf32> -> vector<4x128xf32>
    %68 = arith.addf %66, %67 : vector<4x128xf32>
    %69 = vector.extract_strided_slice %68 {offsets = [0, 0], sizes = [4, 96], strides = [1, 1]} : vector<4x128xf32> to vector<4x96xf32>
    %70 = arith.negf %69 : vector<4x96xf32>
    %71 = math.exp %70 : vector<4x96xf32>
    %cst_36 = arith.constant 1.000000e+00 : f32
    %72 = vector.broadcast %cst_36 : f32 to vector<4x96xf32>
    %73 = arith.addf %72, %71 : vector<4x96xf32>
    %74 = arith.divf %72, %73 : vector<4x96xf32>
    %75 = vector.extract_strided_slice %68 {offsets = [0, 96], sizes = [4, 32], strides = [1, 1]} : vector<4x128xf32> to vector<4x32xf32>
    %76 = math.tanh %75 : vector<4x32xf32>
    %77 = vector.extract_strided_slice %74 {offsets = [0, 0], sizes = [4, 32], strides = [1, 1]} : vector<4x96xf32> to vector<4x32xf32>
    %78 = vector.extract_strided_slice %74 {offsets = [0, 32], sizes = [4, 32], strides = [1, 1]} : vector<4x96xf32> to vector<4x32xf32>
    %79 = vector.extract_strided_slice %74 {offsets = [0, 64], sizes = [4, 32], strides = [1, 1]} : vector<4x96xf32> to vector<4x32xf32>
    %80 = arith.mulf %78, %42 : vector<4x32xf32>
    %81 = arith.mulf %77, %76 : vector<4x32xf32>
    %82 = arith.addf %80, %81 : vector<4x32xf32>
    %83 = math.tanh %82 : vector<4x32xf32>
    %84 = arith.mulf %79, %83 : vector<4x32xf32>
    %c56 = arith.constant 56 : index
    %c128_37 = arith.constant 128 : index
    %85 = vector.load %arg15[%c56, %c128_37] : memref<64x256xf32, #tpu.memory_space<vmem>>, vector<4x128xf32>
    %cst_38 = arith.constant dense<0.000000e+00> : vector<4x128xf32>
    %86 = tpu.matmul %63, %25, %cst_38 {dimension_numbers = #tpu.dot_dimension_numbers<[1], [0], [0], [1], [0, 0, 1, 1], [], []>} : vector<4x32xf32>, vector<32x128xf32>, vector<4x128xf32> -> vector<4x128xf32>
    %87 = arith.addf %85, %86 : vector<4x128xf32>
    %88 = vector.extract_strided_slice %87 {offsets = [0, 0], sizes = [4, 96], strides = [1, 1]} : vector<4x128xf32> to vector<4x96xf32>
    %89 = arith.negf %88 : vector<4x96xf32>
    %90 = math.exp %89 : vector<4x96xf32>
    %cst_39 = arith.constant 1.000000e+00 : f32
    %91 = vector.broadcast %cst_39 : f32 to vector<4x96xf32>
    %92 = arith.addf %91, %90 : vector<4x96xf32>
    %93 = arith.divf %91, %92 : vector<4x96xf32>
    %94 = vector.extract_strided_slice %87 {offsets = [0, 96], sizes = [4, 32], strides = [1, 1]} : vector<4x128xf32> to vector<4x32xf32>
    %95 = math.tanh %94 : vector<4x32xf32>
    %96 = vector.extract_strided_slice %93 {offsets = [0, 0], sizes = [4, 32], strides = [1, 1]} : vector<4x96xf32> to vector<4x32xf32>
    %97 = vector.extract_strided_slice %93 {offsets = [0, 32], sizes = [4, 32], strides = [1, 1]} : vector<4x96xf32> to vector<4x32xf32>
    %98 = vector.extract_strided_slice %93 {offsets = [0, 64], sizes = [4, 32], strides = [1, 1]} : vector<4x96xf32> to vector<4x32xf32>
    %99 = arith.mulf %97, %61 : vector<4x32xf32>
    %100 = arith.mulf %96, %95 : vector<4x32xf32>
    %101 = arith.addf %99, %100 : vector<4x32xf32>
    %102 = math.tanh %101 : vector<4x32xf32>
    %103 = arith.mulf %98, %102 : vector<4x32xf32>
    %c4_40 = arith.constant 4 : index
    %c0_41 = arith.constant 0 : index
    %104 = vector.load %arg16[%c4_40, %c0_41] : memref<64x64xf32, #tpu.memory_space<vmem>>, vector<4x32xf32>
    tpu.vector_store %arg16[%c4_40, %c0_41], %84 {strides = array<i32>} : memref<64x64xf32, #tpu.memory_space<vmem>>, vector<4x32xf32>,
    %c56_42 = arith.constant 56 : index
    %c32_43 = arith.constant 32 : index
    %105 = vector.load %arg16[%c56_42, %c32_43] : memref<64x64xf32, #tpu.memory_space<vmem>>, vector<4x32xf32>
    tpu.vector_store %arg16[%c56_42, %c32_43], %103 {strides = array<i32>} : memref<64x64xf32, #tpu.memory_space<vmem>>, vector<4x32xf32>,
    %c8 = arith.constant 8 : index
    %c0_44 = arith.constant 0 : index
    %106 = vector.load %arg15[%c8, %c0_44] : memref<64x256xf32, #tpu.memory_space<vmem>>, vector<4x128xf32>
    %cst_45 = arith.constant dense<0.000000e+00> : vector<4x128xf32>
    %107 = tpu.matmul %84, %24, %cst_45 {dimension_numbers = #tpu.dot_dimension_numbers<[1], [0], [0], [1], [0, 0, 1, 1], [], []>} : vector<4x32xf32>, vector<32x128xf32>, vector<4x128xf32> -> vector<4x128xf32>
    %108 = arith.addf %106, %107 : vector<4x128xf32>
    %109 = vector.extract_strided_slice %108 {offsets = [0, 0], sizes = [4, 96], strides = [1, 1]} : vector<4x128xf32> to vector<4x96xf32>
    %110 = arith.negf %109 : vector<4x96xf32>
    %111 = math.exp %110 : vector<4x96xf32>
    %cst_46 = arith.constant 1.000000e+00 : f32
    %112 = vector.broadcast %cst_46 : f32 to vector<4x96xf32>
    %113 = arith.addf %112, %111 : vector<4x96xf32>
    %114 = arith.divf %112, %113 : vector<4x96xf32>
    %115 = vector.extract_strided_slice %108 {offsets = [0, 96], sizes = [4, 32], strides = [1, 1]} : vector<4x128xf32> to vector<4x32xf32>
    %116 = math.tanh %115 : vector<4x32xf32>
    %117 = vector.extract_strided_slice %114 {offsets = [0, 0], sizes = [4, 32], strides = [1, 1]} : vector<4x96xf32> to vector<4x32xf32>
    %118 = vector.extract_strided_slice %114 {offsets = [0, 32], sizes = [4, 32], strides = [1, 1]} : vector<4x96xf32> to vector<4x32xf32>
    %119 = vector.extract_strided_slice %114 {offsets = [0, 64], sizes = [4, 32], strides = [1, 1]} : vector<4x96xf32> to vector<4x32xf32>
    %120 = arith.mulf %118, %82 : vector<4x32xf32>
    %121 = arith.mulf %117, %116 : vector<4x32xf32>
    %122 = arith.addf %120, %121 : vector<4x32xf32>
    %123 = math.tanh %122 : vector<4x32xf32>
    %124 = arith.mulf %119, %123 : vector<4x32xf32>
    %c52 = arith.constant 52 : index
    %c128_47 = arith.constant 128 : index
    %125 = vector.load %arg15[%c52, %c128_47] : memref<64x256xf32, #tpu.memory_space<vmem>>, vector<4x128xf32>
    %cst_48 = arith.constant dense<0.000000e+00> : vector<4x128xf32>
    %126 = tpu.matmul %103, %25, %cst_48 {dimension_numbers = #tpu.dot_dimension_numbers<[1], [0], [0], [1], [0, 0, 1, 1], [], []>} : vector<4x32xf32>, vector<32x128xf32>, vector<4x128xf32> -> vector<4x128xf32>
    %127 = arith.addf %125, %126 : vector<4x128xf32>
    %128 = vector.extract_strided_slice %127 {offsets = [0, 0], sizes = [4, 96], strides = [1, 1]} : vector<4x128xf32> to vector<4x96xf32>
    %129 = arith.negf %128 : vector<4x96xf32>
    %130 = math.exp %129 : vector<4x96xf32>
    %cst_49 = arith.constant 1.000000e+00 : f32
    %131 = vector.broadcast %cst_49 : f32 to vector<4x96xf32>
    %132 = arith.addf %131, %130 : vector<4x96xf32>
    %133 = arith.divf %131, %132 : vector<4x96xf32>
    %134 = vector.extract_strided_slice %127 {offsets = [0, 96], sizes = [4, 32], strides = [1, 1]} : vector<4x128xf32> to vector<4x32xf32>
    %135 = math.tanh %134 : vector<4x32xf32>
    %136 = vector.extract_strided_slice %133 {offsets = [0, 0], sizes = [4, 32], strides = [1, 1]} : vector<4x96xf32> to vector<4x32xf32>
    %137 = vector.extract_strided_slice %133 {offsets = [0, 32], sizes = [4, 32], strides = [1, 1]} : vector<4x96xf32> to vector<4x32xf32>
    %138 = vector.extract_strided_slice %133 {offsets = [0, 64], sizes = [4, 32], strides = [1, 1]} : vector<4x96xf32> to vector<4x32xf32>
    %139 = arith.mulf %137, %101 : vector<4x32xf32>
    %140 = arith.mulf %136, %135 : vector<4x32xf32>
    %141 = arith.addf %139, %140 : vector<4x32xf32>
    %142 = math.tanh %141 : vector<4x32xf32>
    %143 = arith.mulf %138, %142 : vector<4x32xf32>
    %c8_50 = arith.constant 8 : index
    %c0_51 = arith.constant 0 : index
    %144 = vector.load %arg16[%c8_50, %c0_51] : memref<64x64xf32, #tpu.memory_space<vmem>>, vector<4x32xf32>
    tpu.vector_store %arg16[%c8_50, %c0_51], %124 {strides = array<i32>} : memref<64x64xf32, #tpu.memory_space<vmem>>, vector<4x32xf32>,
    %c52_52 = arith.constant 52 : index
    %c32_53 = arith.constant 32 : index
    %145 = vector.load %arg16[%c52_52, %c32_53] : memref<64x64xf32, #tpu.memory_space<vmem>>, vector<4x32xf32>
    tpu.vector_store %arg16[%c52_52, %c32_53], %143 {strides = array<i32>} : memref<64x64xf32, #tpu.memory_space<vmem>>, vector<4x32xf32>,
    %c12 = arith.constant 12 : index
    %c0_54 = arith.constant 0 : index
    %146 = vector.load %arg15[%c12, %c0_54] : memref<64x256xf32, #tpu.memory_space<vmem>>, vector<4x128xf32>
    %cst_55 = arith.constant dense<0.000000e+00> : vector<4x128xf32>
    %147 = tpu.matmul %124, %24, %cst_55 {dimension_numbers = #tpu.dot_dimension_numbers<[1], [0], [0], [1], [0, 0, 1, 1], [], []>} : vector<4x32xf32>, vector<32x128xf32>, vector<4x128xf32> -> vector<4x128xf32>
    %148 = arith.addf %146, %147 : vector<4x128xf32>
    %149 = vector.extract_strided_slice %148 {offsets = [0, 0], sizes = [4, 96], strides = [1, 1]} : vector<4x128xf32> to vector<4x96xf32>
    %150 = arith.negf %149 : vector<4x96xf32>
    %151 = math.exp %150 : vector<4x96xf32>
    %cst_56 = arith.constant 1.000000e+00 : f32
    %152 = vector.broadcast %cst_56 : f32 to vector<4x96xf32>
    %153 = arith.addf %152, %151 : vector<4x96xf32>
    %154 = arith.divf %152, %153 : vector<4x96xf32>
    %155 = vector.extract_strided_slice %148 {offsets = [0, 96], sizes = [4, 32], strides = [1, 1]} : vector<4x128xf32> to vector<4x32xf32>
    %156 = math.tanh %155 : vector<4x32xf32>
    %157 = vector.extract_strided_slice %154 {offsets = [0, 0], sizes = [4, 32], strides = [1, 1]} : vector<4x96xf32> to vector<4x32xf32>
    %158 = vector.extract_strided_slice %154 {offsets = [0, 32], sizes = [4, 32], strides = [1, 1]} : vector<4x96xf32> to vector<4x32xf32>
    %159 = vector.extract_strided_slice %154 {offsets = [0, 64], sizes = [4, 32], strides = [1, 1]} : vector<4x96xf32> to vector<4x32xf32>
    %160 = arith.mulf %158, %122 : vector<4x32xf32>
    %161 = arith.mulf %157, %156 : vector<4x32xf32>
    %162 = arith.addf %160, %161 : vector<4x32xf32>
    %163 = math.tanh %162 : vector<4x32xf32>
    %164 = arith.mulf %159, %163 : vector<4x32xf32>
    %c48 = arith.constant 48 : index
    %c128_57 = arith.constant 128 : index
    %165 = vector.load %arg15[%c48, %c128_57] : memref<64x256xf32, #tpu.memory_space<vmem>>, vector<4x128xf32>
    %cst_58 = arith.constant dense<0.000000e+00> : vector<4x128xf32>
    %166 = tpu.matmul %143, %25, %cst_58 {dimension_numbers = #tpu.dot_dimension_numbers<[1], [0], [0], [1], [0, 0, 1, 1], [], []>} : vector<4x32xf32>, vector<32x128xf32>, vector<4x128xf32> -> vector<4x128xf32>
    %167 = arith.addf %165, %166 : vector<4x128xf32>
    %168 = vector.extract_strided_slice %167 {offsets = [0, 0], sizes = [4, 96], strides = [1, 1]} : vector<4x128xf32> to vector<4x96xf32>
    %169 = arith.negf %168 : vector<4x96xf32>
    %170 = math.exp %169 : vector<4x96xf32>
    %cst_59 = arith.constant 1.000000e+00 : f32
    %171 = vector.broadcast %cst_59 : f32 to vector<4x96xf32>
    %172 = arith.addf %171, %170 : vector<4x96xf32>
    %173 = arith.divf %171, %172 : vector<4x96xf32>
    %174 = vector.extract_strided_slice %167 {offsets = [0, 96], sizes = [4, 32], strides = [1, 1]} : vector<4x128xf32> to vector<4x32xf32>
    %175 = math.tanh %174 : vector<4x32xf32>
    %176 = vector.extract_strided_slice %173 {offsets = [0, 0], sizes = [4, 32], strides = [1, 1]} : vector<4x96xf32> to vector<4x32xf32>
    %177 = vector.extract_strided_slice %173 {offsets = [0, 32], sizes = [4, 32], strides = [1, 1]} : vector<4x96xf32> to vector<4x32xf32>
    %178 = vector.extract_strided_slice %173 {offsets = [0, 64], sizes = [4, 32], strides = [1, 1]} : vector<4x96xf32> to vector<4x32xf32>
    %179 = arith.mulf %177, %141 : vector<4x32xf32>
    %180 = arith.mulf %176, %175 : vector<4x32xf32>
    %181 = arith.addf %179, %180 : vector<4x32xf32>
    %182 = math.tanh %181 : vector<4x32xf32>
    %183 = arith.mulf %178, %182 : vector<4x32xf32>
    %c12_60 = arith.constant 12 : index
    %c0_61 = arith.constant 0 : index
    %184 = vector.load %arg16[%c12_60, %c0_61] : memref<64x64xf32, #tpu.memory_space<vmem>>, vector<4x32xf32>
    tpu.vector_store %arg16[%c12_60, %c0_61], %164 {strides = array<i32>} : memref<64x64xf32, #tpu.memory_space<vmem>>, vector<4x32xf32>,
    %c48_62 = arith.constant 48 : index
    %c32_63 = arith.constant 32 : index
    %185 = vector.load %arg16[%c48_62, %c32_63] : memref<64x64xf32, #tpu.memory_space<vmem>>, vector<4x32xf32>
    tpu.vector_store %arg16[%c48_62, %c32_63], %183 {strides = array<i32>} : memref<64x64xf32, #tpu.memory_space<vmem>>, vector<4x32xf32>,
    %c16 = arith.constant 16 : index
    %c0_64 = arith.constant 0 : index
    %186 = vector.load %arg15[%c16, %c0_64] : memref<64x256xf32, #tpu.memory_space<vmem>>, vector<4x128xf32>
    %cst_65 = arith.constant dense<0.000000e+00> : vector<4x128xf32>
    %187 = tpu.matmul %164, %24, %cst_65 {dimension_numbers = #tpu.dot_dimension_numbers<[1], [0], [0], [1], [0, 0, 1, 1], [], []>} : vector<4x32xf32>, vector<32x128xf32>, vector<4x128xf32> -> vector<4x128xf32>
    %188 = arith.addf %186, %187 : vector<4x128xf32>
    %189 = vector.extract_strided_slice %188 {offsets = [0, 0], sizes = [4, 96], strides = [1, 1]} : vector<4x128xf32> to vector<4x96xf32>
    %190 = arith.negf %189 : vector<4x96xf32>
    %191 = math.exp %190 : vector<4x96xf32>
    %cst_66 = arith.constant 1.000000e+00 : f32
    %192 = vector.broadcast %cst_66 : f32 to vector<4x96xf32>
    %193 = arith.addf %192, %191 : vector<4x96xf32>
    %194 = arith.divf %192, %193 : vector<4x96xf32>
    %195 = vector.extract_strided_slice %188 {offsets = [0, 96], sizes = [4, 32], strides = [1, 1]} : vector<4x128xf32> to vector<4x32xf32>
    %196 = math.tanh %195 : vector<4x32xf32>
    %197 = vector.extract_strided_slice %194 {offsets = [0, 0], sizes = [4, 32], strides = [1, 1]} : vector<4x96xf32> to vector<4x32xf32>
    %198 = vector.extract_strided_slice %194 {offsets = [0, 32], sizes = [4, 32], strides = [1, 1]} : vector<4x96xf32> to vector<4x32xf32>
    %199 = vector.extract_strided_slice %194 {offsets = [0, 64], sizes = [4, 32], strides = [1, 1]} : vector<4x96xf32> to vector<4x32xf32>
    %200 = arith.mulf %198, %162 : vector<4x32xf32>
    %201 = arith.mulf %197, %196 : vector<4x32xf32>
    %202 = arith.addf %200, %201 : vector<4x32xf32>
    %203 = math.tanh %202 : vector<4x32xf32>
    %204 = arith.mulf %199, %203 : vector<4x32xf32>
    %c44 = arith.constant 44 : index
    %c128_67 = arith.constant 128 : index
    %205 = vector.load %arg15[%c44, %c128_67] : memref<64x256xf32, #tpu.memory_space<vmem>>, vector<4x128xf32>
    %cst_68 = arith.constant dense<0.000000e+00> : vector<4x128xf32>
    %206 = tpu.matmul %183, %25, %cst_68 {dimension_numbers = #tpu.dot_dimension_numbers<[1], [0], [0], [1], [0, 0, 1, 1], [], []>} : vector<4x32xf32>, vector<32x128xf32>, vector<4x128xf32> -> vector<4x128xf32>
    %207 = arith.addf %205, %206 : vector<4x128xf32>
    %208 = vector.extract_strided_slice %207 {offsets = [0, 0], sizes = [4, 96], strides = [1, 1]} : vector<4x128xf32> to vector<4x96xf32>
    %209 = arith.negf %208 : vector<4x96xf32>
    %210 = math.exp %209 : vector<4x96xf32>
    %cst_69 = arith.constant 1.000000e+00 : f32
    %211 = vector.broadcast %cst_69 : f32 to vector<4x96xf32>
    %212 = arith.addf %211, %210 : vector<4x96xf32>
    %213 = arith.divf %211, %212 : vector<4x96xf32>
    %214 = vector.extract_strided_slice %207 {offsets = [0, 96], sizes = [4, 32], strides = [1, 1]} : vector<4x128xf32> to vector<4x32xf32>
    %215 = math.tanh %214 : vector<4x32xf32>
    %216 = vector.extract_strided_slice %213 {offsets = [0, 0], sizes = [4, 32], strides = [1, 1]} : vector<4x96xf32> to vector<4x32xf32>
    %217 = vector.extract_strided_slice %213 {offsets = [0, 32], sizes = [4, 32], strides = [1, 1]} : vector<4x96xf32> to vector<4x32xf32>
    %218 = vector.extract_strided_slice %213 {offsets = [0, 64], sizes = [4, 32], strides = [1, 1]} : vector<4x96xf32> to vector<4x32xf32>
    %219 = arith.mulf %217, %181 : vector<4x32xf32>
    %220 = arith.mulf %216, %215 : vector<4x32xf32>
    %221 = arith.addf %219, %220 : vector<4x32xf32>
    %222 = math.tanh %221 : vector<4x32xf32>
    %223 = arith.mulf %218, %222 : vector<4x32xf32>
    %c16_70 = arith.constant 16 : index
    %c0_71 = arith.constant 0 : index
    %224 = vector.load %arg16[%c16_70, %c0_71] : memref<64x64xf32, #tpu.memory_space<vmem>>, vector<4x32xf32>
    tpu.vector_store %arg16[%c16_70, %c0_71], %204 {strides = array<i32>} : memref<64x64xf32, #tpu.memory_space<vmem>>, vector<4x32xf32>,
    %c44_72 = arith.constant 44 : index
    %c32_73 = arith.constant 32 : index
    %225 = vector.load %arg16[%c44_72, %c32_73] : memref<64x64xf32, #tpu.memory_space<vmem>>, vector<4x32xf32>
    tpu.vector_store %arg16[%c44_72, %c32_73], %223 {strides = array<i32>} : memref<64x64xf32, #tpu.memory_space<vmem>>, vector<4x32xf32>,
    %c20 = arith.constant 20 : index
    %c0_74 = arith.constant 0 : index
    %226 = vector.load %arg15[%c20, %c0_74] : memref<64x256xf32, #tpu.memory_space<vmem>>, vector<4x128xf32>
    %cst_75 = arith.constant dense<0.000000e+00> : vector<4x128xf32>
    %227 = tpu.matmul %204, %24, %cst_75 {dimension_numbers = #tpu.dot_dimension_numbers<[1], [0], [0], [1], [0, 0, 1, 1], [], []>} : vector<4x32xf32>, vector<32x128xf32>, vector<4x128xf32> -> vector<4x128xf32>
    %228 = arith.addf %226, %227 : vector<4x128xf32>
    %229 = vector.extract_strided_slice %228 {offsets = [0, 0], sizes = [4, 96], strides = [1, 1]} : vector<4x128xf32> to vector<4x96xf32>
    %230 = arith.negf %229 : vector<4x96xf32>
    %231 = math.exp %230 : vector<4x96xf32>
    %cst_76 = arith.constant 1.000000e+00 : f32
    %232 = vector.broadcast %cst_76 : f32 to vector<4x96xf32>
    %233 = arith.addf %232, %231 : vector<4x96xf32>
    %234 = arith.divf %232, %233 : vector<4x96xf32>
    %235 = vector.extract_strided_slice %228 {offsets = [0, 96], sizes = [4, 32], strides = [1, 1]} : vector<4x128xf32> to vector<4x32xf32>
    %236 = math.tanh %235 : vector<4x32xf32>
    %237 = vector.extract_strided_slice %234 {offsets = [0, 0], sizes = [4, 32], strides = [1, 1]} : vector<4x96xf32> to vector<4x32xf32>
    %238 = vector.extract_strided_slice %234 {offsets = [0, 32], sizes = [4, 32], strides = [1, 1]} : vector<4x96xf32> to vector<4x32xf32>
    %239 = vector.extract_strided_slice %234 {offsets = [0, 64], sizes = [4, 32], strides = [1, 1]} : vector<4x96xf32> to vector<4x32xf32>
    %240 = arith.mulf %238, %202 : vector<4x32xf32>
    %241 = arith.mulf %237, %236 : vector<4x32xf32>
    %242 = arith.addf %240, %241 : vector<4x32xf32>
    %243 = math.tanh %242 : vector<4x32xf32>
    %244 = arith.mulf %239, %243 : vector<4x32xf32>
    %c40 = arith.constant 40 : index
    %c128_77 = arith.constant 128 : index
    %245 = vector.load %arg15[%c40, %c128_77] : memref<64x256xf32, #tpu.memory_space<vmem>>, vector<4x128xf32>
    %cst_78 = arith.constant dense<0.000000e+00> : vector<4x128xf32>
    %246 = tpu.matmul %223, %25, %cst_78 {dimension_numbers = #tpu.dot_dimension_numbers<[1], [0], [0], [1], [0, 0, 1, 1], [], []>} : vector<4x32xf32>, vector<32x128xf32>, vector<4x128xf32> -> vector<4x128xf32>
    %247 = arith.addf %245, %246 : vector<4x128xf32>
    %248 = vector.extract_strided_slice %247 {offsets = [0, 0], sizes = [4, 96], strides = [1, 1]} : vector<4x128xf32> to vector<4x96xf32>
    %249 = arith.negf %248 : vector<4x96xf32>
    %250 = math.exp %249 : vector<4x96xf32>
    %cst_79 = arith.constant 1.000000e+00 : f32
    %251 = vector.broadcast %cst_79 : f32 to vector<4x96xf32>
    %252 = arith.addf %251, %250 : vector<4x96xf32>
    %253 = arith.divf %251, %252 : vector<4x96xf32>
    %254 = vector.extract_strided_slice %247 {offsets = [0, 96], sizes = [4, 32], strides = [1, 1]} : vector<4x128xf32> to vector<4x32xf32>
    %255 = math.tanh %254 : vector<4x32xf32>
    %256 = vector.extract_strided_slice %253 {offsets = [0, 0], sizes = [4, 32], strides = [1, 1]} : vector<4x96xf32> to vector<4x32xf32>
    %257 = vector.extract_strided_slice %253 {offsets = [0, 32], sizes = [4, 32], strides = [1, 1]} : vector<4x96xf32> to vector<4x32xf32>
    %258 = vector.extract_strided_slice %253 {offsets = [0, 64], sizes = [4, 32], strides = [1, 1]} : vector<4x96xf32> to vector<4x32xf32>
    %259 = arith.mulf %257, %221 : vector<4x32xf32>
    %260 = arith.mulf %256, %255 : vector<4x32xf32>
    %261 = arith.addf %259, %260 : vector<4x32xf32>
    %262 = math.tanh %261 : vector<4x32xf32>
    %263 = arith.mulf %258, %262 : vector<4x32xf32>
    %c20_80 = arith.constant 20 : index
    %c0_81 = arith.constant 0 : index
    %264 = vector.load %arg16[%c20_80, %c0_81] : memref<64x64xf32, #tpu.memory_space<vmem>>, vector<4x32xf32>
    tpu.vector_store %arg16[%c20_80, %c0_81], %244 {strides = array<i32>} : memref<64x64xf32, #tpu.memory_space<vmem>>, vector<4x32xf32>,
    %c40_82 = arith.constant 40 : index
    %c32_83 = arith.constant 32 : index
    %265 = vector.load %arg16[%c40_82, %c32_83] : memref<64x64xf32, #tpu.memory_space<vmem>>, vector<4x32xf32>
    tpu.vector_store %arg16[%c40_82, %c32_83], %263 {strides = array<i32>} : memref<64x64xf32, #tpu.memory_space<vmem>>, vector<4x32xf32>,
    %c24 = arith.constant 24 : index
    %c0_84 = arith.constant 0 : index
    %266 = vector.load %arg15[%c24, %c0_84] : memref<64x256xf32, #tpu.memory_space<vmem>>, vector<4x128xf32>
    %cst_85 = arith.constant dense<0.000000e+00> : vector<4x128xf32>
    %267 = tpu.matmul %244, %24, %cst_85 {dimension_numbers = #tpu.dot_dimension_numbers<[1], [0], [0], [1], [0, 0, 1, 1], [], []>} : vector<4x32xf32>, vector<32x128xf32>, vector<4x128xf32> -> vector<4x128xf32>
    %268 = arith.addf %266, %267 : vector<4x128xf32>
    %269 = vector.extract_strided_slice %268 {offsets = [0, 0], sizes = [4, 96], strides = [1, 1]} : vector<4x128xf32> to vector<4x96xf32>
    %270 = arith.negf %269 : vector<4x96xf32>
    %271 = math.exp %270 : vector<4x96xf32>
    %cst_86 = arith.constant 1.000000e+00 : f32
    %272 = vector.broadcast %cst_86 : f32 to vector<4x96xf32>
    %273 = arith.addf %272, %271 : vector<4x96xf32>
    %274 = arith.divf %272, %273 : vector<4x96xf32>
    %275 = vector.extract_strided_slice %268 {offsets = [0, 96], sizes = [4, 32], strides = [1, 1]} : vector<4x128xf32> to vector<4x32xf32>
    %276 = math.tanh %275 : vector<4x32xf32>
    %277 = vector.extract_strided_slice %274 {offsets = [0, 0], sizes = [4, 32], strides = [1, 1]} : vector<4x96xf32> to vector<4x32xf32>
    %278 = vector.extract_strided_slice %274 {offsets = [0, 32], sizes = [4, 32], strides = [1, 1]} : vector<4x96xf32> to vector<4x32xf32>
    %279 = vector.extract_strided_slice %274 {offsets = [0, 64], sizes = [4, 32], strides = [1, 1]} : vector<4x96xf32> to vector<4x32xf32>
    %280 = arith.mulf %278, %242 : vector<4x32xf32>
    %281 = arith.mulf %277, %276 : vector<4x32xf32>
    %282 = arith.addf %280, %281 : vector<4x32xf32>
    %283 = math.tanh %282 : vector<4x32xf32>
    %284 = arith.mulf %279, %283 : vector<4x32xf32>
    %c36 = arith.constant 36 : index
    %c128_87 = arith.constant 128 : index
    %285 = vector.load %arg15[%c36, %c128_87] : memref<64x256xf32, #tpu.memory_space<vmem>>, vector<4x128xf32>
    %cst_88 = arith.constant dense<0.000000e+00> : vector<4x128xf32>
    %286 = tpu.matmul %263, %25, %cst_88 {dimension_numbers = #tpu.dot_dimension_numbers<[1], [0], [0], [1], [0, 0, 1, 1], [], []>} : vector<4x32xf32>, vector<32x128xf32>, vector<4x128xf32> -> vector<4x128xf32>
    %287 = arith.addf %285, %286 : vector<4x128xf32>
    %288 = vector.extract_strided_slice %287 {offsets = [0, 0], sizes = [4, 96], strides = [1, 1]} : vector<4x128xf32> to vector<4x96xf32>
    %289 = arith.negf %288 : vector<4x96xf32>
    %290 = math.exp %289 : vector<4x96xf32>
    %cst_89 = arith.constant 1.000000e+00 : f32
    %291 = vector.broadcast %cst_89 : f32 to vector<4x96xf32>
    %292 = arith.addf %291, %290 : vector<4x96xf32>
    %293 = arith.divf %291, %292 : vector<4x96xf32>
    %294 = vector.extract_strided_slice %287 {offsets = [0, 96], sizes = [4, 32], strides = [1, 1]} : vector<4x128xf32> to vector<4x32xf32>
    %295 = math.tanh %294 : vector<4x32xf32>
    %296 = vector.extract_strided_slice %293 {offsets = [0, 0], sizes = [4, 32], strides = [1, 1]} : vector<4x96xf32> to vector<4x32xf32>
    %297 = vector.extract_strided_slice %293 {offsets = [0, 32], sizes = [4, 32], strides = [1, 1]} : vector<4x96xf32> to vector<4x32xf32>
    %298 = vector.extract_strided_slice %293 {offsets = [0, 64], sizes = [4, 32], strides = [1, 1]} : vector<4x96xf32> to vector<4x32xf32>
    %299 = arith.mulf %297, %261 : vector<4x32xf32>
    %300 = arith.mulf %296, %295 : vector<4x32xf32>
    %301 = arith.addf %299, %300 : vector<4x32xf32>
    %302 = math.tanh %301 : vector<4x32xf32>
    %303 = arith.mulf %298, %302 : vector<4x32xf32>
    %c24_90 = arith.constant 24 : index
    %c0_91 = arith.constant 0 : index
    %304 = vector.load %arg16[%c24_90, %c0_91] : memref<64x64xf32, #tpu.memory_space<vmem>>, vector<4x32xf32>
    tpu.vector_store %arg16[%c24_90, %c0_91], %284 {strides = array<i32>} : memref<64x64xf32, #tpu.memory_space<vmem>>, vector<4x32xf32>,
    %c36_92 = arith.constant 36 : index
    %c32_93 = arith.constant 32 : index
    %305 = vector.load %arg16[%c36_92, %c32_93] : memref<64x64xf32, #tpu.memory_space<vmem>>, vector<4x32xf32>
    tpu.vector_store %arg16[%c36_92, %c32_93], %303 {strides = array<i32>} : memref<64x64xf32, #tpu.memory_space<vmem>>, vector<4x32xf32>,
    %c28 = arith.constant 28 : index
    %c0_94 = arith.constant 0 : index
    %306 = vector.load %arg15[%c28, %c0_94] : memref<64x256xf32, #tpu.memory_space<vmem>>, vector<4x128xf32>
    %cst_95 = arith.constant dense<0.000000e+00> : vector<4x128xf32>
    %307 = tpu.matmul %284, %24, %cst_95 {dimension_numbers = #tpu.dot_dimension_numbers<[1], [0], [0], [1], [0, 0, 1, 1], [], []>} : vector<4x32xf32>, vector<32x128xf32>, vector<4x128xf32> -> vector<4x128xf32>
    %308 = arith.addf %306, %307 : vector<4x128xf32>
    %309 = vector.extract_strided_slice %308 {offsets = [0, 0], sizes = [4, 96], strides = [1, 1]} : vector<4x128xf32> to vector<4x96xf32>
    %310 = arith.negf %309 : vector<4x96xf32>
    %311 = math.exp %310 : vector<4x96xf32>
    %cst_96 = arith.constant 1.000000e+00 : f32
    %312 = vector.broadcast %cst_96 : f32 to vector<4x96xf32>
    %313 = arith.addf %312, %311 : vector<4x96xf32>
    %314 = arith.divf %312, %313 : vector<4x96xf32>
    %315 = vector.extract_strided_slice %308 {offsets = [0, 96], sizes = [4, 32], strides = [1, 1]} : vector<4x128xf32> to vector<4x32xf32>
    %316 = math.tanh %315 : vector<4x32xf32>
    %317 = vector.extract_strided_slice %314 {offsets = [0, 0], sizes = [4, 32], strides = [1, 1]} : vector<4x96xf32> to vector<4x32xf32>
    %318 = vector.extract_strided_slice %314 {offsets = [0, 32], sizes = [4, 32], strides = [1, 1]} : vector<4x96xf32> to vector<4x32xf32>
    %319 = vector.extract_strided_slice %314 {offsets = [0, 64], sizes = [4, 32], strides = [1, 1]} : vector<4x96xf32> to vector<4x32xf32>
    %320 = arith.mulf %318, %282 : vector<4x32xf32>
    %321 = arith.mulf %317, %316 : vector<4x32xf32>
    %322 = arith.addf %320, %321 : vector<4x32xf32>
    %323 = math.tanh %322 : vector<4x32xf32>
    %324 = arith.mulf %319, %323 : vector<4x32xf32>
    %c32_97 = arith.constant 32 : index
    %c128_98 = arith.constant 128 : index
    %325 = vector.load %arg15[%c32_97, %c128_98] : memref<64x256xf32, #tpu.memory_space<vmem>>, vector<4x128xf32>
    %cst_99 = arith.constant dense<0.000000e+00> : vector<4x128xf32>
    %326 = tpu.matmul %303, %25, %cst_99 {dimension_numbers = #tpu.dot_dimension_numbers<[1], [0], [0], [1], [0, 0, 1, 1], [], []>} : vector<4x32xf32>, vector<32x128xf32>, vector<4x128xf32> -> vector<4x128xf32>
    %327 = arith.addf %325, %326 : vector<4x128xf32>
    %328 = vector.extract_strided_slice %327 {offsets = [0, 0], sizes = [4, 96], strides = [1, 1]} : vector<4x128xf32> to vector<4x96xf32>
    %329 = arith.negf %328 : vector<4x96xf32>
    %330 = math.exp %329 : vector<4x96xf32>
    %cst_100 = arith.constant 1.000000e+00 : f32
    %331 = vector.broadcast %cst_100 : f32 to vector<4x96xf32>
    %332 = arith.addf %331, %330 : vector<4x96xf32>
    %333 = arith.divf %331, %332 : vector<4x96xf32>
    %334 = vector.extract_strided_slice %327 {offsets = [0, 96], sizes = [4, 32], strides = [1, 1]} : vector<4x128xf32> to vector<4x32xf32>
    %335 = math.tanh %334 : vector<4x32xf32>
    %336 = vector.extract_strided_slice %333 {offsets = [0, 0], sizes = [4, 32], strides = [1, 1]} : vector<4x96xf32> to vector<4x32xf32>
    %337 = vector.extract_strided_slice %333 {offsets = [0, 32], sizes = [4, 32], strides = [1, 1]} : vector<4x96xf32> to vector<4x32xf32>
    %338 = vector.extract_strided_slice %333 {offsets = [0, 64], sizes = [4, 32], strides = [1, 1]} : vector<4x96xf32> to vector<4x32xf32>
    %339 = arith.mulf %337, %301 : vector<4x32xf32>
    %340 = arith.mulf %336, %335 : vector<4x32xf32>
    %341 = arith.addf %339, %340 : vector<4x32xf32>
    %342 = math.tanh %341 : vector<4x32xf32>
    %343 = arith.mulf %338, %342 : vector<4x32xf32>
    %c28_101 = arith.constant 28 : index
    %c0_102 = arith.constant 0 : index
    %344 = vector.load %arg16[%c28_101, %c0_102] : memref<64x64xf32, #tpu.memory_space<vmem>>, vector<4x32xf32>
    tpu.vector_store %arg16[%c28_101, %c0_102], %324 {strides = array<i32>} : memref<64x64xf32, #tpu.memory_space<vmem>>, vector<4x32xf32>,
    %c32_103 = arith.constant 32 : index
    %c32_104 = arith.constant 32 : index
    %345 = vector.load %arg16[%c32_103, %c32_104] : memref<64x64xf32, #tpu.memory_space<vmem>>, vector<4x32xf32>
    tpu.vector_store %arg16[%c32_103, %c32_104], %343 {strides = array<i32>} : memref<64x64xf32, #tpu.memory_space<vmem>>, vector<4x32xf32>,
    %c32_105 = arith.constant 32 : index
    %c0_106 = arith.constant 0 : index
    %346 = vector.load %arg15[%c32_105, %c0_106] : memref<64x256xf32, #tpu.memory_space<vmem>>, vector<4x128xf32>
    %cst_107 = arith.constant dense<0.000000e+00> : vector<4x128xf32>
    %347 = tpu.matmul %324, %24, %cst_107 {dimension_numbers = #tpu.dot_dimension_numbers<[1], [0], [0], [1], [0, 0, 1, 1], [], []>} : vector<4x32xf32>, vector<32x128xf32>, vector<4x128xf32> -> vector<4x128xf32>
    %348 = arith.addf %346, %347 : vector<4x128xf32>
    %349 = vector.extract_strided_slice %348 {offsets = [0, 0], sizes = [4, 96], strides = [1, 1]} : vector<4x128xf32> to vector<4x96xf32>
    %350 = arith.negf %349 : vector<4x96xf32>
    %351 = math.exp %350 : vector<4x96xf32>
    %cst_108 = arith.constant 1.000000e+00 : f32
    %352 = vector.broadcast %cst_108 : f32 to vector<4x96xf32>
    %353 = arith.addf %352, %351 : vector<4x96xf32>
    %354 = arith.divf %352, %353 : vector<4x96xf32>
    %355 = vector.extract_strided_slice %348 {offsets = [0, 96], sizes = [4, 32], strides = [1, 1]} : vector<4x128xf32> to vector<4x32xf32>
    %356 = math.tanh %355 : vector<4x32xf32>
    %357 = vector.extract_strided_slice %354 {offsets = [0, 0], sizes = [4, 32], strides = [1, 1]} : vector<4x96xf32> to vector<4x32xf32>
    %358 = vector.extract_strided_slice %354 {offsets = [0, 32], sizes = [4, 32], strides = [1, 1]} : vector<4x96xf32> to vector<4x32xf32>
    %359 = vector.extract_strided_slice %354 {offsets = [0, 64], sizes = [4, 32], strides = [1, 1]} : vector<4x96xf32> to vector<4x32xf32>
    %360 = arith.mulf %358, %322 : vector<4x32xf32>
    %361 = arith.mulf %357, %356 : vector<4x32xf32>
    %362 = arith.addf %360, %361 : vector<4x32xf32>
    %363 = math.tanh %362 : vector<4x32xf32>
    %364 = arith.mulf %359, %363 : vector<4x32xf32>
    %c28_109 = arith.constant 28 : index
    %c128_110 = arith.constant 128 : index
    %365 = vector.load %arg15[%c28_109, %c128_110] : memref<64x256xf32, #tpu.memory_space<vmem>>, vector<4x128xf32>
    %cst_111 = arith.constant dense<0.000000e+00> : vector<4x128xf32>
    %366 = tpu.matmul %343, %25, %cst_111 {dimension_numbers = #tpu.dot_dimension_numbers<[1], [0], [0], [1], [0, 0, 1, 1], [], []>} : vector<4x32xf32>, vector<32x128xf32>, vector<4x128xf32> -> vector<4x128xf32>
    %367 = arith.addf %365, %366 : vector<4x128xf32>
    %368 = vector.extract_strided_slice %367 {offsets = [0, 0], sizes = [4, 96], strides = [1, 1]} : vector<4x128xf32> to vector<4x96xf32>
    %369 = arith.negf %368 : vector<4x96xf32>
    %370 = math.exp %369 : vector<4x96xf32>
    %cst_112 = arith.constant 1.000000e+00 : f32
    %371 = vector.broadcast %cst_112 : f32 to vector<4x96xf32>
    %372 = arith.addf %371, %370 : vector<4x96xf32>
    %373 = arith.divf %371, %372 : vector<4x96xf32>
    %374 = vector.extract_strided_slice %367 {offsets = [0, 96], sizes = [4, 32], strides = [1, 1]} : vector<4x128xf32> to vector<4x32xf32>
    %375 = math.tanh %374 : vector<4x32xf32>
    %376 = vector.extract_strided_slice %373 {offsets = [0, 0], sizes = [4, 32], strides = [1, 1]} : vector<4x96xf32> to vector<4x32xf32>
    %377 = vector.extract_strided_slice %373 {offsets = [0, 32], sizes = [4, 32], strides = [1, 1]} : vector<4x96xf32> to vector<4x32xf32>
    %378 = vector.extract_strided_slice %373 {offsets = [0, 64], sizes = [4, 32], strides = [1, 1]} : vector<4x96xf32> to vector<4x32xf32>
    %379 = arith.mulf %377, %341 : vector<4x32xf32>
    %380 = arith.mulf %376, %375 : vector<4x32xf32>
    %381 = arith.addf %379, %380 : vector<4x32xf32>
    %382 = math.tanh %381 : vector<4x32xf32>
    %383 = arith.mulf %378, %382 : vector<4x32xf32>
    %c32_113 = arith.constant 32 : index
    %c0_114 = arith.constant 0 : index
    %384 = vector.load %arg16[%c32_113, %c0_114] : memref<64x64xf32, #tpu.memory_space<vmem>>, vector<4x32xf32>
    tpu.vector_store %arg16[%c32_113, %c0_114], %364 {strides = array<i32>} : memref<64x64xf32, #tpu.memory_space<vmem>>, vector<4x32xf32>,
    %c28_115 = arith.constant 28 : index
    %c32_116 = arith.constant 32 : index
    %385 = vector.load %arg16[%c28_115, %c32_116] : memref<64x64xf32, #tpu.memory_space<vmem>>, vector<4x32xf32>
    tpu.vector_store %arg16[%c28_115, %c32_116], %383 {strides = array<i32>} : memref<64x64xf32, #tpu.memory_space<vmem>>, vector<4x32xf32>,
    %c36_117 = arith.constant 36 : index
    %c0_118 = arith.constant 0 : index
    %386 = vector.load %arg15[%c36_117, %c0_118] : memref<64x256xf32, #tpu.memory_space<vmem>>, vector<4x128xf32>
    %cst_119 = arith.constant dense<0.000000e+00> : vector<4x128xf32>
    %387 = tpu.matmul %364, %24, %cst_119 {dimension_numbers = #tpu.dot_dimension_numbers<[1], [0], [0], [1], [0, 0, 1, 1], [], []>} : vector<4x32xf32>, vector<32x128xf32>, vector<4x128xf32> -> vector<4x128xf32>
    %388 = arith.addf %386, %387 : vector<4x128xf32>
    %389 = vector.extract_strided_slice %388 {offsets = [0, 0], sizes = [4, 96], strides = [1, 1]} : vector<4x128xf32> to vector<4x96xf32>
    %390 = arith.negf %389 : vector<4x96xf32>
    %391 = math.exp %390 : vector<4x96xf32>
    %cst_120 = arith.constant 1.000000e+00 : f32
    %392 = vector.broadcast %cst_120 : f32 to vector<4x96xf32>
    %393 = arith.addf %392, %391 : vector<4x96xf32>
    %394 = arith.divf %392, %393 : vector<4x96xf32>
    %395 = vector.extract_strided_slice %388 {offsets = [0, 96], sizes = [4, 32], strides = [1, 1]} : vector<4x128xf32> to vector<4x32xf32>
    %396 = math.tanh %395 : vector<4x32xf32>
    %397 = vector.extract_strided_slice %394 {offsets = [0, 0], sizes = [4, 32], strides = [1, 1]} : vector<4x96xf32> to vector<4x32xf32>
    %398 = vector.extract_strided_slice %394 {offsets = [0, 32], sizes = [4, 32], strides = [1, 1]} : vector<4x96xf32> to vector<4x32xf32>
    %399 = vector.extract_strided_slice %394 {offsets = [0, 64], sizes = [4, 32], strides = [1, 1]} : vector<4x96xf32> to vector<4x32xf32>
    %400 = arith.mulf %398, %362 : vector<4x32xf32>
    %401 = arith.mulf %397, %396 : vector<4x32xf32>
    %402 = arith.addf %400, %401 : vector<4x32xf32>
    %403 = math.tanh %402 : vector<4x32xf32>
    %404 = arith.mulf %399, %403 : vector<4x32xf32>
    %c24_121 = arith.constant 24 : index
    %c128_122 = arith.constant 128 : index
    %405 = vector.load %arg15[%c24_121, %c128_122] : memref<64x256xf32, #tpu.memory_space<vmem>>, vector<4x128xf32>
    %cst_123 = arith.constant dense<0.000000e+00> : vector<4x128xf32>
    %406 = tpu.matmul %383, %25, %cst_123 {dimension_numbers = #tpu.dot_dimension_numbers<[1], [0], [0], [1], [0, 0, 1, 1], [], []>} : vector<4x32xf32>, vector<32x128xf32>, vector<4x128xf32> -> vector<4x128xf32>
    %407 = arith.addf %405, %406 : vector<4x128xf32>
    %408 = vector.extract_strided_slice %407 {offsets = [0, 0], sizes = [4, 96], strides = [1, 1]} : vector<4x128xf32> to vector<4x96xf32>
    %409 = arith.negf %408 : vector<4x96xf32>
    %410 = math.exp %409 : vector<4x96xf32>
    %cst_124 = arith.constant 1.000000e+00 : f32
    %411 = vector.broadcast %cst_124 : f32 to vector<4x96xf32>
    %412 = arith.addf %411, %410 : vector<4x96xf32>
    %413 = arith.divf %411, %412 : vector<4x96xf32>
    %414 = vector.extract_strided_slice %407 {offsets = [0, 96], sizes = [4, 32], strides = [1, 1]} : vector<4x128xf32> to vector<4x32xf32>
    %415 = math.tanh %414 : vector<4x32xf32>
    %416 = vector.extract_strided_slice %413 {offsets = [0, 0], sizes = [4, 32], strides = [1, 1]} : vector<4x96xf32> to vector<4x32xf32>
    %417 = vector.extract_strided_slice %413 {offsets = [0, 32], sizes = [4, 32], strides = [1, 1]} : vector<4x96xf32> to vector<4x32xf32>
    %418 = vector.extract_strided_slice %413 {offsets = [0, 64], sizes = [4, 32], strides = [1, 1]} : vector<4x96xf32> to vector<4x32xf32>
    %419 = arith.mulf %417, %381 : vector<4x32xf32>
    %420 = arith.mulf %416, %415 : vector<4x32xf32>
    %421 = arith.addf %419, %420 : vector<4x32xf32>
    %422 = math.tanh %421 : vector<4x32xf32>
    %423 = arith.mulf %418, %422 : vector<4x32xf32>
    %c36_125 = arith.constant 36 : index
    %c0_126 = arith.constant 0 : index
    %424 = vector.load %arg16[%c36_125, %c0_126] : memref<64x64xf32, #tpu.memory_space<vmem>>, vector<4x32xf32>
    tpu.vector_store %arg16[%c36_125, %c0_126], %404 {strides = array<i32>} : memref<64x64xf32, #tpu.memory_space<vmem>>, vector<4x32xf32>,
    %c24_127 = arith.constant 24 : index
    %c32_128 = arith.constant 32 : index
    %425 = vector.load %arg16[%c24_127, %c32_128] : memref<64x64xf32, #tpu.memory_space<vmem>>, vector<4x32xf32>
    tpu.vector_store %arg16[%c24_127, %c32_128], %423 {strides = array<i32>} : memref<64x64xf32, #tpu.memory_space<vmem>>, vector<4x32xf32>,
    %c40_129 = arith.constant 40 : index
    %c0_130 = arith.constant 0 : index
    %426 = vector.load %arg15[%c40_129, %c0_130] : memref<64x256xf32, #tpu.memory_space<vmem>>, vector<4x128xf32>
    %cst_131 = arith.constant dense<0.000000e+00> : vector<4x128xf32>
    %427 = tpu.matmul %404, %24, %cst_131 {dimension_numbers = #tpu.dot_dimension_numbers<[1], [0], [0], [1], [0, 0, 1, 1], [], []>} : vector<4x32xf32>, vector<32x128xf32>, vector<4x128xf32> -> vector<4x128xf32>
    %428 = arith.addf %426, %427 : vector<4x128xf32>
    %429 = vector.extract_strided_slice %428 {offsets = [0, 0], sizes = [4, 96], strides = [1, 1]} : vector<4x128xf32> to vector<4x96xf32>
    %430 = arith.negf %429 : vector<4x96xf32>
    %431 = math.exp %430 : vector<4x96xf32>
    %cst_132 = arith.constant 1.000000e+00 : f32
    %432 = vector.broadcast %cst_132 : f32 to vector<4x96xf32>
    %433 = arith.addf %432, %431 : vector<4x96xf32>
    %434 = arith.divf %432, %433 : vector<4x96xf32>
    %435 = vector.extract_strided_slice %428 {offsets = [0, 96], sizes = [4, 32], strides = [1, 1]} : vector<4x128xf32> to vector<4x32xf32>
    %436 = math.tanh %435 : vector<4x32xf32>
    %437 = vector.extract_strided_slice %434 {offsets = [0, 0], sizes = [4, 32], strides = [1, 1]} : vector<4x96xf32> to vector<4x32xf32>
    %438 = vector.extract_strided_slice %434 {offsets = [0, 32], sizes = [4, 32], strides = [1, 1]} : vector<4x96xf32> to vector<4x32xf32>
    %439 = vector.extract_strided_slice %434 {offsets = [0, 64], sizes = [4, 32], strides = [1, 1]} : vector<4x96xf32> to vector<4x32xf32>
    %440 = arith.mulf %438, %402 : vector<4x32xf32>
    %441 = arith.mulf %437, %436 : vector<4x32xf32>
    %442 = arith.addf %440, %441 : vector<4x32xf32>
    %443 = math.tanh %442 : vector<4x32xf32>
    %444 = arith.mulf %439, %443 : vector<4x32xf32>
    %c20_133 = arith.constant 20 : index
    %c128_134 = arith.constant 128 : index
    %445 = vector.load %arg15[%c20_133, %c128_134] : memref<64x256xf32, #tpu.memory_space<vmem>>, vector<4x128xf32>
    %cst_135 = arith.constant dense<0.000000e+00> : vector<4x128xf32>
    %446 = tpu.matmul %423, %25, %cst_135 {dimension_numbers = #tpu.dot_dimension_numbers<[1], [0], [0], [1], [0, 0, 1, 1], [], []>} : vector<4x32xf32>, vector<32x128xf32>, vector<4x128xf32> -> vector<4x128xf32>
    %447 = arith.addf %445, %446 : vector<4x128xf32>
    %448 = vector.extract_strided_slice %447 {offsets = [0, 0], sizes = [4, 96], strides = [1, 1]} : vector<4x128xf32> to vector<4x96xf32>
    %449 = arith.negf %448 : vector<4x96xf32>
    %450 = math.exp %449 : vector<4x96xf32>
    %cst_136 = arith.constant 1.000000e+00 : f32
    %451 = vector.broadcast %cst_136 : f32 to vector<4x96xf32>
    %452 = arith.addf %451, %450 : vector<4x96xf32>
    %453 = arith.divf %451, %452 : vector<4x96xf32>
    %454 = vector.extract_strided_slice %447 {offsets = [0, 96], sizes = [4, 32], strides = [1, 1]} : vector<4x128xf32> to vector<4x32xf32>
    %455 = math.tanh %454 : vector<4x32xf32>
    %456 = vector.extract_strided_slice %453 {offsets = [0, 0], sizes = [4, 32], strides = [1, 1]} : vector<4x96xf32> to vector<4x32xf32>
    %457 = vector.extract_strided_slice %453 {offsets = [0, 32], sizes = [4, 32], strides = [1, 1]} : vector<4x96xf32> to vector<4x32xf32>
    %458 = vector.extract_strided_slice %453 {offsets = [0, 64], sizes = [4, 32], strides = [1, 1]} : vector<4x96xf32> to vector<4x32xf32>
    %459 = arith.mulf %457, %421 : vector<4x32xf32>
    %460 = arith.mulf %456, %455 : vector<4x32xf32>
    %461 = arith.addf %459, %460 : vector<4x32xf32>
    %462 = math.tanh %461 : vector<4x32xf32>
    %463 = arith.mulf %458, %462 : vector<4x32xf32>
    %c40_137 = arith.constant 40 : index
    %c0_138 = arith.constant 0 : index
    %464 = vector.load %arg16[%c40_137, %c0_138] : memref<64x64xf32, #tpu.memory_space<vmem>>, vector<4x32xf32>
    tpu.vector_store %arg16[%c40_137, %c0_138], %444 {strides = array<i32>} : memref<64x64xf32, #tpu.memory_space<vmem>>, vector<4x32xf32>,
    %c20_139 = arith.constant 20 : index
    %c32_140 = arith.constant 32 : index
    %465 = vector.load %arg16[%c20_139, %c32_140] : memref<64x64xf32, #tpu.memory_space<vmem>>, vector<4x32xf32>
    tpu.vector_store %arg16[%c20_139, %c32_140], %463 {strides = array<i32>} : memref<64x64xf32, #tpu.memory_space<vmem>>, vector<4x32xf32>,
    %c44_141 = arith.constant 44 : index
    %c0_142 = arith.constant 0 : index
    %466 = vector.load %arg15[%c44_141, %c0_142] : memref<64x256xf32, #tpu.memory_space<vmem>>, vector<4x128xf32>
    %cst_143 = arith.constant dense<0.000000e+00> : vector<4x128xf32>
    %467 = tpu.matmul %444, %24, %cst_143 {dimension_numbers = #tpu.dot_dimension_numbers<[1], [0], [0], [1], [0, 0, 1, 1], [], []>} : vector<4x32xf32>, vector<32x128xf32>, vector<4x128xf32> -> vector<4x128xf32>
    %468 = arith.addf %466, %467 : vector<4x128xf32>
    %469 = vector.extract_strided_slice %468 {offsets = [0, 0], sizes = [4, 96], strides = [1, 1]} : vector<4x128xf32> to vector<4x96xf32>
    %470 = arith.negf %469 : vector<4x96xf32>
    %471 = math.exp %470 : vector<4x96xf32>
    %cst_144 = arith.constant 1.000000e+00 : f32
    %472 = vector.broadcast %cst_144 : f32 to vector<4x96xf32>
    %473 = arith.addf %472, %471 : vector<4x96xf32>
    %474 = arith.divf %472, %473 : vector<4x96xf32>
    %475 = vector.extract_strided_slice %468 {offsets = [0, 96], sizes = [4, 32], strides = [1, 1]} : vector<4x128xf32> to vector<4x32xf32>
    %476 = math.tanh %475 : vector<4x32xf32>
    %477 = vector.extract_strided_slice %474 {offsets = [0, 0], sizes = [4, 32], strides = [1, 1]} : vector<4x96xf32> to vector<4x32xf32>
    %478 = vector.extract_strided_slice %474 {offsets = [0, 32], sizes = [4, 32], strides = [1, 1]} : vector<4x96xf32> to vector<4x32xf32>
    %479 = vector.extract_strided_slice %474 {offsets = [0, 64], sizes = [4, 32], strides = [1, 1]} : vector<4x96xf32> to vector<4x32xf32>
    %480 = arith.mulf %478, %442 : vector<4x32xf32>
    %481 = arith.mulf %477, %476 : vector<4x32xf32>
    %482 = arith.addf %480, %481 : vector<4x32xf32>
    %483 = math.tanh %482 : vector<4x32xf32>
    %484 = arith.mulf %479, %483 : vector<4x32xf32>
    %c16_145 = arith.constant 16 : index
    %c128_146 = arith.constant 128 : index
    %485 = vector.load %arg15[%c16_145, %c128_146] : memref<64x256xf32, #tpu.memory_space<vmem>>, vector<4x128xf32>
    %cst_147 = arith.constant dense<0.000000e+00> : vector<4x128xf32>
    %486 = tpu.matmul %463, %25, %cst_147 {dimension_numbers = #tpu.dot_dimension_numbers<[1], [0], [0], [1], [0, 0, 1, 1], [], []>} : vector<4x32xf32>, vector<32x128xf32>, vector<4x128xf32> -> vector<4x128xf32>
    %487 = arith.addf %485, %486 : vector<4x128xf32>
    %488 = vector.extract_strided_slice %487 {offsets = [0, 0], sizes = [4, 96], strides = [1, 1]} : vector<4x128xf32> to vector<4x96xf32>
    %489 = arith.negf %488 : vector<4x96xf32>
    %490 = math.exp %489 : vector<4x96xf32>
    %cst_148 = arith.constant 1.000000e+00 : f32
    %491 = vector.broadcast %cst_148 : f32 to vector<4x96xf32>
    %492 = arith.addf %491, %490 : vector<4x96xf32>
    %493 = arith.divf %491, %492 : vector<4x96xf32>
    %494 = vector.extract_strided_slice %487 {offsets = [0, 96], sizes = [4, 32], strides = [1, 1]} : vector<4x128xf32> to vector<4x32xf32>
    %495 = math.tanh %494 : vector<4x32xf32>
    %496 = vector.extract_strided_slice %493 {offsets = [0, 0], sizes = [4, 32], strides = [1, 1]} : vector<4x96xf32> to vector<4x32xf32>
    %497 = vector.extract_strided_slice %493 {offsets = [0, 32], sizes = [4, 32], strides = [1, 1]} : vector<4x96xf32> to vector<4x32xf32>
    %498 = vector.extract_strided_slice %493 {offsets = [0, 64], sizes = [4, 32], strides = [1, 1]} : vector<4x96xf32> to vector<4x32xf32>
    %499 = arith.mulf %497, %461 : vector<4x32xf32>
    %500 = arith.mulf %496, %495 : vector<4x32xf32>
    %501 = arith.addf %499, %500 : vector<4x32xf32>
    %502 = math.tanh %501 : vector<4x32xf32>
    %503 = arith.mulf %498, %502 : vector<4x32xf32>
    %c44_149 = arith.constant 44 : index
    %c0_150 = arith.constant 0 : index
    %504 = vector.load %arg16[%c44_149, %c0_150] : memref<64x64xf32, #tpu.memory_space<vmem>>, vector<4x32xf32>
    tpu.vector_store %arg16[%c44_149, %c0_150], %484 {strides = array<i32>} : memref<64x64xf32, #tpu.memory_space<vmem>>, vector<4x32xf32>,
    %c16_151 = arith.constant 16 : index
    %c32_152 = arith.constant 32 : index
    %505 = vector.load %arg16[%c16_151, %c32_152] : memref<64x64xf32, #tpu.memory_space<vmem>>, vector<4x32xf32>
    tpu.vector_store %arg16[%c16_151, %c32_152], %503 {strides = array<i32>} : memref<64x64xf32, #tpu.memory_space<vmem>>, vector<4x32xf32>,
    %c48_153 = arith.constant 48 : index
    %c0_154 = arith.constant 0 : index
    %506 = vector.load %arg15[%c48_153, %c0_154] : memref<64x256xf32, #tpu.memory_space<vmem>>, vector<4x128xf32>
    %cst_155 = arith.constant dense<0.000000e+00> : vector<4x128xf32>
    %507 = tpu.matmul %484, %24, %cst_155 {dimension_numbers = #tpu.dot_dimension_numbers<[1], [0], [0], [1], [0, 0, 1, 1], [], []>} : vector<4x32xf32>, vector<32x128xf32>, vector<4x128xf32> -> vector<4x128xf32>
    %508 = arith.addf %506, %507 : vector<4x128xf32>
    %509 = vector.extract_strided_slice %508 {offsets = [0, 0], sizes = [4, 96], strides = [1, 1]} : vector<4x128xf32> to vector<4x96xf32>
    %510 = arith.negf %509 : vector<4x96xf32>
    %511 = math.exp %510 : vector<4x96xf32>
    %cst_156 = arith.constant 1.000000e+00 : f32
    %512 = vector.broadcast %cst_156 : f32 to vector<4x96xf32>
    %513 = arith.addf %512, %511 : vector<4x96xf32>
    %514 = arith.divf %512, %513 : vector<4x96xf32>
    %515 = vector.extract_strided_slice %508 {offsets = [0, 96], sizes = [4, 32], strides = [1, 1]} : vector<4x128xf32> to vector<4x32xf32>
    %516 = math.tanh %515 : vector<4x32xf32>
    %517 = vector.extract_strided_slice %514 {offsets = [0, 0], sizes = [4, 32], strides = [1, 1]} : vector<4x96xf32> to vector<4x32xf32>
    %518 = vector.extract_strided_slice %514 {offsets = [0, 32], sizes = [4, 32], strides = [1, 1]} : vector<4x96xf32> to vector<4x32xf32>
    %519 = vector.extract_strided_slice %514 {offsets = [0, 64], sizes = [4, 32], strides = [1, 1]} : vector<4x96xf32> to vector<4x32xf32>
    %520 = arith.mulf %518, %482 : vector<4x32xf32>
    %521 = arith.mulf %517, %516 : vector<4x32xf32>
    %522 = arith.addf %520, %521 : vector<4x32xf32>
    %523 = math.tanh %522 : vector<4x32xf32>
    %524 = arith.mulf %519, %523 : vector<4x32xf32>
    %c12_157 = arith.constant 12 : index
    %c128_158 = arith.constant 128 : index
    %525 = vector.load %arg15[%c12_157, %c128_158] : memref<64x256xf32, #tpu.memory_space<vmem>>, vector<4x128xf32>
    %cst_159 = arith.constant dense<0.000000e+00> : vector<4x128xf32>
    %526 = tpu.matmul %503, %25, %cst_159 {dimension_numbers = #tpu.dot_dimension_numbers<[1], [0], [0], [1], [0, 0, 1, 1], [], []>} : vector<4x32xf32>, vector<32x128xf32>, vector<4x128xf32> -> vector<4x128xf32>
    %527 = arith.addf %525, %526 : vector<4x128xf32>
    %528 = vector.extract_strided_slice %527 {offsets = [0, 0], sizes = [4, 96], strides = [1, 1]} : vector<4x128xf32> to vector<4x96xf32>
    %529 = arith.negf %528 : vector<4x96xf32>
    %530 = math.exp %529 : vector<4x96xf32>
    %cst_160 = arith.constant 1.000000e+00 : f32
    %531 = vector.broadcast %cst_160 : f32 to vector<4x96xf32>
    %532 = arith.addf %531, %530 : vector<4x96xf32>
    %533 = arith.divf %531, %532 : vector<4x96xf32>
    %534 = vector.extract_strided_slice %527 {offsets = [0, 96], sizes = [4, 32], strides = [1, 1]} : vector<4x128xf32> to vector<4x32xf32>
    %535 = math.tanh %534 : vector<4x32xf32>
    %536 = vector.extract_strided_slice %533 {offsets = [0, 0], sizes = [4, 32], strides = [1, 1]} : vector<4x96xf32> to vector<4x32xf32>
    %537 = vector.extract_strided_slice %533 {offsets = [0, 32], sizes = [4, 32], strides = [1, 1]} : vector<4x96xf32> to vector<4x32xf32>
    %538 = vector.extract_strided_slice %533 {offsets = [0, 64], sizes = [4, 32], strides = [1, 1]} : vector<4x96xf32> to vector<4x32xf32>
    %539 = arith.mulf %537, %501 : vector<4x32xf32>
    %540 = arith.mulf %536, %535 : vector<4x32xf32>
    %541 = arith.addf %539, %540 : vector<4x32xf32>
    %542 = math.tanh %541 : vector<4x32xf32>
    %543 = arith.mulf %538, %542 : vector<4x32xf32>
    %c48_161 = arith.constant 48 : index
    %c0_162 = arith.constant 0 : index
    %544 = vector.load %arg16[%c48_161, %c0_162] : memref<64x64xf32, #tpu.memory_space<vmem>>, vector<4x32xf32>
    tpu.vector_store %arg16[%c48_161, %c0_162], %524 {strides = array<i32>} : memref<64x64xf32, #tpu.memory_space<vmem>>, vector<4x32xf32>,
    %c12_163 = arith.constant 12 : index
    %c32_164 = arith.constant 32 : index
    %545 = vector.load %arg16[%c12_163, %c32_164] : memref<64x64xf32, #tpu.memory_space<vmem>>, vector<4x32xf32>
    tpu.vector_store %arg16[%c12_163, %c32_164], %543 {strides = array<i32>} : memref<64x64xf32, #tpu.memory_space<vmem>>, vector<4x32xf32>,
    %c52_165 = arith.constant 52 : index
    %c0_166 = arith.constant 0 : index
    %546 = vector.load %arg15[%c52_165, %c0_166] : memref<64x256xf32, #tpu.memory_space<vmem>>, vector<4x128xf32>
    %cst_167 = arith.constant dense<0.000000e+00> : vector<4x128xf32>
    %547 = tpu.matmul %524, %24, %cst_167 {dimension_numbers = #tpu.dot_dimension_numbers<[1], [0], [0], [1], [0, 0, 1, 1], [], []>} : vector<4x32xf32>, vector<32x128xf32>, vector<4x128xf32> -> vector<4x128xf32>
    %548 = arith.addf %546, %547 : vector<4x128xf32>
    %549 = vector.extract_strided_slice %548 {offsets = [0, 0], sizes = [4, 96], strides = [1, 1]} : vector<4x128xf32> to vector<4x96xf32>
    %550 = arith.negf %549 : vector<4x96xf32>
    %551 = math.exp %550 : vector<4x96xf32>
    %cst_168 = arith.constant 1.000000e+00 : f32
    %552 = vector.broadcast %cst_168 : f32 to vector<4x96xf32>
    %553 = arith.addf %552, %551 : vector<4x96xf32>
    %554 = arith.divf %552, %553 : vector<4x96xf32>
    %555 = vector.extract_strided_slice %548 {offsets = [0, 96], sizes = [4, 32], strides = [1, 1]} : vector<4x128xf32> to vector<4x32xf32>
    %556 = math.tanh %555 : vector<4x32xf32>
    %557 = vector.extract_strided_slice %554 {offsets = [0, 0], sizes = [4, 32], strides = [1, 1]} : vector<4x96xf32> to vector<4x32xf32>
    %558 = vector.extract_strided_slice %554 {offsets = [0, 32], sizes = [4, 32], strides = [1, 1]} : vector<4x96xf32> to vector<4x32xf32>
    %559 = vector.extract_strided_slice %554 {offsets = [0, 64], sizes = [4, 32], strides = [1, 1]} : vector<4x96xf32> to vector<4x32xf32>
    %560 = arith.mulf %558, %522 : vector<4x32xf32>
    %561 = arith.mulf %557, %556 : vector<4x32xf32>
    %562 = arith.addf %560, %561 : vector<4x32xf32>
    %563 = math.tanh %562 : vector<4x32xf32>
    %564 = arith.mulf %559, %563 : vector<4x32xf32>
    %c8_169 = arith.constant 8 : index
    %c128_170 = arith.constant 128 : index
    %565 = vector.load %arg15[%c8_169, %c128_170] : memref<64x256xf32, #tpu.memory_space<vmem>>, vector<4x128xf32>
    %cst_171 = arith.constant dense<0.000000e+00> : vector<4x128xf32>
    %566 = tpu.matmul %543, %25, %cst_171 {dimension_numbers = #tpu.dot_dimension_numbers<[1], [0], [0], [1], [0, 0, 1, 1], [], []>} : vector<4x32xf32>, vector<32x128xf32>, vector<4x128xf32> -> vector<4x128xf32>
    %567 = arith.addf %565, %566 : vector<4x128xf32>
    %568 = vector.extract_strided_slice %567 {offsets = [0, 0], sizes = [4, 96], strides = [1, 1]} : vector<4x128xf32> to vector<4x96xf32>
    %569 = arith.negf %568 : vector<4x96xf32>
    %570 = math.exp %569 : vector<4x96xf32>
    %cst_172 = arith.constant 1.000000e+00 : f32
    %571 = vector.broadcast %cst_172 : f32 to vector<4x96xf32>
    %572 = arith.addf %571, %570 : vector<4x96xf32>
    %573 = arith.divf %571, %572 : vector<4x96xf32>
    %574 = vector.extract_strided_slice %567 {offsets = [0, 96], sizes = [4, 32], strides = [1, 1]} : vector<4x128xf32> to vector<4x32xf32>
    %575 = math.tanh %574 : vector<4x32xf32>
    %576 = vector.extract_strided_slice %573 {offsets = [0, 0], sizes = [4, 32], strides = [1, 1]} : vector<4x96xf32> to vector<4x32xf32>
    %577 = vector.extract_strided_slice %573 {offsets = [0, 32], sizes = [4, 32], strides = [1, 1]} : vector<4x96xf32> to vector<4x32xf32>
    %578 = vector.extract_strided_slice %573 {offsets = [0, 64], sizes = [4, 32], strides = [1, 1]} : vector<4x96xf32> to vector<4x32xf32>
    %579 = arith.mulf %577, %541 : vector<4x32xf32>
    %580 = arith.mulf %576, %575 : vector<4x32xf32>
    %581 = arith.addf %579, %580 : vector<4x32xf32>
    %582 = math.tanh %581 : vector<4x32xf32>
    %583 = arith.mulf %578, %582 : vector<4x32xf32>
    %c52_173 = arith.constant 52 : index
    %c0_174 = arith.constant 0 : index
    %584 = vector.load %arg16[%c52_173, %c0_174] : memref<64x64xf32, #tpu.memory_space<vmem>>, vector<4x32xf32>
    tpu.vector_store %arg16[%c52_173, %c0_174], %564 {strides = array<i32>} : memref<64x64xf32, #tpu.memory_space<vmem>>, vector<4x32xf32>,
    %c8_175 = arith.constant 8 : index
    %c32_176 = arith.constant 32 : index
    %585 = vector.load %arg16[%c8_175, %c32_176] : memref<64x64xf32, #tpu.memory_space<vmem>>, vector<4x32xf32>
    tpu.vector_store %arg16[%c8_175, %c32_176], %583 {strides = array<i32>} : memref<64x64xf32, #tpu.memory_space<vmem>>, vector<4x32xf32>,
    %c56_177 = arith.constant 56 : index
    %c0_178 = arith.constant 0 : index
    %586 = vector.load %arg15[%c56_177, %c0_178] : memref<64x256xf32, #tpu.memory_space<vmem>>, vector<4x128xf32>
    %cst_179 = arith.constant dense<0.000000e+00> : vector<4x128xf32>
    %587 = tpu.matmul %564, %24, %cst_179 {dimension_numbers = #tpu.dot_dimension_numbers<[1], [0], [0], [1], [0, 0, 1, 1], [], []>} : vector<4x32xf32>, vector<32x128xf32>, vector<4x128xf32> -> vector<4x128xf32>
    %588 = arith.addf %586, %587 : vector<4x128xf32>
    %589 = vector.extract_strided_slice %588 {offsets = [0, 0], sizes = [4, 96], strides = [1, 1]} : vector<4x128xf32> to vector<4x96xf32>
    %590 = arith.negf %589 : vector<4x96xf32>
    %591 = math.exp %590 : vector<4x96xf32>
    %cst_180 = arith.constant 1.000000e+00 : f32
    %592 = vector.broadcast %cst_180 : f32 to vector<4x96xf32>
    %593 = arith.addf %592, %591 : vector<4x96xf32>
    %594 = arith.divf %592, %593 : vector<4x96xf32>
    %595 = vector.extract_strided_slice %588 {offsets = [0, 96], sizes = [4, 32], strides = [1, 1]} : vector<4x128xf32> to vector<4x32xf32>
    %596 = math.tanh %595 : vector<4x32xf32>
    %597 = vector.extract_strided_slice %594 {offsets = [0, 0], sizes = [4, 32], strides = [1, 1]} : vector<4x96xf32> to vector<4x32xf32>
    %598 = vector.extract_strided_slice %594 {offsets = [0, 32], sizes = [4, 32], strides = [1, 1]} : vector<4x96xf32> to vector<4x32xf32>
    %599 = vector.extract_strided_slice %594 {offsets = [0, 64], sizes = [4, 32], strides = [1, 1]} : vector<4x96xf32> to vector<4x32xf32>
    %600 = arith.mulf %598, %562 : vector<4x32xf32>
    %601 = arith.mulf %597, %596 : vector<4x32xf32>
    %602 = arith.addf %600, %601 : vector<4x32xf32>
    %603 = math.tanh %602 : vector<4x32xf32>
    %604 = arith.mulf %599, %603 : vector<4x32xf32>
    %c4_181 = arith.constant 4 : index
    %c128_182 = arith.constant 128 : index
    %605 = vector.load %arg15[%c4_181, %c128_182] : memref<64x256xf32, #tpu.memory_space<vmem>>, vector<4x128xf32>
    %cst_183 = arith.constant dense<0.000000e+00> : vector<4x128xf32>
    %606 = tpu.matmul %583, %25, %cst_183 {dimension_numbers = #tpu.dot_dimension_numbers<[1], [0], [0], [1], [0, 0, 1, 1], [], []>} : vector<4x32xf32>, vector<32x128xf32>, vector<4x128xf32> -> vector<4x128xf32>
    %607 = arith.addf %605, %606 : vector<4x128xf32>
    %608 = vector.extract_strided_slice %607 {offsets = [0, 0], sizes = [4, 96], strides = [1, 1]} : vector<4x128xf32> to vector<4x96xf32>
    %609 = arith.negf %608 : vector<4x96xf32>
    %610 = math.exp %609 : vector<4x96xf32>
    %cst_184 = arith.constant 1.000000e+00 : f32
    %611 = vector.broadcast %cst_184 : f32 to vector<4x96xf32>
    %612 = arith.addf %611, %610 : vector<4x96xf32>
    %613 = arith.divf %611, %612 : vector<4x96xf32>
    %614 = vector.extract_strided_slice %607 {offsets = [0, 96], sizes = [4, 32], strides = [1, 1]} : vector<4x128xf32> to vector<4x32xf32>
    %615 = math.tanh %614 : vector<4x32xf32>
    %616 = vector.extract_strided_slice %613 {offsets = [0, 0], sizes = [4, 32], strides = [1, 1]} : vector<4x96xf32> to vector<4x32xf32>
    %617 = vector.extract_strided_slice %613 {offsets = [0, 32], sizes = [4, 32], strides = [1, 1]} : vector<4x96xf32> to vector<4x32xf32>
    %618 = vector.extract_strided_slice %613 {offsets = [0, 64], sizes = [4, 32], strides = [1, 1]} : vector<4x96xf32> to vector<4x32xf32>
    %619 = arith.mulf %617, %581 : vector<4x32xf32>
    %620 = arith.mulf %616, %615 : vector<4x32xf32>
    %621 = arith.addf %619, %620 : vector<4x32xf32>
    %622 = math.tanh %621 : vector<4x32xf32>
    %623 = arith.mulf %618, %622 : vector<4x32xf32>
    %c56_185 = arith.constant 56 : index
    %c0_186 = arith.constant 0 : index
    %624 = vector.load %arg16[%c56_185, %c0_186] : memref<64x64xf32, #tpu.memory_space<vmem>>, vector<4x32xf32>
    tpu.vector_store %arg16[%c56_185, %c0_186], %604 {strides = array<i32>} : memref<64x64xf32, #tpu.memory_space<vmem>>, vector<4x32xf32>,
    %c4_187 = arith.constant 4 : index
    %c32_188 = arith.constant 32 : index
    %625 = vector.load %arg16[%c4_187, %c32_188] : memref<64x64xf32, #tpu.memory_space<vmem>>, vector<4x32xf32>
    tpu.vector_store %arg16[%c4_187, %c32_188], %623 {strides = array<i32>} : memref<64x64xf32, #tpu.memory_space<vmem>>, vector<4x32xf32>,
    %c60_189 = arith.constant 60 : index
    %c0_190 = arith.constant 0 : index
    %626 = vector.load %arg15[%c60_189, %c0_190] : memref<64x256xf32, #tpu.memory_space<vmem>>, vector<4x128xf32>
    %cst_191 = arith.constant dense<0.000000e+00> : vector<4x128xf32>
    %627 = tpu.matmul %604, %24, %cst_191 {dimension_numbers = #tpu.dot_dimension_numbers<[1], [0], [0], [1], [0, 0, 1, 1], [], []>} : vector<4x32xf32>, vector<32x128xf32>, vector<4x128xf32> -> vector<4x128xf32>
    %628 = arith.addf %626, %627 : vector<4x128xf32>
    %629 = vector.extract_strided_slice %628 {offsets = [0, 0], sizes = [4, 96], strides = [1, 1]} : vector<4x128xf32> to vector<4x96xf32>
    %630 = arith.negf %629 : vector<4x96xf32>
    %631 = math.exp %630 : vector<4x96xf32>
    %cst_192 = arith.constant 1.000000e+00 : f32
    %632 = vector.broadcast %cst_192 : f32 to vector<4x96xf32>
    %633 = arith.addf %632, %631 : vector<4x96xf32>
    %634 = arith.divf %632, %633 : vector<4x96xf32>
    %635 = vector.extract_strided_slice %628 {offsets = [0, 96], sizes = [4, 32], strides = [1, 1]} : vector<4x128xf32> to vector<4x32xf32>
    %636 = math.tanh %635 : vector<4x32xf32>
    %637 = vector.extract_strided_slice %634 {offsets = [0, 0], sizes = [4, 32], strides = [1, 1]} : vector<4x96xf32> to vector<4x32xf32>
    %638 = vector.extract_strided_slice %634 {offsets = [0, 32], sizes = [4, 32], strides = [1, 1]} : vector<4x96xf32> to vector<4x32xf32>
    %639 = vector.extract_strided_slice %634 {offsets = [0, 64], sizes = [4, 32], strides = [1, 1]} : vector<4x96xf32> to vector<4x32xf32>
    %640 = arith.mulf %638, %602 : vector<4x32xf32>
    %641 = arith.mulf %637, %636 : vector<4x32xf32>
    %642 = arith.addf %640, %641 : vector<4x32xf32>
    %643 = math.tanh %642 : vector<4x32xf32>
    %644 = arith.mulf %639, %643 : vector<4x32xf32>
    %c0_193 = arith.constant 0 : index
    %c128_194 = arith.constant 128 : index
    %645 = vector.load %arg15[%c0_193, %c128_194] : memref<64x256xf32, #tpu.memory_space<vmem>>, vector<4x128xf32>
    %cst_195 = arith.constant dense<0.000000e+00> : vector<4x128xf32>
    %646 = tpu.matmul %623, %25, %cst_195 {dimension_numbers = #tpu.dot_dimension_numbers<[1], [0], [0], [1], [0, 0, 1, 1], [], []>} : vector<4x32xf32>, vector<32x128xf32>, vector<4x128xf32> -> vector<4x128xf32>
    %647 = arith.addf %645, %646 : vector<4x128xf32>
    %648 = vector.extract_strided_slice %647 {offsets = [0, 0], sizes = [4, 96], strides = [1, 1]} : vector<4x128xf32> to vector<4x96xf32>
    %649 = arith.negf %648 : vector<4x96xf32>
    %650 = math.exp %649 : vector<4x96xf32>
    %cst_196 = arith.constant 1.000000e+00 : f32
    %651 = vector.broadcast %cst_196 : f32 to vector<4x96xf32>
    %652 = arith.addf %651, %650 : vector<4x96xf32>
    %653 = arith.divf %651, %652 : vector<4x96xf32>
    %654 = vector.extract_strided_slice %647 {offsets = [0, 96], sizes = [4, 32], strides = [1, 1]} : vector<4x128xf32> to vector<4x32xf32>
    %655 = math.tanh %654 : vector<4x32xf32>
    %656 = vector.extract_strided_slice %653 {offsets = [0, 0], sizes = [4, 32], strides = [1, 1]} : vector<4x96xf32> to vector<4x32xf32>
    %657 = vector.extract_strided_slice %653 {offsets = [0, 32], sizes = [4, 32], strides = [1, 1]} : vector<4x96xf32> to vector<4x32xf32>
    %658 = vector.extract_strided_slice %653 {offsets = [0, 64], sizes = [4, 32], strides = [1, 1]} : vector<4x96xf32> to vector<4x32xf32>
    %659 = arith.mulf %657, %621 : vector<4x32xf32>
    %660 = arith.mulf %656, %655 : vector<4x32xf32>
    %661 = arith.addf %659, %660 : vector<4x32xf32>
    %662 = math.tanh %661 : vector<4x32xf32>
    %663 = arith.mulf %658, %662 : vector<4x32xf32>
    %c60_197 = arith.constant 60 : index
    %c0_198 = arith.constant 0 : index
    %664 = vector.load %arg16[%c60_197, %c0_198] : memref<64x64xf32, #tpu.memory_space<vmem>>, vector<4x32xf32>
    tpu.vector_store %arg16[%c60_197, %c0_198], %644 {strides = array<i32>} : memref<64x64xf32, #tpu.memory_space<vmem>>, vector<4x32xf32>,
    %c0_199 = arith.constant 0 : index
    %c32_200 = arith.constant 32 : index
    %665 = vector.load %arg16[%c0_199, %c32_200] : memref<64x64xf32, #tpu.memory_space<vmem>>, vector<4x32xf32>
    tpu.vector_store %arg16[%c0_199, %c32_200], %663 {strides = array<i32>} : memref<64x64xf32, #tpu.memory_space<vmem>>, vector<4x32xf32>,
    %c0_201 = arith.constant 0 : index
    %c0_202 = arith.constant 0 : index
    %666 = vector.load %arg16[%c0_201, %c0_202] : memref<64x64xf32, #tpu.memory_space<vmem>>, vector<64x64xf32>
    %c0_203 = arith.constant 0 : index
    %c0_204 = arith.constant 0 : index
    %667 = vector.load %arg10[%c0_203, %c0_204] : memref<64x256xf32, #tpu.memory_space<vmem>>, vector<64x256xf32>
    %cst_205 = arith.constant dense<0.000000e+00> : vector<64x256xf32>
    %668 = tpu.matmul %666, %667, %cst_205 {dimension_numbers = #tpu.dot_dimension_numbers<[1], [0], [0], [1], [0, 0, 1, 1], [], []>} : vector<64x64xf32>, vector<64x256xf32>, vector<64x256xf32> -> vector<64x256xf32>
    %c0_206 = arith.constant 0 : index
    %c0_207 = arith.constant 0 : index
    %669 = vector.load %arg11[%c0_206, %c0_207] : memref<1x256xf32, #tpu.memory_space<vmem>>, vector<1x256xf32>
    %670 = vector.broadcast %669 : vector<1x256xf32> to vector<64x256xf32>
    %671 = arith.addf %668, %670 : vector<64x256xf32>
    %c0_208 = arith.constant 0 : index
    %c0_209 = arith.constant 0 : index
    %672 = vector.load %arg17[%c0_208, %c0_209] : memref<64x256xf32, #tpu.memory_space<vmem>>, vector<64x256xf32>
    tpu.vector_store %arg17[%c0_208, %c0_209], %671 {strides = array<i32>} : memref<64x256xf32, #tpu.memory_space<vmem>>, vector<64x256xf32>,
    %c0_210 = arith.constant 0 : index
    %c0_211 = arith.constant 0 : index
    %673 = vector.load %arg12[%c0_210, %c0_211] : memref<32x128xf32, #tpu.memory_space<vmem>>, vector<32x128xf32>
    %c0_212 = arith.constant 0 : index
    %c0_213 = arith.constant 0 : index
    %674 = vector.load %arg13[%c0_212, %c0_213] : memref<32x128xf32, #tpu.memory_space<vmem>>, vector<32x128xf32>
    %c0_214 = arith.constant 0 : index
    %c0_215 = arith.constant 0 : index
    %675 = vector.load %arg17[%c0_214, %c0_215] : memref<64x256xf32, #tpu.memory_space<vmem>>, vector<4x128xf32>
    %cst_216 = arith.constant dense<0.000000e+00> : vector<4x128xf32>
    %676 = tpu.matmul %23, %673, %cst_216 {dimension_numbers = #tpu.dot_dimension_numbers<[1], [0], [0], [1], [0, 0, 1, 1], [], []>} : vector<4x32xf32>, vector<32x128xf32>, vector<4x128xf32> -> vector<4x128xf32>
    %677 = arith.addf %675, %676 : vector<4x128xf32>
    %678 = vector.extract_strided_slice %677 {offsets = [0, 0], sizes = [4, 96], strides = [1, 1]} : vector<4x128xf32> to vector<4x96xf32>
    %679 = arith.negf %678 : vector<4x96xf32>
    %680 = math.exp %679 : vector<4x96xf32>
    %cst_217 = arith.constant 1.000000e+00 : f32
    %681 = vector.broadcast %cst_217 : f32 to vector<4x96xf32>
    %682 = arith.addf %681, %680 : vector<4x96xf32>
    %683 = arith.divf %681, %682 : vector<4x96xf32>
    %684 = vector.extract_strided_slice %677 {offsets = [0, 96], sizes = [4, 32], strides = [1, 1]} : vector<4x128xf32> to vector<4x32xf32>
    %685 = math.tanh %684 : vector<4x32xf32>
    %686 = vector.extract_strided_slice %683 {offsets = [0, 0], sizes = [4, 32], strides = [1, 1]} : vector<4x96xf32> to vector<4x32xf32>
    %687 = vector.extract_strided_slice %683 {offsets = [0, 32], sizes = [4, 32], strides = [1, 1]} : vector<4x96xf32> to vector<4x32xf32>
    %688 = vector.extract_strided_slice %683 {offsets = [0, 64], sizes = [4, 32], strides = [1, 1]} : vector<4x96xf32> to vector<4x32xf32>
    %689 = arith.mulf %687, %23 : vector<4x32xf32>
    %690 = arith.mulf %686, %685 : vector<4x32xf32>
    %691 = arith.addf %689, %690 : vector<4x32xf32>
    %692 = math.tanh %691 : vector<4x32xf32>
    %693 = arith.mulf %688, %692 : vector<4x32xf32>
    %c60_218 = arith.constant 60 : index
    %c128_219 = arith.constant 128 : index
    %694 = vector.load %arg17[%c60_218, %c128_219] : memref<64x256xf32, #tpu.memory_space<vmem>>, vector<4x128xf32>
    %cst_220 = arith.constant dense<0.000000e+00> : vector<4x128xf32>
    %695 = tpu.matmul %23, %674, %cst_220 {dimension_numbers = #tpu.dot_dimension_numbers<[1], [0], [0], [1], [0, 0, 1, 1], [], []>} : vector<4x32xf32>, vector<32x128xf32>, vector<4x128xf32> -> vector<4x128xf32>
    %696 = arith.addf %694, %695 : vector<4x128xf32>
    %697 = vector.extract_strided_slice %696 {offsets = [0, 0], sizes = [4, 96], strides = [1, 1]} : vector<4x128xf32> to vector<4x96xf32>
    %698 = arith.negf %697 : vector<4x96xf32>
    %699 = math.exp %698 : vector<4x96xf32>
    %cst_221 = arith.constant 1.000000e+00 : f32
    %700 = vector.broadcast %cst_221 : f32 to vector<4x96xf32>
    %701 = arith.addf %700, %699 : vector<4x96xf32>
    %702 = arith.divf %700, %701 : vector<4x96xf32>
    %703 = vector.extract_strided_slice %696 {offsets = [0, 96], sizes = [4, 32], strides = [1, 1]} : vector<4x128xf32> to vector<4x32xf32>
    %704 = math.tanh %703 : vector<4x32xf32>
    %705 = vector.extract_strided_slice %702 {offsets = [0, 0], sizes = [4, 32], strides = [1, 1]} : vector<4x96xf32> to vector<4x32xf32>
    %706 = vector.extract_strided_slice %702 {offsets = [0, 32], sizes = [4, 32], strides = [1, 1]} : vector<4x96xf32> to vector<4x32xf32>
    %707 = vector.extract_strided_slice %702 {offsets = [0, 64], sizes = [4, 32], strides = [1, 1]} : vector<4x96xf32> to vector<4x32xf32>
    %708 = arith.mulf %706, %23 : vector<4x32xf32>
    %709 = arith.mulf %705, %704 : vector<4x32xf32>
    %710 = arith.addf %708, %709 : vector<4x32xf32>
    %711 = math.tanh %710 : vector<4x32xf32>
    %712 = arith.mulf %707, %711 : vector<4x32xf32>
    %c4_222 = arith.constant 4 : index
    %c0_223 = arith.constant 0 : index
    %713 = vector.load %arg17[%c4_222, %c0_223] : memref<64x256xf32, #tpu.memory_space<vmem>>, vector<4x128xf32>
    %cst_224 = arith.constant dense<0.000000e+00> : vector<4x128xf32>
    %714 = tpu.matmul %693, %673, %cst_224 {dimension_numbers = #tpu.dot_dimension_numbers<[1], [0], [0], [1], [0, 0, 1, 1], [], []>} : vector<4x32xf32>, vector<32x128xf32>, vector<4x128xf32> -> vector<4x128xf32>
    %715 = arith.addf %713, %714 : vector<4x128xf32>
    %716 = vector.extract_strided_slice %715 {offsets = [0, 0], sizes = [4, 96], strides = [1, 1]} : vector<4x128xf32> to vector<4x96xf32>
    %717 = arith.negf %716 : vector<4x96xf32>
    %718 = math.exp %717 : vector<4x96xf32>
    %cst_225 = arith.constant 1.000000e+00 : f32
    %719 = vector.broadcast %cst_225 : f32 to vector<4x96xf32>
    %720 = arith.addf %719, %718 : vector<4x96xf32>
    %721 = arith.divf %719, %720 : vector<4x96xf32>
    %722 = vector.extract_strided_slice %715 {offsets = [0, 96], sizes = [4, 32], strides = [1, 1]} : vector<4x128xf32> to vector<4x32xf32>
    %723 = math.tanh %722 : vector<4x32xf32>
    %724 = vector.extract_strided_slice %721 {offsets = [0, 0], sizes = [4, 32], strides = [1, 1]} : vector<4x96xf32> to vector<4x32xf32>
    %725 = vector.extract_strided_slice %721 {offsets = [0, 32], sizes = [4, 32], strides = [1, 1]} : vector<4x96xf32> to vector<4x32xf32>
    %726 = vector.extract_strided_slice %721 {offsets = [0, 64], sizes = [4, 32], strides = [1, 1]} : vector<4x96xf32> to vector<4x32xf32>
    %727 = arith.mulf %725, %691 : vector<4x32xf32>
    %728 = arith.mulf %724, %723 : vector<4x32xf32>
    %729 = arith.addf %727, %728 : vector<4x32xf32>
    %730 = math.tanh %729 : vector<4x32xf32>
    %731 = arith.mulf %726, %730 : vector<4x32xf32>
    %c56_226 = arith.constant 56 : index
    %c128_227 = arith.constant 128 : index
    %732 = vector.load %arg17[%c56_226, %c128_227] : memref<64x256xf32, #tpu.memory_space<vmem>>, vector<4x128xf32>
    %cst_228 = arith.constant dense<0.000000e+00> : vector<4x128xf32>
    %733 = tpu.matmul %712, %674, %cst_228 {dimension_numbers = #tpu.dot_dimension_numbers<[1], [0], [0], [1], [0, 0, 1, 1], [], []>} : vector<4x32xf32>, vector<32x128xf32>, vector<4x128xf32> -> vector<4x128xf32>
    %734 = arith.addf %732, %733 : vector<4x128xf32>
    %735 = vector.extract_strided_slice %734 {offsets = [0, 0], sizes = [4, 96], strides = [1, 1]} : vector<4x128xf32> to vector<4x96xf32>
    %736 = arith.negf %735 : vector<4x96xf32>
    %737 = math.exp %736 : vector<4x96xf32>
    %cst_229 = arith.constant 1.000000e+00 : f32
    %738 = vector.broadcast %cst_229 : f32 to vector<4x96xf32>
    %739 = arith.addf %738, %737 : vector<4x96xf32>
    %740 = arith.divf %738, %739 : vector<4x96xf32>
    %741 = vector.extract_strided_slice %734 {offsets = [0, 96], sizes = [4, 32], strides = [1, 1]} : vector<4x128xf32> to vector<4x32xf32>
    %742 = math.tanh %741 : vector<4x32xf32>
    %743 = vector.extract_strided_slice %740 {offsets = [0, 0], sizes = [4, 32], strides = [1, 1]} : vector<4x96xf32> to vector<4x32xf32>
    %744 = vector.extract_strided_slice %740 {offsets = [0, 32], sizes = [4, 32], strides = [1, 1]} : vector<4x96xf32> to vector<4x32xf32>
    %745 = vector.extract_strided_slice %740 {offsets = [0, 64], sizes = [4, 32], strides = [1, 1]} : vector<4x96xf32> to vector<4x32xf32>
    %746 = arith.mulf %744, %710 : vector<4x32xf32>
    %747 = arith.mulf %743, %742 : vector<4x32xf32>
    %748 = arith.addf %746, %747 : vector<4x32xf32>
    %749 = math.tanh %748 : vector<4x32xf32>
    %750 = arith.mulf %745, %749 : vector<4x32xf32>
    %c8_230 = arith.constant 8 : index
    %c0_231 = arith.constant 0 : index
    %751 = vector.load %arg17[%c8_230, %c0_231] : memref<64x256xf32, #tpu.memory_space<vmem>>, vector<4x128xf32>
    %cst_232 = arith.constant dense<0.000000e+00> : vector<4x128xf32>
    %752 = tpu.matmul %731, %673, %cst_232 {dimension_numbers = #tpu.dot_dimension_numbers<[1], [0], [0], [1], [0, 0, 1, 1], [], []>} : vector<4x32xf32>, vector<32x128xf32>, vector<4x128xf32> -> vector<4x128xf32>
    %753 = arith.addf %751, %752 : vector<4x128xf32>
    %754 = vector.extract_strided_slice %753 {offsets = [0, 0], sizes = [4, 96], strides = [1, 1]} : vector<4x128xf32> to vector<4x96xf32>
    %755 = arith.negf %754 : vector<4x96xf32>
    %756 = math.exp %755 : vector<4x96xf32>
    %cst_233 = arith.constant 1.000000e+00 : f32
    %757 = vector.broadcast %cst_233 : f32 to vector<4x96xf32>
    %758 = arith.addf %757, %756 : vector<4x96xf32>
    %759 = arith.divf %757, %758 : vector<4x96xf32>
    %760 = vector.extract_strided_slice %753 {offsets = [0, 96], sizes = [4, 32], strides = [1, 1]} : vector<4x128xf32> to vector<4x32xf32>
    %761 = math.tanh %760 : vector<4x32xf32>
    %762 = vector.extract_strided_slice %759 {offsets = [0, 0], sizes = [4, 32], strides = [1, 1]} : vector<4x96xf32> to vector<4x32xf32>
    %763 = vector.extract_strided_slice %759 {offsets = [0, 32], sizes = [4, 32], strides = [1, 1]} : vector<4x96xf32> to vector<4x32xf32>
    %764 = vector.extract_strided_slice %759 {offsets = [0, 64], sizes = [4, 32], strides = [1, 1]} : vector<4x96xf32> to vector<4x32xf32>
    %765 = arith.mulf %763, %729 : vector<4x32xf32>
    %766 = arith.mulf %762, %761 : vector<4x32xf32>
    %767 = arith.addf %765, %766 : vector<4x32xf32>
    %768 = math.tanh %767 : vector<4x32xf32>
    %769 = arith.mulf %764, %768 : vector<4x32xf32>
    %c52_234 = arith.constant 52 : index
    %c128_235 = arith.constant 128 : index
    %770 = vector.load %arg17[%c52_234, %c128_235] : memref<64x256xf32, #tpu.memory_space<vmem>>, vector<4x128xf32>
    %cst_236 = arith.constant dense<0.000000e+00> : vector<4x128xf32>
    %771 = tpu.matmul %750, %674, %cst_236 {dimension_numbers = #tpu.dot_dimension_numbers<[1], [0], [0], [1], [0, 0, 1, 1], [], []>} : vector<4x32xf32>, vector<32x128xf32>, vector<4x128xf32> -> vector<4x128xf32>
    %772 = arith.addf %770, %771 : vector<4x128xf32>
    %773 = vector.extract_strided_slice %772 {offsets = [0, 0], sizes = [4, 96], strides = [1, 1]} : vector<4x128xf32> to vector<4x96xf32>
    %774 = arith.negf %773 : vector<4x96xf32>
    %775 = math.exp %774 : vector<4x96xf32>
    %cst_237 = arith.constant 1.000000e+00 : f32
    %776 = vector.broadcast %cst_237 : f32 to vector<4x96xf32>
    %777 = arith.addf %776, %775 : vector<4x96xf32>
    %778 = arith.divf %776, %777 : vector<4x96xf32>
    %779 = vector.extract_strided_slice %772 {offsets = [0, 96], sizes = [4, 32], strides = [1, 1]} : vector<4x128xf32> to vector<4x32xf32>
    %780 = math.tanh %779 : vector<4x32xf32>
    %781 = vector.extract_strided_slice %778 {offsets = [0, 0], sizes = [4, 32], strides = [1, 1]} : vector<4x96xf32> to vector<4x32xf32>
    %782 = vector.extract_strided_slice %778 {offsets = [0, 32], sizes = [4, 32], strides = [1, 1]} : vector<4x96xf32> to vector<4x32xf32>
    %783 = vector.extract_strided_slice %778 {offsets = [0, 64], sizes = [4, 32], strides = [1, 1]} : vector<4x96xf32> to vector<4x32xf32>
    %784 = arith.mulf %782, %748 : vector<4x32xf32>
    %785 = arith.mulf %781, %780 : vector<4x32xf32>
    %786 = arith.addf %784, %785 : vector<4x32xf32>
    %787 = math.tanh %786 : vector<4x32xf32>
    %788 = arith.mulf %783, %787 : vector<4x32xf32>
    %c12_238 = arith.constant 12 : index
    %c0_239 = arith.constant 0 : index
    %789 = vector.load %arg17[%c12_238, %c0_239] : memref<64x256xf32, #tpu.memory_space<vmem>>, vector<4x128xf32>
    %cst_240 = arith.constant dense<0.000000e+00> : vector<4x128xf32>
    %790 = tpu.matmul %769, %673, %cst_240 {dimension_numbers = #tpu.dot_dimension_numbers<[1], [0], [0], [1], [0, 0, 1, 1], [], []>} : vector<4x32xf32>, vector<32x128xf32>, vector<4x128xf32> -> vector<4x128xf32>
    %791 = arith.addf %789, %790 : vector<4x128xf32>
    %792 = vector.extract_strided_slice %791 {offsets = [0, 0], sizes = [4, 96], strides = [1, 1]} : vector<4x128xf32> to vector<4x96xf32>
    %793 = arith.negf %792 : vector<4x96xf32>
    %794 = math.exp %793 : vector<4x96xf32>
    %cst_241 = arith.constant 1.000000e+00 : f32
    %795 = vector.broadcast %cst_241 : f32 to vector<4x96xf32>
    %796 = arith.addf %795, %794 : vector<4x96xf32>
    %797 = arith.divf %795, %796 : vector<4x96xf32>
    %798 = vector.extract_strided_slice %791 {offsets = [0, 96], sizes = [4, 32], strides = [1, 1]} : vector<4x128xf32> to vector<4x32xf32>
    %799 = math.tanh %798 : vector<4x32xf32>
    %800 = vector.extract_strided_slice %797 {offsets = [0, 0], sizes = [4, 32], strides = [1, 1]} : vector<4x96xf32> to vector<4x32xf32>
    %801 = vector.extract_strided_slice %797 {offsets = [0, 32], sizes = [4, 32], strides = [1, 1]} : vector<4x96xf32> to vector<4x32xf32>
    %802 = vector.extract_strided_slice %797 {offsets = [0, 64], sizes = [4, 32], strides = [1, 1]} : vector<4x96xf32> to vector<4x32xf32>
    %803 = arith.mulf %801, %767 : vector<4x32xf32>
    %804 = arith.mulf %800, %799 : vector<4x32xf32>
    %805 = arith.addf %803, %804 : vector<4x32xf32>
    %806 = math.tanh %805 : vector<4x32xf32>
    %807 = arith.mulf %802, %806 : vector<4x32xf32>
    %c48_242 = arith.constant 48 : index
    %c128_243 = arith.constant 128 : index
    %808 = vector.load %arg17[%c48_242, %c128_243] : memref<64x256xf32, #tpu.memory_space<vmem>>, vector<4x128xf32>
    %cst_244 = arith.constant dense<0.000000e+00> : vector<4x128xf32>
    %809 = tpu.matmul %788, %674, %cst_244 {dimension_numbers = #tpu.dot_dimension_numbers<[1], [0], [0], [1], [0, 0, 1, 1], [], []>} : vector<4x32xf32>, vector<32x128xf32>, vector<4x128xf32> -> vector<4x128xf32>
    %810 = arith.addf %808, %809 : vector<4x128xf32>
    %811 = vector.extract_strided_slice %810 {offsets = [0, 0], sizes = [4, 96], strides = [1, 1]} : vector<4x128xf32> to vector<4x96xf32>
    %812 = arith.negf %811 : vector<4x96xf32>
    %813 = math.exp %812 : vector<4x96xf32>
    %cst_245 = arith.constant 1.000000e+00 : f32
    %814 = vector.broadcast %cst_245 : f32 to vector<4x96xf32>
    %815 = arith.addf %814, %813 : vector<4x96xf32>
    %816 = arith.divf %814, %815 : vector<4x96xf32>
    %817 = vector.extract_strided_slice %810 {offsets = [0, 96], sizes = [4, 32], strides = [1, 1]} : vector<4x128xf32> to vector<4x32xf32>
    %818 = math.tanh %817 : vector<4x32xf32>
    %819 = vector.extract_strided_slice %816 {offsets = [0, 0], sizes = [4, 32], strides = [1, 1]} : vector<4x96xf32> to vector<4x32xf32>
    %820 = vector.extract_strided_slice %816 {offsets = [0, 32], sizes = [4, 32], strides = [1, 1]} : vector<4x96xf32> to vector<4x32xf32>
    %821 = vector.extract_strided_slice %816 {offsets = [0, 64], sizes = [4, 32], strides = [1, 1]} : vector<4x96xf32> to vector<4x32xf32>
    %822 = arith.mulf %820, %786 : vector<4x32xf32>
    %823 = arith.mulf %819, %818 : vector<4x32xf32>
    %824 = arith.addf %822, %823 : vector<4x32xf32>
    %825 = math.tanh %824 : vector<4x32xf32>
    %826 = arith.mulf %821, %825 : vector<4x32xf32>
    %c16_246 = arith.constant 16 : index
    %c0_247 = arith.constant 0 : index
    %827 = vector.load %arg17[%c16_246, %c0_247] : memref<64x256xf32, #tpu.memory_space<vmem>>, vector<4x128xf32>
    %cst_248 = arith.constant dense<0.000000e+00> : vector<4x128xf32>
    %828 = tpu.matmul %807, %673, %cst_248 {dimension_numbers = #tpu.dot_dimension_numbers<[1], [0], [0], [1], [0, 0, 1, 1], [], []>} : vector<4x32xf32>, vector<32x128xf32>, vector<4x128xf32> -> vector<4x128xf32>
    %829 = arith.addf %827, %828 : vector<4x128xf32>
    %830 = vector.extract_strided_slice %829 {offsets = [0, 0], sizes = [4, 96], strides = [1, 1]} : vector<4x128xf32> to vector<4x96xf32>
    %831 = arith.negf %830 : vector<4x96xf32>
    %832 = math.exp %831 : vector<4x96xf32>
    %cst_249 = arith.constant 1.000000e+00 : f32
    %833 = vector.broadcast %cst_249 : f32 to vector<4x96xf32>
    %834 = arith.addf %833, %832 : vector<4x96xf32>
    %835 = arith.divf %833, %834 : vector<4x96xf32>
    %836 = vector.extract_strided_slice %829 {offsets = [0, 96], sizes = [4, 32], strides = [1, 1]} : vector<4x128xf32> to vector<4x32xf32>
    %837 = math.tanh %836 : vector<4x32xf32>
    %838 = vector.extract_strided_slice %835 {offsets = [0, 0], sizes = [4, 32], strides = [1, 1]} : vector<4x96xf32> to vector<4x32xf32>
    %839 = vector.extract_strided_slice %835 {offsets = [0, 32], sizes = [4, 32], strides = [1, 1]} : vector<4x96xf32> to vector<4x32xf32>
    %840 = vector.extract_strided_slice %835 {offsets = [0, 64], sizes = [4, 32], strides = [1, 1]} : vector<4x96xf32> to vector<4x32xf32>
    %841 = arith.mulf %839, %805 : vector<4x32xf32>
    %842 = arith.mulf %838, %837 : vector<4x32xf32>
    %843 = arith.addf %841, %842 : vector<4x32xf32>
    %844 = math.tanh %843 : vector<4x32xf32>
    %845 = arith.mulf %840, %844 : vector<4x32xf32>
    %c44_250 = arith.constant 44 : index
    %c128_251 = arith.constant 128 : index
    %846 = vector.load %arg17[%c44_250, %c128_251] : memref<64x256xf32, #tpu.memory_space<vmem>>, vector<4x128xf32>
    %cst_252 = arith.constant dense<0.000000e+00> : vector<4x128xf32>
    %847 = tpu.matmul %826, %674, %cst_252 {dimension_numbers = #tpu.dot_dimension_numbers<[1], [0], [0], [1], [0, 0, 1, 1], [], []>} : vector<4x32xf32>, vector<32x128xf32>, vector<4x128xf32> -> vector<4x128xf32>
    %848 = arith.addf %846, %847 : vector<4x128xf32>
    %849 = vector.extract_strided_slice %848 {offsets = [0, 0], sizes = [4, 96], strides = [1, 1]} : vector<4x128xf32> to vector<4x96xf32>
    %850 = arith.negf %849 : vector<4x96xf32>
    %851 = math.exp %850 : vector<4x96xf32>
    %cst_253 = arith.constant 1.000000e+00 : f32
    %852 = vector.broadcast %cst_253 : f32 to vector<4x96xf32>
    %853 = arith.addf %852, %851 : vector<4x96xf32>
    %854 = arith.divf %852, %853 : vector<4x96xf32>
    %855 = vector.extract_strided_slice %848 {offsets = [0, 96], sizes = [4, 32], strides = [1, 1]} : vector<4x128xf32> to vector<4x32xf32>
    %856 = math.tanh %855 : vector<4x32xf32>
    %857 = vector.extract_strided_slice %854 {offsets = [0, 0], sizes = [4, 32], strides = [1, 1]} : vector<4x96xf32> to vector<4x32xf32>
    %858 = vector.extract_strided_slice %854 {offsets = [0, 32], sizes = [4, 32], strides = [1, 1]} : vector<4x96xf32> to vector<4x32xf32>
    %859 = vector.extract_strided_slice %854 {offsets = [0, 64], sizes = [4, 32], strides = [1, 1]} : vector<4x96xf32> to vector<4x32xf32>
    %860 = arith.mulf %858, %824 : vector<4x32xf32>
    %861 = arith.mulf %857, %856 : vector<4x32xf32>
    %862 = arith.addf %860, %861 : vector<4x32xf32>
    %863 = math.tanh %862 : vector<4x32xf32>
    %864 = arith.mulf %859, %863 : vector<4x32xf32>
    %c20_254 = arith.constant 20 : index
    %c0_255 = arith.constant 0 : index
    %865 = vector.load %arg17[%c20_254, %c0_255] : memref<64x256xf32, #tpu.memory_space<vmem>>, vector<4x128xf32>
    %cst_256 = arith.constant dense<0.000000e+00> : vector<4x128xf32>
    %866 = tpu.matmul %845, %673, %cst_256 {dimension_numbers = #tpu.dot_dimension_numbers<[1], [0], [0], [1], [0, 0, 1, 1], [], []>} : vector<4x32xf32>, vector<32x128xf32>, vector<4x128xf32> -> vector<4x128xf32>
    %867 = arith.addf %865, %866 : vector<4x128xf32>
    %868 = vector.extract_strided_slice %867 {offsets = [0, 0], sizes = [4, 96], strides = [1, 1]} : vector<4x128xf32> to vector<4x96xf32>
    %869 = arith.negf %868 : vector<4x96xf32>
    %870 = math.exp %869 : vector<4x96xf32>
    %cst_257 = arith.constant 1.000000e+00 : f32
    %871 = vector.broadcast %cst_257 : f32 to vector<4x96xf32>
    %872 = arith.addf %871, %870 : vector<4x96xf32>
    %873 = arith.divf %871, %872 : vector<4x96xf32>
    %874 = vector.extract_strided_slice %867 {offsets = [0, 96], sizes = [4, 32], strides = [1, 1]} : vector<4x128xf32> to vector<4x32xf32>
    %875 = math.tanh %874 : vector<4x32xf32>
    %876 = vector.extract_strided_slice %873 {offsets = [0, 0], sizes = [4, 32], strides = [1, 1]} : vector<4x96xf32> to vector<4x32xf32>
    %877 = vector.extract_strided_slice %873 {offsets = [0, 32], sizes = [4, 32], strides = [1, 1]} : vector<4x96xf32> to vector<4x32xf32>
    %878 = vector.extract_strided_slice %873 {offsets = [0, 64], sizes = [4, 32], strides = [1, 1]} : vector<4x96xf32> to vector<4x32xf32>
    %879 = arith.mulf %877, %843 : vector<4x32xf32>
    %880 = arith.mulf %876, %875 : vector<4x32xf32>
    %881 = arith.addf %879, %880 : vector<4x32xf32>
    %882 = math.tanh %881 : vector<4x32xf32>
    %883 = arith.mulf %878, %882 : vector<4x32xf32>
    %c40_258 = arith.constant 40 : index
    %c128_259 = arith.constant 128 : index
    %884 = vector.load %arg17[%c40_258, %c128_259] : memref<64x256xf32, #tpu.memory_space<vmem>>, vector<4x128xf32>
    %cst_260 = arith.constant dense<0.000000e+00> : vector<4x128xf32>
    %885 = tpu.matmul %864, %674, %cst_260 {dimension_numbers = #tpu.dot_dimension_numbers<[1], [0], [0], [1], [0, 0, 1, 1], [], []>} : vector<4x32xf32>, vector<32x128xf32>, vector<4x128xf32> -> vector<4x128xf32>
    %886 = arith.addf %884, %885 : vector<4x128xf32>
    %887 = vector.extract_strided_slice %886 {offsets = [0, 0], sizes = [4, 96], strides = [1, 1]} : vector<4x128xf32> to vector<4x96xf32>
    %888 = arith.negf %887 : vector<4x96xf32>
    %889 = math.exp %888 : vector<4x96xf32>
    %cst_261 = arith.constant 1.000000e+00 : f32
    %890 = vector.broadcast %cst_261 : f32 to vector<4x96xf32>
    %891 = arith.addf %890, %889 : vector<4x96xf32>
    %892 = arith.divf %890, %891 : vector<4x96xf32>
    %893 = vector.extract_strided_slice %886 {offsets = [0, 96], sizes = [4, 32], strides = [1, 1]} : vector<4x128xf32> to vector<4x32xf32>
    %894 = math.tanh %893 : vector<4x32xf32>
    %895 = vector.extract_strided_slice %892 {offsets = [0, 0], sizes = [4, 32], strides = [1, 1]} : vector<4x96xf32> to vector<4x32xf32>
    %896 = vector.extract_strided_slice %892 {offsets = [0, 32], sizes = [4, 32], strides = [1, 1]} : vector<4x96xf32> to vector<4x32xf32>
    %897 = vector.extract_strided_slice %892 {offsets = [0, 64], sizes = [4, 32], strides = [1, 1]} : vector<4x96xf32> to vector<4x32xf32>
    %898 = arith.mulf %896, %862 : vector<4x32xf32>
    %899 = arith.mulf %895, %894 : vector<4x32xf32>
    %900 = arith.addf %898, %899 : vector<4x32xf32>
    %901 = math.tanh %900 : vector<4x32xf32>
    %902 = arith.mulf %897, %901 : vector<4x32xf32>
    %c24_262 = arith.constant 24 : index
    %c0_263 = arith.constant 0 : index
    %903 = vector.load %arg17[%c24_262, %c0_263] : memref<64x256xf32, #tpu.memory_space<vmem>>, vector<4x128xf32>
    %cst_264 = arith.constant dense<0.000000e+00> : vector<4x128xf32>
    %904 = tpu.matmul %883, %673, %cst_264 {dimension_numbers = #tpu.dot_dimension_numbers<[1], [0], [0], [1], [0, 0, 1, 1], [], []>} : vector<4x32xf32>, vector<32x128xf32>, vector<4x128xf32> -> vector<4x128xf32>
    %905 = arith.addf %903, %904 : vector<4x128xf32>
    %906 = vector.extract_strided_slice %905 {offsets = [0, 0], sizes = [4, 96], strides = [1, 1]} : vector<4x128xf32> to vector<4x96xf32>
    %907 = arith.negf %906 : vector<4x96xf32>
    %908 = math.exp %907 : vector<4x96xf32>
    %cst_265 = arith.constant 1.000000e+00 : f32
    %909 = vector.broadcast %cst_265 : f32 to vector<4x96xf32>
    %910 = arith.addf %909, %908 : vector<4x96xf32>
    %911 = arith.divf %909, %910 : vector<4x96xf32>
    %912 = vector.extract_strided_slice %905 {offsets = [0, 96], sizes = [4, 32], strides = [1, 1]} : vector<4x128xf32> to vector<4x32xf32>
    %913 = math.tanh %912 : vector<4x32xf32>
    %914 = vector.extract_strided_slice %911 {offsets = [0, 0], sizes = [4, 32], strides = [1, 1]} : vector<4x96xf32> to vector<4x32xf32>
    %915 = vector.extract_strided_slice %911 {offsets = [0, 32], sizes = [4, 32], strides = [1, 1]} : vector<4x96xf32> to vector<4x32xf32>
    %916 = vector.extract_strided_slice %911 {offsets = [0, 64], sizes = [4, 32], strides = [1, 1]} : vector<4x96xf32> to vector<4x32xf32>
    %917 = arith.mulf %915, %881 : vector<4x32xf32>
    %918 = arith.mulf %914, %913 : vector<4x32xf32>
    %919 = arith.addf %917, %918 : vector<4x32xf32>
    %920 = math.tanh %919 : vector<4x32xf32>
    %921 = arith.mulf %916, %920 : vector<4x32xf32>
    %c36_266 = arith.constant 36 : index
    %c128_267 = arith.constant 128 : index
    %922 = vector.load %arg17[%c36_266, %c128_267] : memref<64x256xf32, #tpu.memory_space<vmem>>, vector<4x128xf32>
    %cst_268 = arith.constant dense<0.000000e+00> : vector<4x128xf32>
    %923 = tpu.matmul %902, %674, %cst_268 {dimension_numbers = #tpu.dot_dimension_numbers<[1], [0], [0], [1], [0, 0, 1, 1], [], []>} : vector<4x32xf32>, vector<32x128xf32>, vector<4x128xf32> -> vector<4x128xf32>
    %924 = arith.addf %922, %923 : vector<4x128xf32>
    %925 = vector.extract_strided_slice %924 {offsets = [0, 0], sizes = [4, 96], strides = [1, 1]} : vector<4x128xf32> to vector<4x96xf32>
    %926 = arith.negf %925 : vector<4x96xf32>
    %927 = math.exp %926 : vector<4x96xf32>
    %cst_269 = arith.constant 1.000000e+00 : f32
    %928 = vector.broadcast %cst_269 : f32 to vector<4x96xf32>
    %929 = arith.addf %928, %927 : vector<4x96xf32>
    %930 = arith.divf %928, %929 : vector<4x96xf32>
    %931 = vector.extract_strided_slice %924 {offsets = [0, 96], sizes = [4, 32], strides = [1, 1]} : vector<4x128xf32> to vector<4x32xf32>
    %932 = math.tanh %931 : vector<4x32xf32>
    %933 = vector.extract_strided_slice %930 {offsets = [0, 0], sizes = [4, 32], strides = [1, 1]} : vector<4x96xf32> to vector<4x32xf32>
    %934 = vector.extract_strided_slice %930 {offsets = [0, 32], sizes = [4, 32], strides = [1, 1]} : vector<4x96xf32> to vector<4x32xf32>
    %935 = vector.extract_strided_slice %930 {offsets = [0, 64], sizes = [4, 32], strides = [1, 1]} : vector<4x96xf32> to vector<4x32xf32>
    %936 = arith.mulf %934, %900 : vector<4x32xf32>
    %937 = arith.mulf %933, %932 : vector<4x32xf32>
    %938 = arith.addf %936, %937 : vector<4x32xf32>
    %939 = math.tanh %938 : vector<4x32xf32>
    %940 = arith.mulf %935, %939 : vector<4x32xf32>
    %c28_270 = arith.constant 28 : index
    %c0_271 = arith.constant 0 : index
    %941 = vector.load %arg17[%c28_270, %c0_271] : memref<64x256xf32, #tpu.memory_space<vmem>>, vector<4x128xf32>
    %cst_272 = arith.constant dense<0.000000e+00> : vector<4x128xf32>
    %942 = tpu.matmul %921, %673, %cst_272 {dimension_numbers = #tpu.dot_dimension_numbers<[1], [0], [0], [1], [0, 0, 1, 1], [], []>} : vector<4x32xf32>, vector<32x128xf32>, vector<4x128xf32> -> vector<4x128xf32>
    %943 = arith.addf %941, %942 : vector<4x128xf32>
    %944 = vector.extract_strided_slice %943 {offsets = [0, 0], sizes = [4, 96], strides = [1, 1]} : vector<4x128xf32> to vector<4x96xf32>
    %945 = arith.negf %944 : vector<4x96xf32>
    %946 = math.exp %945 : vector<4x96xf32>
    %cst_273 = arith.constant 1.000000e+00 : f32
    %947 = vector.broadcast %cst_273 : f32 to vector<4x96xf32>
    %948 = arith.addf %947, %946 : vector<4x96xf32>
    %949 = arith.divf %947, %948 : vector<4x96xf32>
    %950 = vector.extract_strided_slice %943 {offsets = [0, 96], sizes = [4, 32], strides = [1, 1]} : vector<4x128xf32> to vector<4x32xf32>
    %951 = math.tanh %950 : vector<4x32xf32>
    %952 = vector.extract_strided_slice %949 {offsets = [0, 0], sizes = [4, 32], strides = [1, 1]} : vector<4x96xf32> to vector<4x32xf32>
    %953 = vector.extract_strided_slice %949 {offsets = [0, 32], sizes = [4, 32], strides = [1, 1]} : vector<4x96xf32> to vector<4x32xf32>
    %954 = vector.extract_strided_slice %949 {offsets = [0, 64], sizes = [4, 32], strides = [1, 1]} : vector<4x96xf32> to vector<4x32xf32>
    %955 = arith.mulf %953, %919 : vector<4x32xf32>
    %956 = arith.mulf %952, %951 : vector<4x32xf32>
    %957 = arith.addf %955, %956 : vector<4x32xf32>
    %958 = math.tanh %957 : vector<4x32xf32>
    %959 = arith.mulf %954, %958 : vector<4x32xf32>
    %c32_274 = arith.constant 32 : index
    %c128_275 = arith.constant 128 : index
    %960 = vector.load %arg17[%c32_274, %c128_275] : memref<64x256xf32, #tpu.memory_space<vmem>>, vector<4x128xf32>
    %cst_276 = arith.constant dense<0.000000e+00> : vector<4x128xf32>
    %961 = tpu.matmul %940, %674, %cst_276 {dimension_numbers = #tpu.dot_dimension_numbers<[1], [0], [0], [1], [0, 0, 1, 1], [], []>} : vector<4x32xf32>, vector<32x128xf32>, vector<4x128xf32> -> vector<4x128xf32>
    %962 = arith.addf %960, %961 : vector<4x128xf32>
    %963 = vector.extract_strided_slice %962 {offsets = [0, 0], sizes = [4, 96], strides = [1, 1]} : vector<4x128xf32> to vector<4x96xf32>
    %964 = arith.negf %963 : vector<4x96xf32>
    %965 = math.exp %964 : vector<4x96xf32>
    %cst_277 = arith.constant 1.000000e+00 : f32
    %966 = vector.broadcast %cst_277 : f32 to vector<4x96xf32>
    %967 = arith.addf %966, %965 : vector<4x96xf32>
    %968 = arith.divf %966, %967 : vector<4x96xf32>
    %969 = vector.extract_strided_slice %962 {offsets = [0, 96], sizes = [4, 32], strides = [1, 1]} : vector<4x128xf32> to vector<4x32xf32>
    %970 = math.tanh %969 : vector<4x32xf32>
    %971 = vector.extract_strided_slice %968 {offsets = [0, 0], sizes = [4, 32], strides = [1, 1]} : vector<4x96xf32> to vector<4x32xf32>
    %972 = vector.extract_strided_slice %968 {offsets = [0, 32], sizes = [4, 32], strides = [1, 1]} : vector<4x96xf32> to vector<4x32xf32>
    %973 = vector.extract_strided_slice %968 {offsets = [0, 64], sizes = [4, 32], strides = [1, 1]} : vector<4x96xf32> to vector<4x32xf32>
    %974 = arith.mulf %972, %938 : vector<4x32xf32>
    %975 = arith.mulf %971, %970 : vector<4x32xf32>
    %976 = arith.addf %974, %975 : vector<4x32xf32>
    %977 = math.tanh %976 : vector<4x32xf32>
    %978 = arith.mulf %973, %977 : vector<4x32xf32>
    %c32_278 = arith.constant 32 : index
    %c0_279 = arith.constant 0 : index
    %979 = vector.load %arg17[%c32_278, %c0_279] : memref<64x256xf32, #tpu.memory_space<vmem>>, vector<4x128xf32>
    %cst_280 = arith.constant dense<0.000000e+00> : vector<4x128xf32>
    %980 = tpu.matmul %959, %673, %cst_280 {dimension_numbers = #tpu.dot_dimension_numbers<[1], [0], [0], [1], [0, 0, 1, 1], [], []>} : vector<4x32xf32>, vector<32x128xf32>, vector<4x128xf32> -> vector<4x128xf32>
    %981 = arith.addf %979, %980 : vector<4x128xf32>
    %982 = vector.extract_strided_slice %981 {offsets = [0, 0], sizes = [4, 96], strides = [1, 1]} : vector<4x128xf32> to vector<4x96xf32>
    %983 = arith.negf %982 : vector<4x96xf32>
    %984 = math.exp %983 : vector<4x96xf32>
    %cst_281 = arith.constant 1.000000e+00 : f32
    %985 = vector.broadcast %cst_281 : f32 to vector<4x96xf32>
    %986 = arith.addf %985, %984 : vector<4x96xf32>
    %987 = arith.divf %985, %986 : vector<4x96xf32>
    %988 = vector.extract_strided_slice %981 {offsets = [0, 96], sizes = [4, 32], strides = [1, 1]} : vector<4x128xf32> to vector<4x32xf32>
    %989 = math.tanh %988 : vector<4x32xf32>
    %990 = vector.extract_strided_slice %987 {offsets = [0, 0], sizes = [4, 32], strides = [1, 1]} : vector<4x96xf32> to vector<4x32xf32>
    %991 = vector.extract_strided_slice %987 {offsets = [0, 32], sizes = [4, 32], strides = [1, 1]} : vector<4x96xf32> to vector<4x32xf32>
    %992 = vector.extract_strided_slice %987 {offsets = [0, 64], sizes = [4, 32], strides = [1, 1]} : vector<4x96xf32> to vector<4x32xf32>
    %993 = arith.mulf %991, %957 : vector<4x32xf32>
    %994 = arith.mulf %990, %989 : vector<4x32xf32>
    %995 = arith.addf %993, %994 : vector<4x32xf32>
    %996 = math.tanh %995 : vector<4x32xf32>
    %997 = arith.mulf %992, %996 : vector<4x32xf32>
    %c28_282 = arith.constant 28 : index
    %c128_283 = arith.constant 128 : index
    %998 = vector.load %arg17[%c28_282, %c128_283] : memref<64x256xf32, #tpu.memory_space<vmem>>, vector<4x128xf32>
    %cst_284 = arith.constant dense<0.000000e+00> : vector<4x128xf32>
    %999 = tpu.matmul %978, %674, %cst_284 {dimension_numbers = #tpu.dot_dimension_numbers<[1], [0], [0], [1], [0, 0, 1, 1], [], []>} : vector<4x32xf32>, vector<32x128xf32>, vector<4x128xf32> -> vector<4x128xf32>
    %1000 = arith.addf %998, %999 : vector<4x128xf32>
    %1001 = vector.extract_strided_slice %1000 {offsets = [0, 0], sizes = [4, 96], strides = [1, 1]} : vector<4x128xf32> to vector<4x96xf32>
    %1002 = arith.negf %1001 : vector<4x96xf32>
    %1003 = math.exp %1002 : vector<4x96xf32>
    %cst_285 = arith.constant 1.000000e+00 : f32
    %1004 = vector.broadcast %cst_285 : f32 to vector<4x96xf32>
    %1005 = arith.addf %1004, %1003 : vector<4x96xf32>
    %1006 = arith.divf %1004, %1005 : vector<4x96xf32>
    %1007 = vector.extract_strided_slice %1000 {offsets = [0, 96], sizes = [4, 32], strides = [1, 1]} : vector<4x128xf32> to vector<4x32xf32>
    %1008 = math.tanh %1007 : vector<4x32xf32>
    %1009 = vector.extract_strided_slice %1006 {offsets = [0, 0], sizes = [4, 32], strides = [1, 1]} : vector<4x96xf32> to vector<4x32xf32>
    %1010 = vector.extract_strided_slice %1006 {offsets = [0, 32], sizes = [4, 32], strides = [1, 1]} : vector<4x96xf32> to vector<4x32xf32>
    %1011 = vector.extract_strided_slice %1006 {offsets = [0, 64], sizes = [4, 32], strides = [1, 1]} : vector<4x96xf32> to vector<4x32xf32>
    %1012 = arith.mulf %1010, %976 : vector<4x32xf32>
    %1013 = arith.mulf %1009, %1008 : vector<4x32xf32>
    %1014 = arith.addf %1012, %1013 : vector<4x32xf32>
    %1015 = math.tanh %1014 : vector<4x32xf32>
    %1016 = arith.mulf %1011, %1015 : vector<4x32xf32>
    %c36_286 = arith.constant 36 : index
    %c0_287 = arith.constant 0 : index
    %1017 = vector.load %arg17[%c36_286, %c0_287] : memref<64x256xf32, #tpu.memory_space<vmem>>, vector<4x128xf32>
    %cst_288 = arith.constant dense<0.000000e+00> : vector<4x128xf32>
    %1018 = tpu.matmul %997, %673, %cst_288 {dimension_numbers = #tpu.dot_dimension_numbers<[1], [0], [0], [1], [0, 0, 1, 1], [], []>} : vector<4x32xf32>, vector<32x128xf32>, vector<4x128xf32> -> vector<4x128xf32>
    %1019 = arith.addf %1017, %1018 : vector<4x128xf32>
    %1020 = vector.extract_strided_slice %1019 {offsets = [0, 0], sizes = [4, 96], strides = [1, 1]} : vector<4x128xf32> to vector<4x96xf32>
    %1021 = arith.negf %1020 : vector<4x96xf32>
    %1022 = math.exp %1021 : vector<4x96xf32>
    %cst_289 = arith.constant 1.000000e+00 : f32
    %1023 = vector.broadcast %cst_289 : f32 to vector<4x96xf32>
    %1024 = arith.addf %1023, %1022 : vector<4x96xf32>
    %1025 = arith.divf %1023, %1024 : vector<4x96xf32>
    %1026 = vector.extract_strided_slice %1019 {offsets = [0, 96], sizes = [4, 32], strides = [1, 1]} : vector<4x128xf32> to vector<4x32xf32>
    %1027 = math.tanh %1026 : vector<4x32xf32>
    %1028 = vector.extract_strided_slice %1025 {offsets = [0, 0], sizes = [4, 32], strides = [1, 1]} : vector<4x96xf32> to vector<4x32xf32>
    %1029 = vector.extract_strided_slice %1025 {offsets = [0, 32], sizes = [4, 32], strides = [1, 1]} : vector<4x96xf32> to vector<4x32xf32>
    %1030 = vector.extract_strided_slice %1025 {offsets = [0, 64], sizes = [4, 32], strides = [1, 1]} : vector<4x96xf32> to vector<4x32xf32>
    %1031 = arith.mulf %1029, %995 : vector<4x32xf32>
    %1032 = arith.mulf %1028, %1027 : vector<4x32xf32>
    %1033 = arith.addf %1031, %1032 : vector<4x32xf32>
    %1034 = math.tanh %1033 : vector<4x32xf32>
    %1035 = arith.mulf %1030, %1034 : vector<4x32xf32>
    %c24_290 = arith.constant 24 : index
    %c128_291 = arith.constant 128 : index
    %1036 = vector.load %arg17[%c24_290, %c128_291] : memref<64x256xf32, #tpu.memory_space<vmem>>, vector<4x128xf32>
    %cst_292 = arith.constant dense<0.000000e+00> : vector<4x128xf32>
    %1037 = tpu.matmul %1016, %674, %cst_292 {dimension_numbers = #tpu.dot_dimension_numbers<[1], [0], [0], [1], [0, 0, 1, 1], [], []>} : vector<4x32xf32>, vector<32x128xf32>, vector<4x128xf32> -> vector<4x128xf32>
    %1038 = arith.addf %1036, %1037 : vector<4x128xf32>
    %1039 = vector.extract_strided_slice %1038 {offsets = [0, 0], sizes = [4, 96], strides = [1, 1]} : vector<4x128xf32> to vector<4x96xf32>
    %1040 = arith.negf %1039 : vector<4x96xf32>
    %1041 = math.exp %1040 : vector<4x96xf32>
    %cst_293 = arith.constant 1.000000e+00 : f32
    %1042 = vector.broadcast %cst_293 : f32 to vector<4x96xf32>
    %1043 = arith.addf %1042, %1041 : vector<4x96xf32>
    %1044 = arith.divf %1042, %1043 : vector<4x96xf32>
    %1045 = vector.extract_strided_slice %1038 {offsets = [0, 96], sizes = [4, 32], strides = [1, 1]} : vector<4x128xf32> to vector<4x32xf32>
    %1046 = math.tanh %1045 : vector<4x32xf32>
    %1047 = vector.extract_strided_slice %1044 {offsets = [0, 0], sizes = [4, 32], strides = [1, 1]} : vector<4x96xf32> to vector<4x32xf32>
    %1048 = vector.extract_strided_slice %1044 {offsets = [0, 32], sizes = [4, 32], strides = [1, 1]} : vector<4x96xf32> to vector<4x32xf32>
    %1049 = vector.extract_strided_slice %1044 {offsets = [0, 64], sizes = [4, 32], strides = [1, 1]} : vector<4x96xf32> to vector<4x32xf32>
    %1050 = arith.mulf %1048, %1014 : vector<4x32xf32>
    %1051 = arith.mulf %1047, %1046 : vector<4x32xf32>
    %1052 = arith.addf %1050, %1051 : vector<4x32xf32>
    %1053 = math.tanh %1052 : vector<4x32xf32>
    %1054 = arith.mulf %1049, %1053 : vector<4x32xf32>
    %c40_294 = arith.constant 40 : index
    %c0_295 = arith.constant 0 : index
    %1055 = vector.load %arg17[%c40_294, %c0_295] : memref<64x256xf32, #tpu.memory_space<vmem>>, vector<4x128xf32>
    %cst_296 = arith.constant dense<0.000000e+00> : vector<4x128xf32>
    %1056 = tpu.matmul %1035, %673, %cst_296 {dimension_numbers = #tpu.dot_dimension_numbers<[1], [0], [0], [1], [0, 0, 1, 1], [], []>} : vector<4x32xf32>, vector<32x128xf32>, vector<4x128xf32> -> vector<4x128xf32>
    %1057 = arith.addf %1055, %1056 : vector<4x128xf32>
    %1058 = vector.extract_strided_slice %1057 {offsets = [0, 0], sizes = [4, 96], strides = [1, 1]} : vector<4x128xf32> to vector<4x96xf32>
    %1059 = arith.negf %1058 : vector<4x96xf32>
    %1060 = math.exp %1059 : vector<4x96xf32>
    %cst_297 = arith.constant 1.000000e+00 : f32
    %1061 = vector.broadcast %cst_297 : f32 to vector<4x96xf32>
    %1062 = arith.addf %1061, %1060 : vector<4x96xf32>
    %1063 = arith.divf %1061, %1062 : vector<4x96xf32>
    %1064 = vector.extract_strided_slice %1057 {offsets = [0, 96], sizes = [4, 32], strides = [1, 1]} : vector<4x128xf32> to vector<4x32xf32>
    %1065 = math.tanh %1064 : vector<4x32xf32>
    %1066 = vector.extract_strided_slice %1063 {offsets = [0, 0], sizes = [4, 32], strides = [1, 1]} : vector<4x96xf32> to vector<4x32xf32>
    %1067 = vector.extract_strided_slice %1063 {offsets = [0, 32], sizes = [4, 32], strides = [1, 1]} : vector<4x96xf32> to vector<4x32xf32>
    %1068 = vector.extract_strided_slice %1063 {offsets = [0, 64], sizes = [4, 32], strides = [1, 1]} : vector<4x96xf32> to vector<4x32xf32>
    %1069 = arith.mulf %1067, %1033 : vector<4x32xf32>
    %1070 = arith.mulf %1066, %1065 : vector<4x32xf32>
    %1071 = arith.addf %1069, %1070 : vector<4x32xf32>
    %1072 = math.tanh %1071 : vector<4x32xf32>
    %1073 = arith.mulf %1068, %1072 : vector<4x32xf32>
    %c20_298 = arith.constant 20 : index
    %c128_299 = arith.constant 128 : index
    %1074 = vector.load %arg17[%c20_298, %c128_299] : memref<64x256xf32, #tpu.memory_space<vmem>>, vector<4x128xf32>
    %cst_300 = arith.constant dense<0.000000e+00> : vector<4x128xf32>
    %1075 = tpu.matmul %1054, %674, %cst_300 {dimension_numbers = #tpu.dot_dimension_numbers<[1], [0], [0], [1], [0, 0, 1, 1], [], []>} : vector<4x32xf32>, vector<32x128xf32>, vector<4x128xf32> -> vector<4x128xf32>
    %1076 = arith.addf %1074, %1075 : vector<4x128xf32>
    %1077 = vector.extract_strided_slice %1076 {offsets = [0, 0], sizes = [4, 96], strides = [1, 1]} : vector<4x128xf32> to vector<4x96xf32>
    %1078 = arith.negf %1077 : vector<4x96xf32>
    %1079 = math.exp %1078 : vector<4x96xf32>
    %cst_301 = arith.constant 1.000000e+00 : f32
    %1080 = vector.broadcast %cst_301 : f32 to vector<4x96xf32>
    %1081 = arith.addf %1080, %1079 : vector<4x96xf32>
    %1082 = arith.divf %1080, %1081 : vector<4x96xf32>
    %1083 = vector.extract_strided_slice %1076 {offsets = [0, 96], sizes = [4, 32], strides = [1, 1]} : vector<4x128xf32> to vector<4x32xf32>
    %1084 = math.tanh %1083 : vector<4x32xf32>
    %1085 = vector.extract_strided_slice %1082 {offsets = [0, 0], sizes = [4, 32], strides = [1, 1]} : vector<4x96xf32> to vector<4x32xf32>
    %1086 = vector.extract_strided_slice %1082 {offsets = [0, 32], sizes = [4, 32], strides = [1, 1]} : vector<4x96xf32> to vector<4x32xf32>
    %1087 = vector.extract_strided_slice %1082 {offsets = [0, 64], sizes = [4, 32], strides = [1, 1]} : vector<4x96xf32> to vector<4x32xf32>
    %1088 = arith.mulf %1086, %1052 : vector<4x32xf32>
    %1089 = arith.mulf %1085, %1084 : vector<4x32xf32>
    %1090 = arith.addf %1088, %1089 : vector<4x32xf32>
    %1091 = math.tanh %1090 : vector<4x32xf32>
    %1092 = arith.mulf %1087, %1091 : vector<4x32xf32>
    %c44_302 = arith.constant 44 : index
    %c0_303 = arith.constant 0 : index
    %1093 = vector.load %arg17[%c44_302, %c0_303] : memref<64x256xf32, #tpu.memory_space<vmem>>, vector<4x128xf32>
    %cst_304 = arith.constant dense<0.000000e+00> : vector<4x128xf32>
    %1094 = tpu.matmul %1073, %673, %cst_304 {dimension_numbers = #tpu.dot_dimension_numbers<[1], [0], [0], [1], [0, 0, 1, 1], [], []>} : vector<4x32xf32>, vector<32x128xf32>, vector<4x128xf32> -> vector<4x128xf32>
    %1095 = arith.addf %1093, %1094 : vector<4x128xf32>
    %1096 = vector.extract_strided_slice %1095 {offsets = [0, 0], sizes = [4, 96], strides = [1, 1]} : vector<4x128xf32> to vector<4x96xf32>
    %1097 = arith.negf %1096 : vector<4x96xf32>
    %1098 = math.exp %1097 : vector<4x96xf32>
    %cst_305 = arith.constant 1.000000e+00 : f32
    %1099 = vector.broadcast %cst_305 : f32 to vector<4x96xf32>
    %1100 = arith.addf %1099, %1098 : vector<4x96xf32>
    %1101 = arith.divf %1099, %1100 : vector<4x96xf32>
    %1102 = vector.extract_strided_slice %1095 {offsets = [0, 96], sizes = [4, 32], strides = [1, 1]} : vector<4x128xf32> to vector<4x32xf32>
    %1103 = math.tanh %1102 : vector<4x32xf32>
    %1104 = vector.extract_strided_slice %1101 {offsets = [0, 0], sizes = [4, 32], strides = [1, 1]} : vector<4x96xf32> to vector<4x32xf32>
    %1105 = vector.extract_strided_slice %1101 {offsets = [0, 32], sizes = [4, 32], strides = [1, 1]} : vector<4x96xf32> to vector<4x32xf32>
    %1106 = vector.extract_strided_slice %1101 {offsets = [0, 64], sizes = [4, 32], strides = [1, 1]} : vector<4x96xf32> to vector<4x32xf32>
    %1107 = arith.mulf %1105, %1071 : vector<4x32xf32>
    %1108 = arith.mulf %1104, %1103 : vector<4x32xf32>
    %1109 = arith.addf %1107, %1108 : vector<4x32xf32>
    %1110 = math.tanh %1109 : vector<4x32xf32>
    %1111 = arith.mulf %1106, %1110 : vector<4x32xf32>
    %c16_306 = arith.constant 16 : index
    %c128_307 = arith.constant 128 : index
    %1112 = vector.load %arg17[%c16_306, %c128_307] : memref<64x256xf32, #tpu.memory_space<vmem>>, vector<4x128xf32>
    %cst_308 = arith.constant dense<0.000000e+00> : vector<4x128xf32>
    %1113 = tpu.matmul %1092, %674, %cst_308 {dimension_numbers = #tpu.dot_dimension_numbers<[1], [0], [0], [1], [0, 0, 1, 1], [], []>} : vector<4x32xf32>, vector<32x128xf32>, vector<4x128xf32> -> vector<4x128xf32>
    %1114 = arith.addf %1112, %1113 : vector<4x128xf32>
    %1115 = vector.extract_strided_slice %1114 {offsets = [0, 0], sizes = [4, 96], strides = [1, 1]} : vector<4x128xf32> to vector<4x96xf32>
    %1116 = arith.negf %1115 : vector<4x96xf32>
    %1117 = math.exp %1116 : vector<4x96xf32>
    %cst_309 = arith.constant 1.000000e+00 : f32
    %1118 = vector.broadcast %cst_309 : f32 to vector<4x96xf32>
    %1119 = arith.addf %1118, %1117 : vector<4x96xf32>
    %1120 = arith.divf %1118, %1119 : vector<4x96xf32>
    %1121 = vector.extract_strided_slice %1114 {offsets = [0, 96], sizes = [4, 32], strides = [1, 1]} : vector<4x128xf32> to vector<4x32xf32>
    %1122 = math.tanh %1121 : vector<4x32xf32>
    %1123 = vector.extract_strided_slice %1120 {offsets = [0, 0], sizes = [4, 32], strides = [1, 1]} : vector<4x96xf32> to vector<4x32xf32>
    %1124 = vector.extract_strided_slice %1120 {offsets = [0, 32], sizes = [4, 32], strides = [1, 1]} : vector<4x96xf32> to vector<4x32xf32>
    %1125 = vector.extract_strided_slice %1120 {offsets = [0, 64], sizes = [4, 32], strides = [1, 1]} : vector<4x96xf32> to vector<4x32xf32>
    %1126 = arith.mulf %1124, %1090 : vector<4x32xf32>
    %1127 = arith.mulf %1123, %1122 : vector<4x32xf32>
    %1128 = arith.addf %1126, %1127 : vector<4x32xf32>
    %1129 = math.tanh %1128 : vector<4x32xf32>
    %1130 = arith.mulf %1125, %1129 : vector<4x32xf32>
    %c48_310 = arith.constant 48 : index
    %c0_311 = arith.constant 0 : index
    %1131 = vector.load %arg17[%c48_310, %c0_311] : memref<64x256xf32, #tpu.memory_space<vmem>>, vector<4x128xf32>
    %cst_312 = arith.constant dense<0.000000e+00> : vector<4x128xf32>
    %1132 = tpu.matmul %1111, %673, %cst_312 {dimension_numbers = #tpu.dot_dimension_numbers<[1], [0], [0], [1], [0, 0, 1, 1], [], []>} : vector<4x32xf32>, vector<32x128xf32>, vector<4x128xf32> -> vector<4x128xf32>
    %1133 = arith.addf %1131, %1132 : vector<4x128xf32>
    %1134 = vector.extract_strided_slice %1133 {offsets = [0, 0], sizes = [4, 96], strides = [1, 1]} : vector<4x128xf32> to vector<4x96xf32>
    %1135 = arith.negf %1134 : vector<4x96xf32>
    %1136 = math.exp %1135 : vector<4x96xf32>
    %cst_313 = arith.constant 1.000000e+00 : f32
    %1137 = vector.broadcast %cst_313 : f32 to vector<4x96xf32>
    %1138 = arith.addf %1137, %1136 : vector<4x96xf32>
    %1139 = arith.divf %1137, %1138 : vector<4x96xf32>
    %1140 = vector.extract_strided_slice %1133 {offsets = [0, 96], sizes = [4, 32], strides = [1, 1]} : vector<4x128xf32> to vector<4x32xf32>
    %1141 = math.tanh %1140 : vector<4x32xf32>
    %1142 = vector.extract_strided_slice %1139 {offsets = [0, 0], sizes = [4, 32], strides = [1, 1]} : vector<4x96xf32> to vector<4x32xf32>
    %1143 = vector.extract_strided_slice %1139 {offsets = [0, 32], sizes = [4, 32], strides = [1, 1]} : vector<4x96xf32> to vector<4x32xf32>
    %1144 = vector.extract_strided_slice %1139 {offsets = [0, 64], sizes = [4, 32], strides = [1, 1]} : vector<4x96xf32> to vector<4x32xf32>
    %1145 = arith.mulf %1143, %1109 : vector<4x32xf32>
    %1146 = arith.mulf %1142, %1141 : vector<4x32xf32>
    %1147 = arith.addf %1145, %1146 : vector<4x32xf32>
    %1148 = math.tanh %1147 : vector<4x32xf32>
    %1149 = arith.mulf %1144, %1148 : vector<4x32xf32>
    %c12_314 = arith.constant 12 : index
    %c128_315 = arith.constant 128 : index
    %1150 = vector.load %arg17[%c12_314, %c128_315] : memref<64x256xf32, #tpu.memory_space<vmem>>, vector<4x128xf32>
    %cst_316 = arith.constant dense<0.000000e+00> : vector<4x128xf32>
    %1151 = tpu.matmul %1130, %674, %cst_316 {dimension_numbers = #tpu.dot_dimension_numbers<[1], [0], [0], [1], [0, 0, 1, 1], [], []>} : vector<4x32xf32>, vector<32x128xf32>, vector<4x128xf32> -> vector<4x128xf32>
    %1152 = arith.addf %1150, %1151 : vector<4x128xf32>
    %1153 = vector.extract_strided_slice %1152 {offsets = [0, 0], sizes = [4, 96], strides = [1, 1]} : vector<4x128xf32> to vector<4x96xf32>
    %1154 = arith.negf %1153 : vector<4x96xf32>
    %1155 = math.exp %1154 : vector<4x96xf32>
    %cst_317 = arith.constant 1.000000e+00 : f32
    %1156 = vector.broadcast %cst_317 : f32 to vector<4x96xf32>
    %1157 = arith.addf %1156, %1155 : vector<4x96xf32>
    %1158 = arith.divf %1156, %1157 : vector<4x96xf32>
    %1159 = vector.extract_strided_slice %1152 {offsets = [0, 96], sizes = [4, 32], strides = [1, 1]} : vector<4x128xf32> to vector<4x32xf32>
    %1160 = math.tanh %1159 : vector<4x32xf32>
    %1161 = vector.extract_strided_slice %1158 {offsets = [0, 0], sizes = [4, 32], strides = [1, 1]} : vector<4x96xf32> to vector<4x32xf32>
    %1162 = vector.extract_strided_slice %1158 {offsets = [0, 32], sizes = [4, 32], strides = [1, 1]} : vector<4x96xf32> to vector<4x32xf32>
    %1163 = vector.extract_strided_slice %1158 {offsets = [0, 64], sizes = [4, 32], strides = [1, 1]} : vector<4x96xf32> to vector<4x32xf32>
    %1164 = arith.mulf %1162, %1128 : vector<4x32xf32>
    %1165 = arith.mulf %1161, %1160 : vector<4x32xf32>
    %1166 = arith.addf %1164, %1165 : vector<4x32xf32>
    %1167 = math.tanh %1166 : vector<4x32xf32>
    %1168 = arith.mulf %1163, %1167 : vector<4x32xf32>
    %c52_318 = arith.constant 52 : index
    %c0_319 = arith.constant 0 : index
    %1169 = vector.load %arg17[%c52_318, %c0_319] : memref<64x256xf32, #tpu.memory_space<vmem>>, vector<4x128xf32>
    %cst_320 = arith.constant dense<0.000000e+00> : vector<4x128xf32>
    %1170 = tpu.matmul %1149, %673, %cst_320 {dimension_numbers = #tpu.dot_dimension_numbers<[1], [0], [0], [1], [0, 0, 1, 1], [], []>} : vector<4x32xf32>, vector<32x128xf32>, vector<4x128xf32> -> vector<4x128xf32>
    %1171 = arith.addf %1169, %1170 : vector<4x128xf32>
    %1172 = vector.extract_strided_slice %1171 {offsets = [0, 0], sizes = [4, 96], strides = [1, 1]} : vector<4x128xf32> to vector<4x96xf32>
    %1173 = arith.negf %1172 : vector<4x96xf32>
    %1174 = math.exp %1173 : vector<4x96xf32>
    %cst_321 = arith.constant 1.000000e+00 : f32
    %1175 = vector.broadcast %cst_321 : f32 to vector<4x96xf32>
    %1176 = arith.addf %1175, %1174 : vector<4x96xf32>
    %1177 = arith.divf %1175, %1176 : vector<4x96xf32>
    %1178 = vector.extract_strided_slice %1171 {offsets = [0, 96], sizes = [4, 32], strides = [1, 1]} : vector<4x128xf32> to vector<4x32xf32>
    %1179 = math.tanh %1178 : vector<4x32xf32>
    %1180 = vector.extract_strided_slice %1177 {offsets = [0, 0], sizes = [4, 32], strides = [1, 1]} : vector<4x96xf32> to vector<4x32xf32>
    %1181 = vector.extract_strided_slice %1177 {offsets = [0, 32], sizes = [4, 32], strides = [1, 1]} : vector<4x96xf32> to vector<4x32xf32>
    %1182 = vector.extract_strided_slice %1177 {offsets = [0, 64], sizes = [4, 32], strides = [1, 1]} : vector<4x96xf32> to vector<4x32xf32>
    %1183 = arith.mulf %1181, %1147 : vector<4x32xf32>
    %1184 = arith.mulf %1180, %1179 : vector<4x32xf32>
    %1185 = arith.addf %1183, %1184 : vector<4x32xf32>
    %1186 = math.tanh %1185 : vector<4x32xf32>
    %1187 = arith.mulf %1182, %1186 : vector<4x32xf32>
    %c8_322 = arith.constant 8 : index
    %c128_323 = arith.constant 128 : index
    %1188 = vector.load %arg17[%c8_322, %c128_323] : memref<64x256xf32, #tpu.memory_space<vmem>>, vector<4x128xf32>
    %cst_324 = arith.constant dense<0.000000e+00> : vector<4x128xf32>
    %1189 = tpu.matmul %1168, %674, %cst_324 {dimension_numbers = #tpu.dot_dimension_numbers<[1], [0], [0], [1], [0, 0, 1, 1], [], []>} : vector<4x32xf32>, vector<32x128xf32>, vector<4x128xf32> -> vector<4x128xf32>
    %1190 = arith.addf %1188, %1189 : vector<4x128xf32>
    %1191 = vector.extract_strided_slice %1190 {offsets = [0, 0], sizes = [4, 96], strides = [1, 1]} : vector<4x128xf32> to vector<4x96xf32>
    %1192 = arith.negf %1191 : vector<4x96xf32>
    %1193 = math.exp %1192 : vector<4x96xf32>
    %cst_325 = arith.constant 1.000000e+00 : f32
    %1194 = vector.broadcast %cst_325 : f32 to vector<4x96xf32>
    %1195 = arith.addf %1194, %1193 : vector<4x96xf32>
    %1196 = arith.divf %1194, %1195 : vector<4x96xf32>
    %1197 = vector.extract_strided_slice %1190 {offsets = [0, 96], sizes = [4, 32], strides = [1, 1]} : vector<4x128xf32> to vector<4x32xf32>
    %1198 = math.tanh %1197 : vector<4x32xf32>
    %1199 = vector.extract_strided_slice %1196 {offsets = [0, 0], sizes = [4, 32], strides = [1, 1]} : vector<4x96xf32> to vector<4x32xf32>
    %1200 = vector.extract_strided_slice %1196 {offsets = [0, 32], sizes = [4, 32], strides = [1, 1]} : vector<4x96xf32> to vector<4x32xf32>
    %1201 = vector.extract_strided_slice %1196 {offsets = [0, 64], sizes = [4, 32], strides = [1, 1]} : vector<4x96xf32> to vector<4x32xf32>
    %1202 = arith.mulf %1200, %1166 : vector<4x32xf32>
    %1203 = arith.mulf %1199, %1198 : vector<4x32xf32>
    %1204 = arith.addf %1202, %1203 : vector<4x32xf32>
    %1205 = math.tanh %1204 : vector<4x32xf32>
    %1206 = arith.mulf %1201, %1205 : vector<4x32xf32>
    %c56_326 = arith.constant 56 : index
    %c0_327 = arith.constant 0 : index
    %1207 = vector.load %arg17[%c56_326, %c0_327] : memref<64x256xf32, #tpu.memory_space<vmem>>, vector<4x128xf32>
    %cst_328 = arith.constant dense<0.000000e+00> : vector<4x128xf32>
    %1208 = tpu.matmul %1187, %673, %cst_328 {dimension_numbers = #tpu.dot_dimension_numbers<[1], [0], [0], [1], [0, 0, 1, 1], [], []>} : vector<4x32xf32>, vector<32x128xf32>, vector<4x128xf32> -> vector<4x128xf32>
    %1209 = arith.addf %1207, %1208 : vector<4x128xf32>
    %1210 = vector.extract_strided_slice %1209 {offsets = [0, 0], sizes = [4, 96], strides = [1, 1]} : vector<4x128xf32> to vector<4x96xf32>
    %1211 = arith.negf %1210 : vector<4x96xf32>
    %1212 = math.exp %1211 : vector<4x96xf32>
    %cst_329 = arith.constant 1.000000e+00 : f32
    %1213 = vector.broadcast %cst_329 : f32 to vector<4x96xf32>
    %1214 = arith.addf %1213, %1212 : vector<4x96xf32>
    %1215 = arith.divf %1213, %1214 : vector<4x96xf32>
    %1216 = vector.extract_strided_slice %1209 {offsets = [0, 96], sizes = [4, 32], strides = [1, 1]} : vector<4x128xf32> to vector<4x32xf32>
    %1217 = math.tanh %1216 : vector<4x32xf32>
    %1218 = vector.extract_strided_slice %1215 {offsets = [0, 0], sizes = [4, 32], strides = [1, 1]} : vector<4x96xf32> to vector<4x32xf32>
    %1219 = vector.extract_strided_slice %1215 {offsets = [0, 32], sizes = [4, 32], strides = [1, 1]} : vector<4x96xf32> to vector<4x32xf32>
    %1220 = vector.extract_strided_slice %1215 {offsets = [0, 64], sizes = [4, 32], strides = [1, 1]} : vector<4x96xf32> to vector<4x32xf32>
    %1221 = arith.mulf %1219, %1185 : vector<4x32xf32>
    %1222 = arith.mulf %1218, %1217 : vector<4x32xf32>
    %1223 = arith.addf %1221, %1222 : vector<4x32xf32>
    %1224 = math.tanh %1223 : vector<4x32xf32>
    %1225 = arith.mulf %1220, %1224 : vector<4x32xf32>
    %c4_330 = arith.constant 4 : index
    %c128_331 = arith.constant 128 : index
    %1226 = vector.load %arg17[%c4_330, %c128_331] : memref<64x256xf32, #tpu.memory_space<vmem>>, vector<4x128xf32>
    %cst_332 = arith.constant dense<0.000000e+00> : vector<4x128xf32>
    %1227 = tpu.matmul %1206, %674, %cst_332 {dimension_numbers = #tpu.dot_dimension_numbers<[1], [0], [0], [1], [0, 0, 1, 1], [], []>} : vector<4x32xf32>, vector<32x128xf32>, vector<4x128xf32> -> vector<4x128xf32>
    %1228 = arith.addf %1226, %1227 : vector<4x128xf32>
    %1229 = vector.extract_strided_slice %1228 {offsets = [0, 0], sizes = [4, 96], strides = [1, 1]} : vector<4x128xf32> to vector<4x96xf32>
    %1230 = arith.negf %1229 : vector<4x96xf32>
    %1231 = math.exp %1230 : vector<4x96xf32>
    %cst_333 = arith.constant 1.000000e+00 : f32
    %1232 = vector.broadcast %cst_333 : f32 to vector<4x96xf32>
    %1233 = arith.addf %1232, %1231 : vector<4x96xf32>
    %1234 = arith.divf %1232, %1233 : vector<4x96xf32>
    %1235 = vector.extract_strided_slice %1228 {offsets = [0, 96], sizes = [4, 32], strides = [1, 1]} : vector<4x128xf32> to vector<4x32xf32>
    %1236 = math.tanh %1235 : vector<4x32xf32>
    %1237 = vector.extract_strided_slice %1234 {offsets = [0, 0], sizes = [4, 32], strides = [1, 1]} : vector<4x96xf32> to vector<4x32xf32>
    %1238 = vector.extract_strided_slice %1234 {offsets = [0, 32], sizes = [4, 32], strides = [1, 1]} : vector<4x96xf32> to vector<4x32xf32>
    %1239 = vector.extract_strided_slice %1234 {offsets = [0, 64], sizes = [4, 32], strides = [1, 1]} : vector<4x96xf32> to vector<4x32xf32>
    %1240 = arith.mulf %1238, %1204 : vector<4x32xf32>
    %1241 = arith.mulf %1237, %1236 : vector<4x32xf32>
    %1242 = arith.addf %1240, %1241 : vector<4x32xf32>
    %1243 = math.tanh %1242 : vector<4x32xf32>
    %1244 = arith.mulf %1239, %1243 : vector<4x32xf32>
    %c60_334 = arith.constant 60 : index
    %c0_335 = arith.constant 0 : index
    %1245 = vector.load %arg17[%c60_334, %c0_335] : memref<64x256xf32, #tpu.memory_space<vmem>>, vector<4x128xf32>
    %cst_336 = arith.constant dense<0.000000e+00> : vector<4x128xf32>
    %1246 = tpu.matmul %1225, %673, %cst_336 {dimension_numbers = #tpu.dot_dimension_numbers<[1], [0], [0], [1], [0, 0, 1, 1], [], []>} : vector<4x32xf32>, vector<32x128xf32>, vector<4x128xf32> -> vector<4x128xf32>
    %1247 = arith.addf %1245, %1246 : vector<4x128xf32>
    %1248 = vector.extract_strided_slice %1247 {offsets = [0, 0], sizes = [4, 96], strides = [1, 1]} : vector<4x128xf32> to vector<4x96xf32>
    %1249 = arith.negf %1248 : vector<4x96xf32>
    %1250 = math.exp %1249 : vector<4x96xf32>
    %cst_337 = arith.constant 1.000000e+00 : f32
    %1251 = vector.broadcast %cst_337 : f32 to vector<4x96xf32>
    %1252 = arith.addf %1251, %1250 : vector<4x96xf32>
    %1253 = arith.divf %1251, %1252 : vector<4x96xf32>
    %1254 = vector.extract_strided_slice %1247 {offsets = [0, 96], sizes = [4, 32], strides = [1, 1]} : vector<4x128xf32> to vector<4x32xf32>
    %1255 = math.tanh %1254 : vector<4x32xf32>
    %1256 = vector.extract_strided_slice %1253 {offsets = [0, 0], sizes = [4, 32], strides = [1, 1]} : vector<4x96xf32> to vector<4x32xf32>
    %1257 = vector.extract_strided_slice %1253 {offsets = [0, 32], sizes = [4, 32], strides = [1, 1]} : vector<4x96xf32> to vector<4x32xf32>
    %1258 = vector.extract_strided_slice %1253 {offsets = [0, 64], sizes = [4, 32], strides = [1, 1]} : vector<4x96xf32> to vector<4x32xf32>
    %1259 = arith.mulf %1257, %1223 : vector<4x32xf32>
    %1260 = arith.mulf %1256, %1255 : vector<4x32xf32>
    %1261 = arith.addf %1259, %1260 : vector<4x32xf32>
    %1262 = math.tanh %1261 : vector<4x32xf32>
    %1263 = arith.mulf %1258, %1262 : vector<4x32xf32>
    %c0_338 = arith.constant 0 : index
    %c128_339 = arith.constant 128 : index
    %1264 = vector.load %arg17[%c0_338, %c128_339] : memref<64x256xf32, #tpu.memory_space<vmem>>, vector<4x128xf32>
    %cst_340 = arith.constant dense<0.000000e+00> : vector<4x128xf32>
    %1265 = tpu.matmul %1244, %674, %cst_340 {dimension_numbers = #tpu.dot_dimension_numbers<[1], [0], [0], [1], [0, 0, 1, 1], [], []>} : vector<4x32xf32>, vector<32x128xf32>, vector<4x128xf32> -> vector<4x128xf32>
    %1266 = arith.addf %1264, %1265 : vector<4x128xf32>
    %1267 = vector.extract_strided_slice %1266 {offsets = [0, 0], sizes = [4, 96], strides = [1, 1]} : vector<4x128xf32> to vector<4x96xf32>
    %1268 = arith.negf %1267 : vector<4x96xf32>
    %1269 = math.exp %1268 : vector<4x96xf32>
    %cst_341 = arith.constant 1.000000e+00 : f32
    %1270 = vector.broadcast %cst_341 : f32 to vector<4x96xf32>
    %1271 = arith.addf %1270, %1269 : vector<4x96xf32>
    %1272 = arith.divf %1270, %1271 : vector<4x96xf32>
    %1273 = vector.extract_strided_slice %1266 {offsets = [0, 96], sizes = [4, 32], strides = [1, 1]} : vector<4x128xf32> to vector<4x32xf32>
    %1274 = math.tanh %1273 : vector<4x32xf32>
    %1275 = vector.extract_strided_slice %1272 {offsets = [0, 0], sizes = [4, 32], strides = [1, 1]} : vector<4x96xf32> to vector<4x32xf32>
    %1276 = vector.extract_strided_slice %1272 {offsets = [0, 32], sizes = [4, 32], strides = [1, 1]} : vector<4x96xf32> to vector<4x32xf32>
    %1277 = vector.extract_strided_slice %1272 {offsets = [0, 64], sizes = [4, 32], strides = [1, 1]} : vector<4x96xf32> to vector<4x32xf32>
    %1278 = arith.mulf %1276, %1242 : vector<4x32xf32>
    %1279 = arith.mulf %1275, %1274 : vector<4x32xf32>
    %1280 = arith.addf %1278, %1279 : vector<4x32xf32>
    %1281 = math.tanh %1280 : vector<4x32xf32>
    %1282 = arith.mulf %1277, %1281 : vector<4x32xf32>
    %1283 = vector.extract_strided_slice %644 {offsets = [0, 0], sizes = [2, 32], strides = [1, 1]} : vector<4x32xf32> to vector<2x32xf32>
    %1284 = vector.extract_strided_slice %644 {offsets = [2, 0], sizes = [2, 32], strides = [1, 1]} : vector<4x32xf32> to vector<2x32xf32>
    %1285 = arith.subf %1283, %1284 : vector<2x32xf32>
    %1286 = arith.mulf %1285, %1285 : vector<2x32xf32>
    %cst_342 = arith.constant dense<0.000000e+00> : vector<2xf32>
    %1287 = vector.multi_reduction <add>, %1286, %cst_342 [1] : vector<2x32xf32> to vector<2xf32>
    %1288 = vector.shape_cast %1287 : vector<2xf32> to vector<2x1xf32>
    %1289 = math.sqrt %1288 : vector<2x1xf32>
    %cst_343 = arith.constant 0.000000e+00 : f32
    %1290 = vector.broadcast %cst_343 : f32 to vector<2x1xf32>
    %1291 = arith.subf %1290, %1289 : vector<2x1xf32>
    %1292 = math.exp %1291 : vector<2x1xf32>
    %1293 = vector.extract_strided_slice %663 {offsets = [0, 0], sizes = [2, 32], strides = [1, 1]} : vector<4x32xf32> to vector<2x32xf32>
    %1294 = vector.extract_strided_slice %663 {offsets = [2, 0], sizes = [2, 32], strides = [1, 1]} : vector<4x32xf32> to vector<2x32xf32>
    %1295 = arith.subf %1293, %1294 : vector<2x32xf32>
    %1296 = arith.mulf %1295, %1295 : vector<2x32xf32>
    %cst_344 = arith.constant dense<0.000000e+00> : vector<2xf32>
    %1297 = vector.multi_reduction <add>, %1296, %cst_344 [1] : vector<2x32xf32> to vector<2xf32>
    %1298 = vector.shape_cast %1297 : vector<2xf32> to vector<2x1xf32>
    %1299 = math.sqrt %1298 : vector<2x1xf32>
    %cst_345 = arith.constant 0.000000e+00 : f32
    %1300 = vector.broadcast %cst_345 : f32 to vector<2x1xf32>
    %1301 = arith.subf %1300, %1299 : vector<2x1xf32>
    %1302 = math.exp %1301 : vector<2x1xf32>
    %1303 = vector.extract_strided_slice %1263 {offsets = [0, 0], sizes = [2, 32], strides = [1, 1]} : vector<4x32xf32> to vector<2x32xf32>
    %1304 = vector.extract_strided_slice %1263 {offsets = [2, 0], sizes = [2, 32], strides = [1, 1]} : vector<4x32xf32> to vector<2x32xf32>
    %1305 = arith.subf %1303, %1304 : vector<2x32xf32>
    %1306 = arith.mulf %1305, %1305 : vector<2x32xf32>
    %cst_346 = arith.constant dense<0.000000e+00> : vector<2xf32>
    %1307 = vector.multi_reduction <add>, %1306, %cst_346 [1] : vector<2x32xf32> to vector<2xf32>
    %1308 = vector.shape_cast %1307 : vector<2xf32> to vector<2x1xf32>
    %1309 = math.sqrt %1308 : vector<2x1xf32>
    %cst_347 = arith.constant 0.000000e+00 : f32
    %1310 = vector.broadcast %cst_347 : f32 to vector<2x1xf32>
    %1311 = arith.subf %1310, %1309 : vector<2x1xf32>
    %1312 = math.exp %1311 : vector<2x1xf32>
    %1313 = vector.extract_strided_slice %1282 {offsets = [0, 0], sizes = [2, 32], strides = [1, 1]} : vector<4x32xf32> to vector<2x32xf32>
    %1314 = vector.extract_strided_slice %1282 {offsets = [2, 0], sizes = [2, 32], strides = [1, 1]} : vector<4x32xf32> to vector<2x32xf32>
    %1315 = arith.subf %1313, %1314 : vector<2x32xf32>
    %1316 = arith.mulf %1315, %1315 : vector<2x32xf32>
    %cst_348 = arith.constant dense<0.000000e+00> : vector<2xf32>
    %1317 = vector.multi_reduction <add>, %1316, %cst_348 [1] : vector<2x32xf32> to vector<2xf32>
    %1318 = vector.shape_cast %1317 : vector<2xf32> to vector<2x1xf32>
    %1319 = math.sqrt %1318 : vector<2x1xf32>
    %cst_349 = arith.constant 0.000000e+00 : f32
    %1320 = vector.broadcast %cst_349 : f32 to vector<2x1xf32>
    %1321 = arith.subf %1320, %1319 : vector<2x1xf32>
    %1322 = math.exp %1321 : vector<2x1xf32>
    %1323 = tpu.concatenate %1292, %1302, %1312, %1322 in 0 : vector<2x1xf32>, vector<2x1xf32>, vector<2x1xf32>, vector<2x1xf32> -> vector<8x1xf32>
    %c0_350 = arith.constant 0 : index
    %c0_351 = arith.constant 0 : index
    %1324 = vector.load %arg14[%c0_350, %c0_351] : memref<8x1xf32, #tpu.memory_space<vmem>>, vector<8x1xf32>
    tpu.vector_store %arg14[%c0_350, %c0_351], %1323 {strides = array<i32>} : memref<8x1xf32, #tpu.memory_space<vmem>>, vector<8x1xf32>,
    return
  }
  func.func @transform_0(%arg0: i32) -> (i32, i32) {
    %c0_i32 = arith.constant 0 : i32
    %c0_i32_0 = arith.constant 0 : i32
    %c0_i32_1 = arith.constant 0 : i32
    return %c0_i32, %c0_i32_0 : i32, i32
  }
  func.func @transform_1(%arg0: i32) -> (i32, i32) {
    %c0_i32 = arith.constant 0 : i32
    %c0_i32_0 = arith.constant 0 : i32
    %c0_i32_1 = arith.constant 0 : i32
    return %c0_i32, %c0_i32_0 : i32, i32
  }
  func.func @transform_2(%arg0: i32) -> (i32, i32) {
    %c0_i32 = arith.constant 0 : i32
    %c0_i32_0 = arith.constant 0 : i32
    %c0_i32_1 = arith.constant 0 : i32
    return %c0_i32, %c0_i32_0 : i32, i32
  }
  func.func @transform_3(%arg0: i32) -> (i32, i32) {
    %c0_i32 = arith.constant 0 : i32
    %c0_i32_0 = arith.constant 0 : i32
    %c0_i32_1 = arith.constant 0 : i32
    return %c0_i32, %c0_i32_0 : i32, i32
  }
  func.func @transform_4(%arg0: i32) -> (i32, i32) {
    %c0_i32 = arith.constant 0 : i32
    %c0_i32_0 = arith.constant 0 : i32
    %c0_i32_1 = arith.constant 0 : i32
    return %c0_i32, %c0_i32_0 : i32, i32
  }
  func.func @transform_5(%arg0: i32) -> (i32, i32) {
    %c0_i32 = arith.constant 0 : i32
    %c0_i32_0 = arith.constant 0 : i32
    %c0_i32_1 = arith.constant 0 : i32
    return %c0_i32, %c0_i32_0 : i32, i32
  }
  func.func @transform_6(%arg0: i32) -> (i32, i32) {
    %c0_i32 = arith.constant 0 : i32
    %c0_i32_0 = arith.constant 0 : i32
    %c0_i32_1 = arith.constant 0 : i32
    return %c0_i32, %c0_i32_0 : i32, i32
  }
  func.func @transform_7(%arg0: i32) -> (i32, i32) {
    %c0_i32 = arith.constant 0 : i32
    %c0_i32_0 = arith.constant 0 : i32
    %c0_i32_1 = arith.constant 0 : i32
    return %c0_i32, %c0_i32_0 : i32, i32
  }
  func.func @transform_8(%arg0: i32) -> (i32, i32) {
    %c0_i32 = arith.constant 0 : i32
    %c0_i32_0 = arith.constant 0 : i32
    %c0_i32_1 = arith.constant 0 : i32
    return %c0_i32, %c0_i32_0 : i32, i32
  }
  func.func @transform_9(%arg0: i32) -> (i32, i32) {
    %c0_i32 = arith.constant 0 : i32
    %c0_i32_0 = arith.constant 0 : i32
    %c0_i32_1 = arith.constant 0 : i32
    return %c0_i32, %c0_i32_0 : i32, i32
  }
  func.func @transform_10(%arg0: i32) -> (i32, i32) {
    %c0_i32 = arith.constant 0 : i32
    %c0_i32_0 = arith.constant 0 : i32
    %c0_i32_1 = arith.constant 0 : i32
    return %c0_i32, %c0_i32_0 : i32, i32
  }
  func.func @transform_11(%arg0: i32) -> (i32, i32) {
    %c0_i32 = arith.constant 0 : i32
    %c0_i32_0 = arith.constant 0 : i32
    %c0_i32_1 = arith.constant 0 : i32
    return %c0_i32, %c0_i32_0 : i32, i32
  }
  func.func @transform_12(%arg0: i32) -> (i32, i32) {
    %c0_i32 = arith.constant 0 : i32
    %c0_i32_0 = arith.constant 0 : i32
    %c0_i32_1 = arith.constant 0 : i32
    return %c0_i32, %c0_i32_0 : i32, i32
  }
  func.func @transform_13(%arg0: i32) -> (i32, i32) {
    %c0_i32 = arith.constant 0 : i32
    %c0_i32_0 = arith.constant 0 : i32
    %c0_i32_1 = arith.constant 0 : i32
    return %c0_i32, %c0_i32_0 : i32, i32
  }
}

</mosaic_0001>

<bundles_post_ra>
// kernel: sia_gru_forward.1
= control target key start
LH: loop header
LB: loop body
LE: loop exit
PB: predicated region body
PF: predicated region fallthrough
CT: control target
= control target key end

     0   :  { %vm61_vm0 = vcmask 523264   ;;  %vm110_vm1 = vcmask 1043456   ;;  %vm85_vm2 = vcmask 31744   ;;  %v5960_v60 = vmov 0.0   ;;  %s7505_s0 = inlined_call_operand.vmem [shape: f32[64,16], index: 0, kind: input, shape index: {}]   ;;  %s7506_s1 = inlined_call_operand.vmem [shape: f32[4,64], index: 1, kind: input, shape index: {}]   ;;  %s7507_s2 = inlined_call_operand.vmem [shape: f32[64,4], index: 2, kind: input, shape index: {}]   ;;  %s7508_s5 = inlined_call_operand.vmem [shape: f32[16,256], index: 5, kind: input, shape index: {}]   ;;  %s7509_s8 = inlined_call_operand.vmem [shape: f32[32,128], index: 8, kind: input, shape index: {}]   ;;  %s7510_s7 = inlined_call_operand.vmem [shape: f32[32,128], index: 7, kind: input, shape index: {}]   ;;  %s7511_s3 = inlined_call_operand.vmem [shape: f32[64,16], index: 3, kind: input, shape index: {}]   ;;  %s7512_s4 = inlined_call_operand.vmem [shape: f32[64,16], index: 4, kind: input, shape index: {}]   ;;  %s7513_s6 = inlined_call_operand.vmem [shape: f32[1,256], index: 6, kind: input, shape index: {}]   ;;  %s7514_s9 = inlined_call_operand.vmem [shape: f32[64,256], index: 9, kind: input, shape index: {}]   ;;  %s7515_s11 = inlined_call_operand.vmem [shape: f32[32,128], index: 11, kind: input, shape index: {}]   ;;  %s7516_s12 = inlined_call_operand.vmem [shape: f32[32,128], index: 12, kind: input, shape index: {}]   ;;  %s7517_s10 = inlined_call_operand.vmem [shape: f32[1,256], index: 10, kind: input, shape index: {}]   ;;  %s7518_s13 = inlined_call_operand.vmem [shape: f32[8,1], index: 13, kind: output, shape index: {}]  }
   0x1   :  { %v51_v0 = vld [vmem:[%s7505_s0 + $0x38] sm:$0xff]  ;;  %v50_v1 = vld [vmem:[%s7505_s0 + $0x30] sm:$0xff]  ;;  %v49_v2 = vld [vmem:[%s7505_s0 + $0x28] sm:$0xff]  ;;  %vm295_vm6 = vcmask 130048   ;;  %vm427_vm15 = vcmask 261120  }
   0x2   :  { %73 = vmatpush.msra.mxu0 %v51_v0  ;;  %v48_v3 = vld [vmem:[%s7505_s0 + $0x20] sm:$0xff]  ;;  %v47_v4 = vld [vmem:[%s7505_s0 + $0x18] sm:$0xff]  ;;  %v46_v5 = vld [vmem:[%s7505_s0 + $0x10] sm:$0xff] }
   0x3   :  { %v45_v6 = vld [vmem:[%s7505_s0 + $0x8] sm:$0xff]  ;;  %v44_v7 = vld [vmem:[%s7505_s0] sm:$0xff]  ;;  %v55_v12 = vld [vmem:[%s7507_s2 + $0x10] sm:$0xff] }
   0x4   :  { %74 = vmatpush.msra.mxu0 %v50_v1  ;;  %v52_v8 = vld [vmem:[%s7506_s1] sm:$0xf]  ;;  %v54_v11 = vld [vmem:[%s7507_s2 + $0x8] sm:$0xff]  ;;  %v56_v13 = vld [vmem:[%s7507_s2 + $0x18] sm:$0xff] }
   0x5   :  { %v6065_v9 = vld [vmem:[%s7507_s2] sm:$0xff]  ;;  %v58_v15 = vld [vmem:[%s7507_s2 + $0x28] sm:$0xff]  ;;  %v59_v16 = vld [vmem:[%s7507_s2 + $0x30] sm:$0xff] }
   0x6   :  { %75 = vmatpush.msra.mxu0 %v49_v2  ;;  %v57_v14 = vld [vmem:[%s7507_s2 + $0x20] sm:$0xff]  ;;  %v60_v17 = vld [vmem:[%s7507_s2 + $0x38] sm:$0xff]  ;;  %v287_v52 = vld [vmem:[%s7508_s5 + $0x10] sm:$0xff] }
   0x7   :  { %v288_v51 = vld [vmem:[%s7508_s5 + $0x18] sm:$0xff]  ;;  %v286_v53 = vld [vmem:[%s7508_s5 + $0x8] sm:$0xff]  ;;  %v285_v54 = vld [vmem:[%s7508_s5] sm:$0xff] }
   0x8   :  { %76 = vmatpush.msra.mxu0 %v48_v3  ;;  %v6156_v55 = vld [vmem:[%s7509_s8 + $0x18] sm:$0xff]  ;;  %v6170_v57 = vld [vmem:[%s7510_s7 + $0x10] sm:$0xff]  ;;  %v6175_v58 = vld [vmem:[%s7510_s7 + $0x8] sm:$0xff] }
   0x9   :  { %v6163_v56 = vld [vmem:[%s7510_s7 + $0x18] sm:$0xff]  ;;  %v6184_v59 = vld [vmem:[%s7510_s7] sm:$0xff]  ;;  %v6195_v61 = vld [vmem:[%s7509_s8 + $0x10] sm:$0xff] }
   0xa   :  { %77 = vmatpush.msra.mxu0 %v47_v4  ;;  %v253_v63 = vld [vmem:[%s7511_s3] sm:$0xff] }
   0xc   :  { %78 = vmatpush.msra.mxu0 %v46_v5 }
   0xe   :  { %79 = vmatpush.msra.mxu0 %v45_v6 }
  0x10   :  { %80 = vmatpush.msra.mxu0 %v44_v7 }
  0x11   :  { %5218 = vmatmul.msk.f32.vlgmr.msra.gmra.mxu0 %vm61_vm0, %v52_v8 }
  0x12   :  { %334 = vmatpush.msrb.mxu0 %v287_v52 }
  0x14   :  { %335 = vmatpush.msrb.mxu0 %v285_v54 }
  0x16   :  { %870 = vmatpush.msra.mxu0 %v6163_v56 }
  0x18   :  { %871 = vmatpush.msra.mxu0 %v6170_v57 }
  0x1a   :  { %872 = vmatpush.msra.mxu0 %v6175_v58 }
  0x1c   :  { %873 = vmatpush.msra.mxu0 %v6184_v59 }
  0x8e   :  { %v82_v10 = vpop.f32.mrf.mxu0 }
  0x8f   :  { %5219 = vmatpush.msk.msra.mxu1 %vm110_vm1, %v82_v10 }
  0x90   :  { %5220 = vmatmul.msk.f32.vlgmr.msra.gmra.mxu1 %vm85_vm2, %v6065_v9 }
  0x91   :  { %443 = vmatpush.msrb.mxu1 %v6163_v56 }
  0x93   :  { %444 = vmatpush.msrb.mxu1 %v6170_v57 }
  0x95   :  { %445 = vmatpush.msrb.mxu1 %v6175_v58 }
  0x97   :  { %446 = vmatpush.msrb.mxu1 %v6184_v59 }
  0x98   :  { %5221 = vmatmul.msk.f32.gmra.mxu1 %vm85_vm2, %v54_v11 }
  0x99   :  { %578 = vmatpush.msra.mxu1 %v6163_v56 }
  0x9b   :  { %579 = vmatpush.msra.mxu1 %v6170_v57 }
  0x9d   :  { %580 = vmatpush.msra.mxu1 %v6175_v58 }
  0x9f   :  { %581 = vmatpush.msra.mxu1 %v6184_v59 }
  0xa0   :  { %5222 = vmatmul.msk.f32.gmra.mxu1 %vm85_vm2, %v55_v12 }
  0xa8   :  { %5223 = vmatmul.msk.f32.gmra.mxu1 %vm85_vm2, %v56_v13 }
  0xb0   :  { %5224 = vmatmul.msk.f32.gmra.mxu1 %vm85_vm2, %v57_v14 }
  0xb8   :  { %5225 = vmatmul.msk.f32.gmra.mxu1 %vm85_vm2, %v58_v15 }
  0xc0   :  { %5226 = vmatmul.msk.f32.gmra.mxu1 %vm85_vm2, %v59_v16 }
  0xc8   :  { %5227 = vmatmul.msk.f32.gmra.mxu1 %vm85_vm2, %v60_v17 }
  0xd0   :  { %447 = vmatmul.f32.vlgmr.msrb.gmra.mxu1 %v5960_v60 }
  0xd1   :  { %727 = vmatpush.msrb.mxu1 %v6163_v56 }
  0xd3   :  { %728 = vmatpush.msrb.mxu1 %v6170_v57 }
  0xd5   :  { %729 = vmatpush.msrb.mxu1 %v6175_v58 }
  0xd7   :  { %730 = vmatpush.msrb.mxu1 %v6184_v59 }
 0x10d   :  { %v131_v18 = vpop.f32.mrf.mxu1 }
 0x10e   :  { %v6122_v38 = vsub.f32 %v44_v7, %v131_v18 }
 0x110   :  { %v163_v41 = vmul.f32 %v6122_v38, %v6122_v38 }
 0x115   :  { %v134_v19 = vpop.f32.mrf.mxu1 }
 0x116   :  { %v6118_v36 = vsub.f32 %v45_v6, %v134_v19  ;;  %v254_v6 = vld [vmem:[%s7511_s3 + $0x8] sm:$0xff]  ;;  %v256_v19 = vld [vmem:[%s7511_s3 + $0x18] sm:$0xff] }
 0x118   :  { %v164_v40 = vmul.f32 %v6118_v36, %v6118_v36 }
 0x11d   :  { %v137_v20 = vpop.f32.mrf.mxu1 }
 0x11e   :  { %v6114_v34 = vsub.f32 %v46_v5, %v137_v20 }
 0x120   :  { %v165_v39 = vmul.f32 %v6114_v34, %v6114_v34 }
 0x125   :  { %v140_v21 = vpop.f32.mrf.mxu1 }
 0x126   :  { %v6110_v32 = vsub.f32 %v47_v4, %v140_v21  ;;  %v6216_v4 = vld [vmem:[%s7509_s8 + $0x8] sm:$0xff]  ;;  %v272_v21 = vld [vmem:[%s7512_s4 + $0x18] sm:$0xff] }
 0x128   :  { %v166_v37 = vmul.f32 %v6110_v32, %v6110_v32 }
 0x12d   :  { %v143_v22 = vpop.f32.mrf.mxu1 }
 0x12e   :  { %v6106_v30 = vsub.f32 %v48_v3, %v143_v22 }
 0x130   :  { %v167_v35 = vmul.f32 %v6106_v30, %v6106_v30 }
 0x135   :  { %v146_v23 = vpop.f32.mrf.mxu1 }
 0x136   :  { %v6102_v28 = vsub.f32 %v49_v2, %v146_v23 }
 0x138   :  { %v168_v33 = vmul.f32 %v6102_v28, %v6102_v28 }
 0x13d   :  { %v149_v24 = vpop.f32.mrf.mxu1 }
 0x13e   :  { %v6098_v26 = vsub.f32 %v50_v1, %v149_v24  ;;  %v269_v1 = vld [vmem:[%s7512_s4] sm:$0xff] }
 0x140   :  { %v169_v31 = vmul.f32 %v6098_v26, %v6098_v26 }
 0x145   :  { %v152_v25 = vpop.f32.mrf.mxu1 }
 0x146   :  { %v6100_v27 = vsub.f32 %v51_v0, %v152_v25  ;;  %v257_v25 = vld [vmem:[%s7511_s3 + $0x20] sm:$0xff] }
 0x148   :  { %v170_v29 = vmul.f32 %v6100_v27, %v6100_v27 }
 0x14a   :  { %179 = vmatpush.msra.mxu2 %v170_v29 }
 0x14c   :  { %180 = vmatpush.msra.mxu2 %v169_v31  ;;  %v273_v31 = vld [vmem:[%s7512_s4 + $0x20] sm:$0xff] }
 0x14e   :  { %181 = vmatpush.msra.mxu2 %v168_v33 }
 0x150   :  { %182 = vmatpush.msra.mxu2 %v167_v35 }
 0x152   :  { %183 = vmatpush.msra.mxu2 %v166_v37 }
 0x154   :  { %184 = vmatpush.msra.mxu2 %v165_v39 }
 0x156   :  { %185 = vmatpush.msra.mxu2 %v164_v40  ;;  %v259_v40 = vld [vmem:[%s7511_s3 + $0x30] sm:$0xff] }
 0x158   :  { %186 = vmatpush.msra.mxu2 %v163_v41 }
 0x159   :  { %5228 = vmatmul.msk.f32.vlgmr.msra.gmra.mxu2 %vm61_vm0, %v52_v8  ;;  %v270_v8 = vld [vmem:[%s7512_s4 + $0x8] sm:$0xff] }
 0x15a   :  { %375 = vmatpush.msrb.mxu2 %v288_v51 }
 0x15c   :  { %376 = vmatpush.msrb.mxu2 %v286_v53 }
 0x15e   :  { %940 = vmatpush.msra.mxu2 %v6156_v55 }
 0x160   :  { %941 = vmatpush.msra.mxu2 %v6195_v61 }
 0x162   :  { %942 = vmatpush.msra.mxu2 %v6216_v4 }
 0x1dc   :  { %v188_v42 = vpop.f32.mrf.mxu2 }
 0x1dd   :  { %v189_v43 = vadd.f32 1e-05, %v188_v42 }
 0x1df   :  { %5398 = vrsqrt.f32 %v189_v43  ;;  %vm197_vm4 = vweird.f32 %v189_v43 }
 0x1e5   :  { %v5399_v44 = vpop.eup %5398 }
 0x1e6   :  { %v192_v45 = vmul.f32 %v5399_v44, %v189_v43  ;;  %vm198_vm3 = vweird.f32 %v5399_v44 }
 0x1e7   :  { %vm199_vm5 = vmor %vm197_vm4, %vm198_vm3 }
 0x1e8   :  { %v193_v46 = vmul.f32 %v5399_v44, %v192_v45  ;;  %v260_v45 = vld [vmem:[%s7511_s3 + $0x38] sm:$0xff] }
 0x1ea   :  { %v194_v47 = vmul.f32 0.5, %v193_v46 }
 0x1ec   :  { %v195_v48 = vsub.f32 1.5, %v194_v47 }
 0x1ee   :  { %v196_v49 = vmul.f32 %v5399_v44, %v195_v48 }
 0x1f0   :  { %v200_v50 = vsel %vm199_vm5, %v5399_v44, %v196_v49  ;;  %v289_v49 = vld [vmem:[%s7513_s6] sm:$0x3] }
 0x1f1   :  { %5229 = vmatpush.msk.msra.mxu3 %vm110_vm1, %v200_v50  ;;  %v291_v50 = vperm.slane %v289_v49, 0  ;;  %v292_v53 = vperm.slane %v289_v49, 1 }
 0x1f2   :  { %5230 = vmatmul.msk.f32.vlgmr.msra.gmra.mxu3 %vm85_vm2, %v6065_v9 }
 0x1f3   :  { %502 = vmatpush.msrb.mxu3 %v6156_v55 }
 0x1f5   :  { %503 = vmatpush.msrb.mxu3 %v6195_v61 }
 0x1f7   :  { %504 = vmatpush.msrb.mxu3 %v6216_v4 }
 0x1fa   :  { %5231 = vmatmul.msk.f32.gmra.mxu3 %vm85_vm2, %v54_v11 }
 0x202   :  { %5232 = vmatmul.msk.f32.gmra.mxu3 %vm85_vm2, %v55_v12  ;;  %v255_v12 = vld [vmem:[%s7511_s3 + $0x10] sm:$0xff] }
 0x20a   :  { %5233 = vmatmul.msk.f32.gmra.mxu3 %vm85_vm2, %v56_v13 }
 0x212   :  { %5234 = vmatmul.msk.f32.gmra.mxu3 %vm85_vm2, %v57_v14  ;;  %v271_v14 = vld [vmem:[%s7512_s4 + $0x10] sm:$0xff] }
 0x21a   :  { %5235 = vmatmul.msk.f32.gmra.mxu3 %vm85_vm2, %v58_v15 }
 0x222   :  { %5236 = vmatmul.msk.f32.gmra.mxu3 %vm85_vm2, %v59_v16 }
 0x22a   :  { %5237 = vmatmul.msk.f32.gmra.mxu3 %vm85_vm2, %v60_v17  ;;  %v6245_v17 = vld [vmem:[%s7509_s8] sm:$0xff]  ;;  %vm555_vm2 = vcmask 257024  }
 0x22b   :  { %505 = vmatpush.msrb.mxu3 %v6245_v17  ;;  %943 = vmatpush.msra.mxu2 %v6245_v17 }
 0x22d   :  { %648 = vmatpush.msra.mxu3 %v6156_v55 }
 0x22f   :  { %649 = vmatpush.msra.mxu3 %v6195_v61 }
 0x231   :  { %650 = vmatpush.msra.mxu3 %v6216_v4 }
 0x232   :  { %506 = vmatmul.f32.vlgmr.msrb.gmra.mxu3 %v5960_v60 }
 0x233   :  { %651 = vmatpush.msra.mxu3 %v6245_v17 }
 0x235   :  { %793 = vmatpush.msrb.mxu3 %v6156_v55 }
 0x237   :  { %794 = vmatpush.msrb.mxu3 %v6195_v61 }
 0x239   :  { %795 = vmatpush.msrb.mxu3 %v6216_v4 }
 0x23b   :  { %796 = vmatpush.msrb.mxu3 %v6245_v17 }
 0x275   :  { %v221_v62 = vpop.f32.mrf.mxu3 }
 0x276   :  { %v245_v0 = vmul.f32 %v221_v62, %v6122_v38 }
 0x278   :  { %v261_v2 = vmul.f32 %v253_v63, %v245_v0  ;;  %v448_v63 = vpop.f32.mrf.mxu1 }
 0x27a   :  { %v277_v3 = vadd.f32 %v269_v1, %v261_v2 }
 0x27c   :  { %5238 = vmatmul.msk.f32.vlgmr.msrb.gmra.mxu0 %vm295_vm6, %v277_v3  ;;  %5246 = vmatmul.msk.f32.vlgmr.msrb.gmra.mxu2 %vm295_vm6, %v277_v3 }
 0x27d   :  { %v224_v5 = vpop.f32.mrf.mxu3  ;;  %1160 = vmatpush.msrb.mxu0 %v6163_v56  ;;  %1230 = vmatpush.msrb.mxu2 %v6156_v55 }
 0x27e   :  { %v246_v7 = vmul.f32 %v224_v5, %v6118_v36  ;;  %v274_v36 = vld [vmem:[%s7512_s4 + $0x28] sm:$0xff] }
 0x27f   :  { %1161 = vmatpush.msrb.mxu0 %v6170_v57  ;;  %1231 = vmatpush.msrb.mxu2 %v6195_v61 }
 0x280   :  { %v262_v9 = vmul.f32 %v254_v6, %v246_v7 }
 0x281   :  { %1162 = vmatpush.msrb.mxu0 %v6175_v58  ;;  %1232 = vmatpush.msrb.mxu2 %v6216_v4 }
 0x282   :  { %v278_v10 = vadd.f32 %v270_v8, %v262_v9 }
 0x283   :  { %1163 = vmatpush.msrb.mxu0 %v6184_v59  ;;  %1233 = vmatpush.msrb.mxu2 %v6245_v17 }
 0x284   :  { %5239 = vmatmul.msk.f32.gmra.mxu0 %vm295_vm6, %v278_v10  ;;  %5247 = vmatmul.msk.f32.gmra.mxu2 %vm295_vm6, %v278_v10 }
 0x285   :  { %v227_v11 = vpop.f32.mrf.mxu3 }
 0x286   :  { %v247_v13 = vmul.f32 %v227_v11, %v6114_v34 }
 0x288   :  { %v263_v15 = vmul.f32 %v255_v12, %v247_v13 }
 0x28a   :  { %v279_v16 = vadd.f32 %v271_v14, %v263_v15 }
 0x28c   :  { %5240 = vmatmul.msk.f32.gmra.mxu0 %vm295_vm6, %v279_v16  ;;  %5248 = vmatmul.msk.f32.gmra.mxu2 %vm295_vm6, %v279_v16 }
 0x28d   :  { %v230_v18 = vpop.f32.mrf.mxu3 }
 0x28e   :  { %v248_v20 = vmul.f32 %v230_v18, %v6110_v32 }
 0x290   :  { %v264_v22 = vmul.f32 %v256_v19, %v248_v20 }
 0x292   :  { %v280_v23 = vadd.f32 %v272_v21, %v264_v22 }
 0x294   :  { %5241 = vmatmul.msk.f32.gmra.mxu0 %vm295_vm6, %v280_v23  ;;  %5249 = vmatmul.msk.f32.gmra.mxu2 %vm295_vm6, %v280_v23 }
 0x295   :  { %v233_v24 = vpop.f32.mrf.mxu3 }
 0x296   :  { %v249_v29 = vmul.f32 %v233_v24, %v6106_v30  ;;  %v258_v30 = vld [vmem:[%s7511_s3 + $0x28] sm:$0xff]  ;;  %s5961_s3 = smov 32  }
 0x298   :  { %v265_v32 = vmul.f32 %v257_v25, %v249_v29 }
 0x29a   :  { %v281_v33 = vadd.f32 %v273_v31, %v265_v32 }
 0x29c   :  { %5242 = vmatmul.msk.f32.gmra.mxu0 %vm295_vm6, %v281_v33  ;;  %5250 = vmatmul.msk.f32.gmra.mxu2 %vm295_vm6, %v281_v33 }
 0x29d   :  { %v236_v34 = vpop.f32.mrf.mxu3 }
 0x29e   :  { %v250_v35 = vmul.f32 %v236_v34, %v6102_v28  ;;  %v275_v28 = vld [vmem:[%s7512_s4 + $0x30] sm:$0xff] }
 0x2a0   :  { %v266_v37 = vmul.f32 %v258_v30, %v250_v35 }
 0x2a2   :  { %v282_v38 = vadd.f32 %v274_v36, %v266_v37 }
 0x2a4   :  { %5243 = vmatmul.msk.f32.gmra.mxu0 %vm295_vm6, %v282_v38  ;;  %5251 = vmatmul.msk.f32.gmra.mxu2 %vm295_vm6, %v282_v38 }
 0x2a5   :  { %v239_v39 = vpop.f32.mrf.mxu3 }
 0x2a6   :  { %v251_v41 = vmul.f32 %v239_v39, %v6098_v26  ;;  %v276_v26 = vld [vmem:[%s7512_s4 + $0x38] sm:$0xff]  ;;  %s5962_s4 = smov 64  }
 0x2a8   :  { %v267_v42 = vmul.f32 %v259_v40, %v251_v41 }
 0x2aa   :  { %v283_v43 = vadd.f32 %v275_v28, %v267_v42 }
 0x2ac   :  { %5244 = vmatmul.msk.f32.gmra.mxu0 %vm295_vm6, %v283_v43  ;;  %5252 = vmatmul.msk.f32.gmra.mxu2 %vm295_vm6, %v283_v43 }
 0x2ad   :  { %v242_v44 = vpop.f32.mrf.mxu3 }
 0x2ae   :  { %v252_v46 = vmul.f32 %v242_v44, %v6100_v27 }
 0x2b0   :  { %v268_v47 = vmul.f32 %v260_v45, %v252_v46 }
 0x2b2   :  { %v284_v48 = vadd.f32 %v276_v26, %v268_v47 }
 0x2b4   :  { %5245 = vmatmul.msk.f32.gmra.mxu0 %vm295_vm6, %v284_v48  ;;  %5253 = vmatmul.msk.f32.gmra.mxu2 %vm295_vm6, %v284_v48 }
 0x2b5   :  { %v507_v36 = vpop.f32.mrf.mxu3 }
 0x2b6   :  { %v511_v37 = vrot.slane %v507_v36, 4 }
 0x2f9   :  { %v337_v51 = vpop.f32.mrf.mxu0 }
 0x2fa   :  { %v338_v52 = vadd.f32 %v337_v51, %v291_v50 }
 0x2fc   :  { %402 = vst [vmem:[#allocation2 + $0x30] sm:$0xff] %v338_v52 }
 0x2ff   :  { %v378_v27 = vpop.f32.mrf.mxu2 }
 0x300   :  { %v379_v54 = vadd.f32 %v378_v27, %v292_v53 }
 0x301   :  { %v340_v62 = vpop.f32.mrf.mxu0 }
 0x302   :  { %403 = vst [vmem:[#allocation2] sm:$0xff] %v379_v54  ;;  %v341_v0 = vadd.f32 %v340_v62, %v291_v50 }
 0x303   :  { %v426_v1 = vld [vmem:[#allocation2 + $0x30] sm:$0xf] }
 0x304   :  { %404 = vst [vmem:[#allocation2 + $0x58] sm:$0xff] %v341_v0  ;;  %v451_v2 = vadd.f32 %v448_v63, %v426_v1 }
 0x306   :  { %5400 = vtanh.f32 %v451_v2  ;;  %v5254_v35 = vmul.f32 -1.442695, %v451_v2 }
 0x307   :  { %v381_v3 = vpop.f32.mrf.mxu2 }
 0x308   :  { %v382_v5 = vadd.f32 %v381_v3, %v292_v53  ;;  %5402 = vpow2.f32 %v5254_v35 }
 0x309   :  { %v343_v6 = vpop.f32.mrf.mxu0 }
 0x30a   :  { %405 = vst [vmem:[#allocation2 + $0x18] sm:$0xff] %v382_v5  ;;  %v344_v7 = vadd.f32 %v343_v6, %v291_v50 }
 0x30c   :  { %v5401_v8 = vpop.eup %5400  ;;  %406 = vst [vmem:[#allocation2 + $0x50] sm:$0xff] %v344_v7 }
 0x30d   :  { %474 = vrot.lane.b32.xlu2 %v5401_v8, %s5961_s3 }
 0x30e   :  { %v5403_v40 = vpop.eup %5402 }
 0x30f   :  { %v384_v9 = vpop.f32.mrf.mxu2  ;;  %v455_v41 = vadd.f32 1.0, %v5403_v40 }
 0x310   :  { %v385_v10 = vadd.f32 %v384_v9, %v292_v53 }
 0x311   :  { %v346_v11 = vpop.f32.mrf.mxu0  ;;  %v467_v26 = vand.u32 2147483648, %v455_v41  ;;  %vm461_vm8 = vweird.f32 %v455_v41  ;;  %v465_v47 = vand.u32 2147483647, %v455_v41 }
 0x312   :  { %407 = vst [vmem:[#allocation2 + $0x68] sm:$0xff] %v385_v10  ;;  %v347_v12 = vadd.f32 %v346_v11, %v291_v50 }
 0x313   :  { %v468_v49 = vor.u32 1.1754944e-38, %v467_v26  ;;  %vm466_vm10 = vcmp.eq.f32.partialorder %v465_v47, 8.507059e+37  ;;  %v563_v26 = vld [vmem:[#allocation2 + $0x30] sm:$0xf0] }
 0x314   :  { %408 = vst [vmem:[#allocation2 + $0x8] sm:$0xff] %v347_v12 }
 0x317   :  { %v387_v13 = vpop.f32.mrf.mxu2 }
 0x318   :  { %v388_v14 = vadd.f32 %v387_v13, %v292_v53 }
 0x319   :  { %v349_v15 = vpop.f32.mrf.mxu0 }
 0x31a   :  { %409 = vst [vmem:[#allocation2 + $0x48] sm:$0xff] %v388_v14  ;;  %v350_v16 = vadd.f32 %v349_v15, %v291_v50 }
 0x31c   :  { %410 = vst [vmem:[#allocation2 + $0x40] sm:$0xff] %v350_v16 }
 0x31f   :  { %v390_v18 = vpop.f32.mrf.mxu2 }
 0x320   :  { %v391_v19 = vadd.f32 %v390_v18, %v292_v53 }
 0x321   :  { %v352_v20 = vpop.f32.mrf.mxu0 }
 0x322   :  { %411 = vst [vmem:[#allocation2 + $0x20] sm:$0xff] %v391_v19  ;;  %v353_v21 = vadd.f32 %v352_v20, %v291_v50 }
 0x324   :  { %412 = vst [vmem:[#allocation2 + $0x10] sm:$0xff] %v353_v21 }
 0x327   :  { %v393_v22 = vpop.f32.mrf.mxu2 }
 0x328   :  { %v394_v23 = vadd.f32 %v393_v22, %v292_v53 }
 0x329   :  { %v355_v24 = vpop.f32.mrf.mxu0 }
 0x32a   :  { %413 = vst [vmem:[#allocation2 + $0x38] sm:$0xff] %v394_v23  ;;  %v356_v25 = vadd.f32 %v355_v24, %v291_v50 }
 0x32c   :  { %414 = vst [vmem:[#allocation2 + $0x60] sm:$0xff] %v356_v25 }
 0x32f   :  { %v396_v29 = vpop.f32.mrf.mxu2 }
 0x330   :  { %v397_v31 = vadd.f32 %v396_v29, %v292_v53 }
 0x331   :  { %v358_v32 = vpop.f32.mrf.mxu0 }
 0x332   :  { %415 = vst [vmem:[#allocation2 + $0x70] sm:$0xff] %v397_v31  ;;  %v359_v33 = vadd.f32 %v358_v32, %v291_v50 }
 0x334   :  { %416 = vst [vmem:[#allocation2 + $0x78] sm:$0xff] %v359_v33 }
 0x337   :  { %v399_v34 = vpop.f32.mrf.mxu2 }
 0x338   :  { %v400_v30 = vadd.f32 %v399_v34, %v292_v53 }
 0x33a   :  { %417 = vst [vmem:[#allocation2 + $0x28] sm:$0xff] %v400_v30 }
 0x341   :  { %v489_v38 = vld [vmem:[#allocation2 + $0x28] sm:$0xf0]  ;;  %v630_v31 = vld [vmem:[#allocation2 + $0x28] sm:$0xf] }
 0x342   :  { %v513_v39 = vadd.f32 %v511_v37, %v489_v38 }
 0x344   :  { %5404 = vtanh.f32 %v513_v39  ;;  %v5255_v53 = vmul.f32 -1.442695, %v513_v39 }
 0x345   :  { %5406 = vrcp.f32 %v455_v41 }
 0x346   :  { %5408 = vpow2.f32 %v5255_v53 }
 0x34a   :  { %v5405_v28 = vpop.eup %5404 }
 0x34b   :  { %536 = vrot.lane.b32.xlu0 %v5405_v28, %s5961_s3  ;;  %v5407_v42 = vpop.eup %5406 }
 0x34c   :  { %v457_v43 = vmul.f32 %v5407_v42, %v455_v41  ;;  %vm462_vm7 = vweird.f32 %v5407_v42  ;;  %v5409_v27 = vpop.eup %5408 }
 0x34d   :  { %vm463_vm9 = vmor %vm461_vm8, %vm462_vm7  ;;  %v517_v54 = vadd.f32 1.0, %v5409_v27 }
 0x34e   :  { %v458_v44 = vsub.f32 1.0, %v457_v43 }
 0x34f   :  { %5410 = vrcp.f32 %v517_v54  ;;  %v529_v3 = vand.u32 2147483648, %v517_v54  ;;  %vm523_vm12 = vweird.f32 %v517_v54  ;;  %v527_v5 = vand.u32 2147483647, %v517_v54 }
 0x350   :  { %v459_v45 = vmul.f32 %v5407_v42, %v458_v44 }
 0x351   :  { %v530_v7 = vor.u32 1.1754944e-38, %v529_v3  ;;  %vm528_vm14 = vcmp.eq.f32.partialorder %v527_v5, 8.507059e+37 }
 0x352   :  { %v460_v46 = vadd.f32 %v5407_v42, %v459_v45 }
 0x354   :  { %v464_v48 = vsel %vm463_vm9, %v5407_v42, %v460_v46 }
 0x355   :  { %v469_v51 = vsel %vm466_vm10, %v468_v49, %v464_v48  ;;  %v5411_v62 = vpop.eup %5410 }
 0x356   :  { %v519_v63 = vmul.f32 %v5411_v62, %v517_v54  ;;  %vm524_vm11 = vweird.f32 %v5411_v62  ;;  %v472_v11 = vmul.f32 0.0, %v469_v51 }
 0x357   :  { %vm525_vm13 = vmor %vm523_vm12, %vm524_vm11 }
 0x358   :  { %v520_v0 = vsub.f32 1.0, %v519_v63 }
 0x35a   :  { %v521_v1 = vmul.f32 %v5411_v62, %v520_v0 }
 0x35c   :  { %v522_v2 = vadd.f32 %v5411_v62, %v521_v1 }
 0x35e   :  { %v526_v6 = vsel %vm525_vm13, %v5411_v62, %v522_v2 }
 0x35f   :  { %v531_v9 = vsel %vm528_vm14, %v530_v7, %v526_v6 }
 0x360   :  { %v534_v15 = vmul.f32 0.0, %v531_v9 }
 0x367   :  { %v475_v50 = vpop.permute.xlu2 %474 }
 0x368   :  { %v477_v52 = vmul.f32 %v475_v50, %v469_v51 }
 0x36a   :  { %479 = vrot.lane.b32.xlu2 %v477_v52, %s5961_s3 }
 0x3bd   :  { %v537_v8 = vpop.permute.xlu0 %536 }
 0x3be   :  { %v539_v10 = vmul.f32 %v537_v8, %v531_v9 }
 0x3c0   :  { %541 = vrot.lane.b32.xlu0 %v539_v10, %s5961_s3 }
 0x3c4   :  { %v480_v12 = vpop.permute.xlu2 %479 }
 0x3c5   :  { %v6314_v13 = vadd.f32 %v480_v12, %v472_v11 }
 0x3c7   :  { %5412 = vtanh.f32 %v6314_v13 }
 0x3cd   :  { %v5413_v14 = vpop.eup %5412 }
 0x3ce   :  { %485 = vrot.lane.b32.xlu0 %v5413_v14, %s5961_s3 }
 0x432   :  { %v542_v16 = vpop.permute.xlu0 %541 }
 0x433   :  { %v6318_v18 = vadd.f32 %v542_v16, %v534_v15 }
 0x435   :  { %5414 = vtanh.f32 %v6318_v18  ;;  %v678_v63 = vrot.slane %v6318_v18, 4 }
 0x43b   :  { %v5415_v19 = vpop.eup %5414 }
 0x43c   :  { %547 = vrot.lane.b32.xlu1 %v5415_v19, %s5961_s3  ;;  %v611_v19 = vrot.slane %v6314_v13, 4 }
 0x440   :  { %v486_v23 = vpop.permute.xlu0 %485 }
 0x441   :  { %v488_v24 = vmul.f32 %v486_v23, %v469_v51 }
 0x4ae   :  { %v548_v20 = vpop.permute.xlu1 %547 }
 0x4af   :  { %v6322_v21 = vmul.f32 %v548_v20, %v531_v9 }
 0x4b1   :  { %v631_v22 = vrot.slane %v6322_v21, 4 }
 0x4b3   :  { %632 = vrot.lane.b32.xlu1 %v631_v22, %s5962_s4 }
 0x4bb   :  { %552 = vrot.lane.b32.xlu1 %v488_v24, %s5962_s4 }
 0x525   :  { %v633_v25 = vpop.permute.xlu1 %632 }
 0x526   :  { %5258 = vmatmul.msk.f32.vlgmr.msra.gmra.mxu3 %vm427_vm15, %v633_v25 }
 0x527   :  { %1083 = vmatpush.msra.mxu3 %v6156_v55 }
 0x529   :  { %1084 = vmatpush.msra.mxu3 %v6195_v61 }
 0x52b   :  { %1085 = vmatpush.msra.mxu3 %v6216_v4 }
 0x52d   :  { %v553_v29 = vpop.permute.xlu1 %552  ;;  %1086 = vmatpush.msra.mxu3 %v6245_v17 }
 0x52e   :  { %556 = vst.msk [vmem:[#allocation3] sm:$0xf] %vm555_vm2, %v553_v29  ;;  %5256 = vmatmul.msk.f32.vlgmr.msra.gmra.mxu1 %vm427_vm15, %v553_v29 }
 0x52f   :  { %1017 = vmatpush.msra.mxu1 %v6163_v56 }
 0x531   :  { %1018 = vmatpush.msra.mxu1 %v6170_v57 }
 0x533   :  { %1019 = vmatpush.msra.mxu1 %v6175_v58 }
 0x535   :  { %1020 = vmatpush.msra.mxu1 %v6184_v59 }
 0x5a9   :  { %v653_v32 = vpop.f32.mrf.mxu3 }
 0x5aa   :  { %v656_v33 = vadd.f32 %v653_v32, %v630_v31 }
 0x5ab   :  { %v583_v41 = vpop.f32.mrf.mxu1 }
 0x5ac   :  { %5416 = vtanh.f32 %v656_v33  ;;  %v5259_v30 = vmul.f32 -1.442695, %v656_v33  ;;  %v587_v44 = vrot.slane %v583_v41, 4 }
 0x5ae   :  { %5418 = vpow2.f32 %v5259_v30  ;;  %v589_v47 = vadd.f32 %v587_v44, %v563_v26 }
 0x5b0   :  { %v5257_v52 = vmul.f32 -1.442695, %v589_v47 }
 0x5b2   :  { %v5417_v34 = vpop.eup %5416 }
 0x5b3   :  { %682 = vrot.lane.b32.xlu2 %v5417_v34, %s5961_s3  ;;  %v776_v34 = vld [vmem:[#allocation2 + $0x70] sm:$0xf0] }
 0x5b4   :  { %v5419_v35 = vpop.eup %5418 }
 0x5b5   :  { %v660_v36 = vadd.f32 1.0, %v5419_v35 }
 0x5b7   :  { %5420 = vrcp.f32 %v660_v36  ;;  %v672_v42 = vand.u32 2147483648, %v660_v36  ;;  %vm666_vm4 = vweird.f32 %v660_v36  ;;  %v670_v43 = vand.u32 2147483647, %v660_v36 }
 0x5b8   :  { %5422 = vtanh.f32 %v589_v47 }
 0x5b9   :  { %v673_v46 = vor.u32 1.1754944e-38, %v672_v42  ;;  %vm671_vm6 = vcmp.eq.f32.partialorder %v670_v43, 8.507059e+37  ;;  %5424 = vpow2.f32 %v5257_v52 }
 0x5bd   :  { %v5421_v37 = vpop.eup %5420 }
 0x5be   :  { %v662_v38 = vmul.f32 %v5421_v37, %v660_v36  ;;  %vm667_vm3 = vweird.f32 %v5421_v37  ;;  %v5423_v51 = vpop.eup %5422 }
 0x5bf   :  { %vm668_vm5 = vmor %vm666_vm4, %vm667_vm3  ;;  %v5425_v53 = vpop.eup %5424 }
 0x5c0   :  { %v663_v39 = vsub.f32 1.0, %v662_v38  ;;  %v593_v27 = vadd.f32 1.0, %v5425_v53 }
 0x5c2   :  { %v664_v40 = vmul.f32 %v5421_v37, %v663_v39  ;;  %5426 = vrcp.f32 %v593_v27  ;;  %v605_v8 = vand.u32 2147483648, %v593_v27  ;;  %vm599_vm8 = vweird.f32 %v593_v27 }
 0x5c3   :  { %v603_v9 = vand.u32 2147483647, %v593_v27 }
 0x5c4   :  { %v665_v28 = vadd.f32 %v5421_v37, %v664_v40  ;;  %v606_v12 = vor.u32 1.1754944e-38, %v605_v8 }
 0x5c5   :  { %vm604_vm10 = vcmp.eq.f32.partialorder %v603_v9, 8.507059e+37 }
 0x5c6   :  { %v669_v45 = vsel %vm668_vm5, %v5421_v37, %v665_v28 }
 0x5c7   :  { %v674_v49 = vsel %vm671_vm6, %v673_v46, %v669_v45 }
 0x5c8   :  { %v5427_v54 = vpop.eup %5426  ;;  %v680_v0 = vmul.f32 %v678_v63, %v674_v49 }
 0x5c9   :  { %v595_v62 = vmul.f32 %v5427_v54, %v593_v27  ;;  %vm600_vm7 = vweird.f32 %v5427_v54 }
 0x5ca   :  { %vm601_vm9 = vmor %vm599_vm8, %vm600_vm7 }
 0x5cb   :  { %v596_v2 = vsub.f32 1.0, %v595_v62 }
 0x5cd   :  { %v597_v5 = vmul.f32 %v5427_v54, %v596_v2 }
 0x5cf   :  { %v598_v6 = vadd.f32 %v5427_v54, %v597_v5 }
 0x5d1   :  { %v602_v10 = vsel %vm601_vm9, %v5427_v54, %v598_v6 }
 0x5d2   :  { %v607_v14 = vsel %vm604_vm10, %v606_v12, %v602_v10 }
 0x5d3   :  { %v613_v20 = vmul.f32 %v611_v19, %v607_v14 }
 0x60d   :  { %v683_v48 = vpop.permute.xlu2 %682 }
 0x60e   :  { %v685_v50 = vmul.f32 %v683_v48, %v674_v49 }
 0x610   :  { %687 = vrot.lane.b32.xlu0 %v685_v50, %s5961_s3  ;;  %v709_v50 = vld [vmem:[#allocation2 + $0x58] sm:$0xf] }
 0x618   :  { %615 = vrot.lane.b32.xlu0 %v5423_v51, %s5961_s3 }
 0x682   :  { %v688_v1 = vpop.permute.xlu0 %687 }
 0x683   :  { %v6342_v3 = vadd.f32 %v688_v1, %v680_v0 }
 0x685   :  { %5428 = vtanh.f32 %v6342_v3  ;;  %v826_v1 = vrot.slane %v6342_v3, 4 }
 0x68a   :  { %v616_v11 = vpop.permute.xlu0 %615 }
 0x68b   :  { %v5429_v7 = vpop.eup %5428  ;;  %v618_v15 = vmul.f32 %v616_v11, %v607_v14 }
 0x68c   :  { %693 = vrot.lane.b32.xlu1 %v5429_v7, %s5961_s3 }
 0x694   :  { %620 = vrot.lane.b32.xlu1 %v618_v15, %s5961_s3 }
 0x6fe   :  { %v694_v16 = vpop.permute.xlu1 %693 }
 0x6ff   :  { %v6347_v18 = vmul.f32 %v694_v16, %v674_v49 }
 0x701   :  { %777 = vrot.lane.b32.xlu2 %v6347_v18, %s5962_s4 }
 0x706   :  { %v621_v22 = vpop.permute.xlu1 %620 }
 0x707   :  { %v6352_v23 = vadd.f32 %v621_v22, %v613_v20 }
 0x709   :  { %5430 = vtanh.f32 %v6352_v23 }
 0x70f   :  { %v5431_v24 = vpop.eup %5430 }
 0x710   :  { %626 = vrot.lane.b32.xlu2 %v5431_v24, %s5961_s3 }
 0x75b   :  { %v778_v25 = vpop.permute.xlu2 %777 }
 0x75c   :  { %5262 = vmatmul.msk.f32.vlgmr.msrb.gmra.mxu3 %vm427_vm15, %v778_v25  ;;  %v757_v25 = vrot.slane %v6352_v23, 4 }
 0x75d   :  { %1373 = vmatpush.msrb.mxu3 %v6156_v55 }
 0x75f   :  { %1374 = vmatpush.msrb.mxu3 %v6195_v61 }
 0x761   :  { %1375 = vmatpush.msrb.mxu3 %v6216_v4 }
 0x763   :  { %1376 = vmatpush.msrb.mxu3 %v6245_v17 }
 0x76a   :  { %v627_v13 = vpop.permute.xlu2 %626 }
 0x76b   :  { %v6361_v29 = vmul.f32 %v627_v13, %v607_v14 }
 0x76d   :  { %v710_v31 = vrot.slane %v6361_v29, 4 }
 0x76f   :  { %711 = vrot.lane.b32.xlu0 %v710_v31, %s5962_s4 }
 0x7df   :  { %v798_v32 = vpop.f32.mrf.mxu3 }
 0x7e0   :  { %v802_v33 = vrot.slane %v798_v32, 4 }
 0x7e1   :  { %v712_v30 = vpop.permute.xlu0 %711 }
 0x7e2   :  { %v804_v35 = vadd.f32 %v802_v33, %v776_v34  ;;  %5260 = vmatmul.msk.f32.vlgmr.msrb.gmra.mxu1 %vm427_vm15, %v712_v30 }
 0x7e3   :  { %1307 = vmatpush.msrb.mxu1 %v6163_v56 }
 0x7e4   :  { %5432 = vtanh.f32 %v804_v35  ;;  %v5263_v37 = vmul.f32 -1.442695, %v804_v35 }
 0x7e5   :  { %1308 = vmatpush.msrb.mxu1 %v6170_v57 }
 0x7e6   :  { %5434 = vpow2.f32 %v5263_v37 }
 0x7e7   :  { %1309 = vmatpush.msrb.mxu1 %v6175_v58 }
 0x7e9   :  { %1310 = vmatpush.msrb.mxu1 %v6184_v59 }
 0x7ea   :  { %v5433_v36 = vpop.eup %5432 }
 0x7eb   :  { %830 = vrot.lane.b32.xlu1 %v5433_v36, %s5961_s3 }
 0x7ec   :  { %v5435_v38 = vpop.eup %5434 }
 0x7ed   :  { %v808_v39 = vadd.f32 1.0, %v5435_v38 }
 0x7ef   :  { %5436 = vrcp.f32 %v808_v39  ;;  %v820_v44 = vand.u32 2147483648, %v808_v39  ;;  %vm814_vm12 = vweird.f32 %v808_v39  ;;  %v818_v45 = vand.u32 2147483647, %v808_v39 }
 0x7f1   :  { %v821_v26 = vor.u32 1.1754944e-38, %v820_v44  ;;  %vm819_vm14 = vcmp.eq.f32.partialorder %v818_v45, 8.507059e+37 }
 0x7f5   :  { %v5437_v40 = vpop.eup %5436 }
 0x7f6   :  { %v810_v41 = vmul.f32 %v5437_v40, %v808_v39  ;;  %vm815_vm11 = vweird.f32 %v5437_v40 }
 0x7f7   :  { %vm816_vm13 = vmor %vm814_vm12, %vm815_vm11 }
 0x7f8   :  { %v811_v28 = vsub.f32 1.0, %v810_v41 }
 0x7fa   :  { %v812_v42 = vmul.f32 %v5437_v40, %v811_v28 }
 0x7fc   :  { %v813_v43 = vadd.f32 %v5437_v40, %v812_v42 }
 0x7fe   :  { %v817_v46 = vsel %vm816_vm13, %v5437_v40, %v813_v43 }
 0x7ff   :  { %v822_v47 = vsel %vm819_vm14, %v821_v26, %v817_v46 }
 0x800   :  { %v828_v2 = vmul.f32 %v826_v1, %v822_v47 }
 0x85d   :  { %v831_v48 = vpop.permute.xlu1 %830 }
 0x85e   :  { %v833_v49 = vmul.f32 %v831_v48, %v822_v47 }
 0x85f   :  { %v732_v51 = vpop.f32.mrf.mxu1 }
 0x860   :  { %v735_v52 = vadd.f32 %v732_v51, %v709_v50  ;;  %835 = vrot.lane.b32.xlu2 %v833_v49, %s5961_s3 }
 0x862   :  { %5438 = vtanh.f32 %v735_v52  ;;  %v5261_v27 = vmul.f32 -1.442695, %v735_v52 }
 0x864   :  { %5440 = vpow2.f32 %v5261_v27 }
 0x868   :  { %v5439_v53 = vpop.eup %5438 }
 0x869   :  { %761 = vrot.lane.b32.xlu2 %v5439_v53, %s5961_s3 }
 0x86a   :  { %v5441_v54 = vpop.eup %5440 }
 0x86b   :  { %v739_v62 = vadd.f32 1.0, %v5441_v54 }
 0x86d   :  { %5442 = vrcp.f32 %v739_v62  ;;  %v751_v11 = vand.u32 2147483648, %v739_v62  ;;  %vm745_vm4 = vweird.f32 %v739_v62  ;;  %v749_v12 = vand.u32 2147483647, %v739_v62 }
 0x86f   :  { %v752_v15 = vor.u32 1.1754944e-38, %v751_v11  ;;  %vm750_vm6 = vcmp.eq.f32.partialorder %v749_v12, 8.507059e+37 }
 0x873   :  { %v5443_v63 = vpop.eup %5442 }
 0x874   :  { %v741_v0 = vmul.f32 %v5443_v63, %v739_v62  ;;  %vm746_vm3 = vweird.f32 %v5443_v63 }
 0x875   :  { %vm747_vm5 = vmor %vm745_vm4, %vm746_vm3 }
 0x876   :  { %v742_v6 = vsub.f32 1.0, %v741_v0 }
 0x878   :  { %v743_v8 = vmul.f32 %v5443_v63, %v742_v6 }
 0x87a   :  { %v744_v9 = vadd.f32 %v5443_v63, %v743_v8 }
 0x87c   :  { %v748_v14 = vsel %vm747_vm5, %v5443_v63, %v744_v9 }
 0x87d   :  { %v753_v16 = vsel %vm750_vm6, %v752_v15, %v748_v14 }
 0x87e   :  { %v759_v13 = vmul.f32 %v757_v25, %v753_v16 }
 0x8ba   :  { %v836_v5 = vpop.permute.xlu2 %835 }
 0x8bb   :  { %v6374_v7 = vadd.f32 %v836_v5, %v828_v2 }
 0x8bd   :  { %5444 = vtanh.f32 %v6374_v7  ;;  %v970_v0 = vrot.slane %v6374_v7, 4 }
 0x8c3   :  { %v5445_v10 = vpop.eup %5444  ;;  %v762_v3 = vpop.permute.xlu2 %761 }
 0x8c4   :  { %841 = vrot.lane.b32.xlu0 %v5445_v10, %s5961_s3  ;;  %v764_v19 = vmul.f32 %v762_v3, %v753_v16 }
 0x8cc   :  { %766 = vrot.lane.b32.xlu0 %v764_v19, %s5961_s3 }
 0x936   :  { %v842_v20 = vpop.permute.xlu0 %841 }
 0x937   :  { %v6379_v22 = vmul.f32 %v842_v20, %v822_v47 }
 0x939   :  { %v923_v24 = vrot.slane %v6379_v22, 4 }
 0x93b   :  { %924 = vrot.lane.b32.xlu1 %v923_v24, %s5962_s4 }
 0x93e   :  { %v767_v31 = vpop.permute.xlu0 %766 }
 0x93f   :  { %v6384_v32 = vadd.f32 %v767_v31, %v759_v13 }
 0x941   :  { %5446 = vtanh.f32 %v6384_v32  ;;  %v903_v24 = vrot.slane %v6384_v32, 4 }
 0x947   :  { %v5447_v33 = vpop.eup %5446 }
 0x948   :  { %772 = vrot.lane.b32.xlu1 %v5447_v33, %s5961_s3 }
 0x9ad   :  { %v925_v34 = vpop.permute.xlu1 %924 }
 0x9ae   :  { %5266 = vmatmul.msk.f32.vlgmr.msra.gmra.mxu2 %vm427_vm15, %v925_v34 }
 0x9af   :  { %1520 = vmatpush.msra.mxu2 %v6156_v55  ;;  %v922_v55 = vld [vmem:[#allocation2 + $0x70] sm:$0xf] }
 0x9b1   :  { %1521 = vmatpush.msra.mxu2 %v6195_v61 }
 0x9b3   :  { %1522 = vmatpush.msra.mxu2 %v6216_v4 }
 0x9b5   :  { %1523 = vmatpush.msra.mxu2 %v6245_v17 }
 0x9ba   :  { %v773_v23 = vpop.permute.xlu1 %772 }
 0x9bb   :  { %v775_v30 = vmul.f32 %v773_v23, %v753_v16  ;;  %v6422_v23 = vld [vmem:[%s7509_s8 + $0x18] sm:$0xff] }
 0x9bd   :  { %846 = vrot.lane.b32.xlu2 %v775_v30, %s5962_s4 }
 0xa17   :  { %v847_v35 = vpop.permute.xlu2 %846 }
 0xa18   :  { %849 = vst.msk [vmem:[#allocation3 + $0x8] sm:$0xf] %vm555_vm2, %v847_v35  ;;  %5264 = vmatmul.msk.f32.vlgmr.msra.gmra.mxu0 %vm427_vm15, %v847_v35 }
 0xa19   :  { %1450 = vmatpush.msra.mxu0 %v6163_v56 }
 0xa1b   :  { %1451 = vmatpush.msra.mxu0 %v6170_v57  ;;  %v855_v57 = vld [vmem:[#allocation2 + $0x58] sm:$0xf0] }
 0xa1d   :  { %1452 = vmatpush.msra.mxu0 %v6175_v58 }
 0xa1f   :  { %1453 = vmatpush.msra.mxu0 %v6184_v59 }
 0xa31   :  { %v945_v36 = vpop.f32.mrf.mxu2 }
 0xa32   :  { %v948_v37 = vadd.f32 %v945_v36, %v922_v55 }
 0xa34   :  { %5448 = vtanh.f32 %v948_v37  ;;  %v5267_v39 = vmul.f32 -1.442695, %v948_v37  ;;  %v1066_v37 = vld [vmem:[#allocation2 + $0x38] sm:$0xf0] }
 0xa36   :  { %5450 = vpow2.f32 %v5267_v39 }
 0xa3a   :  { %v5449_v38 = vpop.eup %5448 }
 0xa3b   :  { %974 = vrot.lane.b32.xlu0 %v5449_v38, %s5961_s3 }
 0xa3c   :  { %v5451_v40 = vpop.eup %5450 }
 0xa3d   :  { %v952_v41 = vadd.f32 1.0, %v5451_v40  ;;  %v6454_v40 = vld [vmem:[%s7510_s7] sm:$0xff] }
 0xa3f   :  { %5452 = vrcp.f32 %v952_v41  ;;  %v964_v26 = vand.u32 2147483648, %v952_v41  ;;  %vm958_vm8 = vweird.f32 %v952_v41  ;;  %v962_v47 = vand.u32 2147483647, %v952_v41 }
 0xa41   :  { %v965_v49 = vor.u32 1.1754944e-38, %v964_v26  ;;  %vm963_vm10 = vcmp.eq.f32.partialorder %v962_v47, 8.507059e+37 }
 0xa45   :  { %v5453_v42 = vpop.eup %5452 }
 0xa46   :  { %v954_v58 = vmul.f32 %v5453_v42, %v952_v41  ;;  %vm959_vm7 = vweird.f32 %v5453_v42 }
 0xa47   :  { %vm960_vm9 = vmor %vm958_vm8, %vm959_vm7 }
 0xa48   :  { %v955_v59 = vsub.f32 1.0, %v954_v58 }
 0xa4a   :  { %v956_v45 = vmul.f32 %v5453_v42, %v955_v59 }
 0xa4c   :  { %v957_v46 = vadd.f32 %v5453_v42, %v956_v45 }
 0xa4e   :  { %v961_v48 = vsel %vm960_vm9, %v5453_v42, %v957_v46 }
 0xa4f   :  { %v966_v50 = vsel %vm963_vm10, %v965_v49, %v961_v48 }
 0xa50   :  { %v972_v1 = vmul.f32 %v970_v0, %v966_v50 }
 0xa95   :  { %v875_v28 = vpop.f32.mrf.mxu0 }
 0xa96   :  { %v879_v56 = vrot.slane %v875_v28, 4 }
 0xa98   :  { %v881_v43 = vadd.f32 %v879_v56, %v855_v57 }
 0xa9a   :  { %5454 = vtanh.f32 %v881_v43  ;;  %v5265_v53 = vmul.f32 -1.442695, %v881_v43 }
 0xa9c   :  { %5456 = vpow2.f32 %v5265_v53 }
 0xaa0   :  { %v5455_v44 = vpop.eup %5454 }
 0xaa1   :  { %907 = vrot.lane.b32.xlu0 %v5455_v44, %s5961_s3 }
 0xaa2   :  { %v5457_v27 = vpop.eup %5456 }
 0xaa3   :  { %v885_v54 = vadd.f32 1.0, %v5457_v27 }
 0xaa5   :  { %5458 = vrcp.f32 %v885_v54  ;;  %v897_v11 = vand.u32 2147483648, %v885_v54  ;;  %vm891_vm12 = vweird.f32 %v885_v54  ;;  %v895_v12 = vand.u32 2147483647, %v885_v54 }
 0xaa7   :  { %v898_v7 = vor.u32 1.1754944e-38, %v897_v11  ;;  %vm896_vm14 = vcmp.eq.f32.partialorder %v895_v12, 8.507059e+37 }
 0xaab   :  { %v5459_v62 = vpop.eup %5458 }
 0xaac   :  { %v887_v63 = vmul.f32 %v5459_v62, %v885_v54  ;;  %vm892_vm11 = vweird.f32 %v5459_v62 }
 0xaad   :  { %v975_v51 = vpop.permute.xlu0 %974  ;;  %vm893_vm13 = vmor %vm891_vm12, %vm892_vm11 }
 0xaae   :  { %v977_v52 = vmul.f32 %v975_v51, %v966_v50  ;;  %v888_v2 = vsub.f32 1.0, %v887_v63  ;;  %v999_v51 = vld [vmem:[#allocation2 + $0x50] sm:$0xf] }
 0xab0   :  { %979 = vrot.lane.b32.xlu1 %v977_v52, %s5961_s3  ;;  %v889_v8 = vmul.f32 %v5459_v62, %v888_v2 }
 0xab2   :  { %v890_v9 = vadd.f32 %v5459_v62, %v889_v8 }
 0xab4   :  { %v894_v14 = vsel %vm893_vm13, %v5459_v62, %v890_v9 }
 0xab5   :  { %v899_v3 = vsel %vm896_vm14, %v898_v7, %v894_v14 }
 0xab6   :  { %v905_v25 = vmul.f32 %v903_v24, %v899_v3 }
 0xb13   :  { %v908_v15 = vpop.permute.xlu0 %907 }
 0xb14   :  { %v910_v16 = vmul.f32 %v908_v15, %v899_v3 }
 0xb22   :  { %v980_v5 = vpop.permute.xlu1 %979 }
 0xb23   :  { %v6404_v6 = vadd.f32 %v980_v5, %v972_v1 }
 0xb25   :  { %5460 = vtanh.f32 %v6404_v6  ;;  %v1116_v2 = vrot.slane %v6404_v6, 4 }
 0xb2b   :  { %v5461_v10 = vpop.eup %5460 }
 0xb2c   :  { %985 = vrot.lane.b32.xlu2 %v5461_v10, %s5961_s3 }
 0xb34   :  { %912 = vrot.lane.b32.xlu2 %v910_v16, %s5961_s3 }
 0xb86   :  { %v986_v19 = vpop.permute.xlu2 %985 }
 0xb87   :  { %v6409_v20 = vmul.f32 %v986_v19, %v966_v50 }
 0xb89   :  { %1067 = vrot.lane.b32.xlu1 %v6409_v20, %s5962_s4 }
 0xb8e   :  { %v913_v13 = vpop.permute.xlu2 %912 }
 0xb8f   :  { %v6414_v31 = vadd.f32 %v913_v13, %v905_v25 }
 0xb91   :  { %5462 = vtanh.f32 %v6414_v31 }
 0xb97   :  { %v5463_v33 = vpop.eup %5462 }
 0xb98   :  { %918 = vrot.lane.b32.xlu0 %v5463_v33, %s5961_s3 }
 0xbfb   :  { %v1068_v34 = vpop.permute.xlu1 %1067 }
 0xbfc   :  { %5270 = vmatmul.msk.f32.vlgmr.msra.gmra.mxu3 %vm427_vm15, %v1068_v34  ;;  %v1047_v34 = vrot.slane %v6414_v31, 4  ;;  %v6481_v31 = vld [vmem:[%s7509_s8 + $0x10] sm:$0xff] }
 0xbfd   :  { %1663 = vmatpush.msra.mxu3 %v6422_v23 }
 0xbff   :  { %1664 = vmatpush.msra.mxu3 %v6195_v61  ;;  %v6436_v61 = vld [vmem:[%s7510_s7 + $0x18] sm:$0xff] }
 0xc01   :  { %1665 = vmatpush.msra.mxu3 %v6216_v4  ;;  %v6442_v4 = vld [vmem:[%s7510_s7 + $0x10] sm:$0xff] }
 0xc03   :  { %1666 = vmatpush.msra.mxu3 %v6245_v17  ;;  %v6448_v17 = vld [vmem:[%s7510_s7 + $0x8] sm:$0xff] }
 0xc0a   :  { %v919_v32 = vpop.permute.xlu0 %918 }
 0xc0b   :  { %v6428_v30 = vmul.f32 %v919_v32, %v899_v3 }
 0xc0d   :  { %v1000_v35 = vrot.slane %v6428_v30, 4 }
 0xc0f   :  { %1001 = vrot.lane.b32.xlu1 %v1000_v35, %s5962_s4 }
 0xc7f   :  { %v1088_v55 = vpop.f32.mrf.mxu3 }
 0xc80   :  { %v1092_v36 = vrot.slane %v1088_v55, 4 }
 0xc81   :  { %v1002_v38 = vpop.permute.xlu1 %1001 }
 0xc82   :  { %v1094_v39 = vadd.f32 %v1092_v36, %v1066_v37  ;;  %5268 = vmatmul.msk.f32.vlgmr.msra.gmra.mxu1 %vm427_vm15, %v1002_v38 }
 0xc83   :  { %1597 = vmatpush.msra.mxu1 %v6436_v61 }
 0xc84   :  { %5464 = vtanh.f32 %v1094_v39  ;;  %v5271_v28 = vmul.f32 -1.442695, %v1094_v39 }
 0xc85   :  { %1598 = vmatpush.msra.mxu1 %v6442_v4 }
 0xc86   :  { %5466 = vpow2.f32 %v5271_v28  ;;  %v6493_v28 = vld [vmem:[%s7509_s8] sm:$0xff] }
 0xc87   :  { %1599 = vmatpush.msra.mxu1 %v6448_v17 }
 0xc89   :  { %1600 = vmatpush.msra.mxu1 %v6454_v40 }
 0xc8a   :  { %v5465_v41 = vpop.eup %5464 }
 0xc8b   :  { %1120 = vrot.lane.b32.xlu2 %v5465_v41, %s5961_s3  ;;  %v6487_v41 = vld [vmem:[%s7509_s8 + $0x8] sm:$0xff] }
 0xc8c   :  { %v5467_v56 = vpop.eup %5466 }
 0xc8d   :  { %v1098_v42 = vadd.f32 1.0, %v5467_v56 }
 0xc8f   :  { %5468 = vrcp.f32 %v1098_v42  ;;  %v1110_v45 = vand.u32 2147483648, %v1098_v42  ;;  %vm1104_vm4 = vweird.f32 %v1098_v42  ;;  %v1108_v46 = vand.u32 2147483647, %v1098_v42 }
 0xc91   :  { %v1111_v47 = vor.u32 1.1754944e-38, %v1110_v45  ;;  %vm1109_vm6 = vcmp.eq.f32.partialorder %v1108_v46, 8.507059e+37 }
 0xc95   :  { %v5469_v57 = vpop.eup %5468 }
 0xc96   :  { %v1100_v43 = vmul.f32 %v5469_v57, %v1098_v42  ;;  %vm1105_vm3 = vweird.f32 %v5469_v57  ;;  %v1212_v42 = vld [vmem:[#allocation2 + $0x38] sm:$0xf] }
 0xc97   :  { %vm1106_vm5 = vmor %vm1104_vm4, %vm1105_vm3 }
 0xc98   :  { %v1101_v58 = vsub.f32 1.0, %v1100_v43 }
 0xc9a   :  { %v1102_v59 = vmul.f32 %v5469_v57, %v1101_v58 }
 0xc9c   :  { %v1103_v44 = vadd.f32 %v5469_v57, %v1102_v59 }
 0xc9e   :  { %v1107_v26 = vsel %vm1106_vm5, %v5469_v57, %v1103_v44 }
 0xc9f   :  { %v1112_v48 = vsel %vm1109_vm6, %v1111_v47, %v1107_v26 }
 0xca0   :  { %v1118_v5 = vmul.f32 %v1116_v2, %v1112_v48 }
 0xce5   :  { %v1121_v49 = vpop.permute.xlu2 %1120 }
 0xce6   :  { %v1123_v50 = vmul.f32 %v1121_v49, %v1112_v48 }
 0xce8   :  { %1125 = vrot.lane.b32.xlu0 %v1123_v50, %s5961_s3 }
 0xcff   :  { %v1022_v52 = vpop.f32.mrf.mxu1 }
 0xd00   :  { %v1025_v53 = vadd.f32 %v1022_v52, %v999_v51 }
 0xd02   :  { %5470 = vtanh.f32 %v1025_v53  ;;  %v5269_v54 = vmul.f32 -1.442695, %v1025_v53 }
 0xd04   :  { %5472 = vpow2.f32 %v5269_v54 }
 0xd08   :  { %v5471_v27 = vpop.eup %5470 }
 0xd09   :  { %1051 = vrot.lane.b32.xlu2 %v5471_v27, %s5961_s3 }
 0xd0a   :  { %v5473_v62 = vpop.eup %5472 }
 0xd0b   :  { %v1029_v63 = vadd.f32 1.0, %v5473_v62 }
 0xd0d   :  { %5474 = vrcp.f32 %v1029_v63  ;;  %v1041_v15 = vand.u32 2147483648, %v1029_v63  ;;  %vm1035_vm8 = vweird.f32 %v1029_v63  ;;  %v1039_v7 = vand.u32 2147483647, %v1029_v63 }
 0xd0f   :  { %v1042_v6 = vor.u32 1.1754944e-38, %v1041_v15  ;;  %vm1040_vm10 = vcmp.eq.f32.partialorder %v1039_v7, 8.507059e+37 }
 0xd13   :  { %v5475_v0 = vpop.eup %5474 }
 0xd14   :  { %v1031_v1 = vmul.f32 %v5475_v0, %v1029_v63  ;;  %vm1036_vm7 = vweird.f32 %v5475_v0 }
 0xd15   :  { %vm1037_vm9 = vmor %vm1035_vm8, %vm1036_vm7 }
 0xd16   :  { %v1032_v9 = vsub.f32 1.0, %v1031_v1 }
 0xd18   :  { %v1033_v11 = vmul.f32 %v5475_v0, %v1032_v9 }
 0xd1a   :  { %v1034_v12 = vadd.f32 %v5475_v0, %v1033_v11 }
 0xd1c   :  { %v1038_v3 = vsel %vm1037_vm9, %v5475_v0, %v1034_v12 }
 0xd1d   :  { %v1043_v19 = vsel %vm1040_vm10, %v1042_v6, %v1038_v3 }
 0xd1e   :  { %v1049_v32 = vmul.f32 %v1047_v34, %v1043_v19 }
 0xd5a   :  { %v1126_v8 = vpop.permute.xlu0 %1125 }
 0xd5b   :  { %v6461_v10 = vadd.f32 %v1126_v8, %v1118_v5 }
 0xd5d   :  { %5476 = vtanh.f32 %v6461_v10  ;;  %v1260_v15 = vrot.slane %v6461_v10, 4 }
 0xd63   :  { %v5477_v14 = vpop.eup %5476  ;;  %v1052_v16 = vpop.permute.xlu2 %1051 }
 0xd64   :  { %1131 = vrot.lane.b32.xlu1 %v5477_v14, %s5961_s3  ;;  %v1054_v24 = vmul.f32 %v1052_v16, %v1043_v19 }
 0xd6c   :  { %1056 = vrot.lane.b32.xlu1 %v1054_v24, %s5961_s3 }
 0xdd6   :  { %v1132_v25 = vpop.permute.xlu1 %1131 }
 0xdd7   :  { %v6466_v13 = vmul.f32 %v1132_v25, %v1112_v48  ;;  %v1145_v48 = vld [vmem:[#allocation2 + $0x50] sm:$0xf0] }
 0xdd9   :  { %v1213_v33 = vrot.slane %v6466_v13, 4 }
 0xddb   :  { %1214 = vrot.lane.b32.xlu0 %v1213_v33, %s5962_s4 }
 0xdde   :  { %v1057_v35 = vpop.permute.xlu1 %1056 }
 0xddf   :  { %v6471_v55 = vadd.f32 %v1057_v35, %v1049_v32 }
 0xde1   :  { %5478 = vtanh.f32 %v6471_v55 }
 0xde7   :  { %v5479_v36 = vpop.eup %5478 }
 0xde8   :  { %1062 = vrot.lane.b32.xlu2 %v5479_v36, %s5961_s3 }
 0xe42   :  { %v1063_v37 = vpop.permute.xlu2 %1062 }
 0xe43   :  { %v1065_v38 = vmul.f32 %v1063_v37, %v1043_v19 }
 0xe45   :  { %1136 = vrot.lane.b32.xlu0 %v1065_v38, %s5962_s4 }
 0xe4d   :  { %v1215_v39 = vpop.permute.xlu0 %1214 }
 0xe4e   :  { %5274 = vmatmul.msk.f32.vlgmr.msrb.gmra.mxu2 %vm427_vm15, %v1215_v39 }
 0xe4f   :  { %1810 = vmatpush.msrb.mxu2 %v6422_v23 }
 0xe51   :  { %1811 = vmatpush.msrb.mxu2 %v6481_v31 }
 0xe53   :  { %1812 = vmatpush.msrb.mxu2 %v6487_v41 }
 0xe55   :  { %1813 = vmatpush.msrb.mxu2 %v6493_v28 }
 0xeb7   :  { %v1137_v56 = vpop.permute.xlu0 %1136 }
 0xeb8   :  { %1139 = vst.msk [vmem:[#allocation3 + $0x10] sm:$0xf] %vm555_vm2, %v1137_v56  ;;  %5272 = vmatmul.msk.f32.vlgmr.msrb.gmra.mxu0 %vm427_vm15, %v1137_v56  ;;  %v1193_v56 = vrot.slane %v6471_v55, 4 }
 0xeb9   :  { %1740 = vmatpush.msrb.mxu0 %v6436_v61 }
 0xebb   :  { %1741 = vmatpush.msrb.mxu0 %v6442_v4 }
 0xebd   :  { %1742 = vmatpush.msrb.mxu0 %v6448_v17 }
 0xebf   :  { %1743 = vmatpush.msrb.mxu0 %v6454_v40 }
 0xed1   :  { %v1235_v57 = vpop.f32.mrf.mxu2 }
 0xed2   :  { %v1238_v43 = vadd.f32 %v1235_v57, %v1212_v42 }
 0xed4   :  { %5480 = vtanh.f32 %v1238_v43  ;;  %v5275_v59 = vmul.f32 -1.442695, %v1238_v43 }
 0xed6   :  { %5482 = vpow2.f32 %v5275_v59 }
 0xeda   :  { %v5481_v58 = vpop.eup %5480 }
 0xedb   :  { %1264 = vrot.lane.b32.xlu1 %v5481_v58, %s5961_s3 }
 0xedc   :  { %v5483_v44 = vpop.eup %5482 }
 0xedd   :  { %v1242_v45 = vadd.f32 1.0, %v5483_v44 }
 0xedf   :  { %5484 = vrcp.f32 %v1242_v45  ;;  %v1254_v54 = vand.u32 2147483648, %v1242_v45  ;;  %vm1248_vm12 = vweird.f32 %v1242_v45  ;;  %v1252_v62 = vand.u32 2147483647, %v1242_v45 }
 0xee1   :  { %v1255_v0 = vor.u32 1.1754944e-38, %v1254_v54  ;;  %vm1253_vm14 = vcmp.eq.f32.partialorder %v1252_v62, 8.507059e+37 }
 0xee5   :  { %v5485_v47 = vpop.eup %5484 }
 0xee6   :  { %v1244_v50 = vmul.f32 %v5485_v47, %v1242_v45  ;;  %vm1249_vm11 = vweird.f32 %v5485_v47 }
 0xee7   :  { %vm1250_vm13 = vmor %vm1248_vm12, %vm1249_vm11 }
 0xee8   :  { %v1245_v51 = vsub.f32 1.0, %v1244_v50 }
 0xeea   :  { %v1246_v53 = vmul.f32 %v5485_v47, %v1245_v51 }
 0xeec   :  { %v1247_v27 = vadd.f32 %v5485_v47, %v1246_v53 }
 0xeee   :  { %v1251_v63 = vsel %vm1250_vm13, %v5485_v47, %v1247_v27  ;;  %v1356_v47 = vld [vmem:[#allocation2 + $0x20] sm:$0xf0] }
 0xeef   :  { %v1256_v1 = vsel %vm1253_vm14, %v1255_v0, %v1251_v63 }
 0xef0   :  { %v1262_v7 = vmul.f32 %v1260_v15, %v1256_v1 }
 0xf35   :  { %v1165_v46 = vpop.f32.mrf.mxu0 }
 0xf36   :  { %v1169_v26 = vrot.slane %v1165_v46, 4 }
 0xf38   :  { %v1171_v49 = vadd.f32 %v1169_v26, %v1145_v48 }
 0xf3a   :  { %5486 = vtanh.f32 %v1171_v49  ;;  %v5273_v8 = vmul.f32 -1.442695, %v1171_v49 }
 0xf3c   :  { %5488 = vpow2.f32 %v5273_v8 }
 0xf40   :  { %v5487_v52 = vpop.eup %5486 }
 0xf41   :  { %1197 = vrot.lane.b32.xlu1 %v5487_v52, %s5961_s3 }
 0xf42   :  { %v5489_v9 = vpop.eup %5488 }
 0xf43   :  { %v1175_v11 = vadd.f32 1.0, %v5489_v9 }
 0xf45   :  { %5490 = vrcp.f32 %v1175_v11  ;;  %v1187_v33 = vand.u32 2147483648, %v1175_v11  ;;  %vm1181_vm4 = vweird.f32 %v1175_v11  ;;  %v1185_v34 = vand.u32 2147483647, %v1175_v11 }
 0xf47   :  { %v1188_v35 = vor.u32 1.1754944e-38, %v1187_v33  ;;  %vm1186_vm6 = vcmp.eq.f32.partialorder %v1185_v34, 8.507059e+37 }
 0xf4b   :  { %v5491_v12 = vpop.eup %5490 }
 0xf4c   :  { %v1177_v14 = vmul.f32 %v5491_v12, %v1175_v11  ;;  %vm1182_vm3 = vweird.f32 %v5491_v12 }
 0xf4d   :  { %v1265_v2 = vpop.permute.xlu1 %1264  ;;  %vm1183_vm5 = vmor %vm1181_vm4, %vm1182_vm3 }
 0xf4e   :  { %v1267_v5 = vmul.f32 %v1265_v2, %v1256_v1  ;;  %v1178_v16 = vsub.f32 1.0, %v1177_v14  ;;  %v1289_v14 = vld [vmem:[#allocation2 + $0x8] sm:$0xf] }
 0xf50   :  { %1269 = vrot.lane.b32.xlu2 %v1267_v5, %s5961_s3  ;;  %v1179_v19 = vmul.f32 %v5491_v12, %v1178_v16 }
 0xf52   :  { %v1180_v24 = vadd.f32 %v5491_v12, %v1179_v19 }
 0xf54   :  { %v1184_v32 = vsel %vm1183_vm5, %v5491_v12, %v1180_v24 }
 0xf55   :  { %v1189_v36 = vsel %vm1186_vm6, %v1188_v35, %v1184_v32 }
 0xf56   :  { %v1195_v42 = vmul.f32 %v1193_v56, %v1189_v36 }
 0xfaa   :  { %v1270_v3 = vpop.permute.xlu2 %1269 }
 0xfab   :  { %v6506_v6 = vadd.f32 %v1270_v3, %v1262_v7 }
 0xfad   :  { %5492 = vtanh.f32 %v6506_v6  ;;  %v1406_v34 = vrot.slane %v6506_v6, 4 }
 0xfb3   :  { %v5493_v25 = vpop.eup %5492  ;;  %v1198_v10 = vpop.permute.xlu1 %1197 }
 0xfb4   :  { %1275 = vrot.lane.b32.xlu0 %v5493_v25, %s5961_s3  ;;  %v1200_v37 = vmul.f32 %v1198_v10, %v1189_v36 }
 0xfbc   :  { %1202 = vrot.lane.b32.xlu0 %v1200_v37, %s5961_s3 }
0x1026   :  { %v1276_v38 = vpop.permute.xlu0 %1275 }
0x1027   :  { %v6511_v39 = vmul.f32 %v1276_v38, %v1256_v1 }
0x1029   :  { %1357 = vrot.lane.b32.xlu2 %v6511_v39, %s5962_s4 }
0x102e   :  { %v1203_v57 = vpop.permute.xlu0 %1202 }
0x102f   :  { %v6516_v43 = vadd.f32 %v1203_v57, %v1195_v42 }
0x1031   :  { %5494 = vtanh.f32 %v6516_v43 }
0x1037   :  { %v5495_v58 = vpop.eup %5494 }
0x1038   :  { %1208 = vrot.lane.b32.xlu1 %v5495_v58, %s5961_s3 }
0x1083   :  { %v1358_v59 = vpop.permute.xlu2 %1357 }
0x1084   :  { %5278 = vmatmul.msk.f32.vlgmr.msrb.gmra.mxu3 %vm427_vm15, %v1358_v59 }
0x1085   :  { %1953 = vmatpush.msrb.mxu3 %v6422_v23 }
0x1087   :  { %1954 = vmatpush.msrb.mxu3 %v6481_v31 }
0x1089   :  { %1955 = vmatpush.msrb.mxu3 %v6487_v41 }
0x108b   :  { %1956 = vmatpush.msrb.mxu3 %v6493_v28 }
0x10aa   :  { %v1209_v55 = vpop.permute.xlu1 %1208 }
0x10ab   :  { %v6525_v44 = vmul.f32 %v1209_v55, %v1189_v36 }
0x10ad   :  { %v1290_v45 = vrot.slane %v6525_v44, 4 }
0x10af   :  { %1291 = vrot.lane.b32.xlu2 %v1290_v45, %s5962_s4 }
0x1107   :  { %v1378_v46 = vpop.f32.mrf.mxu3 }
0x1108   :  { %v1382_v26 = vrot.slane %v1378_v46, 4 }
0x1109   :  { %v1292_v48 = vpop.permute.xlu2 %1291 }
0x110a   :  { %v1384_v49 = vadd.f32 %v1382_v26, %v1356_v47  ;;  %5276 = vmatmul.msk.f32.vlgmr.msrb.gmra.mxu1 %vm427_vm15, %v1292_v48  ;;  %v1337_v48 = vrot.slane %v6516_v43, 4 }
0x110b   :  { %1887 = vmatpush.msrb.mxu1 %v6436_v61 }
0x110c   :  { %5496 = vtanh.f32 %v1384_v49  ;;  %v5279_v51 = vmul.f32 -1.442695, %v1384_v49 }
0x110d   :  { %1888 = vmatpush.msrb.mxu1 %v6442_v4 }
0x110e   :  { %5498 = vpow2.f32 %v5279_v51 }
0x110f   :  { %1889 = vmatpush.msrb.mxu1 %v6448_v17 }
0x1111   :  { %1890 = vmatpush.msrb.mxu1 %v6454_v40 }
0x1112   :  { %v5497_v50 = vpop.eup %5496 }
0x1113   :  { %1410 = vrot.lane.b32.xlu0 %v5497_v50, %s5961_s3 }
0x1114   :  { %v5499_v52 = vpop.eup %5498 }
0x1115   :  { %v1388_v53 = vadd.f32 1.0, %v5499_v52 }
0x1117   :  { %5500 = vrcp.f32 %v1388_v53  ;;  %v1400_v1 = vand.u32 2147483648, %v1388_v53  ;;  %vm1394_vm8 = vweird.f32 %v1388_v53  ;;  %v1398_v2 = vand.u32 2147483647, %v1388_v53 }
0x1119   :  { %v1401_v8 = vor.u32 1.1754944e-38, %v1400_v1  ;;  %vm1399_vm10 = vcmp.eq.f32.partialorder %v1398_v2, 8.507059e+37 }
0x111d   :  { %v5501_v27 = vpop.eup %5500 }
0x111e   :  { %v1390_v54 = vmul.f32 %v5501_v27, %v1388_v53  ;;  %vm1395_vm7 = vweird.f32 %v5501_v27 }
0x111f   :  { %vm1396_vm9 = vmor %vm1394_vm8, %vm1395_vm7 }
0x1120   :  { %v1391_v62 = vsub.f32 1.0, %v1390_v54 }
0x1122   :  { %v1392_v63 = vmul.f32 %v5501_v27, %v1391_v62  ;;  %v1502_v62 = vld [vmem:[#allocation2 + $0x20] sm:$0xf] }
0x1124   :  { %v1393_v0 = vadd.f32 %v5501_v27, %v1392_v63 }
0x1126   :  { %v1397_v5 = vsel %vm1396_vm9, %v5501_v27, %v1393_v0 }
0x1127   :  { %v1402_v9 = vsel %vm1399_vm10, %v1401_v8, %v1397_v5 }
0x1128   :  { %v1408_v32 = vmul.f32 %v1406_v34, %v1402_v9 }
0x1185   :  { %v1411_v11 = vpop.permute.xlu0 %1410 }
0x1186   :  { %v1413_v12 = vmul.f32 %v1411_v11, %v1402_v9 }
0x1187   :  { %v1312_v15 = vpop.f32.mrf.mxu1 }
0x1188   :  { %v1315_v7 = vadd.f32 %v1312_v15, %v1289_v14  ;;  %1415 = vrot.lane.b32.xlu1 %v1413_v12, %s5961_s3 }
0x118a   :  { %5502 = vtanh.f32 %v1315_v7  ;;  %v5277_v16 = vmul.f32 -1.442695, %v1315_v7 }
0x118c   :  { %5504 = vpow2.f32 %v5277_v16 }
0x1190   :  { %v5503_v3 = vpop.eup %5502 }
0x1191   :  { %1341 = vrot.lane.b32.xlu0 %v5503_v3, %s5961_s3 }
0x1192   :  { %v5505_v19 = vpop.eup %5504 }
0x1193   :  { %v1319_v24 = vadd.f32 1.0, %v5505_v19 }
0x1195   :  { %5506 = vrcp.f32 %v1319_v24  ;;  %v1331_v42 = vand.u32 2147483648, %v1319_v24  ;;  %vm1325_vm12 = vweird.f32 %v1319_v24  ;;  %v1329_v57 = vand.u32 2147483647, %v1319_v24 }
0x1197   :  { %v1332_v59 = vor.u32 1.1754944e-38, %v1331_v42  ;;  %vm1330_vm14 = vcmp.eq.f32.partialorder %v1329_v57, 8.507059e+37 }
0x119b   :  { %v5507_v25 = vpop.eup %5506 }
0x119c   :  { %v1321_v33 = vmul.f32 %v5507_v25, %v1319_v24  ;;  %vm1326_vm11 = vweird.f32 %v5507_v25 }
0x119d   :  { %vm1327_vm13 = vmor %vm1325_vm12, %vm1326_vm11 }
0x119e   :  { %v1322_v10 = vsub.f32 1.0, %v1321_v33 }
0x11a0   :  { %v1323_v37 = vmul.f32 %v5507_v25, %v1322_v10 }
0x11a2   :  { %v1324_v38 = vadd.f32 %v5507_v25, %v1323_v37 }
0x11a4   :  { %v1328_v58 = vsel %vm1327_vm13, %v5507_v25, %v1324_v38 }
0x11a5   :  { %v1333_v55 = vsel %vm1330_vm14, %v1332_v59, %v1328_v58 }
0x11a6   :  { %v1339_v49 = vmul.f32 %v1337_v48, %v1333_v55 }
0x11fa   :  { %v1416_v35 = vpop.permute.xlu1 %1415 }
0x11fb   :  { %v6538_v36 = vadd.f32 %v1416_v35, %v1408_v32  ;;  %v1435_v35 = vld [vmem:[#allocation2 + $0x8] sm:$0xf0] }
0x11fd   :  { %5508 = vtanh.f32 %v6538_v36  ;;  %v1550_v59 = vrot.slane %v6538_v36, 4 }
0x1203   :  { %v5509_v56 = vpop.eup %5508  ;;  %v1342_v6 = vpop.permute.xlu0 %1341 }
0x1204   :  { %1421 = vrot.lane.b32.xlu2 %v5509_v56, %s5961_s3  ;;  %v1344_v45 = vmul.f32 %v1342_v6, %v1333_v55 }
0x120c   :  { %1346 = vrot.lane.b32.xlu2 %v1344_v45, %s5961_s3 }
0x125e   :  { %v1422_v46 = vpop.permute.xlu2 %1421 }
0x125f   :  { %v6543_v26 = vmul.f32 %v1422_v46, %v1402_v9 }
0x1261   :  { %v1503_v47 = vrot.slane %v6543_v26, 4 }
0x1263   :  { %1504 = vrot.lane.b32.xlu1 %v1503_v47, %s5962_s4 }
0x1266   :  { %v1347_v50 = vpop.permute.xlu2 %1346 }
0x1267   :  { %v6548_v51 = vadd.f32 %v1347_v50, %v1339_v49 }
0x1269   :  { %5510 = vtanh.f32 %v6548_v51 }
0x126f   :  { %v5511_v52 = vpop.eup %5510 }
0x1270   :  { %1352 = vrot.lane.b32.xlu0 %v5511_v52, %s5961_s3 }
0x12d5   :  { %v1505_v53 = vpop.permute.xlu1 %1504 }
0x12d6   :  { %5282 = vmatmul.msk.f32.vlgmr.msra.gmra.mxu2 %vm427_vm15, %v1505_v53 }
0x12d7   :  { %2100 = vmatpush.msra.mxu2 %v6422_v23 }
0x12d9   :  { %2101 = vmatpush.msra.mxu2 %v6481_v31 }
0x12db   :  { %2102 = vmatpush.msra.mxu2 %v6487_v41 }
0x12dd   :  { %2103 = vmatpush.msra.mxu2 %v6493_v28 }
0x12e2   :  { %v1353_v43 = vpop.permute.xlu0 %1352 }
0x12e3   :  { %v1355_v27 = vmul.f32 %v1353_v43, %v1333_v55 }
0x12e5   :  { %1426 = vrot.lane.b32.xlu1 %v1355_v27, %s5962_s4 }
0x1357   :  { %v1427_v54 = vpop.permute.xlu1 %1426 }
0x1358   :  { %1429 = vst.msk [vmem:[#allocation3 + $0x18] sm:$0xf] %vm555_vm2, %v1427_v54  ;;  %5280 = vmatmul.msk.f32.vlgmr.msra.gmra.mxu0 %vm427_vm15, %v1427_v54 }
0x1359   :  { %v1525_v63 = vpop.f32.mrf.mxu2  ;;  %2030 = vmatpush.msra.mxu0 %v6436_v61 }
0x135a   :  { %v1528_v0 = vadd.f32 %v1525_v63, %v1502_v62 }
0x135b   :  { %2031 = vmatpush.msra.mxu0 %v6442_v4 }
0x135c   :  { %5512 = vtanh.f32 %v1528_v0  ;;  %v5283_v2 = vmul.f32 -1.442695, %v1528_v0  ;;  %v1483_v0 = vrot.slane %v6548_v51, 4 }
0x135d   :  { %2032 = vmatpush.msra.mxu0 %v6448_v17 }
0x135e   :  { %5514 = vpow2.f32 %v5283_v2 }
0x135f   :  { %2033 = vmatpush.msra.mxu0 %v6454_v40 }
0x1362   :  { %v5513_v1 = vpop.eup %5512 }
0x1363   :  { %1554 = vrot.lane.b32.xlu2 %v5513_v1, %s5961_s3 }
0x1364   :  { %v5515_v5 = vpop.eup %5514 }
0x1365   :  { %v1532_v8 = vadd.f32 1.0, %v5515_v5 }
0x1367   :  { %5516 = vrcp.f32 %v1532_v8  ;;  %v1544_v7 = vand.u32 2147483648, %v1532_v8  ;;  %vm1538_vm4 = vweird.f32 %v1532_v8  ;;  %v1542_v3 = vand.u32 2147483647, %v1532_v8 }
0x1369   :  { %v1545_v19 = vor.u32 1.1754944e-38, %v1544_v7  ;;  %vm1543_vm6 = vcmp.eq.f32.partialorder %v1542_v3, 8.507059e+37  ;;  %v1646_v3 = vld [vmem:[#allocation2 + $0x48] sm:$0xf0] }
0x136d   :  { %v5517_v9 = vpop.eup %5516 }
0x136e   :  { %v1534_v11 = vmul.f32 %v5517_v9, %v1532_v8  ;;  %vm1539_vm3 = vweird.f32 %v5517_v9 }
0x136f   :  { %vm1540_vm5 = vmor %vm1538_vm4, %vm1539_vm3 }
0x1370   :  { %v1535_v12 = vsub.f32 1.0, %v1534_v11 }
0x1372   :  { %v1536_v14 = vmul.f32 %v5517_v9, %v1535_v12 }
0x1374   :  { %v1537_v15 = vadd.f32 %v5517_v9, %v1536_v14 }
0x1376   :  { %v1541_v16 = vsel %vm1540_vm5, %v5517_v9, %v1537_v15 }
0x1377   :  { %v1546_v24 = vsel %vm1543_vm6, %v1545_v19, %v1541_v16 }
0x1378   :  { %v1552_v6 = vmul.f32 %v1550_v59, %v1546_v24 }
0x13bd   :  { %v1555_v25 = vpop.permute.xlu2 %1554 }
0x13be   :  { %v1557_v33 = vmul.f32 %v1555_v25, %v1546_v24 }
0x13c0   :  { %1559 = vrot.lane.b32.xlu0 %v1557_v33, %s5961_s3 }
0x13d5   :  { %v1455_v34 = vpop.f32.mrf.mxu0 }
0x13d6   :  { %v1459_v32 = vrot.slane %v1455_v34, 4 }
0x13d8   :  { %v1461_v10 = vadd.f32 %v1459_v32, %v1435_v35  ;;  %v1579_v32 = vld [vmem:[#allocation2 + $0x40] sm:$0xf] }
0x13da   :  { %5518 = vtanh.f32 %v1461_v10  ;;  %v5281_v38 = vmul.f32 -1.442695, %v1461_v10 }
0x13dc   :  { %5520 = vpow2.f32 %v5281_v38 }
0x13e0   :  { %v5519_v37 = vpop.eup %5518 }
0x13e1   :  { %1487 = vrot.lane.b32.xlu2 %v5519_v37, %s5961_s3 }
0x13e2   :  { %v5521_v56 = vpop.eup %5520 }
0x13e3   :  { %v1465_v42 = vadd.f32 1.0, %v5521_v56 }
0x13e5   :  { %5522 = vrcp.f32 %v1465_v42  ;;  %v1477_v50 = vand.u32 2147483648, %v1465_v42  ;;  %vm1471_vm8 = vweird.f32 %v1465_v42  ;;  %v1475_v52 = vand.u32 2147483647, %v1465_v42 }
0x13e7   :  { %v1478_v43 = vor.u32 1.1754944e-38, %v1477_v50  ;;  %vm1476_vm10 = vcmp.eq.f32.partialorder %v1475_v52, 8.507059e+37 }
0x13eb   :  { %v5523_v57 = vpop.eup %5522 }
0x13ec   :  { %v1467_v58 = vmul.f32 %v5523_v57, %v1465_v42  ;;  %vm1472_vm7 = vweird.f32 %v5523_v57 }
0x13ed   :  { %vm1473_vm9 = vmor %vm1471_vm8, %vm1472_vm7 }
0x13ee   :  { %v1468_v45 = vsub.f32 1.0, %v1467_v58 }
0x13f0   :  { %v1469_v47 = vmul.f32 %v5523_v57, %v1468_v45 }
0x13f2   :  { %v1470_v48 = vadd.f32 %v5523_v57, %v1469_v47 }
0x13f4   :  { %v1474_v53 = vsel %vm1473_vm9, %v5523_v57, %v1470_v48 }
0x13f5   :  { %v1479_v27 = vsel %vm1476_vm10, %v1478_v43, %v1474_v53 }
0x13f6   :  { %v1485_v1 = vmul.f32 %v1483_v0, %v1479_v27 }
0x1432   :  { %v1560_v55 = vpop.permute.xlu0 %1559 }
0x1433   :  { %v6568_v46 = vadd.f32 %v1560_v55, %v1552_v6 }
0x1435   :  { %5524 = vtanh.f32 %v6568_v46 }
0x143b   :  { %v5525_v49 = vpop.eup %5524  ;;  %v1488_v36 = vpop.permute.xlu2 %1487 }
0x143c   :  { %1565 = vrot.lane.b32.xlu1 %v5525_v49, %s5961_s3  ;;  %v1490_v54 = vmul.f32 %v1488_v36, %v1479_v27  ;;  %v1696_v36 = vrot.slane %v6568_v46, 4 }
0x1444   :  { %1492 = vrot.lane.b32.xlu1 %v1490_v54, %s5961_s3 }
0x14ae   :  { %v1566_v62 = vpop.permute.xlu1 %1565 }
0x14af   :  { %v6573_v63 = vmul.f32 %v1566_v62, %v1546_v24 }
0x14b1   :  { %1647 = vrot.lane.b32.xlu0 %v6573_v63, %s5962_s4 }
0x14b6   :  { %v1493_v2 = vpop.permute.xlu1 %1492 }
0x14b7   :  { %v6578_v5 = vadd.f32 %v1493_v2, %v1485_v1 }
0x14b9   :  { %5526 = vtanh.f32 %v6578_v5 }
0x14bf   :  { %v5527_v8 = vpop.eup %5526 }
0x14c0   :  { %1498 = vrot.lane.b32.xlu2 %v5527_v8, %s5961_s3 }
0x151a   :  { %v1499_v9 = vpop.permute.xlu2 %1498 }
0x151b   :  { %v6582_v11 = vmul.f32 %v1499_v9, %v1479_v27 }
0x151d   :  { %v1580_v12 = vrot.slane %v6582_v11, 4 }
0x151f   :  { %1581 = vrot.lane.b32.xlu0 %v1580_v12, %s5962_s4 }
0x1523   :  { %v1648_v14 = vpop.permute.xlu0 %1647 }
0x1524   :  { %5286 = vmatmul.msk.f32.vlgmr.msra.gmra.mxu3 %vm427_vm15, %v1648_v14 }
0x1525   :  { %2243 = vmatpush.msra.mxu3 %v6422_v23 }
0x1527   :  { %2244 = vmatpush.msra.mxu3 %v6481_v31 }
0x1529   :  { %2245 = vmatpush.msra.mxu3 %v6487_v41 }
0x152b   :  { %2246 = vmatpush.msra.mxu3 %v6493_v28 }
0x1591   :  { %v1582_v51 = vpop.permute.xlu0 %1581 }
0x1592   :  { %5284 = vmatmul.msk.f32.vlgmr.msra.gmra.mxu1 %vm427_vm15, %v1582_v51 }
0x1593   :  { %2177 = vmatpush.msra.mxu1 %v6436_v61 }
0x1595   :  { %2178 = vmatpush.msra.mxu1 %v6442_v4 }
0x1597   :  { %2179 = vmatpush.msra.mxu1 %v6448_v17 }
0x1599   :  { %2180 = vmatpush.msra.mxu1 %v6454_v40 }
0x15a7   :  { %v1668_v15 = vpop.f32.mrf.mxu3 }
0x15a8   :  { %v1672_v7 = vrot.slane %v1668_v15, 4 }
0x15aa   :  { %v1674_v16 = vadd.f32 %v1672_v7, %v1646_v3 }
0x15ac   :  { %5528 = vtanh.f32 %v1674_v16  ;;  %v5287_v24 = vmul.f32 -1.442695, %v1674_v16 }
0x15ae   :  { %5530 = vpow2.f32 %v5287_v24  ;;  %v1627_v24 = vrot.slane %v6578_v5, 4 }
0x15b2   :  { %v5529_v19 = vpop.eup %5528 }
0x15b3   :  { %1700 = vrot.lane.b32.xlu1 %v5529_v19, %s5961_s3 }
0x15b4   :  { %v5531_v25 = vpop.eup %5530 }
0x15b5   :  { %v1678_v33 = vadd.f32 1.0, %v5531_v25 }
0x15b7   :  { %5532 = vrcp.f32 %v1678_v33  ;;  %v1690_v58 = vand.u32 2147483648, %v1678_v33  ;;  %vm1684_vm12 = vweird.f32 %v1678_v33  ;;  %v1688_v59 = vand.u32 2147483647, %v1678_v33 }
0x15b9   :  { %v1691_v55 = vor.u32 1.1754944e-38, %v1690_v58  ;;  %vm1689_vm14 = vcmp.eq.f32.partialorder %v1688_v59, 8.507059e+37 }
0x15bd   :  { %v5533_v34 = vpop.eup %5532 }
0x15be   :  { %v1680_v37 = vmul.f32 %v5533_v34, %v1678_v33  ;;  %vm1685_vm11 = vweird.f32 %v5533_v34 }
0x15bf   :  { %vm1686_vm13 = vmor %vm1684_vm12, %vm1685_vm11 }
0x15c0   :  { %v1681_v38 = vsub.f32 1.0, %v1680_v37 }
0x15c2   :  { %v1682_v42 = vmul.f32 %v5533_v34, %v1681_v38  ;;  %v1792_v38 = vld [vmem:[#allocation2 + $0x48] sm:$0xf] }
0x15c4   :  { %v1683_v57 = vadd.f32 %v5533_v34, %v1682_v42 }
0x15c6   :  { %v1687_v6 = vsel %vm1686_vm13, %v5533_v34, %v1683_v57 }
0x15c7   :  { %v1692_v45 = vsel %vm1689_vm14, %v1691_v55, %v1687_v6 }
0x15c8   :  { %v1698_v27 = vmul.f32 %v1696_v36, %v1692_v45  ;;  %v1725_v36 = vld [vmem:[#allocation2 + $0x40] sm:$0xf0] }
0x160f   :  { %v1602_v35 = vpop.f32.mrf.mxu1 }
0x1610   :  { %v1605_v10 = vadd.f32 %v1602_v35, %v1579_v32 }
0x1612   :  { %5534 = vtanh.f32 %v1605_v10  ;;  %v5285_v49 = vmul.f32 -1.442695, %v1605_v10 }
0x1614   :  { %5536 = vpow2.f32 %v5285_v49 }
0x1618   :  { %v5535_v56 = vpop.eup %5534 }
0x1619   :  { %1631 = vrot.lane.b32.xlu1 %v5535_v56, %s5961_s3 }
0x161a   :  { %v5537_v50 = vpop.eup %5536 }
0x161b   :  { %v1609_v52 = vadd.f32 1.0, %v5537_v50 }
0x161d   :  { %5538 = vrcp.f32 %v1609_v52  ;;  %v1621_v9 = vand.u32 2147483648, %v1609_v52  ;;  %vm1615_vm4 = vweird.f32 %v1609_v52  ;;  %v1619_v12 = vand.u32 2147483647, %v1609_v52 }
0x161f   :  { %v1622_v51 = vor.u32 1.1754944e-38, %v1621_v9  ;;  %vm1620_vm6 = vcmp.eq.f32.partialorder %v1619_v12, 8.507059e+37 }
0x1623   :  { %v5539_v53 = vpop.eup %5538 }
0x1624   :  { %v1611_v43 = vmul.f32 %v5539_v53, %v1609_v52  ;;  %vm1616_vm3 = vweird.f32 %v5539_v53 }
0x1625   :  { %v1701_v47 = vpop.permute.xlu1 %1700  ;;  %vm1617_vm5 = vmor %vm1615_vm4, %vm1616_vm3 }
0x1626   :  { %v1703_v48 = vmul.f32 %v1701_v47, %v1692_v45  ;;  %v1612_v62 = vsub.f32 1.0, %v1611_v43 }
0x1628   :  { %1705 = vrot.lane.b32.xlu2 %v1703_v48, %s5961_s3  ;;  %v1613_v1 = vmul.f32 %v5539_v53, %v1612_v62 }
0x162a   :  { %v1614_v2 = vadd.f32 %v5539_v53, %v1613_v1 }
0x162c   :  { %v1618_v14 = vsel %vm1617_vm5, %v5539_v53, %v1614_v2 }
0x162d   :  { %v1623_v15 = vsel %vm1620_vm6, %v1622_v51, %v1618_v14 }
0x162e   :  { %v1629_v25 = vmul.f32 %v1627_v24, %v1623_v15 }
0x1682   :  { %v1706_v54 = vpop.permute.xlu2 %1705 }
0x1683   :  { %v6600_v0 = vadd.f32 %v1706_v54, %v1698_v27 }
0x1685   :  { %5540 = vtanh.f32 %v6600_v0  ;;  %v1840_v12 = vrot.slane %v6600_v0, 4 }
0x168b   :  { %v5541_v8 = vpop.eup %5540  ;;  %v1632_v46 = vpop.permute.xlu1 %1631 }
0x168c   :  { %1711 = vrot.lane.b32.xlu0 %v5541_v8, %s5961_s3  ;;  %v1634_v7 = vmul.f32 %v1632_v46, %v1623_v15 }
0x1694   :  { %1636 = vrot.lane.b32.xlu0 %v1634_v7, %s5961_s3 }
0x16fe   :  { %v1712_v3 = vpop.permute.xlu0 %1711 }
0x16ff   :  { %v6605_v16 = vmul.f32 %v1712_v3, %v1692_v45 }
0x1701   :  { %v1793_v19 = vrot.slane %v6605_v16, 4 }
0x1703   :  { %1794 = vrot.lane.b32.xlu2 %v1793_v19, %s5962_s4 }
0x1706   :  { %v1637_v33 = vpop.permute.xlu0 %1636 }
0x1707   :  { %v6610_v34 = vadd.f32 %v1637_v33, %v1629_v25 }
0x1709   :  { %5542 = vtanh.f32 %v6610_v34 }
0x170f   :  { %v5543_v32 = vpop.eup %5542 }
0x1710   :  { %1642 = vrot.lane.b32.xlu1 %v5543_v32, %s5961_s3 }
0x175d   :  { %v1795_v35 = vpop.permute.xlu2 %1794 }
0x175e   :  { %5290 = vmatmul.msk.f32.vlgmr.msrb.gmra.mxu2 %vm427_vm15, %v1795_v35 }
0x175f   :  { %2390 = vmatpush.msrb.mxu2 %v6422_v23 }
0x1761   :  { %2391 = vmatpush.msrb.mxu2 %v6481_v31 }
0x1763   :  { %2392 = vmatpush.msrb.mxu2 %v6487_v41 }
0x1765   :  { %2393 = vmatpush.msrb.mxu2 %v6493_v28 }
0x1782   :  { %v1643_v5 = vpop.permute.xlu1 %1642 }
0x1783   :  { %v1645_v10 = vmul.f32 %v1643_v5, %v1623_v15 }
0x1785   :  { %1716 = vrot.lane.b32.xlu2 %v1645_v10, %s5962_s4 }
0x17df   :  { %v6620_v37 = vpop.permute.xlu2 %1716 }
0x17e0   :  { %5288 = vmatmul.msk.f32.vlgmr.msrb.gmra.mxu0 %vm427_vm15, %v6620_v37 }
0x17e1   :  { %v1815_v56 = vpop.f32.mrf.mxu2  ;;  %2320 = vmatpush.msrb.mxu0 %v6436_v61 }
0x17e2   :  { %v1818_v23 = vadd.f32 %v1815_v56, %v1792_v38  ;;  %v1773_v56 = vrot.slane %v6610_v34, 4 }
0x17e3   :  { %2321 = vmatpush.msrb.mxu0 %v6442_v4 }
0x17e4   :  { %5544 = vtanh.f32 %v1818_v23  ;;  %v5291_v57 = vmul.f32 -1.442695, %v1818_v23 }
0x17e5   :  { %2322 = vmatpush.msrb.mxu0 %v6448_v17 }
0x17e6   :  { %5546 = vpow2.f32 %v5291_v57 }
0x17e7   :  { %2323 = vmatpush.msrb.mxu0 %v6454_v40 }
0x17ea   :  { %v5545_v42 = vpop.eup %5544 }
0x17eb   :  { %1844 = vrot.lane.b32.xlu0 %v5545_v42, %s5961_s3 }
0x17ec   :  { %v5547_v58 = vpop.eup %5546 }
0x17ed   :  { %v1822_v59 = vadd.f32 1.0, %v5547_v58 }
0x17ef   :  { %5548 = vrcp.f32 %v1822_v59  ;;  %v1834_v4 = vand.u32 2147483648, %v1822_v59  ;;  %vm1828_vm8 = vweird.f32 %v1822_v59  ;;  %v1832_v48 = vand.u32 2147483647, %v1822_v59 }
0x17f1   :  { %v1835_v40 = vor.u32 1.1754944e-38, %v1834_v4  ;;  %vm1833_vm10 = vcmp.eq.f32.partialorder %v1832_v48, 8.507059e+37  ;;  %v1936_v4 = vld [vmem:[#allocation2 + $0x68] sm:$0xf0] }
0x17f5   :  { %v5549_v6 = vpop.eup %5548 }
0x17f6   :  { %v1824_v55 = vmul.f32 %v5549_v6, %v1822_v59  ;;  %vm1829_vm7 = vweird.f32 %v5549_v6 }
0x17f7   :  { %vm1830_vm9 = vmor %vm1828_vm8, %vm1829_vm7 }
0x17f8   :  { %v1825_v45 = vsub.f32 1.0, %v1824_v55 }
0x17fa   :  { %v1826_v61 = vmul.f32 %v5549_v6, %v1825_v45 }
0x17fc   :  { %v1827_v47 = vadd.f32 %v5549_v6, %v1826_v61 }
0x17fe   :  { %v1831_v17 = vsel %vm1830_vm9, %v5549_v6, %v1827_v47  ;;  %v6650_v6 = vld [vmem:[%s7509_s8 + $0x18] sm:$0xff] }
0x17ff   :  { %v1836_v50 = vsel %vm1833_vm10, %v1835_v40, %v1831_v17  ;;  %v6682_v40 = vld [vmem:[%s7510_s7] sm:$0xff] }
0x1800   :  { %v1842_v14 = vmul.f32 %v1840_v12, %v1836_v50 }
0x185d   :  { %v1745_v49 = vpop.f32.mrf.mxu0  ;;  %v1845_v52 = vpop.permute.xlu0 %1844 }
0x185e   :  { %v1749_v53 = vrot.slane %v1745_v49, 4  ;;  %v1847_v43 = vmul.f32 %v1845_v52, %v1836_v50 }
0x1860   :  { %v1751_v27 = vadd.f32 %v1749_v53, %v1725_v36  ;;  %1849 = vrot.lane.b32.xlu1 %v1847_v43, %s5961_s3 }
0x1862   :  { %5550 = vtanh.f32 %v1751_v27  ;;  %v5289_v62 = vmul.f32 -1.442695, %v1751_v27 }
0x1864   :  { %5552 = vpow2.f32 %v5289_v62 }
0x1868   :  { %v5551_v54 = vpop.eup %5550 }
0x1869   :  { %1777 = vrot.lane.b32.xlu0 %v5551_v54, %s5961_s3 }
0x186a   :  { %v5553_v1 = vpop.eup %5552 }
0x186b   :  { %v1755_v2 = vadd.f32 1.0, %v5553_v1 }
0x186d   :  { %5554 = vrcp.f32 %v1755_v2  ;;  %v1767_v24 = vand.u32 2147483648, %v1755_v2  ;;  %vm1761_vm12 = vweird.f32 %v1755_v2  ;;  %v1765_v25 = vand.u32 2147483647, %v1755_v2 }
0x186f   :  { %v1768_v32 = vor.u32 1.1754944e-38, %v1767_v24  ;;  %vm1766_vm14 = vcmp.eq.f32.partialorder %v1765_v25, 8.507059e+37 }
0x1873   :  { %v5555_v8 = vpop.eup %5554 }
0x1874   :  { %v1757_v9 = vmul.f32 %v5555_v8, %v1755_v2  ;;  %vm1762_vm11 = vweird.f32 %v5555_v8 }
0x1875   :  { %vm1763_vm13 = vmor %vm1761_vm12, %vm1762_vm11 }
0x1876   :  { %v1758_v46 = vsub.f32 1.0, %v1757_v9 }
0x1878   :  { %v1759_v7 = vmul.f32 %v5555_v8, %v1758_v46  ;;  %v1869_v46 = vld [vmem:[#allocation2 + $0x10] sm:$0xf] }
0x187a   :  { %v1760_v3 = vadd.f32 %v5555_v8, %v1759_v7 }
0x187c   :  { %v1764_v33 = vsel %vm1763_vm13, %v5555_v8, %v1760_v3 }
0x187d   :  { %v1769_v35 = vsel %vm1766_vm14, %v1768_v32, %v1764_v33 }
0x187e   :  { %v1775_v23 = vmul.f32 %v1773_v56, %v1769_v35 }
0x18d2   :  { %v1850_v51 = vpop.permute.xlu1 %1849 }
0x18d3   :  { %v6632_v15 = vadd.f32 %v1850_v51, %v1842_v14 }
0x18d5   :  { %5556 = vtanh.f32 %v6632_v15  ;;  %v1986_v25 = vrot.slane %v6632_v15, 4 }
0x18db   :  { %v5557_v19 = vpop.eup %5556  ;;  %v1778_v0 = vpop.permute.xlu0 %1777 }
0x18dc   :  { %1855 = vrot.lane.b32.xlu2 %v5557_v19, %s5961_s3  ;;  %v1780_v5 = vmul.f32 %v1778_v0, %v1769_v35 }
0x18e4   :  { %1782 = vrot.lane.b32.xlu2 %v1780_v5, %s5961_s3 }
0x1936   :  { %v1856_v10 = vpop.permute.xlu2 %1855 }
0x1937   :  { %v6637_v38 = vmul.f32 %v1856_v10, %v1836_v50 }
0x1939   :  { %1937 = vrot.lane.b32.xlu1 %v6637_v38, %s5962_s4 }
0x193e   :  { %v1783_v42 = vpop.permute.xlu2 %1782 }
0x193f   :  { %v6642_v57 = vadd.f32 %v1783_v42, %v1775_v23 }
0x1941   :  { %5558 = vtanh.f32 %v6642_v57 }
0x1947   :  { %v5559_v58 = vpop.eup %5558 }
0x1948   :  { %1788 = vrot.lane.b32.xlu0 %v5559_v58, %s5961_s3 }
0x19ab   :  { %v1938_v59 = vpop.permute.xlu1 %1937 }
0x19ac   :  { %5294 = vmatmul.msk.f32.vlgmr.msrb.gmra.mxu3 %vm427_vm15, %v1938_v59 }
0x19ad   :  { %2533 = vmatpush.msrb.mxu3 %v6650_v6 }
0x19af   :  { %2534 = vmatpush.msrb.mxu3 %v6481_v31  ;;  %v6664_v31 = vld [vmem:[%s7510_s7 + $0x18] sm:$0xff] }
0x19b1   :  { %2535 = vmatpush.msrb.mxu3 %v6487_v41  ;;  %v6670_v41 = vld [vmem:[%s7510_s7 + $0x10] sm:$0xff] }
0x19b3   :  { %2536 = vmatpush.msrb.mxu3 %v6493_v28  ;;  %v6676_v28 = vld [vmem:[%s7510_s7 + $0x8] sm:$0xff] }
0x19ba   :  { %v1789_v34 = vpop.permute.xlu0 %1788 }
0x19bb   :  { %v6656_v55 = vmul.f32 %v1789_v34, %v1769_v35 }
0x19bd   :  { %v1870_v45 = vrot.slane %v6656_v55, 4 }
0x19bf   :  { %1871 = vrot.lane.b32.xlu1 %v1870_v45, %s5962_s4 }
0x1a2f   :  { %v1958_v61 = vpop.f32.mrf.mxu3 }
0x1a30   :  { %v1962_v47 = vrot.slane %v1958_v61, 4 }
0x1a31   :  { %v1872_v48 = vpop.permute.xlu1 %1871 }
0x1a32   :  { %v1964_v17 = vadd.f32 %v1962_v47, %v1936_v4  ;;  %5292 = vmatmul.msk.f32.vlgmr.msrb.gmra.mxu1 %vm427_vm15, %v1872_v48 }
0x1a33   :  { %2467 = vmatpush.msrb.mxu1 %v6664_v31 }
0x1a34   :  { %5560 = vtanh.f32 %v1964_v17  ;;  %v5295_v50 = vmul.f32 -1.442695, %v1964_v17 }
0x1a35   :  { %2468 = vmatpush.msrb.mxu1 %v6670_v41 }
0x1a36   :  { %5562 = vpow2.f32 %v5295_v50 }
0x1a37   :  { %2469 = vmatpush.msrb.mxu1 %v6676_v28 }
0x1a39   :  { %2470 = vmatpush.msrb.mxu1 %v6682_v40 }
0x1a3a   :  { %v5561_v49 = vpop.eup %5560 }
0x1a3b   :  { %1990 = vrot.lane.b32.xlu2 %v5561_v49, %s5961_s3 }
0x1a3c   :  { %v5563_v52 = vpop.eup %5562 }
0x1a3d   :  { %v1968_v53 = vadd.f32 1.0, %v5563_v52  ;;  %v1917_v52 = vrot.slane %v6642_v57, 4  ;;  %v5942_v57 = vld [vmem:[%s7509_s8 + $0x8] sm:$0xff] }
0x1a3f   :  { %5564 = vrcp.f32 %v1968_v53  ;;  %v1980_v1 = vand.u32 2147483648, %v1968_v53  ;;  %vm1974_vm4 = vweird.f32 %v1968_v53  ;;  %v1978_v2 = vand.u32 2147483647, %v1968_v53 }
0x1a41   :  { %v1981_v9 = vor.u32 1.1754944e-38, %v1980_v1  ;;  %vm1979_vm6 = vcmp.eq.f32.partialorder %v1978_v2, 8.507059e+37  ;;  %v5943_v1 = vld [vmem:[%s7509_s8] sm:$0xff] }
0x1a45   :  { %v5565_v43 = vpop.eup %5564 }
0x1a46   :  { %v1970_v36 = vmul.f32 %v5565_v43, %v1968_v53  ;;  %vm1975_vm3 = vweird.f32 %v5565_v43 }
0x1a47   :  { %vm1976_vm5 = vmor %vm1974_vm4, %vm1975_vm3 }
0x1a48   :  { %v1971_v27 = vsub.f32 1.0, %v1970_v36 }
0x1a4a   :  { %v1972_v54 = vmul.f32 %v5565_v43, %v1971_v27 }
0x1a4c   :  { %v1973_v62 = vadd.f32 %v5565_v43, %v1972_v54 }
0x1a4e   :  { %v1977_v8 = vsel %vm1976_vm5, %v5565_v43, %v1973_v62  ;;  %v5941_v62 = vld [vmem:[%s7509_s8 + $0x10] sm:$0xff]  ;;  %s5963_s8 = smov 96  }
0x1a4f   :  { %v1982_v12 = vsel %vm1979_vm6, %v1981_v9, %v1977_v8 }
0x1a50   :  { %v1988_v32 = vmul.f32 %v1986_v25, %v1982_v12 }
0x1a95   :  { %v1991_v14 = vpop.permute.xlu2 %1990 }
0x1a96   :  { %v1993_v51 = vmul.f32 %v1991_v14, %v1982_v12 }
0x1a98   :  { %1995 = vrot.lane.b32.xlu0 %v1993_v51, %s5961_s3 }
0x1aaf   :  { %v1892_v7 = vpop.f32.mrf.mxu1 }
0x1ab0   :  { %v1895_v3 = vadd.f32 %v1892_v7, %v1869_v46 }
0x1ab2   :  { %5566 = vtanh.f32 %v1895_v3  ;;  %v5293_v24 = vmul.f32 -1.442695, %v1895_v3 }
0x1ab4   :  { %5568 = vpow2.f32 %v5293_v24 }
0x1ab8   :  { %v5567_v19 = vpop.eup %5566 }
0x1ab9   :  { %1921 = vrot.lane.b32.xlu1 %v5567_v19, %s5961_s3 }
0x1aba   :  { %v5569_v33 = vpop.eup %5568 }
0x1abb   :  { %v1899_v35 = vadd.f32 1.0, %v5569_v33 }
0x1abd   :  { %v1911_v34 = vand.u32 2147483648, %v1899_v35  ;;  %vm1905_vm8 = vweird.f32 %v1899_v35  ;;  %v1909_v15 = vand.u32 2147483647, %v1899_v35 }
0x1abf   :  { %v1912_v61 = vor.u32 1.1754944e-38, %v1911_v34  ;;  %vm1910_vm10 = vcmp.eq.f32.partialorder %v1909_v15, 8.507059e+37 }
0x1b0a   :  { %v1996_v0 = vpop.permute.xlu0 %1995 }
0x1b0b   :  { %v6689_v5 = vadd.f32 %v1996_v0, %v1988_v32 }
0x1b0d   :  { %5570 = vtanh.f32 %v6689_v5  ;;  %v2130_v34 = vrot.slane %v6689_v5, 4 }
0x1b0e   :  { %5572 = vrcp.f32 %v1899_v35 }
0x1b13   :  { %v5571_v10 = vpop.eup %5570 }
0x1b14   :  { %2001 = vrot.lane.b32.xlu2 %v5571_v10, %s5961_s3  ;;  %v5573_v56 = vpop.eup %5572 }
0x1b15   :  { %v1901_v23 = vmul.f32 %v5573_v56, %v1899_v35  ;;  %vm1906_vm7 = vweird.f32 %v5573_v56 }
0x1b16   :  { %vm1907_vm9 = vmor %vm1905_vm8, %vm1906_vm7 }
0x1b17   :  { %v1902_v42 = vsub.f32 1.0, %v1901_v23 }
0x1b19   :  { %v1903_v58 = vmul.f32 %v5573_v56, %v1902_v42  ;;  %v2015_v42 = vld [vmem:[#allocation2 + $0x10] sm:$0xf0] }
0x1b1b   :  { %v1904_v59 = vadd.f32 %v5573_v56, %v1903_v58 }
0x1b1d   :  { %v1908_v45 = vsel %vm1907_vm9, %v5573_v56, %v1904_v59 }
0x1b1e   :  { %v1913_v4 = vsel %vm1910_vm10, %v1912_v61, %v1908_v45 }
0x1b1f   :  { %v1919_v53 = vmul.f32 %v1917_v52, %v1913_v4 }
0x1b2b   :  { %v1922_v47 = vpop.permute.xlu1 %1921 }
0x1b2c   :  { %v1924_v48 = vmul.f32 %v1922_v47, %v1913_v4 }
0x1b2e   :  { %1926 = vrot.lane.b32.xlu0 %v1924_v48, %s5961_s3 }
0x1b6e   :  { %v2002_v17 = vpop.permute.xlu2 %2001 }
0x1b6f   :  { %v6694_v49 = vmul.f32 %v2002_v17, %v1982_v12 }
0x1b71   :  { %v2083_v50 = vrot.slane %v6694_v49, 4 }
0x1b73   :  { %2084 = vrot.lane.b32.xlu1 %v2083_v50, %s5962_s4 }
0x1ba0   :  { %v1927_v43 = vpop.permute.xlu0 %1926 }
0x1ba1   :  { %v6699_v36 = vadd.f32 %v1927_v43, %v1919_v53 }
0x1ba3   :  { %5574 = vtanh.f32 %v6699_v36 }
0x1ba9   :  { %v5575_v27 = vpop.eup %5574 }
0x1baa   :  { %1932 = vrot.lane.b32.xlu2 %v5575_v27, %s5961_s3 }
0x1be5   :  { %v2085_v54 = vpop.permute.xlu1 %2084 }
0x1be6   :  { %5298 = vmatmul.msk.f32.vlgmr.msra.gmra.mxu2 %vm427_vm15, %v2085_v54 }
0x1be7   :  { %2680 = vmatpush.msra.mxu2 %v6650_v6  ;;  %v2082_v6 = vld [vmem:[#allocation2 + $0x68] sm:$0xf] }
0x1be9   :  { %2681 = vmatpush.msra.mxu2 %v5941_v62 }
0x1beb   :  { %2682 = vmatpush.msra.mxu2 %v5942_v57 }
0x1bed   :  { %2683 = vmatpush.msra.mxu2 %v5943_v1 }
0x1c04   :  { %v1933_v2 = vpop.permute.xlu2 %1932 }
0x1c05   :  { %v1935_v8 = vmul.f32 %v1933_v2, %v1913_v4 }
0x1c07   :  { %2006 = vrot.lane.b32.xlu0 %v1935_v8, %s5962_s4 }
0x1c69   :  { %v2105_v9 = vpop.f32.mrf.mxu2 }
0x1c6a   :  { %v2108_v12 = vadd.f32 %v2105_v9, %v2082_v6 }
0x1c6c   :  { %5576 = vtanh.f32 %v2108_v12  ;;  %v5299_v46 = vmul.f32 -1.442695, %v2108_v12  ;;  %v2063_v12 = vrot.slane %v6699_v36, 4 }
0x1c6e   :  { %5578 = vpow2.f32 %v5299_v46 }
0x1c72   :  { %v5577_v14 = vpop.eup %5576 }
0x1c73   :  { %2134 = vrot.lane.b32.xlu1 %v5577_v14, %s5961_s3 }
0x1c74   :  { %v5579_v7 = vpop.eup %5578 }
0x1c75   :  { %v2112_v3 = vadd.f32 1.0, %v5579_v7 }
0x1c77   :  { %5580 = vrcp.f32 %v2112_v3  ;;  %v2124_v0 = vand.u32 2147483648, %v2112_v3  ;;  %vm2118_vm12 = vweird.f32 %v2112_v3 }
0x1c79   :  { %v6716_v51 = vpop.permute.xlu0 %2006  ;;  %v2125_v35 = vor.u32 1.1754944e-38, %v2124_v0 }
0x1c7a   :  { %5296 = vmatmul.msk.f32.vlgmr.msra.gmra.mxu0 %vm427_vm15, %v6716_v51 }
0x1c7b   :  { %2610 = vmatpush.msra.mxu0 %v6664_v31  ;;  %v2122_v31 = vand.u32 2147483647, %v2112_v3 }
0x1c7d   :  { %2611 = vmatpush.msra.mxu0 %v6670_v41  ;;  %v5581_v19 = vpop.eup %5580  ;;  %vm2123_vm14 = vcmp.eq.f32.partialorder %v2122_v31, 8.507059e+37  ;;  %v2226_v31 = vld [vmem:[#allocation2 + $0x18] sm:$0xf0] }
0x1c7e   :  { %v2114_v24 = vmul.f32 %v5581_v19, %v2112_v3  ;;  %vm2119_vm11 = vweird.f32 %v5581_v19 }
0x1c7f   :  { %2612 = vmatpush.msra.mxu0 %v6676_v28  ;;  %vm2120_vm13 = vmor %vm2118_vm12, %vm2119_vm11 }
0x1c80   :  { %v2115_v25 = vsub.f32 1.0, %v2114_v24 }
0x1c81   :  { %2613 = vmatpush.msra.mxu0 %v6682_v40 }
0x1c82   :  { %v2116_v33 = vmul.f32 %v5581_v19, %v2115_v25 }
0x1c84   :  { %v2117_v32 = vadd.f32 %v5581_v19, %v2116_v33 }
0x1c86   :  { %v2121_v41 = vsel %vm2120_vm13, %v5581_v19, %v2117_v32 }
0x1c87   :  { %v2126_v40 = vsel %vm2123_vm14, %v2125_v35, %v2121_v41 }
0x1c88   :  { %v2132_v15 = vmul.f32 %v2130_v34, %v2126_v40 }
0x1ce5   :  { %v2135_v28 = vpop.permute.xlu1 %2134 }
0x1ce6   :  { %v2137_v10 = vmul.f32 %v2135_v28, %v2126_v40 }
0x1ce8   :  { %2139 = vrot.lane.b32.xlu2 %v2137_v10, %s5961_s3 }
0x1cf7   :  { %v2035_v56 = vpop.f32.mrf.mxu0 }
0x1cf8   :  { %v2039_v23 = vrot.slane %v2035_v56, 4 }
0x1cfa   :  { %v2041_v58 = vadd.f32 %v2039_v23, %v2015_v42 }
0x1cfc   :  { %5582 = vtanh.f32 %v2041_v58  ;;  %v5297_v47 = vmul.f32 -1.442695, %v2041_v58 }
0x1d02   :  { %v5583_v59 = vpop.eup %5582 }
0x1d03   :  { %2067 = vrot.lane.b32.xlu0 %v5583_v59, %s5961_s3  ;;  %v2159_v59 = vld [vmem:[#allocation2 + $0x60] sm:$0xf] }
0x1d42   :  { %v2140_v45 = vpop.permute.xlu2 %2139 }
0x1d43   :  { %v6727_v61 = vadd.f32 %v2140_v45, %v2132_v15 }
0x1d45   :  { %5584 = vtanh.f32 %v6727_v61 }
0x1d46   :  { %5586 = vpow2.f32 %v5297_v47 }
0x1d4b   :  { %v5585_v4 = vpop.eup %5584 }
0x1d4c   :  { %2145 = vrot.lane.b32.xlu1 %v5585_v4, %s5961_s3  ;;  %v5587_v48 = vpop.eup %5586 }
0x1d4d   :  { %v2045_v17 = vadd.f32 1.0, %v5587_v48 }
0x1d4f   :  { %5588 = vrcp.f32 %v2045_v17  ;;  %v2057_v5 = vand.u32 2147483648, %v2045_v17  ;;  %vm2051_vm4 = vweird.f32 %v2045_v17  ;;  %v2055_v54 = vand.u32 2147483647, %v2045_v17 }
0x1d51   :  { %v2058_v57 = vor.u32 1.1754944e-38, %v2057_v5  ;;  %vm2056_vm6 = vcmp.eq.f32.partialorder %v2055_v54, 8.507059e+37 }
0x1d55   :  { %v5589_v50 = vpop.eup %5588 }
0x1d56   :  { %v2047_v52 = vmul.f32 %v5589_v50, %v2045_v17  ;;  %vm2052_vm3 = vweird.f32 %v5589_v50 }
0x1d57   :  { %vm2053_vm5 = vmor %vm2051_vm4, %vm2052_vm3 }
0x1d58   :  { %v2048_v53 = vsub.f32 1.0, %v2047_v52 }
0x1d5a   :  { %v2049_v43 = vmul.f32 %v5589_v50, %v2048_v53 }
0x1d5c   :  { %v2050_v27 = vadd.f32 %v5589_v50, %v2049_v43 }
0x1d5e   :  { %v2054_v62 = vsel %vm2053_vm5, %v5589_v50, %v2050_v27 }
0x1d5f   :  { %v2059_v2 = vsel %vm2056_vm6, %v2058_v57, %v2054_v62 }
0x1d60   :  { %v2065_v14 = vmul.f32 %v2063_v12, %v2059_v2 }
0x1d75   :  { %v2068_v1 = vpop.permute.xlu0 %2067 }
0x1d76   :  { %v2070_v8 = vmul.f32 %v2068_v1, %v2059_v2 }
0x1d78   :  { %2072 = vrot.lane.b32.xlu2 %v2070_v8, %s5961_s3 }
0x1dbe   :  { %v2146_v6 = vpop.permute.xlu1 %2145 }
0x1dbf   :  { %v6732_v9 = vmul.f32 %v2146_v6, %v2126_v40 }
0x1dc1   :  { %2227 = vrot.lane.b32.xlu0 %v6732_v9, %s5962_s4 }
0x1dd2   :  { %v2073_v46 = vpop.permute.xlu2 %2072 }
0x1dd3   :  { %v6737_v7 = vadd.f32 %v2073_v46, %v2065_v14 }
0x1dd5   :  { %5590 = vtanh.f32 %v6737_v7 }
0x1ddb   :  { %v5591_v3 = vpop.eup %5590 }
0x1ddc   :  { %2078 = vrot.lane.b32.xlu1 %v5591_v3, %s5961_s3 }
0x1e33   :  { %v2228_v19 = vpop.permute.xlu0 %2227 }
0x1e34   :  { %5302 = vmatmul.msk.f32.vlgmr.msra.gmra.mxu3 %vm427_vm15, %v2228_v19 }
0x1e4e   :  { %v2079_v24 = vpop.permute.xlu1 %2078 }
0x1e4f   :  { %v6742_v25 = vmul.f32 %v2079_v24, %v2059_v2 }
0x1e51   :  { %v2160_v33 = vrot.slane %v6742_v25, 4 }
0x1e53   :  { %2161 = vrot.lane.b32.xlu2 %v2160_v33, %s5962_s4  ;;  %v2276_v33 = vrot.slane %v6727_v61, 4 }
0x1ead   :  { %v2162_v36 = vpop.permute.xlu2 %2161 }
0x1eae   :  { %5300 = vmatmul.msk.f32.vlgmr.msra.gmra.mxu1 %vm427_vm15, %v2162_v36 }
0x1eb7   :  { %v2248_v32 = vpop.f32.mrf.mxu3 }
0x1eb8   :  { %v2252_v0 = vrot.slane %v2248_v32, 4 }
0x1eba   :  { %v2254_v41 = vadd.f32 %v2252_v0, %v2226_v31 }
0x1ebc   :  { %5592 = vtanh.f32 %v2254_v41  ;;  %v5303_v28 = vmul.f32 -1.442695, %v2254_v41  ;;  %v2207_v41 = vrot.slane %v6737_v7, 4 }
0x1ebe   :  { %5594 = vpow2.f32 %v5303_v28 }
0x1ec2   :  { %v5593_v35 = vpop.eup %5592 }
0x1ec3   :  { %2280 = vrot.lane.b32.xlu0 %v5593_v35, %s5961_s3 }
0x1ec4   :  { %v5595_v40 = vpop.eup %5594 }
0x1ec5   :  { %v2258_v10 = vadd.f32 1.0, %v5595_v40 }
0x1ec7   :  { %5596 = vrcp.f32 %v2258_v10  ;;  %v2270_v47 = vand.u32 2147483648, %v2258_v10  ;;  %vm2264_vm8 = vweird.f32 %v2258_v10  ;;  %v2268_v4 = vand.u32 2147483647, %v2258_v10 }
0x1ec9   :  { %v2271_v17 = vor.u32 1.1754944e-38, %v2270_v47  ;;  %vm2269_vm10 = vcmp.eq.f32.partialorder %v2268_v4, 8.507059e+37 }
0x1ecd   :  { %v5597_v56 = vpop.eup %5596 }
0x1ece   :  { %v2260_v23 = vmul.f32 %v5597_v56, %v2258_v10  ;;  %vm2265_vm7 = vweird.f32 %v5597_v56 }
0x1ecf   :  { %vm2266_vm9 = vmor %vm2264_vm8, %vm2265_vm7 }
0x1ed0   :  { %v2261_v42 = vsub.f32 1.0, %v2260_v23 }
0x1ed2   :  { %v2262_v58 = vmul.f32 %v5597_v56, %v2261_v42 }
0x1ed4   :  { %v2263_v45 = vadd.f32 %v5597_v56, %v2262_v58 }
0x1ed6   :  { %v2267_v48 = vsel %vm2266_vm9, %v5597_v56, %v2263_v45 }
0x1ed7   :  { %v2272_v53 = vsel %vm2269_vm10, %v2271_v17, %v2267_v48 }
0x1ed8   :  { %v2278_v36 = vmul.f32 %v2276_v33, %v2272_v53 }
0x1f2b   :  { %v2182_v34 = vpop.f32.mrf.mxu1 }
0x1f2c   :  { %v2185_v15 = vadd.f32 %v2182_v34, %v2159_v59  ;;  %v2372_v34 = vld [vmem:[#allocation2 + $0x18] sm:$0xf] }
0x1f2e   :  { %5598 = vtanh.f32 %v2185_v15  ;;  %v5301_v27 = vmul.f32 -1.442695, %v2185_v15 }
0x1f30   :  { %5600 = vpow2.f32 %v5301_v27 }
0x1f34   :  { %v5599_v50 = vpop.eup %5598 }
0x1f35   :  { %v2281_v52 = vpop.permute.xlu0 %2280  ;;  %2211 = vrot.lane.b32.xlu2 %v5599_v50, %s5961_s3 }
0x1f36   :  { %v2283_v43 = vmul.f32 %v2281_v52, %v2272_v53  ;;  %v5601_v5 = vpop.eup %5600 }
0x1f37   :  { %v2189_v54 = vadd.f32 1.0, %v5601_v5 }
0x1f38   :  { %2285 = vrot.lane.b32.xlu1 %v2283_v43, %s5961_s3 }
0x1f39   :  { %5602 = vrcp.f32 %v2189_v54  ;;  %v2201_v6 = vand.u32 2147483648, %v2189_v54  ;;  %vm2195_vm12 = vweird.f32 %v2189_v54  ;;  %v2199_v12 = vand.u32 2147483647, %v2189_v54 }
0x1f3b   :  { %v2202_v46 = vor.u32 1.1754944e-38, %v2201_v6  ;;  %vm2200_vm14 = vcmp.eq.f32.partialorder %v2199_v12, 8.507059e+37 }
0x1f3f   :  { %v5603_v62 = vpop.eup %5602 }
0x1f40   :  { %v2191_v57 = vmul.f32 %v5603_v62, %v2189_v54  ;;  %vm2196_vm11 = vweird.f32 %v5603_v62 }
0x1f41   :  { %vm2197_vm13 = vmor %vm2195_vm12, %vm2196_vm11 }
0x1f42   :  { %v2192_v1 = vsub.f32 1.0, %v2191_v57 }
0x1f44   :  { %v2193_v2 = vmul.f32 %v5603_v62, %v2192_v1 }
0x1f46   :  { %v2194_v8 = vadd.f32 %v5603_v62, %v2193_v2 }
0x1f48   :  { %v2198_v14 = vsel %vm2197_vm13, %v5603_v62, %v2194_v8 }
0x1f49   :  { %v2203_v19 = vsel %vm2200_vm14, %v2202_v46, %v2198_v14  ;;  %v2305_v14 = vld [vmem:[#allocation2 + $0x60] sm:$0xf0] }
0x1f4a   :  { %v2209_v35 = vmul.f32 %v2207_v41, %v2203_v19 }
0x1f8f   :  { %v2212_v3 = vpop.permute.xlu2 %2211 }
0x1f90   :  { %v2214_v24 = vmul.f32 %v2212_v3, %v2203_v19 }
0x1f92   :  { %2216 = vrot.lane.b32.xlu1 %v2214_v24, %s5961_s3 }
0x1faa   :  { %v2286_v32 = vpop.permute.xlu1 %2285 }
0x1fab   :  { %v6752_v0 = vadd.f32 %v2286_v32, %v2278_v36 }
0x1fad   :  { %5604 = vtanh.f32 %v6752_v0 }
0x1fb3   :  { %v5605_v31 = vpop.eup %5604 }
0x1fb4   :  { %2291 = vrot.lane.b32.xlu0 %v5605_v31, %s5961_s3  ;;  %v2420_v31 = vrot.slane %v6752_v0, 4 }
0x2004   :  { %v2217_v28 = vpop.permute.xlu1 %2216 }
0x2005   :  { %v6757_v40 = vadd.f32 %v2217_v28, %v2209_v35 }
0x2007   :  { %5606 = vtanh.f32 %v6757_v40 }
0x200d   :  { %v5607_v10 = vpop.eup %5606 }
0x200e   :  { %2222 = vrot.lane.b32.xlu0 %v5607_v10, %s5961_s3 }
0x2026   :  { %v2292_v61 = vpop.permute.xlu0 %2291 }
0x2027   :  { %v6761_v56 = vmul.f32 %v2292_v61, %v2272_v53 }
0x2029   :  { %v2373_v23 = vrot.slane %v6761_v56, 4 }
0x202b   :  { %2374 = vrot.lane.b32.xlu2 %v2373_v23, %s5962_s4 }
0x2080   :  { %v2223_v42 = vpop.permute.xlu0 %2222 }
0x2081   :  { %v2225_v58 = vmul.f32 %v2223_v42, %v2203_v19 }
0x2083   :  { %2296 = vrot.lane.b32.xlu1 %v2225_v58, %s5962_s4 }
0x2085   :  { %v2375_v7 = vpop.permute.xlu2 %2374 }
0x2086   :  { %5306 = vmatmul.msk.f32.vlgmr.msrb.gmra.mxu2 %vm427_vm15, %v2375_v7 }
0x20f5   :  { %v6767_v59 = vpop.permute.xlu1 %2296 }
0x20f6   :  { %5304 = vmatmul.msk.f32.vlgmr.msrb.gmra.mxu0 %vm427_vm15, %v6767_v59 }
0x2109   :  { %v2395_v15 = vpop.f32.mrf.mxu2 }
0x210a   :  { %v2398_v45 = vadd.f32 %v2395_v15, %v2372_v34 }
0x210c   :  { %5608 = vtanh.f32 %v2398_v45  ;;  %v5307_v4 = vmul.f32 -1.442695, %v2398_v45 }
0x210e   :  { %5610 = vpow2.f32 %v5307_v4 }
0x2112   :  { %v5609_v47 = vpop.eup %5608 }
0x2113   :  { %2424 = vrot.lane.b32.xlu2 %v5609_v47, %s5961_s3 }
0x2114   :  { %v5611_v48 = vpop.eup %5610 }
0x2115   :  { %v2402_v17 = vadd.f32 1.0, %v5611_v48 }
0x2117   :  { %5612 = vrcp.f32 %v2402_v17  ;;  %v2414_v5 = vand.u32 2147483648, %v2402_v17  ;;  %vm2408_vm4 = vweird.f32 %v2402_v17  ;;  %v2412_v54 = vand.u32 2147483647, %v2402_v17 }
0x2119   :  { %v2415_v57 = vor.u32 1.1754944e-38, %v2414_v5  ;;  %vm2413_vm6 = vcmp.eq.f32.partialorder %v2412_v54, 8.507059e+37 }
0x211d   :  { %v5613_v50 = vpop.eup %5612 }
0x211e   :  { %v2404_v52 = vmul.f32 %v5613_v50, %v2402_v17  ;;  %vm2409_vm3 = vweird.f32 %v5613_v50  ;;  %v2353_v17 = vrot.slane %v6757_v40, 4 }
0x211f   :  { %vm2410_vm5 = vmor %vm2408_vm4, %vm2409_vm3 }
0x2120   :  { %v2405_v53 = vsub.f32 1.0, %v2404_v52 }
0x2122   :  { %v2406_v43 = vmul.f32 %v5613_v50, %v2405_v53 }
0x2124   :  { %v2407_v27 = vadd.f32 %v5613_v50, %v2406_v43 }
0x2126   :  { %v2411_v62 = vsel %vm2410_vm5, %v5613_v50, %v2407_v27 }
0x2127   :  { %v2416_v2 = vsel %vm2413_vm6, %v2415_v57, %v2411_v62 }
0x2128   :  { %v2422_v41 = vmul.f32 %v2420_v31, %v2416_v2 }
0x216d   :  { %v2425_v1 = vpop.permute.xlu2 %2424 }
0x216e   :  { %v2427_v8 = vmul.f32 %v2425_v1, %v2416_v2  ;;  %v2516_v1 = vld [vmem:[#allocation2] sm:$0xf0] }
0x2170   :  { %2429 = vrot.lane.b32.xlu0 %v2427_v8, %s5961_s3 }
0x2173   :  { %v2325_v6 = vpop.f32.mrf.mxu0 }
0x2174   :  { %v2329_v12 = vrot.slane %v2325_v6, 4 }
0x2176   :  { %v2331_v46 = vadd.f32 %v2329_v12, %v2305_v14 }
0x2178   :  { %5614 = vtanh.f32 %v2331_v46  ;;  %v5305_v19 = vmul.f32 -1.442695, %v2331_v46 }
0x217a   :  { %5616 = vpow2.f32 %v5305_v19 }
0x217e   :  { %v5615_v3 = vpop.eup %5614 }
0x217f   :  { %2357 = vrot.lane.b32.xlu1 %v5615_v3, %s5961_s3 }
0x2180   :  { %v5617_v24 = vpop.eup %5616 }
0x2181   :  { %v2335_v33 = vadd.f32 1.0, %v5617_v24 }
0x2183   :  { %5618 = vrcp.f32 %v2335_v33  ;;  %v2347_v58 = vand.u32 2147483648, %v2335_v33  ;;  %vm2341_vm8 = vweird.f32 %v2335_v33  ;;  %v2345_v7 = vand.u32 2147483647, %v2335_v33 }
0x2185   :  { %v2348_v15 = vor.u32 1.1754944e-38, %v2347_v58  ;;  %vm2346_vm10 = vcmp.eq.f32.partialorder %v2345_v7, 8.507059e+37 }
0x2189   :  { %v5619_v36 = vpop.eup %5618 }
0x218a   :  { %v2337_v32 = vmul.f32 %v5619_v36, %v2335_v33  ;;  %vm2342_vm7 = vweird.f32 %v5619_v36 }
0x218b   :  { %vm2343_vm9 = vmor %vm2341_vm8, %vm2342_vm7 }
0x218c   :  { %v2338_v28 = vsub.f32 1.0, %v2337_v32 }
0x218e   :  { %v2339_v61 = vmul.f32 %v5619_v36, %v2338_v28 }
0x2190   :  { %v2340_v23 = vadd.f32 %v5619_v36, %v2339_v61 }
0x2192   :  { %v2344_v34 = vsel %vm2343_vm9, %v5619_v36, %v2340_v23 }
0x2193   :  { %v2349_v45 = vsel %vm2346_vm10, %v2348_v15, %v2344_v34 }
0x2194   :  { %v2355_v50 = vmul.f32 %v2353_v17, %v2349_v45 }
0x21e2   :  { %v2430_v35 = vpop.permute.xlu0 %2429 }
0x21e3   :  { %v6775_v10 = vadd.f32 %v2430_v35, %v2422_v41 }
0x21e5   :  { %5620 = vtanh.f32 %v6775_v10 }
0x21eb   :  { %v5621_v42 = vpop.eup %5620 }
0x21ec   :  { %2435 = vrot.lane.b32.xlu2 %v5621_v42, %s5961_s3  ;;  %v2449_v42 = vld [vmem:[#allocation2 + $0x78] sm:$0xf] }
0x21f1   :  { %v2358_v0 = vpop.permute.xlu1 %2357 }
0x21f2   :  { %v2360_v47 = vmul.f32 %v2358_v0, %v2349_v45  ;;  %v2566_v0 = vrot.slane %v6775_v10, 4 }
0x21f4   :  { %2362 = vrot.lane.b32.xlu0 %v2360_v47, %s5961_s3 }
0x2246   :  { %v2436_v4 = vpop.permute.xlu2 %2435 }
0x2247   :  { %v6780_v48 = vmul.f32 %v2436_v4, %v2416_v2 }
0x2249   :  { %2517 = vrot.lane.b32.xlu1 %v6780_v48, %s5962_s4 }
0x2266   :  { %v2363_v52 = vpop.permute.xlu0 %2362 }
0x2267   :  { %v6785_v53 = vadd.f32 %v2363_v52, %v2355_v50 }
0x2269   :  { %5622 = vtanh.f32 %v6785_v53 }
0x226f   :  { %v5623_v43 = vpop.eup %5622 }
0x2270   :  { %2368 = vrot.lane.b32.xlu2 %v5623_v43, %s5961_s3 }
0x22bb   :  { %v2518_v27 = vpop.permute.xlu1 %2517 }
0x22bc   :  { %5310 = vmatmul.msk.f32.vlgmr.msrb.gmra.mxu3 %vm427_vm15, %v2518_v27 }
0x22ca   :  { %v2369_v5 = vpop.permute.xlu2 %2368 }
0x22cb   :  { %v6790_v54 = vmul.f32 %v2369_v5, %v2349_v45 }
0x22cd   :  { %v2450_v62 = vrot.slane %v6790_v54, 4 }
0x22cf   :  { %2451 = vrot.lane.b32.xlu0 %v2450_v62, %s5962_s4 }
0x233f   :  { %v2538_v40 = vpop.f32.mrf.mxu3 }
0x2340   :  { %v2542_v57 = vrot.slane %v2538_v40, 4 }
0x2341   :  { %v2452_v2 = vpop.permute.xlu0 %2451 }
0x2342   :  { %v2544_v8 = vadd.f32 %v2542_v57, %v2516_v1  ;;  %5308 = vmatmul.msk.f32.vlgmr.msrb.gmra.mxu1 %vm427_vm15, %v2452_v2 }
0x2344   :  { %5624 = vtanh.f32 %v2544_v8  ;;  %v5311_v12 = vmul.f32 -1.442695, %v2544_v8 }
0x2346   :  { %5626 = vpow2.f32 %v5311_v12 }
0x234a   :  { %v5625_v6 = vpop.eup %5624 }
0x234b   :  { %2570 = vrot.lane.b32.xlu1 %v5625_v6, %s5961_s3 }
0x234c   :  { %v5627_v14 = vpop.eup %5626 }
0x234d   :  { %v2548_v46 = vadd.f32 1.0, %v5627_v14  ;;  %v2497_v14 = vrot.slane %v6785_v53, 4 }
0x234f   :  { %5628 = vrcp.f32 %v2548_v46  ;;  %v2560_v32 = vand.u32 2147483648, %v2548_v46  ;;  %vm2554_vm12 = vweird.f32 %v2548_v46  ;;  %v2558_v31 = vand.u32 2147483647, %v2548_v46 }
0x2351   :  { %v2561_v35 = vor.u32 1.1754944e-38, %v2560_v32  ;;  %vm2559_vm14 = vcmp.eq.f32.partialorder %v2558_v31, 8.507059e+37 }
0x2355   :  { %v5629_v3 = vpop.eup %5628 }
0x2356   :  { %v2550_v19 = vmul.f32 %v5629_v3, %v2548_v46  ;;  %vm2555_vm11 = vweird.f32 %v5629_v3 }
0x2357   :  { %vm2556_vm13 = vmor %vm2554_vm12, %vm2555_vm11 }
0x2358   :  { %v2551_v24 = vsub.f32 1.0, %v2550_v19 }
0x235a   :  { %v2552_v33 = vmul.f32 %v5629_v3, %v2551_v24 }
0x235c   :  { %v2553_v36 = vadd.f32 %v5629_v3, %v2552_v33 }
0x235e   :  { %v2557_v41 = vsel %vm2556_vm13, %v5629_v3, %v2553_v36 }
0x235f   :  { %v2562_v61 = vsel %vm2559_vm14, %v2561_v35, %v2557_v41 }
0x2360   :  { %v2568_v47 = vmul.f32 %v2566_v0, %v2562_v61 }
0x23bd   :  { %v2571_v28 = vpop.permute.xlu1 %2570 }
0x23be   :  { %v2573_v23 = vmul.f32 %v2571_v28, %v2562_v61  ;;  %v2662_v28 = vld [vmem:[#allocation2] sm:$0xf] }
0x23bf   :  { %v2472_v58 = vpop.f32.mrf.mxu1 }
0x23c0   :  { %v2475_v7 = vadd.f32 %v2472_v58, %v2449_v42  ;;  %2575 = vrot.lane.b32.xlu2 %v2573_v23, %s5961_s3 }
0x23c2   :  { %5630 = vtanh.f32 %v2475_v7  ;;  %v5309_v15 = vmul.f32 -1.442695, %v2475_v7 }
0x23c4   :  { %5632 = vpow2.f32 %v5309_v15 }
0x23c8   :  { %v5631_v34 = vpop.eup %5630 }
0x23c9   :  { %2501 = vrot.lane.b32.xlu0 %v5631_v34, %s5961_s3 }
0x23ca   :  { %v5633_v45 = vpop.eup %5632 }
0x23cb   :  { %v2479_v17 = vadd.f32 1.0, %v5633_v45  ;;  %v2595_v45 = vld [vmem:[#allocation2 + $0x78] sm:$0xf0] }
0x23cd   :  { %v2491_v57 = vand.u32 2147483648, %v2479_v17  ;;  %vm2485_vm4 = vweird.f32 %v2479_v17  ;;  %v2489_v10 = vand.u32 2147483647, %v2479_v17 }
0x23cf   :  { %v2492_v2 = vor.u32 1.1754944e-38, %v2491_v57  ;;  %vm2490_vm6 = vcmp.eq.f32.partialorder %v2489_v10, 8.507059e+37 }
0x241a   :  { %v2576_v4 = vpop.permute.xlu2 %2575 }
0x241b   :  { %v6799_v50 = vadd.f32 %v2576_v4, %v2568_v47 }
0x241d   :  { %5634 = vtanh.f32 %v6799_v50 }
0x241e   :  { %5636 = vrcp.f32 %v2479_v17 }
0x2423   :  { %v5635_v52 = vpop.eup %5634 }
0x2424   :  { %2581 = vrot.lane.b32.xlu1 %v5635_v52, %s5961_s3  ;;  %v5637_v43 = vpop.eup %5636 }
0x2425   :  { %v2481_v27 = vmul.f32 %v5637_v43, %v2479_v17  ;;  %vm2486_vm3 = vweird.f32 %v5637_v43 }
0x2426   :  { %vm2487_vm5 = vmor %vm2485_vm4, %vm2486_vm3  ;;  %vm701_vm3 = vcmask 261124   ;;  %vm707_vm4 = vcmask 519424  }
0x2427   :  { %v2482_v5 = vsub.f32 1.0, %v2481_v27 }
0x2429   :  { %v2483_v62 = vmul.f32 %v5637_v43, %v2482_v5 }
0x242b   :  { %v2484_v40 = vadd.f32 %v5637_v43, %v2483_v62 }
0x242d   :  { %v2488_v1 = vsel %vm2487_vm5, %v5637_v43, %v2484_v40  ;;  %vm561_vm5 = vcmask 523524  }
0x242e   :  { %v2493_v6 = vsel %vm2490_vm6, %v2492_v2, %v2488_v1 }
0x242f   :  { %v2499_v19 = vmul.f32 %v2497_v14, %v2493_v6 }
0x243b   :  { %v2502_v8 = vpop.permute.xlu0 %2501 }
0x243c   :  { %v2504_v12 = vmul.f32 %v2502_v8, %v2493_v6 }
0x243e   :  { %2506 = vrot.lane.b32.xlu2 %v2504_v12, %s5961_s3 }
0x2496   :  { %v2582_v46 = vpop.permute.xlu1 %2581 }
0x2497   :  { %v6805_v3 = vmul.f32 %v2582_v46, %v2562_v61 }
0x2498   :  { %v2507_v24 = vpop.permute.xlu2 %2506 }
0x2499   :  { %v2663_v33 = vrot.slane %v6805_v3, 4  ;;  %v6808_v36 = vadd.f32 %v2507_v24, %v2499_v19 }
0x249b   :  { %5638 = vtanh.f32 %v6808_v36  ;;  %2664 = vrot.lane.b32.xlu0 %v2663_v33, %s5962_s4 }
0x24a1   :  { %v5639_v32 = vpop.eup %5638 }
0x24a2   :  { %2512 = vrot.lane.b32.xlu1 %v5639_v32, %s5961_s3 }
0x250d   :  { %v2665_v31 = vpop.permute.xlu0 %2664 }
0x250e   :  { %5314 = vmatmul.msk.f32.vlgmr.msra.gmra.mxu2 %vm427_vm15, %v2665_v31 }
0x2514   :  { %v2513_v53 = vpop.permute.xlu1 %2512 }
0x2515   :  { %v2515_v41 = vmul.f32 %v2513_v53, %v2493_v6 }
0x2517   :  { %2586 = vrot.lane.b32.xlu2 %v2515_v41, %s5962_s4 }
0x2571   :  { %v6815_v35 = vpop.permute.xlu2 %2586 }
0x2572   :  { %5312 = vmatmul.msk.f32.vlgmr.msra.gmra.mxu0 %vm427_vm15, %v6815_v35 }
0x2591   :  { %v2685_v61 = vpop.f32.mrf.mxu2 }
0x2592   :  { %v2688_v23 = vadd.f32 %v2685_v61, %v2662_v28  ;;  %v2710_v61 = vrot.slane %v6799_v50, 4 }
0x2594   :  { %5640 = vtanh.f32 %v2688_v23  ;;  %v5315_v58 = vmul.f32 -1.442695, %v2688_v23 }
0x2596   :  { %5642 = vpow2.f32 %v5315_v58 }
0x259a   :  { %v5641_v42 = vpop.eup %5640 }
0x259b   :  { %2714 = vrot.lane.b32.xlu0 %v5641_v42, %s5961_s3 }
0x259c   :  { %v5643_v7 = vpop.eup %5642 }
0x259d   :  { %v2692_v34 = vadd.f32 1.0, %v5643_v7 }
0x259f   :  { %5644 = vrcp.f32 %v2692_v34  ;;  %v2704_v62 = vand.u32 2147483648, %v2692_v34  ;;  %vm2698_vm8 = vweird.f32 %v2692_v34  ;;  %v2702_v40 = vand.u32 2147483647, %v2692_v34 }
0x25a1   :  { %v2705_v10 = vor.u32 1.1754944e-38, %v2704_v62  ;;  %vm2703_vm10 = vcmp.eq.f32.partialorder %v2702_v40, 8.507059e+37  ;;  %v2750_v62 = vld [vmem:[%s7514_s9 + $0x18] sm:$0xff]  ;;  %v2747_v40 = vld [vmem:[%s7514_s9] sm:$0xff] }
0x25a5   :  { %v5645_v4 = vpop.eup %5644 }
0x25a6   :  { %v2694_v52 = vmul.f32 %v5645_v4, %v2692_v34  ;;  %vm2699_vm7 = vweird.f32 %v5645_v4  ;;  %v2643_v34 = vrot.slane %v6808_v36, 4  ;;  %v2756_v36 = vld [vmem:[%s7514_s9 + $0x48] sm:$0xff] }
0x25a7   :  { %vm2700_vm9 = vmor %vm2698_vm8, %vm2699_vm7 }
0x25a8   :  { %v2695_v43 = vsub.f32 1.0, %v2694_v52  ;;  %v2751_v52 = vld [vmem:[%s7514_s9 + $0x20] sm:$0xff] }
0x25aa   :  { %v2696_v27 = vmul.f32 %v5645_v4, %v2695_v43  ;;  %v2752_v43 = vld [vmem:[%s7514_s9 + $0x28] sm:$0xff] }
0x25ac   :  { %v2697_v5 = vadd.f32 %v5645_v4, %v2696_v27 }
0x25ae   :  { %v2701_v57 = vsel %vm2700_vm9, %v5645_v4, %v2697_v5  ;;  %v2753_v4 = vld [vmem:[%s7514_s9 + $0x30] sm:$0xff] }
0x25af   :  { %v6825_v2 = vsel %vm2703_vm10, %v2705_v10, %v2701_v57  ;;  %v2749_v5 = vld [vmem:[%s7514_s9 + $0x10] sm:$0xff]  ;;  %v2748_v57 = vld [vmem:[%s7514_s9 + $0x8] sm:$0xff]  ;;  %v6945_v10 = vld [vmem:[%s7515_s11 + $0x18] sm:$0xff] }
0x25b0   :  { %v2712_v23 = vmul.f32 %v2710_v61, %v6825_v2  ;;  %2912 = vmatpush.msrb.mxu0 %v6945_v10 }
0x25ef   :  { %v2615_v15 = vpop.f32.mrf.mxu0 }
0x25f0   :  { %v2619_v0 = vrot.slane %v2615_v15, 4 }
0x25f2   :  { %v2621_v47 = vadd.f32 %v2619_v0, %v2595_v45 }
0x25f4   :  { %5646 = vtanh.f32 %v2621_v47 }
0x25fa   :  { %v5647_v17 = vpop.eup %5646 }
0x25fb   :  { %2647 = vrot.lane.b32.xlu2 %v5647_v17, %s5961_s3  ;;  %v2754_v17 = vld [vmem:[%s7514_s9 + $0x38] sm:$0xff] }
0x2603   :  { %698 = vrot.lane.b32.xlu2 %v6361_v29, %s5962_s4  ;;  %v5313_v29 = vmul.f32 -1.442695, %v2621_v47 }
0x2605   :  { %5648 = vpow2.f32 %v5313_v29  ;;  %v6957_v29 = vld [vmem:[%s7515_s11 + $0x8] sm:$0xff] }
0x260b   :  { %990 = vrot.lane.b32.xlu2 %v6428_v30, %s5962_s4  ;;  %v5649_v30 = vpop.eup %5648 }
0x260c   :  { %v2625_v6 = vadd.f32 1.0, %v5649_v30  ;;  %v6968_v30 = vld [vmem:[%s7515_s11] sm:$0xff] }
0x260d   :  { %v2715_v1 = vpop.permute.xlu0 %2714 }
0x260e   :  { %v2717_v8 = vmul.f32 %v2715_v1, %v6825_v2  ;;  %5650 = vrcp.f32 %v2625_v6  ;;  %vm2631_vm12 = vweird.f32 %v2625_v6  ;;  %v2635_v19 = vand.u32 2147483647, %v2625_v6  ;;  %v6950_v1 = vld [vmem:[%s7515_s11 + $0x10] sm:$0xff] }
0x260f   :  { %2913 = vmatpush.msrb.mxu0 %v6950_v1 }
0x2610   :  { %2719 = vrot.lane.b32.xlu1 %v2717_v8, %s5961_s3  ;;  %vm2636_vm14 = vcmp.eq.f32.partialorder %v2635_v19, 8.507059e+37 }
0x2611   :  { %2914 = vmatpush.msrb.mxu0 %v6957_v29 }
0x2613   :  { %1280 = vrot.lane.b32.xlu2 %v6525_v44, %s5962_s4  ;;  %2915 = vmatpush.msrb.mxu0 %v6968_v30 }
0x2614   :  { %v5651_v44 = vpop.eup %5650  ;;  %2916 = vmatmul.f32.vlgmr.msrb.gmra.mxu0 %v5960_v60 }
0x2615   :  { %v2627_v12 = vmul.f32 %v5651_v44, %v2625_v6  ;;  %vm2632_vm11 = vweird.f32 %v5651_v44  ;;  %3038 = vmatpush.msra.mxu0 %v6945_v10 }
0x2616   :  { %vm2633_vm13 = vmor %vm2631_vm12, %vm2632_vm11 }
0x2617   :  { %3039 = vmatpush.msra.mxu0 %v6950_v1 }
0x2619   :  { %3040 = vmatpush.msra.mxu0 %v6957_v29 }
0x261b   :  { %2155 = vrot.lane.b32.xlu2 %v6732_v9, %s5963_s8  ;;  %v2628_v9 = vsub.f32 1.0, %v2627_v12  ;;  %3041 = vmatpush.msra.mxu0 %v6968_v30 }
0x261d   :  { %v2629_v14 = vmul.f32 %v5651_v44, %v2628_v9  ;;  %3177 = vmatpush.msrb.mxu0 %v6945_v10 }
0x261f   :  { %v2630_v46 = vadd.f32 %v5651_v44, %v2629_v14  ;;  %3178 = vmatpush.msrb.mxu0 %v6950_v1 }
0x2621   :  { %3179 = vmatpush.msrb.mxu0 %v6957_v29 }
0x2623   :  { %1865 = vrot.lane.b32.xlu2 %v6637_v38, %s5963_s8  ;;  %v2637_v38 = vand.u32 2147483648, %v2625_v6  ;;  %3180 = vmatpush.msrb.mxu0 %v6968_v30 }
0x2625   :  { %v2638_v24 = vor.u32 1.1754944e-38, %v2637_v38 }
0x262b   :  { %1860 = vrot.lane.b32.xlu2 %v6656_v55, %s5962_s4  ;;  %v2634_v55 = vsel %vm2633_vm13, %v5651_v44, %v2630_v46 }
0x2633   :  { %2150 = vrot.lane.b32.xlu2 %v6742_v25, %s5962_s4  ;;  %v2639_v25 = vsel %vm2636_vm14, %v2638_v24, %v2634_v55 }
0x2634   :  { %v2645_v15 = vmul.f32 %v2643_v34, %v2639_v25 }
0x263b   :  { %2440 = vrot.lane.b32.xlu2 %v6790_v54, %s5962_s4 }
0x2655   :  { %v2648_v33 = vpop.permute.xlu2 %2647 }
0x2656   :  { %v2650_v32 = vmul.f32 %v2648_v33, %v2639_v25 }
0x2658   :  { %2652 = vrot.lane.b32.xlu1 %v2650_v32, %s5961_s3  ;;  %v7006_v32 = vld [vmem:[%s7516_s12 + $0x18] sm:$0xff] }
0x2659   :  { %2971 = vmatpush.msrb.mxu2 %v7006_v32 }
0x265d   :  { %v699_v54 = vpop.permute.xlu2 %698 }
0x265e   :  { %702 = vst.msk [vmem:[#allocation3] sm:$0xf0] %vm701_vm3, %v699_v54  ;;  %v7011_v54 = vld [vmem:[%s7516_s12 + $0x10] sm:$0xff] }
0x265f   :  { %2972 = vmatpush.msrb.mxu2 %v7011_v54 }
0x2665   :  { %v991_v31 = vpop.permute.xlu2 %990 }
0x2666   :  { %993 = vst.msk [vmem:[#allocation3 + $0x8] sm:$0xf0] %vm701_vm3, %v991_v31  ;;  %v7018_v31 = vld [vmem:[%s7516_s12 + $0x8] sm:$0xff] }
0x2667   :  { %2973 = vmatpush.msrb.mxu2 %v7018_v31 }
0x266d   :  { %v1281_v53 = vpop.permute.xlu2 %1280 }
0x266e   :  { %1283 = vst.msk [vmem:[#allocation3 + $0x10] sm:$0xf0] %vm701_vm3, %v1281_v53  ;;  %v7026_v53 = vld [vmem:[%s7516_s12] sm:$0xff] }
0x266f   :  { %2974 = vmatpush.msrb.mxu2 %v7026_v53 }
0x2670   :  { %2975 = vmatmul.f32.vlgmr.msrb.gmra.mxu2 %v5960_v60 }
0x2671   :  { %3109 = vmatpush.msra.mxu2 %v7006_v32 }
0x2673   :  { %3110 = vmatpush.msra.mxu2 %v7011_v54 }
0x2675   :  { %v2156_v41 = vpop.permute.xlu2 %2155  ;;  %3111 = vmatpush.msra.mxu2 %v7018_v31 }
0x2676   :  { %2158 = vst.msk [vmem:[#allocation3 + $0x10] sm:$0xf] %vm707_vm4, %v2156_v41 }
0x2677   :  { %3112 = vmatpush.msra.mxu2 %v7026_v53 }
0x2679   :  { %3244 = vmatpush.msrb.mxu2 %v7006_v32 }
0x267b   :  { %3245 = vmatpush.msrb.mxu2 %v7011_v54 }
0x267d   :  { %v1866_v28 = vpop.permute.xlu2 %1865  ;;  %3246 = vmatpush.msrb.mxu2 %v7018_v31 }
0x267e   :  { %1868 = vst.msk [vmem:[#allocation3 + $0x18] sm:$0xf] %vm707_vm4, %v1866_v28 }
0x267f   :  { %3247 = vmatpush.msrb.mxu2 %v7026_v53 }
0x2682   :  { %v2720_v42 = vpop.permute.xlu1 %2719 }
0x2683   :  { %v2722_v58 = vadd.f32 %v2720_v42, %v2712_v23  ;;  %v2763_v42 = vld [vmem:[%s7517_s10] sm:$0x3] }
0x2685   :  { %5652 = vtanh.f32 %v2722_v58  ;;  %v1861_v47 = vpop.permute.xlu2 %1860  ;;  %v2765_v58 = vperm.slane %v2763_v42, 0 }
0x268b   :  { %v5653_v7 = vpop.eup %5652 }
0x268c   :  { %2725 = vrot.lane.b32.xlu0 %v5653_v7, %s5961_s3 }
0x2694   :  { %2591 = vrot.lane.b32.xlu0 %v6805_v3, %s5963_s8 }
0x269c   :  { %2301 = vrot.lane.b32.xlu0 %v6761_v56, %s5963_s8 }
0x26ca   :  { %v2653_v0 = vpop.permute.xlu1 %2652 }
0x26cb   :  { %v2655_v45 = vadd.f32 %v2653_v0, %v2645_v15 }
0x26cd   :  { %5654 = vtanh.f32 %v2655_v45 }
0x26d3   :  { %v5655_v50 = vpop.eup %5654 }
0x26d4   :  { %2658 = vrot.lane.b32.xlu0 %v5655_v50, %s5961_s3 }
0x26dc   :  { %1570 = vrot.lane.b32.xlu0 %v6582_v11, %s5962_s4 }
0x26e4   :  { %1431 = vrot.lane.b32.xlu0 %v6543_v26, %s5963_s8  ;;  %v2761_v26 = vld [vmem:[%s7514_s9 + $0x70] sm:$0xff] }
0x26e5   :  { %2801 = vmatpush.msra.mxu1 %v2761_v26 }
0x26ec   :  { %1141 = vrot.lane.b32.xlu0 %v6466_v13, %s5963_s8 }
0x26f4   :  { %851 = vrot.lane.b32.xlu0 %v6379_v22, %s5963_s8 }
0x26fc   :  { %558 = vrot.lane.b32.xlu0 %v6322_v21, %s5963_s8 }
0x26fe   :  { %v2726_v56 = vpop.permute.xlu0 %2725 }
0x26ff   :  { %v6867_v3 = vmul.f32 %v2726_v56, %v6825_v2  ;;  %v2151_v2 = vpop.permute.xlu2 %2150 }
0x2701   :  { %2735 = vrot.lane.b32.xlu1 %v6867_v3, %s5963_s8 }
0x2706   :  { %v2592_v11 = vpop.permute.xlu0 %2591 }
0x2707   :  { %2594 = vst.msk [vmem:[#allocation3] sm:$0xf0] %vm561_vm5, %v2592_v11  ;;  %v2441_v44 = vpop.permute.xlu2 %2440 }
0x2709   :  { %2445 = vrot.lane.b32.xlu1 %v6780_v48, %s5963_s8  ;;  %v2755_v48 = vld [vmem:[%s7514_s9 + $0x40] sm:$0xff] }
0x270e   :  { %v2302_v13 = vpop.permute.xlu0 %2301 }
0x270f   :  { %2304 = vst.msk [vmem:[#allocation3 + $0x8] sm:$0xf0] %vm561_vm5, %v2302_v13 }
0x2711   :  { %2011 = vrot.lane.b32.xlu1 %v6694_v49, %s5963_s8  ;;  %v2758_v49 = vld [vmem:[%s7514_s9 + $0x58] sm:$0xff] }
0x2719   :  { %1721 = vrot.lane.b32.xlu1 %v6605_v16, %s5963_s8  ;;  %v2757_v16 = vld [vmem:[%s7514_s9 + $0x50] sm:$0xff] }
0x2721   :  { %1575 = vrot.lane.b32.xlu1 %v6573_v63, %s5963_s8  ;;  %v2762_v63 = vld [vmem:[%s7514_s9 + $0x78] sm:$0xff] }
0x2722   :  { %2842 = vmatpush.msra.mxu3 %v2762_v63 }
0x2729   :  { %1285 = vrot.lane.b32.xlu1 %v6511_v39, %s5963_s8  ;;  %v2760_v39 = vld [vmem:[%s7514_s9 + $0x68] sm:$0xff] }
0x272a   :  { %2843 = vmatpush.msra.mxu3 %v2760_v39 }
0x272c   :  { %2844 = vmatpush.msra.mxu3 %v2758_v49 }
0x272e   :  { %2845 = vmatpush.msra.mxu3 %v2756_v36 }
0x2730   :  { %2846 = vmatpush.msra.mxu3 %v2754_v17 }
0x2731   :  { %995 = vrot.lane.b32.xlu1 %v6409_v20, %s5963_s8 }
0x2732   :  { %2847 = vmatpush.msra.mxu3 %v2752_v43 }
0x2734   :  { %2848 = vmatpush.msra.mxu3 %v2750_v62 }
0x2736   :  { %2849 = vmatpush.msra.mxu3 %v2748_v57 }
0x2738   :  { %4213 = vmatpush.msrb.mxu3 %v7006_v32 }
0x2739   :  { %704 = vrot.lane.b32.xlu1 %v6347_v18, %s5963_s8  ;;  %v2759_v18 = vld [vmem:[%s7514_s9 + $0x60] sm:$0xff] }
0x273a   :  { %2802 = vmatpush.msra.mxu1 %v2759_v18  ;;  %4214 = vmatpush.msrb.mxu3 %v7011_v54 }
0x273c   :  { %2803 = vmatpush.msra.mxu1 %v2757_v16  ;;  %4215 = vmatpush.msrb.mxu3 %v7018_v31 }
0x273e   :  { %2804 = vmatpush.msra.mxu1 %v2755_v48  ;;  %4216 = vmatpush.msrb.mxu3 %v7026_v53 }
0x2740   :  { %2805 = vmatpush.msra.mxu1 %v2753_v4 }
0x2742   :  { %2806 = vmatpush.msra.mxu1 %v2751_v52 }
0x2744   :  { %2807 = vmatpush.msra.mxu1 %v2749_v5 }
0x2746   :  { %v2659_v21 = vpop.permute.xlu0 %2658  ;;  %2808 = vmatpush.msra.mxu1 %v2747_v40 }
0x2747   :  { %v6887_v22 = vmul.f32 %v2659_v21, %v2639_v25 }
0x2748   :  { %4142 = vmatpush.msrb.mxu1 %v6945_v10 }
0x2749   :  { %2730 = vrot.lane.b32.xlu2 %v6887_v22, %s5962_s4 }
0x274a   :  { %4143 = vmatpush.msrb.mxu1 %v6950_v1 }
0x274c   :  { %4144 = vmatpush.msrb.mxu1 %v6957_v29 }
0x274e   :  { %v1571_v20 = vpop.permute.xlu0 %1570  ;;  %4145 = vmatpush.msrb.mxu1 %v6968_v30 }
0x274f   :  { %1573 = vst.msk [vmem:[#allocation3 + $0x18] sm:$0xf0] %vm701_vm3, %v1571_v20 }
0x2756   :  { %v1432_v27 = vpop.permute.xlu0 %1431 }
0x2757   :  { %1434 = vst.msk [vmem:[#allocation3 + $0x20] sm:$0xf0] %vm561_vm5, %v1432_v27 }
0x2758   :  { %1863 = vst.msk [vmem:[#allocation3 + $0x20] sm:$0xf0] %vm701_vm3, %v1861_v47 }
0x275e   :  { %v1142_v8 = vpop.permute.xlu0 %1141 }
0x275f   :  { %1144 = vst.msk [vmem:[#allocation3 + $0x28] sm:$0xf0] %vm561_vm5, %v1142_v8 }
0x2760   :  { %2153 = vst.msk [vmem:[#allocation3 + $0x28] sm:$0xf0] %vm701_vm3, %v2151_v2 }
0x2766   :  { %v852_v6 = vpop.permute.xlu0 %851 }
0x2767   :  { %854 = vst.msk [vmem:[#allocation3 + $0x30] sm:$0xf0] %vm561_vm5, %v852_v6 }
0x2768   :  { %2443 = vst.msk [vmem:[#allocation3 + $0x30] sm:$0xf0] %vm701_vm3, %v2441_v44  ;;  %v2976_v44 = vpop.f32.mrf.mxu2 }
0x276e   :  { %v559_v12 = vpop.permute.xlu0 %558 }
0x276f   :  { %562 = vst.msk [vmem:[#allocation3 + $0x38] sm:$0xf0] %vm561_vm5, %v559_v12  ;;  %v2980_v12 = vrot.slane %v2976_v44, 4 }
0x2773   :  { %v2736_v9 = vpop.permute.xlu1 %2735 }
0x2774   :  { %2738 = vst.msk [vmem:[#allocation3] sm:$0xf] %vm707_vm4, %v2736_v9 }
0x277b   :  { %v2446_v14 = vpop.permute.xlu1 %2445  ;;  %v2739_v46 = vld [vmem:[#allocation3] sm:$0xff] }
0x277c   :  { %2448 = vst.msk [vmem:[#allocation3 + $0x8] sm:$0xf] %vm707_vm4, %v2446_v14  ;;  %5316 = vmatmul.msk.f32.vlgmr.msra.gmra.mxu1 %vm61_vm0, %v2739_v46  ;;  %5324 = vmatmul.msk.f32.vlgmr.msra.gmra.mxu3 %vm61_vm0, %v2739_v46 }
0x277d   :  { %4418 = vmatpush.msra.mxu1 %v6945_v10  ;;  %4489 = vmatpush.msra.mxu3 %v7006_v32 }
0x277f   :  { %4419 = vmatpush.msra.mxu1 %v6950_v1  ;;  %4490 = vmatpush.msra.mxu3 %v7011_v54 }
0x2781   :  { %4420 = vmatpush.msra.mxu1 %v6957_v29  ;;  %4491 = vmatpush.msra.mxu3 %v7018_v31 }
0x2783   :  { %v2012_v38 = vpop.permute.xlu1 %2011  ;;  %v2740_v19 = vld [vmem:[#allocation3 + $0x8] sm:$0xff]  ;;  %4421 = vmatpush.msra.mxu1 %v6968_v30  ;;  %4492 = vmatpush.msra.mxu3 %v7026_v53 }
0x2784   :  { %2014 = vst.msk [vmem:[#allocation3 + $0x10] sm:$0xf0] %vm561_vm5, %v2012_v38  ;;  %5317 = vmatmul.msk.f32.gmra.mxu1 %vm61_vm0, %v2740_v19  ;;  %5325 = vmatmul.msk.f32.gmra.mxu3 %vm61_vm0, %v2740_v19  ;;  %v2917_v38 = vpop.f32.mrf.mxu0 }
0x278b   :  { %v1722_v55 = vpop.permute.xlu1 %1721  ;;  %v2741_v24 = vld [vmem:[#allocation3 + $0x10] sm:$0xff] }
0x278c   :  { %1724 = vst.msk [vmem:[#allocation3 + $0x18] sm:$0xf0] %vm561_vm5, %v1722_v55  ;;  %5318 = vmatmul.msk.f32.gmra.mxu1 %vm61_vm0, %v2741_v24  ;;  %5326 = vmatmul.msk.f32.gmra.mxu3 %vm61_vm0, %v2741_v24 }
0x2793   :  { %v1576_v33 = vpop.permute.xlu1 %1575  ;;  %v2742_v25 = vld [vmem:[#allocation3 + $0x18] sm:$0xff] }
0x2794   :  { %1578 = vst.msk [vmem:[#allocation3 + $0x20] sm:$0xf] %vm707_vm4, %v1576_v33  ;;  %5319 = vmatmul.msk.f32.gmra.mxu1 %vm61_vm0, %v2742_v25  ;;  %5327 = vmatmul.msk.f32.gmra.mxu3 %vm61_vm0, %v2742_v25 }
0x2795   :  { %1719 = vst.msk [vmem:[#allocation3 + $0x20] sm:$0xf] %vm555_vm2, %v6620_v37 }
0x279b   :  { %v1286_v37 = vpop.permute.xlu1 %1285 }
0x279c   :  { %1288 = vst.msk [vmem:[#allocation3 + $0x28] sm:$0xf] %vm707_vm4, %v1286_v37  ;;  %v2743_v41 = vld [vmem:[#allocation3 + $0x20] sm:$0xff] }
0x279d   :  { %2009 = vst.msk [vmem:[#allocation3 + $0x28] sm:$0xf] %vm555_vm2, %v6716_v51  ;;  %5320 = vmatmul.msk.f32.gmra.mxu1 %vm61_vm0, %v2743_v41  ;;  %5328 = vmatmul.msk.f32.gmra.mxu3 %vm61_vm0, %v2743_v41 }
0x27a3   :  { %v2731_v28 = vpop.permute.xlu2 %2730  ;;  %v996_v51 = vpop.permute.xlu1 %995 }
0x27a4   :  { %2733 = vst.msk [vmem:[#allocation3 + $0x38] sm:$0xf0] %vm701_vm3, %v2731_v28  ;;  %v2744_v61 = vld [vmem:[#allocation3 + $0x28] sm:$0xff] }
0x27a5   :  { %998 = vst.msk [vmem:[#allocation3 + $0x30] sm:$0xf] %vm707_vm4, %v996_v51  ;;  %5321 = vmatmul.msk.f32.gmra.mxu1 %vm61_vm0, %v2744_v61  ;;  %5329 = vmatmul.msk.f32.gmra.mxu3 %vm61_vm0, %v2744_v61 }
0x27a6   :  { %2299 = vst.msk [vmem:[#allocation3 + $0x30] sm:$0xf] %vm555_vm2, %v6767_v59 }
0x27ab   :  { %v705_v60 = vpop.permute.xlu1 %704 }
0x27ac   :  { %708 = vst.msk [vmem:[#allocation3 + $0x38] sm:$0xf] %vm707_vm4, %v705_v60 }
0x27ad   :  { %2589 = vst.msk [vmem:[#allocation3 + $0x38] sm:$0xf] %vm555_vm2, %v6815_v35  ;;  %v2745_v23 = vld [vmem:[#allocation3 + $0x30] sm:$0xff]  ;;  %v2766_v35 = vperm.slane %v2763_v42, 1 }
0x27ae   :  { %5322 = vmatmul.msk.f32.gmra.mxu1 %vm61_vm0, %v2745_v23  ;;  %5330 = vmatmul.msk.f32.gmra.mxu3 %vm61_vm0, %v2745_v23 }
0x27b4   :  { %v2746_v59 = vld [vmem:[#allocation3 + $0x38] sm:$0xff] }
0x27b6   :  { %5323 = vmatmul.msk.f32.gmra.mxu1 %vm61_vm0, %v2746_v59  ;;  %5331 = vmatmul.msk.f32.gmra.mxu3 %vm61_vm0, %v2746_v59 }
0x27f9   :  { %v2810_v7 = vpop.f32.mrf.mxu1 }
0x27fa   :  { %v2811_v34 = vadd.f32 %v2810_v7, %v2765_v58 }
0x27fc   :  { %2875 = vst [vmem:[#allocation4 + $0x28] sm:$0xff] %v2811_v34 }
0x27ff   :  { %v2851_v15 = vpop.f32.mrf.mxu3 }
0x2800   :  { %v2852_v0 = vadd.f32 %v2851_v15, %v2766_v35 }
0x2801   :  { %v2813_v45 = vpop.f32.mrf.mxu1 }
0x2802   :  { %2876 = vst [vmem:[#allocation4 + $0x68] sm:$0xff] %v2852_v0  ;;  %v2814_v50 = vadd.f32 %v2813_v45, %v2765_v58 }
0x2803   :  { %v2899_v46 = vld [vmem:[#allocation4 + $0x28] sm:$0xf] }
0x2804   :  { %2877 = vst [vmem:[#allocation4 + $0x10] sm:$0xff] %v2814_v50  ;;  %v2920_v19 = vadd.f32 %v2917_v38, %v2899_v46 }
0x2806   :  { %v5332_v25 = vmul.f32 -1.442695, %v2920_v19 }
0x2807   :  { %v2854_v56 = vpop.f32.mrf.mxu3 }
0x2808   :  { %v2855_v11 = vadd.f32 %v2854_v56, %v2766_v35 }
0x2809   :  { %v2816_v13 = vpop.f32.mrf.mxu1 }
0x280a   :  { %2878 = vst [vmem:[#allocation4 + $0x40] sm:$0xff] %v2855_v11  ;;  %v2817_v21 = vadd.f32 %v2816_v13, %v2765_v58 }
0x280c   :  { %2879 = vst [vmem:[#allocation4 + $0x48] sm:$0xff] %v2817_v21 }
0x280f   :  { %v2857_v26 = vpop.f32.mrf.mxu3 }
0x2810   :  { %v2858_v63 = vadd.f32 %v2857_v26, %v2766_v35 }
0x2811   :  { %v2819_v20 = vpop.f32.mrf.mxu1 }
0x2812   :  { %2880 = vst [vmem:[#allocation4 + $0x30] sm:$0xff] %v2858_v63  ;;  %v2820_v18 = vadd.f32 %v2819_v20, %v2765_v58 }
0x2814   :  { %2881 = vst [vmem:[#allocation4 + $0x70] sm:$0xff] %v2820_v18 }
0x2817   :  { %v2860_v39 = vpop.f32.mrf.mxu3 }
0x2818   :  { %v2861_v16 = vadd.f32 %v2860_v39, %v2766_v35 }
0x281a   :  { %2882 = vst [vmem:[#allocation4 + $0x38] sm:$0xff] %v2861_v16  ;;  %v2822_v49 = vpop.f32.mrf.mxu1 }
0x281b   :  { %v2823_v48 = vadd.f32 %v2822_v49, %v2765_v58 }
0x281d   :  { %2883 = vst [vmem:[#allocation4 + $0x20] sm:$0xff] %v2823_v48 }
0x2820   :  { %v2863_v36 = vpop.f32.mrf.mxu3 }
0x2821   :  { %v2864_v47 = vadd.f32 %v2863_v36, %v2766_v35 }
0x2822   :  { %v2825_v4 = vpop.f32.mrf.mxu1 }
0x2823   :  { %2884 = vst [vmem:[#allocation4 + $0x78] sm:$0xff] %v2864_v47  ;;  %v2826_v17 = vadd.f32 %v2825_v4, %v2765_v58 }
0x2825   :  { %2885 = vst [vmem:[#allocation4 + $0x18] sm:$0xff] %v2826_v17 }
0x2828   :  { %v2866_v52 = vpop.f32.mrf.mxu3 }
0x2829   :  { %v2867_v43 = vadd.f32 %v2866_v52, %v2766_v35 }
0x282b   :  { %2886 = vst [vmem:[#allocation4 + $0x58] sm:$0xff] %v2867_v43  ;;  %v2828_v27 = vpop.f32.mrf.mxu1 }
0x282c   :  { %v2829_v5 = vadd.f32 %v2828_v27, %v2765_v58 }
0x282e   :  { %2887 = vst [vmem:[#allocation4] sm:$0xff] %v2829_v5 }
0x2831   :  { %v2869_v62 = vpop.f32.mrf.mxu3 }
0x2832   :  { %v2870_v40 = vadd.f32 %v2869_v62, %v2766_v35 }
0x2833   :  { %v2831_v57 = vpop.f32.mrf.mxu1 }
0x2834   :  { %2888 = vst [vmem:[#allocation4 + $0x8] sm:$0xff] %v2870_v40  ;;  %v2832_v2 = vadd.f32 %v2831_v57, %v2765_v58 }
0x2836   :  { %2889 = vst [vmem:[#allocation4 + $0x60] sm:$0xff] %v2832_v2 }
0x2839   :  { %v2872_v8 = vpop.f32.mrf.mxu3 }
0x283a   :  { %v2873_v6 = vadd.f32 %v2872_v8, %v2766_v35 }
0x283c   :  { %2890 = vst [vmem:[#allocation4 + $0x50] sm:$0xff] %v2873_v6 }
0x2843   :  { %v2958_v9 = vld [vmem:[#allocation4 + $0x50] sm:$0xf0]  ;;  %v3090_v44 = vld [vmem:[#allocation4 + $0x50] sm:$0xf] }
0x2844   :  { %v2982_v14 = vadd.f32 %v2980_v12, %v2958_v9 }
0x2846   :  { %5656 = vtanh.f32 %v2982_v14  ;;  %v5333_v33 = vmul.f32 -1.442695, %v2982_v14 }
0x2847   :  { %5658 = vtanh.f32 %v2920_v19  ;;  %v3020_v19 = vld [vmem:[#allocation4 + $0x28] sm:$0xf0] }
0x2848   :  { %5660 = vpow2.f32 %v5333_v33 }
0x2849   :  { %5662 = vpow2.f32 %v5332_v25 }
0x284c   :  { %v5657_v55 = vpop.eup %5656 }
0x284d   :  { %3005 = vrot.lane.b32.xlu0 %v5657_v55, %s5961_s3  ;;  %v5659_v24 = vpop.eup %5658 }
0x284e   :  { %v5661_v37 = vpop.eup %5660 }
0x284f   :  { %v2986_v41 = vadd.f32 1.0, %v5661_v37  ;;  %v5663_v28 = vpop.eup %5662 }
0x2850   :  { %v2924_v51 = vadd.f32 1.0, %v5663_v28 }
0x2851   :  { %5664 = vrcp.f32 %v2986_v41  ;;  %v2998_v35 = vand.u32 2147483648, %v2986_v41  ;;  %vm2992_vm2 = vweird.f32 %v2986_v41  ;;  %v2996_v15 = vand.u32 2147483647, %v2986_v41 }
0x2852   :  { %5666 = vrcp.f32 %v2924_v51  ;;  %v2936_v26 = vand.u32 2147483648, %v2924_v51  ;;  %vm2930_vm9 = vweird.f32 %v2924_v51  ;;  %v2934_v63 = vand.u32 2147483647, %v2924_v51 }
0x2853   :  { %v2999_v50 = vor.u32 1.1754944e-38, %v2998_v35  ;;  %vm2997_vm7 = vcmp.eq.f32.partialorder %v2996_v15, 8.507059e+37 }
0x2854   :  { %v2937_v18 = vor.u32 1.1754944e-38, %v2936_v26  ;;  %vm2935_vm11 = vcmp.eq.f32.partialorder %v2934_v63, 8.507059e+37 }
0x2855   :  { %2943 = vrot.lane.b32.xlu0 %v5659_v24, %s5961_s3 }
0x2857   :  { %v5665_v61 = vpop.eup %5664 }
0x2858   :  { %v2988_v60 = vmul.f32 %v5665_v61, %v2986_v41  ;;  %v5667_v59 = vpop.eup %5666  ;;  %vm2993_vm0 = vweird.f32 %v5665_v61 }
0x2859   :  { %v2926_v58 = vmul.f32 %v5667_v59, %v2924_v51  ;;  %vm2994_vm6 = vmor %vm2992_vm2, %vm2993_vm0  ;;  %vm2931_vm8 = vweird.f32 %v5667_v59 }
0x285a   :  { %v2989_v23 = vsub.f32 1.0, %v2988_v60  ;;  %vm2932_vm10 = vmor %vm2930_vm9, %vm2931_vm8 }
0x285b   :  { %v2927_v34 = vsub.f32 1.0, %v2926_v58 }
0x285c   :  { %v2990_v42 = vmul.f32 %v5665_v61, %v2989_v23 }
0x285d   :  { %v2928_v45 = vmul.f32 %v5667_v59, %v2927_v34 }
0x285e   :  { %v2991_v7 = vadd.f32 %v5665_v61, %v2990_v42 }
0x285f   :  { %v2929_v21 = vadd.f32 %v5667_v59, %v2928_v45 }
0x2860   :  { %v2995_v0 = vsel %vm2994_vm6, %v5665_v61, %v2991_v7 }
0x2861   :  { %v3000_v11 = vsel %vm2997_vm7, %v2999_v50, %v2995_v0  ;;  %v2933_v20 = vsel %vm2932_vm10, %v5667_v59, %v2929_v21 }
0x2862   :  { %v2938_v39 = vsel %vm2935_vm11, %v2937_v18, %v2933_v20  ;;  %v3003_v48 = vmul.f32 0.0, %v3000_v11 }
0x2863   :  { %v2941_v4 = vmul.f32 0.0, %v2938_v39 }
0x28bf   :  { %v3006_v56 = vpop.permute.xlu0 %3005 }
0x28c0   :  { %v3008_v13 = vmul.f32 %v3006_v56, %v3000_v11 }
0x28c2   :  { %3010 = vrot.lane.b32.xlu1 %v3008_v13, %s5961_s3 }
0x28c7   :  { %v2944_v16 = vpop.permute.xlu0 %2943 }
0x28c8   :  { %v2946_v49 = vmul.f32 %v2944_v16, %v2938_v39 }
0x28ca   :  { %2948 = vrot.lane.b32.xlu1 %v2946_v49, %s5961_s3 }
0x2934   :  { %v3011_v36 = vpop.permute.xlu1 %3010 }
0x2935   :  { %v7069_v47 = vadd.f32 %v3011_v36, %v3003_v48 }
0x2937   :  { %5668 = vtanh.f32 %v7069_v47  ;;  %v3139_v48 = vrot.slane %v7069_v47, 4 }
0x293c   :  { %v2949_v17 = vpop.permute.xlu1 %2948 }
0x293d   :  { %v5669_v52 = vpop.eup %5668  ;;  %v7072_v43 = vadd.f32 %v2949_v17, %v2941_v4 }
0x293e   :  { %3016 = vrot.lane.b32.xlu2 %v5669_v52, %s5961_s3 }
0x293f   :  { %5670 = vtanh.f32 %v7072_v43 }
0x2945   :  { %v5671_v27 = vpop.eup %5670 }
0x2946   :  { %2954 = vrot.lane.b32.xlu0 %v5671_v27, %s5961_s3  ;;  %v3071_v27 = vrot.slane %v7072_v43, 4 }
0x2998   :  { %v3017_v5 = vpop.permute.xlu2 %3016 }
0x2999   :  { %v3019_v62 = vmul.f32 %v3017_v5, %v3000_v11 }
0x299b   :  { %v3092_v40 = vrot.slane %v3019_v62, 4 }
0x299d   :  { %3093 = vrot.lane.b32.xlu2 %v3092_v40, %s5962_s4 }
0x29b8   :  { %v2955_v57 = vpop.permute.xlu0 %2954 }
0x29b9   :  { %v2957_v2 = vmul.f32 %v2955_v57, %v2938_v39 }
0x29bb   :  { %3022 = vrot.lane.b32.xlu1 %v2957_v2, %s5962_s4 }
0x29f7   :  { %v3094_v8 = vpop.permute.xlu2 %3093 }
0x29f8   :  { %5336 = vmatmul.msk.f32.vlgmr.msra.gmra.mxu2 %vm427_vm15, %v3094_v8 }
0x29f9   :  { %3385 = vmatpush.msra.mxu2 %v7006_v32 }
0x29fb   :  { %3386 = vmatpush.msra.mxu2 %v7011_v54 }
0x29fd   :  { %3387 = vmatpush.msra.mxu2 %v7018_v31 }
0x29ff   :  { %3388 = vmatpush.msra.mxu2 %v7026_v53 }
0x2a2d   :  { %v3023_v6 = vpop.permute.xlu1 %3022 }
0x2a2e   :  { %5334 = vmatmul.msk.f32.vlgmr.msra.gmra.mxu0 %vm427_vm15, %v3023_v6 }
0x2a2f   :  { %3314 = vmatpush.msra.mxu0 %v6945_v10 }
0x2a31   :  { %3315 = vmatpush.msra.mxu0 %v6950_v1 }
0x2a33   :  { %3316 = vmatpush.msra.mxu0 %v6957_v29 }
0x2a35   :  { %3317 = vmatpush.msra.mxu0 %v6968_v30 }
0x2a7b   :  { %v3114_v12 = vpop.f32.mrf.mxu2 }
0x2a7c   :  { %v3117_v9 = vadd.f32 %v3114_v12, %v3090_v44 }
0x2a7e   :  { %5672 = vtanh.f32 %v3117_v9  ;;  %v5337_v24 = vmul.f32 -1.442695, %v3117_v9 }
0x2a84   :  { %v5673_v14 = vpop.eup %5672 }
0x2a85   :  { %3143 = vrot.lane.b32.xlu2 %v5673_v14, %s5961_s3 }
0x2aab   :  { %v3043_v46 = vpop.f32.mrf.mxu0 }
0x2aac   :  { %v3047_v38 = vrot.slane %v3043_v46, 4  ;;  %v3226_v46 = vld [vmem:[#allocation4 + $0x8] sm:$0xf0] }
0x2aae   :  { %v3049_v55 = vadd.f32 %v3047_v38, %v3020_v19 }
0x2ab0   :  { %5674 = vtanh.f32 %v3049_v55  ;;  %v5335_v15 = vmul.f32 -1.442695, %v3049_v55  ;;  %v3158_v55 = vld [vmem:[#allocation4 + $0x10] sm:$0xf] }
0x2ab1   :  { %5676 = vpow2.f32 %v5337_v24 }
0x2ab6   :  { %v5675_v33 = vpop.eup %5674 }
0x2ab7   :  { %3075 = vrot.lane.b32.xlu1 %v5675_v33, %s5961_s3  ;;  %v5677_v25 = vpop.eup %5676 }
0x2ab8   :  { %v3121_v37 = vadd.f32 1.0, %v5677_v25 }
0x2aba   :  { %5678 = vrcp.f32 %v3121_v37  ;;  %v3133_v23 = vand.u32 2147483648, %v3121_v37  ;;  %vm3127_vm13 = vweird.f32 %v3121_v37  ;;  %v3131_v59 = vand.u32 2147483647, %v3121_v37 }
0x2abb   :  { %5680 = vpow2.f32 %v5335_v15 }
0x2abc   :  { %v3134_v58 = vor.u32 1.1754944e-38, %v3133_v23  ;;  %vm3132_vm3 = vcmp.eq.f32.partialorder %v3131_v59, 8.507059e+37 }
0x2ac0   :  { %v5679_v41 = vpop.eup %5678 }
0x2ac1   :  { %v3123_v28 = vmul.f32 %v5679_v41, %v3121_v37  ;;  %vm3128_vm12 = vweird.f32 %v5679_v41  ;;  %v5681_v0 = vpop.eup %5680 }
0x2ac2   :  { %vm3129_vm14 = vmor %vm3127_vm13, %vm3128_vm12  ;;  %v3053_v45 = vadd.f32 1.0, %v5681_v0 }
0x2ac3   :  { %v3124_v51 = vsub.f32 1.0, %v3123_v28 }
0x2ac4   :  { %5682 = vrcp.f32 %v3053_v45  ;;  %v3065_v26 = vand.u32 2147483648, %v3053_v45  ;;  %vm3059_vm5 = vweird.f32 %v3053_v45  ;;  %v3063_v63 = vand.u32 2147483647, %v3053_v45 }
0x2ac5   :  { %v3125_v61 = vmul.f32 %v5679_v41, %v3124_v51 }
0x2ac6   :  { %v3066_v18 = vor.u32 1.1754944e-38, %v3065_v26  ;;  %vm3064_vm2 = vcmp.eq.f32.partialorder %v3063_v63, 8.507059e+37 }
0x2ac7   :  { %v3126_v60 = vadd.f32 %v5679_v41, %v3125_v61 }
0x2ac9   :  { %v3130_v42 = vsel %vm3129_vm14, %v5679_v41, %v3126_v60 }
0x2aca   :  { %v3135_v34 = vsel %vm3132_vm3, %v3134_v58, %v3130_v42  ;;  %v5683_v50 = vpop.eup %5682 }
0x2acb   :  { %v3055_v56 = vmul.f32 %v5683_v50, %v3053_v45  ;;  %vm3060_vm4 = vweird.f32 %v5683_v50  ;;  %v3141_v36 = vmul.f32 %v3139_v48, %v3135_v34 }
0x2acc   :  { %vm3061_vm0 = vmor %vm3059_vm5, %vm3060_vm4 }
0x2acd   :  { %v3056_v11 = vsub.f32 1.0, %v3055_v56 }
0x2acf   :  { %v3057_v13 = vmul.f32 %v5683_v50, %v3056_v11 }
0x2ad1   :  { %v3058_v21 = vadd.f32 %v5683_v50, %v3057_v13 }
0x2ad3   :  { %v3062_v20 = vsel %vm3061_vm0, %v5683_v50, %v3058_v21 }
0x2ad4   :  { %v3067_v16 = vsel %vm3064_vm2, %v3066_v18, %v3062_v20 }
0x2ad5   :  { %v3073_v5 = vmul.f32 %v3071_v27, %v3067_v16 }
0x2adf   :  { %v3144_v7 = vpop.permute.xlu2 %3143 }
0x2ae0   :  { %v3146_v35 = vmul.f32 %v3144_v7, %v3135_v34 }
0x2ae2   :  { %3148 = vrot.lane.b32.xlu0 %v3146_v35, %s5961_s3 }
0x2b29   :  { %v3076_v39 = vpop.permute.xlu1 %3075 }
0x2b2a   :  { %v3078_v49 = vmul.f32 %v3076_v39, %v3067_v16 }
0x2b2c   :  { %3080 = vrot.lane.b32.xlu0 %v3078_v49, %s5961_s3 }
0x2b54   :  { %v3149_v4 = vpop.permute.xlu0 %3148 }
0x2b55   :  { %v7094_v17 = vadd.f32 %v3149_v4, %v3141_v36 }
0x2b57   :  { %5684 = vtanh.f32 %v7094_v17  ;;  %v3277_v4 = vrot.slane %v7094_v17, 4 }
0x2b5d   :  { %v5685_v52 = vpop.eup %5684 }
0x2b5e   :  { %3154 = vrot.lane.b32.xlu2 %v5685_v52, %s5961_s3 }
0x2b9e   :  { %v3081_v62 = vpop.permute.xlu0 %3080 }
0x2b9f   :  { %v7099_v40 = vadd.f32 %v3081_v62, %v3073_v5 }
0x2ba1   :  { %5686 = vtanh.f32 %v7099_v40 }
0x2ba7   :  { %v5687_v57 = vpop.eup %5686 }
0x2ba8   :  { %3086 = vrot.lane.b32.xlu2 %v5687_v57, %s5961_s3  ;;  %v3207_v57 = vrot.slane %v7099_v40, 4 }
0x2bb8   :  { %v3155_v47 = vpop.permute.xlu2 %3154 }
0x2bb9   :  { %v3157_v2 = vmul.f32 %v3155_v47, %v3135_v34 }
0x2bbb   :  { %3228 = vrot.lane.b32.xlu1 %v3157_v2, %s5962_s4 }
0x2c02   :  { %v3087_v8 = vpop.permute.xlu2 %3086 }
0x2c03   :  { %v3089_v6 = vmul.f32 %v3087_v8, %v3067_v16 }
0x2c05   :  { %v3160_v44 = vrot.slane %v3089_v6, 4 }
0x2c07   :  { %3161 = vrot.lane.b32.xlu0 %v3160_v44, %s5962_s4 }
0x2c2d   :  { %v3229_v12 = vpop.permute.xlu1 %3228 }
0x2c2e   :  { %5340 = vmatmul.msk.f32.vlgmr.msrb.gmra.mxu2 %vm427_vm15, %v3229_v12 }
0x2c2f   :  { %3520 = vmatpush.msrb.mxu2 %v7006_v32 }
0x2c31   :  { %3521 = vmatpush.msrb.mxu2 %v7011_v54 }
0x2c33   :  { %3522 = vmatpush.msrb.mxu2 %v7018_v31 }
0x2c35   :  { %3523 = vmatpush.msrb.mxu2 %v7026_v53 }
0x2c79   :  { %v3162_v43 = vpop.permute.xlu0 %3161 }
0x2c7a   :  { %5338 = vmatmul.msk.f32.vlgmr.msrb.gmra.mxu0 %vm427_vm15, %v3162_v43 }
0x2c7b   :  { %3453 = vmatpush.msrb.mxu0 %v6945_v10 }
0x2c7d   :  { %3454 = vmatpush.msrb.mxu0 %v6950_v1 }
0x2c7f   :  { %3455 = vmatpush.msrb.mxu0 %v6957_v29 }
0x2c81   :  { %3456 = vmatpush.msrb.mxu0 %v6968_v30 }
0x2cb1   :  { %v3249_v9 = vpop.f32.mrf.mxu2 }
0x2cb2   :  { %v3253_v14 = vrot.slane %v3249_v9, 4 }
0x2cb4   :  { %v3255_v38 = vadd.f32 %v3253_v14, %v3226_v46  ;;  %v3366_v46 = vld [vmem:[#allocation4 + $0x8] sm:$0xf] }
0x2cb6   :  { %5688 = vtanh.f32 %v3255_v38  ;;  %v5341_v37 = vmul.f32 -1.442695, %v3255_v38 }
0x2cbc   :  { %v5689_v19 = vpop.eup %5688 }
0x2cbd   :  { %3281 = vrot.lane.b32.xlu1 %v5689_v19, %s5961_s3 }
0x2cf7   :  { %v3182_v24 = vpop.f32.mrf.mxu0 }
0x2cf8   :  { %v3185_v33 = vadd.f32 %v3182_v24, %v3158_v55 }
0x2cfa   :  { %5690 = vtanh.f32 %v3185_v33  ;;  %v5339_v45 = vmul.f32 -1.442695, %v3185_v33 }
0x2cfb   :  { %5692 = vpow2.f32 %v5341_v37 }
0x2d00   :  { %v5691_v25 = vpop.eup %5690 }
0x2d01   :  { %3211 = vrot.lane.b32.xlu0 %v5691_v25, %s5961_s3  ;;  %v5693_v41 = vpop.eup %5692  ;;  %v3296_v25 = vld [vmem:[#allocation4 + $0x10] sm:$0xf0] }
0x2d02   :  { %v3259_v28 = vadd.f32 1.0, %v5693_v41 }
0x2d04   :  { %5694 = vrcp.f32 %v3259_v28  ;;  %v3271_v42 = vand.u32 2147483648, %v3259_v28  ;;  %vm3265_vm7 = vweird.f32 %v3259_v28  ;;  %v3269_v58 = vand.u32 2147483647, %v3259_v28 }
0x2d05   :  { %5696 = vpow2.f32 %v5339_v45 }
0x2d06   :  { %v3272_v34 = vor.u32 1.1754944e-38, %v3271_v42  ;;  %vm3270_vm9 = vcmp.eq.f32.partialorder %v3269_v58, 8.507059e+37 }
0x2d0a   :  { %v5695_v51 = vpop.eup %5694 }
0x2d0b   :  { %v3261_v61 = vmul.f32 %v5695_v51, %v3259_v28  ;;  %vm3266_vm6 = vweird.f32 %v5695_v51  ;;  %v5697_v50 = vpop.eup %5696 }
0x2d0c   :  { %vm3267_vm8 = vmor %vm3265_vm7, %vm3266_vm6  ;;  %v3189_v56 = vadd.f32 1.0, %v5697_v50 }
0x2d0d   :  { %v3262_v60 = vsub.f32 1.0, %v3261_v61 }
0x2d0e   :  { %5698 = vrcp.f32 %v3189_v56  ;;  %v3201_v20 = vand.u32 2147483648, %v3189_v56  ;;  %vm3195_vm11 = vweird.f32 %v3189_v56  ;;  %v3199_v18 = vand.u32 2147483647, %v3189_v56 }
0x2d0f   :  { %v3263_v23 = vmul.f32 %v5695_v51, %v3262_v60 }
0x2d10   :  { %v3202_v16 = vor.u32 1.1754944e-38, %v3201_v20  ;;  %vm3200_vm13 = vcmp.eq.f32.partialorder %v3199_v18, 8.507059e+37 }
0x2d11   :  { %v3264_v59 = vadd.f32 %v5695_v51, %v3263_v23 }
0x2d13   :  { %v3268_v7 = vsel %vm3267_vm8, %v5695_v51, %v3264_v59 }
0x2d14   :  { %v3273_v15 = vsel %vm3270_vm9, %v3272_v34, %v3268_v7  ;;  %v5699_v11 = vpop.eup %5698 }
0x2d15   :  { %v3191_v13 = vmul.f32 %v5699_v11, %v3189_v56  ;;  %vm3196_vm10 = vweird.f32 %v5699_v11  ;;  %v3279_v52 = vmul.f32 %v3277_v4, %v3273_v15 }
0x2d16   :  { %vm3197_vm12 = vmor %vm3195_vm11, %vm3196_vm10 }
0x2d17   :  { %v3192_v21 = vsub.f32 1.0, %v3191_v13 }
0x2d19   :  { %v3193_v26 = vmul.f32 %v5699_v11, %v3192_v21 }
0x2d1b   :  { %v3194_v63 = vadd.f32 %v5699_v11, %v3193_v26 }
0x2d1d   :  { %v3198_v39 = vsel %vm3197_vm12, %v5699_v11, %v3194_v63 }
0x2d1e   :  { %v3203_v48 = vsel %vm3200_vm13, %v3202_v16, %v3198_v39 }
0x2d1f   :  { %v3209_v47 = vmul.f32 %v3207_v57, %v3203_v48 }
0x2d2f   :  { %v3282_v35 = vpop.permute.xlu1 %3281 }
0x2d30   :  { %v3284_v0 = vmul.f32 %v3282_v35, %v3273_v15 }
0x2d32   :  { %3286 = vrot.lane.b32.xlu2 %v3284_v0, %s5961_s3 }
0x2d73   :  { %v3212_v49 = vpop.permute.xlu0 %3211 }
0x2d74   :  { %v3214_v36 = vmul.f32 %v3212_v49, %v3203_v48 }
0x2d76   :  { %3216 = vrot.lane.b32.xlu2 %v3214_v36, %s5961_s3 }
0x2d8c   :  { %v3287_v27 = vpop.permute.xlu2 %3286 }
0x2d8d   :  { %v7120_v5 = vadd.f32 %v3287_v27, %v3279_v52 }
0x2d8f   :  { %5700 = vtanh.f32 %v7120_v5  ;;  %v3415_v4 = vrot.slane %v7120_v5, 4 }
0x2d95   :  { %v5701_v62 = vpop.eup %5700 }
0x2d96   :  { %3292 = vrot.lane.b32.xlu1 %v5701_v62, %s5961_s3 }
0x2dd0   :  { %v3217_v2 = vpop.permute.xlu2 %3216 }
0x2dd1   :  { %v7125_v8 = vadd.f32 %v3217_v2, %v3209_v47 }
0x2dd3   :  { %5702 = vtanh.f32 %v7125_v8  ;;  %v3347_v47 = vrot.slane %v7125_v8, 4 }
0x2dd9   :  { %v5703_v6 = vpop.eup %5702 }
0x2dda   :  { %3222 = vrot.lane.b32.xlu1 %v5703_v6, %s5961_s3 }
0x2e08   :  { %v3293_v17 = vpop.permute.xlu1 %3292 }
0x2e09   :  { %v3295_v44 = vmul.f32 %v3293_v17, %v3273_v15 }
0x2e0b   :  { %v3368_v12 = vrot.slane %v3295_v44, 4 }
0x2e0d   :  { %3369 = vrot.lane.b32.xlu0 %v3368_v12, %s5962_s4 }
0x2e4c   :  { %v3223_v43 = vpop.permute.xlu1 %3222 }
0x2e4d   :  { %v3225_v9 = vmul.f32 %v3223_v43, %v3203_v48 }
0x2e4f   :  { %3298 = vrot.lane.b32.xlu2 %v3225_v9, %s5962_s4 }
0x2e7f   :  { %v3370_v14 = vpop.permute.xlu0 %3369 }
0x2e80   :  { %5344 = vmatmul.msk.f32.vlgmr.msra.gmra.mxu2 %vm427_vm15, %v3370_v14 }
0x2e81   :  { %3661 = vmatpush.msra.mxu2 %v7006_v32 }
0x2e83   :  { %3662 = vmatpush.msra.mxu2 %v7011_v54 }
0x2e85   :  { %3663 = vmatpush.msra.mxu2 %v7018_v31 }
0x2e87   :  { %3664 = vmatpush.msra.mxu2 %v7026_v53 }
0x2ea9   :  { %v3299_v40 = vpop.permute.xlu2 %3298 }
0x2eaa   :  { %5342 = vmatmul.msk.f32.vlgmr.msra.gmra.mxu0 %vm427_vm15, %v3299_v40 }
0x2eab   :  { %3590 = vmatpush.msra.mxu0 %v6945_v10 }
0x2ead   :  { %3591 = vmatpush.msra.mxu0 %v6950_v1 }
0x2eaf   :  { %3592 = vmatpush.msra.mxu0 %v6957_v29 }
0x2eb1   :  { %3593 = vmatpush.msra.mxu0 %v6968_v30 }
0x2f03   :  { %v3390_v38 = vpop.f32.mrf.mxu2 }
0x2f04   :  { %v3393_v19 = vadd.f32 %v3390_v38, %v3366_v46  ;;  %v7166_v46 = vld [vmem:[%s7515_s11 + $0x18] sm:$0xff] }
0x2f06   :  { %5704 = vtanh.f32 %v3393_v19  ;;  %v5345_v10 = vmul.f32 -1.442695, %v3393_v19 }
0x2f0c   :  { %v5705_v55 = vpop.eup %5704 }
0x2f0d   :  { %3419 = vrot.lane.b32.xlu0 %v5705_v55, %s5961_s3  ;;  %v3434_v55 = vld [vmem:[#allocation4 + $0x48] sm:$0xf] }
0x2f27   :  { %v3319_v24 = vpop.f32.mrf.mxu0 }
0x2f28   :  { %v3323_v33 = vrot.slane %v3319_v24, 4 }
0x2f2a   :  { %v3325_v37 = vadd.f32 %v3323_v33, %v3296_v25 }
0x2f2c   :  { %5706 = vtanh.f32 %v3325_v37  ;;  %v5343_v51 = vmul.f32 -1.442695, %v3325_v37 }
0x2f2d   :  { %5708 = vpow2.f32 %v5345_v10 }
0x2f32   :  { %v5707_v41 = vpop.eup %5706 }
0x2f33   :  { %3351 = vrot.lane.b32.xlu2 %v5707_v41, %s5961_s3  ;;  %v5709_v1 = vpop.eup %5708 }
0x2f34   :  { %v3397_v28 = vadd.f32 1.0, %v5709_v1 }
0x2f36   :  { %5710 = vrcp.f32 %v3397_v28  ;;  %v3409_v35 = vand.u32 2147483648, %v3397_v28  ;;  %vm3403_vm3 = vweird.f32 %v3397_v28  ;;  %v3407_v15 = vand.u32 2147483647, %v3397_v28 }
0x2f37   :  { %5712 = vpow2.f32 %v5343_v51 }
0x2f38   :  { %v3410_v50 = vor.u32 1.1754944e-38, %v3409_v35  ;;  %vm3408_vm5 = vcmp.eq.f32.partialorder %v3407_v15, 8.507059e+37 }
0x2f3c   :  { %v5711_v61 = vpop.eup %5710 }
0x2f3d   :  { %v5713_v60 = vpop.eup %5712  ;;  %v3399_v23 = vmul.f32 %v5711_v61, %v3397_v28  ;;  %vm3404_vm14 = vweird.f32 %v5711_v61 }
0x2f3e   :  { %v3329_v59 = vadd.f32 1.0, %v5713_v60  ;;  %vm3405_vm4 = vmor %vm3403_vm3, %vm3404_vm14 }
0x2f3f   :  { %v3400_v42 = vsub.f32 1.0, %v3399_v23 }
0x2f40   :  { %5714 = vrcp.f32 %v3329_v59  ;;  %v3341_v20 = vand.u32 2147483648, %v3329_v59  ;;  %vm3335_vm2 = vweird.f32 %v3329_v59  ;;  %v3339_v18 = vand.u32 2147483647, %v3329_v59 }
0x2f41   :  { %v3401_v58 = vmul.f32 %v5711_v61, %v3400_v42 }
0x2f42   :  { %v3342_v16 = vor.u32 1.1754944e-38, %v3341_v20  ;;  %vm3340_vm7 = vcmp.eq.f32.partialorder %v3339_v18, 8.507059e+37 }
0x2f43   :  { %v3402_v34 = vadd.f32 %v5711_v61, %v3401_v58 }
0x2f45   :  { %v3406_v45 = vsel %vm3405_vm4, %v5711_v61, %v3402_v34 }
0x2f46   :  { %v5715_v7 = vpop.eup %5714  ;;  %v3411_v13 = vsel %vm3408_vm5, %v3410_v50, %v3406_v45 }
0x2f47   :  { %v3331_v0 = vmul.f32 %v5715_v7, %v3329_v59  ;;  %vm3336_vm0 = vweird.f32 %v5715_v7  ;;  %v3417_v52 = vmul.f32 %v3415_v4, %v3411_v13 }
0x2f48   :  { %vm3337_vm6 = vmor %vm3335_vm2, %vm3336_vm0 }
0x2f49   :  { %v3332_v56 = vsub.f32 1.0, %v3331_v0 }
0x2f4b   :  { %v3333_v26 = vmul.f32 %v5715_v7, %v3332_v56 }
0x2f4d   :  { %v3334_v63 = vadd.f32 %v5715_v7, %v3333_v26 }
0x2f4f   :  { %v3338_v39 = vsel %vm3337_vm6, %v5715_v7, %v3334_v63 }
0x2f50   :  { %v3343_v48 = vsel %vm3340_vm7, %v3342_v16, %v3338_v39 }
0x2f51   :  { %v3349_v2 = vmul.f32 %v3347_v47, %v3343_v48 }
0x2f7f   :  { %v3420_v11 = vpop.permute.xlu0 %3419 }
0x2f80   :  { %v3422_v21 = vmul.f32 %v3420_v11, %v3411_v13 }
0x2f82   :  { %3424 = vrot.lane.b32.xlu1 %v3422_v21, %s5961_s3 }
0x2f8d   :  { %v3352_v49 = vpop.permute.xlu2 %3351 }
0x2f8e   :  { %v3354_v36 = vmul.f32 %v3352_v49, %v3343_v48 }
0x2f90   :  { %3356 = vrot.lane.b32.xlu1 %v3354_v36, %s5961_s3 }
0x2ff4   :  { %v3425_v27 = vpop.permute.xlu1 %3424 }
0x2ff5   :  { %v7146_v62 = vadd.f32 %v3425_v27, %v3417_v52 }
0x2ff7   :  { %5716 = vtanh.f32 %v7146_v62  ;;  %v3553_v16 = vrot.slane %v7146_v62, 4 }
0x2ffd   :  { %v5717_v57 = vpop.eup %5716 }
0x2ffe   :  { %3430 = vrot.lane.b32.xlu0 %v5717_v57, %s5961_s3 }
0x3002   :  { %v3357_v6 = vpop.permute.xlu1 %3356 }
0x3003   :  { %v7151_v17 = vadd.f32 %v3357_v6, %v3349_v2 }
0x3005   :  { %5718 = vtanh.f32 %v7151_v17  ;;  %v3483_v52 = vrot.slane %v7151_v17, 4  ;;  %v7197_v17 = vld [vmem:[%s7516_s12 + $0x18] sm:$0xff] }
0x300b   :  { %v5719_v44 = vpop.eup %5718 }
0x300c   :  { %3362 = vrot.lane.b32.xlu0 %v5719_v44, %s5961_s3 }
0x3070   :  { %v3431_v5 = vpop.permute.xlu0 %3430 }
0x3071   :  { %v3433_v12 = vmul.f32 %v3431_v5, %v3411_v13 }
0x3073   :  { %3504 = vrot.lane.b32.xlu2 %v3433_v12, %s5962_s4 }
0x307e   :  { %v3363_v43 = vpop.permute.xlu0 %3362 }
0x307f   :  { %v3365_v9 = vmul.f32 %v3363_v43, %v3343_v48 }
0x3081   :  { %v3436_v14 = vrot.slane %v3365_v9, 4  ;;  %v7203_v9 = vld [vmem:[%s7516_s12 + $0x10] sm:$0xff] }
0x3083   :  { %3437 = vrot.lane.b32.xlu1 %v3436_v14, %s5962_s4  ;;  %v7209_v14 = vld [vmem:[%s7516_s12 + $0x8] sm:$0xff] }
0x30cd   :  { %v3505_v40 = vpop.permute.xlu2 %3504 }
0x30ce   :  { %5348 = vmatmul.msk.f32.vlgmr.msrb.gmra.mxu2 %vm427_vm15, %v3505_v40  ;;  %v7215_v40 = vld [vmem:[%s7516_s12] sm:$0xff] }
0x30cf   :  { %3796 = vmatpush.msrb.mxu2 %v7006_v32  ;;  %v7172_v32 = vld [vmem:[%s7515_s11 + $0x10] sm:$0xff] }
0x30d1   :  { %3797 = vmatpush.msrb.mxu2 %v7011_v54 }
0x30d3   :  { %3798 = vmatpush.msrb.mxu2 %v7018_v31 }
0x30d5   :  { %3799 = vmatpush.msrb.mxu2 %v7026_v53  ;;  %v3502_v53 = vld [vmem:[#allocation4 + $0x58] sm:$0xf0] }
0x30f5   :  { %v3438_v8 = vpop.permute.xlu1 %3437 }
0x30f6   :  { %5346 = vmatmul.msk.f32.vlgmr.msrb.gmra.mxu0 %vm427_vm15, %v3438_v8 }
0x30f7   :  { %3729 = vmatpush.msrb.mxu0 %v7166_v46 }
0x30f9   :  { %3730 = vmatpush.msrb.mxu0 %v7172_v32 }
0x30fb   :  { %3731 = vmatpush.msrb.mxu0 %v6957_v29 }
0x30fd   :  { %3732 = vmatpush.msrb.mxu0 %v6968_v30 }
0x3151   :  { %v3525_v54 = vpop.f32.mrf.mxu2 }
0x3152   :  { %v3529_v31 = vrot.slane %v3525_v54, 4  ;;  %v7224_v54 = vld [vmem:[%s7515_s11 + $0x8] sm:$0xff] }
0x3154   :  { %v3531_v38 = vadd.f32 %v3529_v31, %v3502_v53  ;;  %v7230_v31 = vld [vmem:[%s7515_s11] sm:$0xff]  ;;  %v3642_v53 = vld [vmem:[#allocation4 + $0x58] sm:$0xf] }
0x3156   :  { %5720 = vtanh.f32 %v3531_v38  ;;  %v5349_v37 = vmul.f32 -1.442695, %v3531_v38 }
0x315c   :  { %v5721_v19 = vpop.eup %5720 }
0x315d   :  { %3557 = vrot.lane.b32.xlu2 %v5721_v19, %s5961_s3 }
0x3173   :  { %v3458_v24 = vpop.f32.mrf.mxu0 }
0x3174   :  { %v3461_v33 = vadd.f32 %v3458_v24, %v3434_v55 }
0x3176   :  { %5722 = vtanh.f32 %v3461_v33  ;;  %v5347_v34 = vmul.f32 -1.442695, %v3461_v33 }
0x3177   :  { %5724 = vpow2.f32 %v5349_v37 }
0x317c   :  { %v5723_v25 = vpop.eup %5722 }
0x317d   :  { %3487 = vrot.lane.b32.xlu1 %v5723_v25, %s5961_s3  ;;  %v5725_v29 = vpop.eup %5724  ;;  %v3572_v25 = vld [vmem:[#allocation4 + $0x48] sm:$0xf0] }
0x317e   :  { %v3535_v41 = vadd.f32 1.0, %v5725_v29 }
0x3180   :  { %5726 = vrcp.f32 %v3535_v41  ;;  %v3547_v61 = vand.u32 2147483648, %v3535_v41  ;;  %vm3541_vm9 = vweird.f32 %v3535_v41  ;;  %v3545_v60 = vand.u32 2147483647, %v3535_v41 }
0x3181   :  { %5728 = vpow2.f32 %v5347_v34 }
0x3182   :  { %v3548_v59 = vor.u32 1.1754944e-38, %v3547_v61  ;;  %vm3546_vm11 = vcmp.eq.f32.partialorder %v3545_v60, 8.507059e+37 }
0x3186   :  { %v5727_v30 = vpop.eup %5726 }
0x3187   :  { %v3537_v10 = vmul.f32 %v5727_v30, %v3535_v41  ;;  %vm3542_vm8 = vweird.f32 %v5727_v30  ;;  %v5729_v35 = vpop.eup %5728 }
0x3188   :  { %vm3543_vm10 = vmor %vm3541_vm9, %vm3542_vm8  ;;  %v3465_v15 = vadd.f32 1.0, %v5729_v35 }
0x3189   :  { %v3538_v1 = vsub.f32 1.0, %v3537_v10 }
0x318a   :  { %5730 = vrcp.f32 %v3465_v15  ;;  %v3477_v13 = vand.u32 2147483648, %v3465_v15  ;;  %vm3471_vm13 = vweird.f32 %v3465_v15  ;;  %v3475_v21 = vand.u32 2147483647, %v3465_v15 }
0x318b   :  { %v3539_v28 = vmul.f32 %v5727_v30, %v3538_v1 }
0x318c   :  { %v3478_v63 = vor.u32 1.1754944e-38, %v3477_v13  ;;  %vm3476_vm3 = vcmp.eq.f32.partialorder %v3475_v21, 8.507059e+37 }
0x318d   :  { %v3540_v51 = vadd.f32 %v5727_v30, %v3539_v28 }
0x318f   :  { %v3544_v23 = vsel %vm3543_vm10, %v5727_v30, %v3540_v51 }
0x3190   :  { %v3549_v58 = vsel %vm3546_vm11, %v3548_v59, %v3544_v23  ;;  %v5731_v0 = vpop.eup %5730 }
0x3191   :  { %v3467_v45 = vmul.f32 %v5731_v0, %v3465_v15  ;;  %vm3472_vm12 = vweird.f32 %v5731_v0  ;;  %v3555_v49 = vmul.f32 %v3553_v16, %v3549_v58 }
0x3192   :  { %vm3473_vm14 = vmor %vm3471_vm13, %vm3472_vm12 }
0x3193   :  { %v3468_v50 = vsub.f32 1.0, %v3467_v45 }
0x3195   :  { %v3469_v56 = vmul.f32 %v5731_v0, %v3468_v50 }
0x3197   :  { %v3470_v11 = vadd.f32 %v5731_v0, %v3469_v56 }
0x3199   :  { %v3474_v26 = vsel %vm3473_vm14, %v5731_v0, %v3470_v11 }
0x319a   :  { %v3479_v18 = vsel %vm3476_vm3, %v3478_v63, %v3474_v26 }
0x319b   :  { %v3485_v27 = vmul.f32 %v3483_v52, %v3479_v18 }
0x31b7   :  { %v3558_v42 = vpop.permute.xlu2 %3557 }
0x31b8   :  { %v3560_v7 = vmul.f32 %v3558_v42, %v3549_v58 }
0x31ba   :  { %3562 = vrot.lane.b32.xlu0 %v3560_v7, %s5961_s3 }
0x31ef   :  { %v3488_v20 = vpop.permute.xlu1 %3487 }
0x31f0   :  { %v3490_v39 = vmul.f32 %v3488_v20, %v3479_v18 }
0x31f2   :  { %3492 = vrot.lane.b32.xlu0 %v3490_v39, %s5961_s3 }
0x322c   :  { %v3563_v48 = vpop.permute.xlu0 %3562 }
0x322d   :  { %v7182_v36 = vadd.f32 %v3563_v48, %v3555_v49 }
0x322f   :  { %5732 = vtanh.f32 %v7182_v36  ;;  %v3691_v48 = vrot.slane %v7182_v36, 4 }
0x3235   :  { %v5733_v4 = vpop.eup %5732 }
0x3236   :  { %3568 = vrot.lane.b32.xlu2 %v5733_v4, %s5961_s3 }
0x3264   :  { %v3493_v57 = vpop.permute.xlu0 %3492 }
0x3265   :  { %v7187_v47 = vadd.f32 %v3493_v57, %v3485_v27 }
0x3267   :  { %5734 = vtanh.f32 %v7187_v47 }
0x326d   :  { %v5735_v2 = vpop.eup %5734 }
0x326e   :  { %3498 = vrot.lane.b32.xlu2 %v5735_v2, %s5961_s3  ;;  %v3623_v2 = vrot.slane %v7187_v47, 4 }
0x3290   :  { %v3569_v62 = vpop.permute.xlu2 %3568 }
0x3291   :  { %v3571_v6 = vmul.f32 %v3569_v62, %v3549_v58 }
0x3293   :  { %v3644_v44 = vrot.slane %v3571_v6, 4 }
0x3295   :  { %3645 = vrot.lane.b32.xlu1 %v3644_v44, %s5962_s4 }
0x32c8   :  { %v3499_v5 = vpop.permute.xlu2 %3498 }
0x32c9   :  { %v3501_v12 = vmul.f32 %v3499_v5, %v3479_v18 }
0x32cb   :  { %3574 = vrot.lane.b32.xlu0 %v3501_v12, %s5962_s4 }
0x3307   :  { %v3646_v43 = vpop.permute.xlu1 %3645 }
0x3308   :  { %5352 = vmatmul.msk.f32.vlgmr.msra.gmra.mxu2 %vm427_vm15, %v3646_v43 }
0x3309   :  { %3937 = vmatpush.msra.mxu2 %v7197_v17 }
0x330b   :  { %3938 = vmatpush.msra.mxu2 %v7203_v9 }
0x330d   :  { %3939 = vmatpush.msra.mxu2 %v7209_v14 }
0x330f   :  { %3940 = vmatpush.msra.mxu2 %v7215_v40 }
0x333d   :  { %v3575_v8 = vpop.permute.xlu0 %3574 }
0x333e   :  { %5350 = vmatmul.msk.f32.vlgmr.msra.gmra.mxu0 %vm427_vm15, %v3575_v8 }
0x333f   :  { %3866 = vmatpush.msra.mxu0 %v7166_v46 }
0x3341   :  { %3867 = vmatpush.msra.mxu0 %v7172_v32 }
0x3343   :  { %3868 = vmatpush.msra.mxu0 %v7224_v54 }
0x3345   :  { %3869 = vmatpush.msra.mxu0 %v7230_v31 }
0x338b   :  { %v3666_v38 = vpop.f32.mrf.mxu2 }
0x338c   :  { %v3669_v19 = vadd.f32 %v3666_v38, %v3642_v53 }
0x338e   :  { %5736 = vtanh.f32 %v3669_v19  ;;  %v5353_v41 = vmul.f32 -1.442695, %v3669_v19 }
0x3394   :  { %v5737_v55 = vpop.eup %5736 }
0x3395   :  { %3695 = vrot.lane.b32.xlu1 %v5737_v55, %s5961_s3 }
0x33bb   :  { %v3595_v24 = vpop.f32.mrf.mxu0 }
0x33bc   :  { %v3599_v33 = vrot.slane %v3595_v24, 4  ;;  %v3778_v24 = vld [vmem:[#allocation4 + $0x78] sm:$0xf0] }
0x33be   :  { %v3601_v37 = vadd.f32 %v3599_v33, %v3572_v25 }
0x33c0   :  { %5738 = vtanh.f32 %v3601_v37  ;;  %v5351_v15 = vmul.f32 -1.442695, %v3601_v37  ;;  %v3710_v37 = vld [vmem:[#allocation4 + $0x70] sm:$0xf] }
0x33c1   :  { %5740 = vpow2.f32 %v5353_v41 }
0x33c6   :  { %v5739_v29 = vpop.eup %5738 }
0x33c7   :  { %3627 = vrot.lane.b32.xlu0 %v5739_v29, %s5961_s3  ;;  %v5741_v30 = vpop.eup %5740 }
0x33c8   :  { %v3673_v10 = vadd.f32 1.0, %v5741_v30 }
0x33ca   :  { %5742 = vrcp.f32 %v3673_v10  ;;  %v3685_v23 = vand.u32 2147483648, %v3673_v10  ;;  %vm3679_vm5 = vweird.f32 %v3673_v10  ;;  %v3683_v59 = vand.u32 2147483647, %v3673_v10 }
0x33cb   :  { %5744 = vpow2.f32 %v5351_v15 }
0x33cc   :  { %v3686_v58 = vor.u32 1.1754944e-38, %v3685_v23  ;;  %vm3684_vm2 = vcmp.eq.f32.partialorder %v3683_v59, 8.507059e+37 }
0x33d0   :  { %v5743_v1 = vpop.eup %5742 }
0x33d1   :  { %v3675_v28 = vmul.f32 %v5743_v1, %v3673_v10  ;;  %vm3680_vm4 = vweird.f32 %v5743_v1  ;;  %v5745_v0 = vpop.eup %5744 }
0x33d2   :  { %vm3681_vm0 = vmor %vm3679_vm5, %vm3680_vm4  ;;  %v3605_v45 = vadd.f32 1.0, %v5745_v0 }
0x33d3   :  { %v3676_v51 = vsub.f32 1.0, %v3675_v28 }
0x33d4   :  { %5746 = vrcp.f32 %v3605_v45  ;;  %v3617_v26 = vand.u32 2147483648, %v3605_v45  ;;  %vm3611_vm7 = vweird.f32 %v3605_v45  ;;  %v3615_v63 = vand.u32 2147483647, %v3605_v45 }
0x33d5   :  { %v3677_v61 = vmul.f32 %v5743_v1, %v3676_v51 }
0x33d6   :  { %v3618_v18 = vor.u32 1.1754944e-38, %v3617_v26  ;;  %vm3616_vm9 = vcmp.eq.f32.partialorder %v3615_v63, 8.507059e+37 }
0x33d7   :  { %v3678_v60 = vadd.f32 %v5743_v1, %v3677_v61 }
0x33d9   :  { %v3682_v42 = vsel %vm3681_vm0, %v5743_v1, %v3678_v60 }
0x33da   :  { %v3687_v34 = vsel %vm3684_vm2, %v3686_v58, %v3682_v42  ;;  %v5747_v50 = vpop.eup %5746 }
0x33db   :  { %v3607_v56 = vmul.f32 %v5747_v50, %v3605_v45  ;;  %vm3612_vm6 = vweird.f32 %v5747_v50  ;;  %v3693_v4 = vmul.f32 %v3691_v48, %v3687_v34 }
0x33dc   :  { %vm3613_vm8 = vmor %vm3611_vm7, %vm3612_vm6 }
0x33dd   :  { %v3608_v11 = vsub.f32 1.0, %v3607_v56 }
0x33df   :  { %v3609_v13 = vmul.f32 %v5747_v50, %v3608_v11 }
0x33e1   :  { %v3610_v21 = vadd.f32 %v5747_v50, %v3609_v13 }
0x33e3   :  { %v3614_v20 = vsel %vm3613_vm8, %v5747_v50, %v3610_v21 }
0x33e4   :  { %v3619_v16 = vsel %vm3616_vm9, %v3618_v18, %v3614_v20 }
0x33e5   :  { %v3625_v62 = vmul.f32 %v3623_v2, %v3619_v16 }
0x3407   :  { %v3696_v7 = vpop.permute.xlu1 %3695 }
0x3408   :  { %v3698_v35 = vmul.f32 %v3696_v7, %v3687_v34 }
0x340a   :  { %3700 = vrot.lane.b32.xlu2 %v3698_v35, %s5961_s3 }
0x3439   :  { %v3628_v39 = vpop.permute.xlu0 %3627 }
0x343a   :  { %v3630_v49 = vmul.f32 %v3628_v39, %v3619_v16 }
0x343c   :  { %3632 = vrot.lane.b32.xlu2 %v3630_v49, %s5961_s3 }
0x3464   :  { %v3701_v52 = vpop.permute.xlu2 %3700 }
0x3465   :  { %v7238_v27 = vadd.f32 %v3701_v52, %v3693_v4 }
0x3467   :  { %5748 = vtanh.f32 %v7238_v27  ;;  %v3829_v52 = vrot.slane %v7238_v27, 4 }
0x346d   :  { %v5749_v57 = vpop.eup %5748 }
0x346e   :  { %3706 = vrot.lane.b32.xlu1 %v5749_v57, %s5961_s3 }
0x3496   :  { %v3633_v6 = vpop.permute.xlu2 %3632 }
0x3497   :  { %v7243_v44 = vadd.f32 %v3633_v6, %v3625_v62 }
0x3499   :  { %5750 = vtanh.f32 %v7243_v44  ;;  %v3759_v6 = vrot.slane %v7243_v44, 4 }
0x349f   :  { %v5751_v5 = vpop.eup %5750 }
0x34a0   :  { %3638 = vrot.lane.b32.xlu1 %v5751_v5, %s5961_s3 }
0x34e0   :  { %v3707_v36 = vpop.permute.xlu1 %3706 }
0x34e1   :  { %v3709_v12 = vmul.f32 %v3707_v36, %v3687_v34 }
0x34e3   :  { %3780 = vrot.lane.b32.xlu0 %v3709_v12, %s5962_s4 }
0x3512   :  { %v3639_v43 = vpop.permute.xlu1 %3638 }
0x3513   :  { %v3641_v8 = vmul.f32 %v3639_v43, %v3619_v16 }
0x3515   :  { %v3712_v53 = vrot.slane %v3641_v8, 4 }
0x3517   :  { %3713 = vrot.lane.b32.xlu2 %v3712_v53, %s5962_s4 }
0x3555   :  { %v3781_v38 = vpop.permute.xlu0 %3780 }
0x3556   :  { %5356 = vmatmul.msk.f32.vlgmr.msrb.gmra.mxu2 %vm427_vm15, %v3781_v38 }
0x3557   :  { %4072 = vmatpush.msrb.mxu2 %v7197_v17 }
0x3559   :  { %4073 = vmatpush.msrb.mxu2 %v7203_v9 }
0x355b   :  { %4074 = vmatpush.msrb.mxu2 %v7209_v14 }
0x355d   :  { %4075 = vmatpush.msrb.mxu2 %v7215_v40 }
0x3571   :  { %v3714_v47 = vpop.permute.xlu2 %3713 }
0x3572   :  { %5354 = vmatmul.msk.f32.vlgmr.msrb.gmra.mxu0 %vm427_vm15, %v3714_v47 }
0x3573   :  { %4005 = vmatpush.msrb.mxu0 %v7166_v46 }
0x3575   :  { %4006 = vmatpush.msrb.mxu0 %v7172_v32 }
0x3577   :  { %4007 = vmatpush.msrb.mxu0 %v7224_v54 }
0x3579   :  { %4008 = vmatpush.msrb.mxu0 %v7230_v31 }
0x35d9   :  { %v3801_v19 = vpop.f32.mrf.mxu2 }
0x35da   :  { %v3805_v55 = vrot.slane %v3801_v19, 4 }
0x35dc   :  { %v3807_v33 = vadd.f32 %v3805_v55, %v3778_v24  ;;  %v3918_v24 = vld [vmem:[#allocation4 + $0x78] sm:$0xf] }
0x35de   :  { %5752 = vtanh.f32 %v3807_v33  ;;  %v5357_v10 = vmul.f32 -1.442695, %v3807_v33 }
0x35e4   :  { %v5753_v25 = vpop.eup %5752 }
0x35e5   :  { %3833 = vrot.lane.b32.xlu0 %v5753_v25, %s5961_s3 }
0x35ef   :  { %v3734_v29 = vpop.f32.mrf.mxu0 }
0x35f0   :  { %v3737_v41 = vadd.f32 %v3734_v29, %v3710_v37 }
0x35f2   :  { %5754 = vtanh.f32 %v3737_v41  ;;  %v5355_v1 = vmul.f32 -1.442695, %v3737_v41 }
0x35f3   :  { %5756 = vpow2.f32 %v5357_v10 }
0x35f4   :  { %5758 = vpow2.f32 %v5355_v1 }
0x35f8   :  { %v5755_v30 = vpop.eup %5754 }
0x35f9   :  { %3763 = vrot.lane.b32.xlu2 %v5755_v30, %s5961_s3  ;;  %v5757_v28 = vpop.eup %5756  ;;  %v3848_v30 = vld [vmem:[#allocation4 + $0x70] sm:$0xf0] }
0x35fa   :  { %v3811_v51 = vadd.f32 1.0, %v5757_v28  ;;  %v5759_v61 = vpop.eup %5758 }
0x35fb   :  { %v3741_v60 = vadd.f32 1.0, %v5759_v61 }
0x35fc   :  { %5760 = vrcp.f32 %v3811_v51  ;;  %v3823_v0 = vand.u32 2147483648, %v3811_v51  ;;  %vm3817_vm11 = vweird.f32 %v3811_v51  ;;  %v3821_v45 = vand.u32 2147483647, %v3811_v51 }
0x35fd   :  { %5762 = vrcp.f32 %v3741_v60  ;;  %v3753_v20 = vand.u32 2147483648, %v3741_v60  ;;  %vm3747_vm3 = vweird.f32 %v3741_v60  ;;  %v3751_v18 = vand.u32 2147483647, %v3741_v60 }
0x35fe   :  { %v3824_v11 = vor.u32 1.1754944e-38, %v3823_v0  ;;  %vm3822_vm13 = vcmp.eq.f32.partialorder %v3821_v45, 8.507059e+37 }
0x35ff   :  { %v3754_v49 = vor.u32 1.1754944e-38, %v3753_v20  ;;  %vm3752_vm5 = vcmp.eq.f32.partialorder %v3751_v18, 8.507059e+37 }
0x3602   :  { %v5761_v23 = vpop.eup %5760 }
0x3603   :  { %v3813_v59 = vmul.f32 %v5761_v23, %v3811_v51  ;;  %v5763_v58 = vpop.eup %5762  ;;  %vm3818_vm10 = vweird.f32 %v5761_v23 }
0x3604   :  { %v3743_v7 = vmul.f32 %v5763_v58, %v3741_v60  ;;  %vm3819_vm12 = vmor %vm3817_vm11, %vm3818_vm10  ;;  %vm3748_vm14 = vweird.f32 %v5763_v58 }
0x3605   :  { %v3814_v42 = vsub.f32 1.0, %v3813_v59  ;;  %vm3749_vm4 = vmor %vm3747_vm3, %vm3748_vm14 }
0x3606   :  { %v3744_v35 = vsub.f32 1.0, %v3743_v7 }
0x3607   :  { %v3815_v34 = vmul.f32 %v5761_v23, %v3814_v42 }
0x3608   :  { %v3745_v50 = vmul.f32 %v5763_v58, %v3744_v35 }
0x3609   :  { %v3816_v15 = vadd.f32 %v5761_v23, %v3815_v34 }
0x360a   :  { %v3746_v26 = vadd.f32 %v5763_v58, %v3745_v50 }
0x360b   :  { %v3820_v56 = vsel %vm3819_vm12, %v5761_v23, %v3816_v15 }
0x360c   :  { %v3825_v21 = vsel %vm3822_vm13, %v3824_v11, %v3820_v56  ;;  %v3750_v39 = vsel %vm3749_vm4, %v5763_v58, %v3746_v26 }
0x360d   :  { %v3755_v48 = vsel %vm3752_vm5, %v3754_v49, %v3750_v39  ;;  %v3831_v57 = vmul.f32 %v3829_v52, %v3825_v21 }
0x360e   :  { %v3761_v5 = vmul.f32 %v3759_v6, %v3755_v48 }
0x3653   :  { %v3764_v16 = vpop.permute.xlu2 %3763 }
0x3654   :  { %v3766_v4 = vmul.f32 %v3764_v16, %v3755_v48 }
0x3657   :  { %v3834_v13 = vpop.permute.xlu0 %3833 }
0x3658   :  { %v3836_v63 = vmul.f32 %v3834_v13, %v3825_v21 }
0x365a   :  { %3838 = vrot.lane.b32.xlu1 %v3836_v63, %s5961_s3 }
0x3662   :  { %3768 = vrot.lane.b32.xlu1 %v3766_v4, %s5961_s3 }
0x36cc   :  { %v3839_v2 = vpop.permute.xlu1 %3838 }
0x36cd   :  { %v7264_v62 = vadd.f32 %v3839_v2, %v3831_v57 }
0x36cf   :  { %5764 = vtanh.f32 %v7264_v62  ;;  %v3967_v2 = vrot.slane %v7264_v62, 4 }
0x36d4   :  { %v3769_v36 = vpop.permute.xlu1 %3768 }
0x36d5   :  { %v5765_v12 = vpop.eup %5764  ;;  %v7268_v43 = vadd.f32 %v3769_v36, %v3761_v5 }
0x36d6   :  { %3844 = vrot.lane.b32.xlu0 %v5765_v12, %s5961_s3 }
0x36d7   :  { %5766 = vtanh.f32 %v7268_v43 }
0x36dd   :  { %v5767_v8 = vpop.eup %5766 }
0x36de   :  { %3774 = vrot.lane.b32.xlu0 %v5767_v8, %s5961_s3  ;;  %v3899_v8 = vrot.slane %v7268_v43, 4 }
0x3748   :  { %v3845_v27 = vpop.permute.xlu0 %3844 }
0x3749   :  { %v3847_v53 = vmul.f32 %v3845_v27, %v3825_v21 }
0x374b   :  { %v3920_v38 = vrot.slane %v3847_v53, 4 }
0x374d   :  { %3921 = vrot.lane.b32.xlu2 %v3920_v38, %s5962_s4 }
0x3750   :  { %v3775_v47 = vpop.permute.xlu0 %3774 }
0x3751   :  { %v3777_v19 = vmul.f32 %v3775_v47, %v3755_v48 }
0x3753   :  { %3850 = vrot.lane.b32.xlu1 %v3777_v19, %s5962_s4 }
0x37a7   :  { %v3922_v44 = vpop.permute.xlu2 %3921 }
0x37a8   :  { %5360 = vmatmul.msk.f32.vlgmr.msra.gmra.mxu2 %vm427_vm15, %v3922_v44 }
0x37a9   :  { %4348 = vmatpush.msra.mxu2 %v7197_v17 }
0x37ab   :  { %4349 = vmatpush.msra.mxu2 %v7203_v9 }
0x37ad   :  { %4350 = vmatpush.msra.mxu2 %v7209_v14 }
0x37af   :  { %4351 = vmatpush.msra.mxu2 %v7215_v40 }
0x37c5   :  { %v3851_v55 = vpop.permute.xlu1 %3850 }
0x37c6   :  { %5358 = vmatmul.msk.f32.vlgmr.msra.gmra.mxu0 %vm427_vm15, %v3851_v55 }
0x37c7   :  { %4281 = vmatpush.msra.mxu0 %v7166_v46 }
0x37c9   :  { %4282 = vmatpush.msra.mxu0 %v7172_v32 }
0x37cb   :  { %4283 = vmatpush.msra.mxu0 %v7224_v54 }
0x37cd   :  { %4284 = vmatpush.msra.mxu0 %v7230_v31 }
0x382b   :  { %v3942_v33 = vpop.f32.mrf.mxu2 }
0x382c   :  { %v3945_v25 = vadd.f32 %v3942_v33, %v3918_v24 }
0x382e   :  { %5768 = vtanh.f32 %v3945_v25  ;;  %v5361_v28 = vmul.f32 -1.442695, %v3945_v25 }
0x3834   :  { %v5769_v37 = vpop.eup %5768 }
0x3835   :  { %3971 = vrot.lane.b32.xlu2 %v5769_v37, %s5961_s3 }
0x3843   :  { %v3871_v29 = vpop.f32.mrf.mxu0 }
0x3844   :  { %v3875_v41 = vrot.slane %v3871_v29, 4  ;;  %v4054_v29 = vld [vmem:[#allocation4 + $0x38] sm:$0xf0] }
0x3846   :  { %v3877_v10 = vadd.f32 %v3875_v41, %v3848_v30 }
0x3848   :  { %5770 = vtanh.f32 %v3877_v10  ;;  %v5359_v56 = vmul.f32 -1.442695, %v3877_v10  ;;  %v3986_v10 = vld [vmem:[#allocation4 + $0x20] sm:$0xf] }
0x3849   :  { %5772 = vpow2.f32 %v5361_v28 }
0x384e   :  { %v5771_v1 = vpop.eup %5770 }
0x384f   :  { %3903 = vrot.lane.b32.xlu1 %v5771_v1, %s5961_s3  ;;  %v5773_v51 = vpop.eup %5772 }
0x3850   :  { %v3949_v61 = vadd.f32 1.0, %v5773_v51 }
0x3852   :  { %5774 = vrcp.f32 %v3949_v61  ;;  %v3961_v7 = vand.u32 2147483648, %v3949_v61  ;;  %vm3955_vm2 = vweird.f32 %v3949_v61  ;;  %v3959_v34 = vand.u32 2147483647, %v3949_v61 }
0x3853   :  { %5776 = vpow2.f32 %v5359_v56 }
0x3854   :  { %v3962_v15 = vor.u32 1.1754944e-38, %v3961_v7  ;;  %vm3960_vm7 = vcmp.eq.f32.partialorder %v3959_v34, 8.507059e+37 }
0x3858   :  { %v5775_v60 = vpop.eup %5774 }
0x3859   :  { %v3951_v23 = vmul.f32 %v5775_v60, %v3949_v61  ;;  %vm3956_vm0 = vweird.f32 %v5775_v60  ;;  %v5777_v11 = vpop.eup %5776 }
0x385a   :  { %vm3957_vm6 = vmor %vm3955_vm2, %vm3956_vm0  ;;  %v3881_v13 = vadd.f32 1.0, %v5777_v11 }
0x385b   :  { %v3952_v59 = vsub.f32 1.0, %v3951_v23 }
0x385c   :  { %5778 = vrcp.f32 %v3881_v13  ;;  %v3893_v39 = vand.u32 2147483648, %v3881_v13  ;;  %vm3887_vm9 = vweird.f32 %v3881_v13  ;;  %v3891_v16 = vand.u32 2147483647, %v3881_v13 }
0x385d   :  { %v3953_v42 = vmul.f32 %v5775_v60, %v3952_v59 }
0x385e   :  { %v3894_v48 = vor.u32 1.1754944e-38, %v3893_v39  ;;  %vm3892_vm11 = vcmp.eq.f32.partialorder %v3891_v16, 8.507059e+37 }
0x385f   :  { %v3954_v58 = vadd.f32 %v5775_v60, %v3953_v42 }
0x3861   :  { %v3958_v35 = vsel %vm3957_vm6, %v5775_v60, %v3954_v58 }
0x3862   :  { %v3963_v45 = vsel %vm3960_vm7, %v3962_v15, %v3958_v35  ;;  %v5779_v21 = vpop.eup %5778 }
0x3863   :  { %v3883_v26 = vmul.f32 %v5779_v21, %v3881_v13  ;;  %vm3888_vm8 = vweird.f32 %v5779_v21  ;;  %v3969_v6 = vmul.f32 %v3967_v2, %v3963_v45 }
0x3864   :  { %vm3889_vm10 = vmor %vm3887_vm9, %vm3888_vm8 }
0x3865   :  { %v3884_v63 = vsub.f32 1.0, %v3883_v26 }
0x3867   :  { %v3885_v20 = vmul.f32 %v5779_v21, %v3884_v63 }
0x3869   :  { %v3886_v18 = vadd.f32 %v5779_v21, %v3885_v20 }
0x386b   :  { %v3890_v49 = vsel %vm3889_vm10, %v5779_v21, %v3886_v18 }
0x386c   :  { %v3895_v52 = vsel %vm3892_vm11, %v3894_v48, %v3890_v49 }
0x386d   :  { %v3901_v27 = vmul.f32 %v3899_v8, %v3895_v52 }
0x388f   :  { %v3972_v0 = vpop.permute.xlu2 %3971 }
0x3890   :  { %v3974_v50 = vmul.f32 %v3972_v0, %v3963_v45 }
0x3892   :  { %3976 = vrot.lane.b32.xlu0 %v3974_v50, %s5961_s3 }
0x38c1   :  { %v3904_v4 = vpop.permute.xlu1 %3903 }
0x38c2   :  { %v3906_v57 = vmul.f32 %v3904_v4, %v3895_v52 }
0x38c4   :  { %3908 = vrot.lane.b32.xlu0 %v3906_v57, %s5961_s3 }
0x3904   :  { %v3977_v5 = vpop.permute.xlu0 %3976 }
0x3905   :  { %v7290_v36 = vadd.f32 %v3977_v5, %v3969_v6 }
0x3907   :  { %5780 = vtanh.f32 %v7290_v36  ;;  %v4105_v5 = vrot.slane %v7290_v36, 4 }
0x390d   :  { %v5781_v12 = vpop.eup %5780 }
0x390e   :  { %3982 = vrot.lane.b32.xlu2 %v5781_v12, %s5961_s3 }
0x3936   :  { %v3909_v53 = vpop.permute.xlu0 %3908 }
0x3937   :  { %v7295_v38 = vadd.f32 %v3909_v53, %v3901_v27 }
0x3939   :  { %5782 = vtanh.f32 %v7295_v38 }
0x393f   :  { %v5783_v47 = vpop.eup %5782 }
0x3940   :  { %3914 = vrot.lane.b32.xlu2 %v5783_v47, %s5961_s3  ;;  %v4035_v47 = vrot.slane %v7295_v38, 4 }
0x3968   :  { %v3983_v62 = vpop.permute.xlu2 %3982 }
0x3969   :  { %v3985_v19 = vmul.f32 %v3983_v62, %v3963_v45 }
0x396b   :  { %4056 = vrot.lane.b32.xlu1 %v3985_v19, %s5962_s4 }
0x399a   :  { %v3915_v44 = vpop.permute.xlu2 %3914 }
0x399b   :  { %v3917_v55 = vmul.f32 %v3915_v44, %v3895_v52 }
0x399d   :  { %v3988_v24 = vrot.slane %v3917_v55, 4 }
0x399f   :  { %3989 = vrot.lane.b32.xlu0 %v3988_v24, %s5962_s4 }
0x39dd   :  { %v4057_v33 = vpop.permute.xlu1 %4056 }
0x39de   :  { %5364 = vmatmul.msk.f32.vlgmr.msrb.gmra.mxu2 %vm427_vm15, %v4057_v33 }
0x39df   :  { %4624 = vmatpush.msrb.mxu2 %v7197_v17 }
0x39e1   :  { %4625 = vmatpush.msrb.mxu2 %v7203_v9 }
0x39e3   :  { %4626 = vmatpush.msrb.mxu2 %v7209_v14 }
0x39e5   :  { %4627 = vmatpush.msrb.mxu2 %v7215_v40 }
0x3a11   :  { %v3990_v43 = vpop.permute.xlu0 %3989 }
0x3a12   :  { %5362 = vmatmul.msk.f32.vlgmr.msrb.gmra.mxu0 %vm427_vm15, %v3990_v43 }
0x3a13   :  { %4557 = vmatpush.msrb.mxu0 %v7166_v46 }
0x3a15   :  { %4558 = vmatpush.msrb.mxu0 %v7172_v32 }
0x3a17   :  { %4559 = vmatpush.msrb.mxu0 %v7224_v54 }
0x3a19   :  { %4560 = vmatpush.msrb.mxu0 %v7230_v31 }
0x3a61   :  { %v4077_v25 = vpop.f32.mrf.mxu2 }
0x3a62   :  { %v4081_v37 = vrot.slane %v4077_v25, 4 }
0x3a64   :  { %v4083_v41 = vadd.f32 %v4081_v37, %v4054_v29  ;;  %v4194_v29 = vld [vmem:[#allocation4 + $0x38] sm:$0xf] }
0x3a66   :  { %5784 = vtanh.f32 %v4083_v41  ;;  %v5365_v61 = vmul.f32 -1.442695, %v4083_v41 }
0x3a6c   :  { %v5785_v30 = vpop.eup %5784 }
0x3a6d   :  { %4109 = vrot.lane.b32.xlu1 %v5785_v30, %s5961_s3 }
0x3a8f   :  { %v4010_v1 = vpop.f32.mrf.mxu0 }
0x3a90   :  { %v4013_v28 = vadd.f32 %v4010_v1, %v3986_v10 }
0x3a92   :  { %5786 = vtanh.f32 %v4013_v28  ;;  %v5363_v50 = vmul.f32 -1.442695, %v4013_v28 }
0x3a93   :  { %5788 = vpow2.f32 %v5365_v61 }
0x3a98   :  { %v5787_v51 = vpop.eup %5786 }
0x3a99   :  { %4039 = vrot.lane.b32.xlu0 %v5787_v51, %s5961_s3  ;;  %v5789_v60 = vpop.eup %5788  ;;  %v4124_v51 = vld [vmem:[#allocation4 + $0x20] sm:$0xf0] }
0x3a9a   :  { %v4087_v23 = vadd.f32 1.0, %v5789_v60 }
0x3a9c   :  { %5790 = vrcp.f32 %v4087_v23  ;;  %v4099_v35 = vand.u32 2147483648, %v4087_v23  ;;  %vm4093_vm13 = vweird.f32 %v4087_v23  ;;  %v4097_v15 = vand.u32 2147483647, %v4087_v23 }
0x3a9d   :  { %5792 = vpow2.f32 %v5363_v50 }
0x3a9e   :  { %v4100_v45 = vor.u32 1.1754944e-38, %v4099_v35  ;;  %vm4098_vm3 = vcmp.eq.f32.partialorder %v4097_v15, 8.507059e+37 }
0x3aa2   :  { %v5791_v59 = vpop.eup %5790 }
0x3aa3   :  { %v4089_v42 = vmul.f32 %v5791_v59, %v4087_v23  ;;  %vm4094_vm12 = vweird.f32 %v5791_v59  ;;  %v5793_v21 = vpop.eup %5792 }
0x3aa4   :  { %vm4095_vm14 = vmor %vm4093_vm13, %vm4094_vm12  ;;  %v4017_v26 = vadd.f32 1.0, %v5793_v21 }
0x3aa5   :  { %v4090_v58 = vsub.f32 1.0, %v4089_v42 }
0x3aa6   :  { %5794 = vrcp.f32 %v4017_v26  ;;  %v4029_v49 = vand.u32 2147483648, %v4017_v26  ;;  %vm4023_vm5 = vweird.f32 %v4017_v26  ;;  %v4027_v48 = vand.u32 2147483647, %v4017_v26 }
0x3aa7   :  { %v4091_v7 = vmul.f32 %v5791_v59, %v4090_v58 }
0x3aa8   :  { %v4030_v52 = vor.u32 1.1754944e-38, %v4029_v49  ;;  %vm4028_vm2 = vcmp.eq.f32.partialorder %v4027_v48, 8.507059e+37 }
0x3aa9   :  { %v4092_v34 = vadd.f32 %v5791_v59, %v4091_v7 }
0x3aab   :  { %v4096_v0 = vsel %vm4095_vm14, %v5791_v59, %v4092_v34 }
0x3aac   :  { %v4101_v11 = vsel %vm4098_vm3, %v4100_v45, %v4096_v0  ;;  %v5795_v63 = vpop.eup %5794 }
0x3aad   :  { %v4019_v20 = vmul.f32 %v5795_v63, %v4017_v26  ;;  %vm4024_vm4 = vweird.f32 %v5795_v63  ;;  %v4107_v12 = vmul.f32 %v4105_v5, %v4101_v11 }
0x3aae   :  { %vm4025_vm0 = vmor %vm4023_vm5, %vm4024_vm4 }
0x3aaf   :  { %v4020_v18 = vsub.f32 1.0, %v4019_v20 }
0x3ab1   :  { %v4021_v39 = vmul.f32 %v5795_v63, %v4020_v18 }
0x3ab3   :  { %v4022_v16 = vadd.f32 %v5795_v63, %v4021_v39 }
0x3ab5   :  { %v4026_v4 = vsel %vm4025_vm0, %v5795_v63, %v4022_v16 }
0x3ab6   :  { %v4031_v2 = vsel %vm4028_vm2, %v4030_v52, %v4026_v4 }
0x3ab7   :  { %v4037_v62 = vmul.f32 %v4035_v47, %v4031_v2 }
0x3adf   :  { %v4110_v56 = vpop.permute.xlu1 %4109 }
0x3ae0   :  { %v4112_v13 = vmul.f32 %v4110_v56, %v4101_v11 }
0x3ae2   :  { %4114 = vrot.lane.b32.xlu2 %v4112_v13, %s5961_s3 }
0x3b0b   :  { %v4040_v57 = vpop.permute.xlu0 %4039 }
0x3b0c   :  { %v4042_v6 = vmul.f32 %v4040_v57, %v4031_v2 }
0x3b0e   :  { %4044 = vrot.lane.b32.xlu1 %v4042_v6, %s5961_s3 }
0x3b3c   :  { %v4115_v8 = vpop.permute.xlu2 %4114 }
0x3b3d   :  { %v7316_v27 = vadd.f32 %v4115_v8, %v4107_v12 }
0x3b3f   :  { %5796 = vtanh.f32 %v7316_v27  ;;  %v4243_v5 = vrot.slane %v7316_v27, 4 }
0x3b45   :  { %v5797_v53 = vpop.eup %5796 }
0x3b46   :  { %4120 = vrot.lane.b32.xlu2 %v5797_v53, %s5961_s3 }
0x3b80   :  { %v4045_v19 = vpop.permute.xlu1 %4044 }
0x3b81   :  { %v7321_v44 = vadd.f32 %v4045_v19, %v4037_v62 }
0x3b83   :  { %5798 = vtanh.f32 %v7321_v44  ;;  %v4175_v62 = vrot.slane %v7321_v44, 4 }
0x3b89   :  { %v5799_v55 = vpop.eup %5798 }
0x3b8a   :  { %4050 = vrot.lane.b32.xlu0 %v5799_v55, %s5961_s3 }
0x3ba0   :  { %v4121_v36 = vpop.permute.xlu2 %4120 }
0x3ba1   :  { %v4123_v24 = vmul.f32 %v4121_v36, %v4101_v11 }
0x3ba3   :  { %v4196_v33 = vrot.slane %v4123_v24, 4 }
0x3ba5   :  { %4197 = vrot.lane.b32.xlu1 %v4196_v33, %s5962_s4 }
0x3bfc   :  { %v4051_v43 = vpop.permute.xlu0 %4050 }
0x3bfd   :  { %v4053_v25 = vmul.f32 %v4051_v43, %v4031_v2 }
0x3bff   :  { %4126 = vrot.lane.b32.xlu2 %v4053_v25, %s5962_s4 }
0x3c17   :  { %v4198_v37 = vpop.permute.xlu1 %4197 }
0x3c18   :  { %5368 = vmatmul.msk.f32.vlgmr.msrb.gmra.mxu3 %vm427_vm15, %v4198_v37 }
0x3c19   :  { %4765 = vmatpush.msrb.mxu3 %v7197_v17 }
0x3c1b   :  { %4766 = vmatpush.msrb.mxu3 %v7203_v9 }
0x3c1d   :  { %4767 = vmatpush.msrb.mxu3 %v7209_v14 }
0x3c1f   :  { %4768 = vmatpush.msrb.mxu3 %v7215_v40 }
0x3c59   :  { %v4127_v38 = vpop.permute.xlu2 %4126 }
0x3c5a   :  { %5366 = vmatmul.msk.f32.vlgmr.msrb.gmra.mxu1 %vm427_vm15, %v4127_v38 }
0x3c5b   :  { %4694 = vmatpush.msrb.mxu1 %v7166_v46 }
0x3c5d   :  { %4695 = vmatpush.msrb.mxu1 %v7172_v32 }
0x3c5f   :  { %4696 = vmatpush.msrb.mxu1 %v7224_v54 }
0x3c61   :  { %4697 = vmatpush.msrb.mxu1 %v7230_v31 }
0x3c9b   :  { %v4218_v41 = vpop.f32.mrf.mxu3 }
0x3c9c   :  { %v4221_v30 = vadd.f32 %v4218_v41, %v4194_v29  ;;  %v7362_v29 = vld [vmem:[%s7515_s11 + $0x18] sm:$0xff] }
0x3c9e   :  { %5800 = vtanh.f32 %v4221_v30  ;;  %v5369_v46 = vmul.f32 -1.442695, %v4221_v30 }
0x3ca4   :  { %v5801_v10 = vpop.eup %5800 }
0x3ca5   :  { %4247 = vrot.lane.b32.xlu0 %v5801_v10, %s5961_s3 }
0x3cd7   :  { %v4147_v1 = vpop.f32.mrf.mxu1 }
0x3cd8   :  { %v4151_v28 = vrot.slane %v4147_v1, 4  ;;  %v4262_v1 = vld [vmem:[#allocation4 + $0x18] sm:$0xf] }
0x3cda   :  { %v4153_v61 = vadd.f32 %v4151_v28, %v4124_v51 }
0x3cdc   :  { %5802 = vtanh.f32 %v4153_v61  ;;  %v5367_v13 = vmul.f32 -1.442695, %v4153_v61 }
0x3cdd   :  { %5804 = vpow2.f32 %v5369_v46 }
0x3ce2   :  { %v5803_v60 = vpop.eup %5802 }
0x3ce3   :  { %4179 = vrot.lane.b32.xlu1 %v5803_v60, %s5961_s3  ;;  %v5805_v32 = vpop.eup %5804 }
0x3ce4   :  { %v4225_v23 = vadd.f32 1.0, %v5805_v32 }
0x3ce6   :  { %5806 = vrcp.f32 %v4225_v23  ;;  %v4237_v35 = vand.u32 2147483648, %v4225_v23  ;;  %vm4231_vm7 = vweird.f32 %v4225_v23  ;;  %v4235_v15 = vand.u32 2147483647, %v4225_v23 }
0x3ce7   :  { %5808 = vpow2.f32 %v5367_v13 }
0x3ce8   :  { %v4238_v45 = vor.u32 1.1754944e-38, %v4237_v35  ;;  %vm4236_vm9 = vcmp.eq.f32.partialorder %v4235_v15, 8.507059e+37 }
0x3cec   :  { %v5807_v59 = vpop.eup %5806 }
0x3ced   :  { %v4227_v42 = vmul.f32 %v5807_v59, %v4225_v23  ;;  %vm4232_vm6 = vweird.f32 %v5807_v59  ;;  %v5809_v21 = vpop.eup %5808 }
0x3cee   :  { %vm4233_vm8 = vmor %vm4231_vm7, %vm4232_vm6  ;;  %v4157_v26 = vadd.f32 1.0, %v5809_v21 }
0x3cef   :  { %v4228_v58 = vsub.f32 1.0, %v4227_v42 }
0x3cf0   :  { %5810 = vrcp.f32 %v4157_v26  ;;  %v4169_v49 = vand.u32 2147483648, %v4157_v26  ;;  %vm4163_vm11 = vweird.f32 %v4157_v26  ;;  %v4167_v48 = vand.u32 2147483647, %v4157_v26 }
0x3cf1   :  { %v4229_v7 = vmul.f32 %v5807_v59, %v4228_v58 }
0x3cf2   :  { %v4170_v52 = vor.u32 1.1754944e-38, %v4169_v49  ;;  %vm4168_vm13 = vcmp.eq.f32.partialorder %v4167_v48, 8.507059e+37 }
0x3cf3   :  { %v4230_v34 = vadd.f32 %v5807_v59, %v4229_v7 }
0x3cf5   :  { %v4234_v0 = vsel %vm4233_vm8, %v5807_v59, %v4230_v34 }
0x3cf6   :  { %v4239_v56 = vsel %vm4236_vm9, %v4238_v45, %v4234_v0  ;;  %v5811_v63 = vpop.eup %5810 }
0x3cf7   :  { %v4159_v20 = vmul.f32 %v5811_v63, %v4157_v26  ;;  %vm4164_vm10 = vweird.f32 %v5811_v63  ;;  %v4245_v12 = vmul.f32 %v4243_v5, %v4239_v56 }
0x3cf8   :  { %vm4165_vm12 = vmor %vm4163_vm11, %vm4164_vm10 }
0x3cf9   :  { %v4160_v18 = vsub.f32 1.0, %v4159_v20 }
0x3cfb   :  { %v4161_v39 = vmul.f32 %v5811_v63, %v4160_v18 }
0x3cfd   :  { %v4162_v16 = vadd.f32 %v5811_v63, %v4161_v39 }
0x3cff   :  { %v4166_v4 = vsel %vm4165_vm12, %v5811_v63, %v4162_v16 }
0x3d00   :  { %v4171_v2 = vsel %vm4168_vm13, %v4170_v52, %v4166_v4 }
0x3d01   :  { %v4177_v19 = vmul.f32 %v4175_v62, %v4171_v2 }
0x3d17   :  { %v4248_v50 = vpop.permute.xlu0 %4247 }
0x3d18   :  { %v4250_v11 = vmul.f32 %v4248_v50, %v4239_v56 }
0x3d1a   :  { %4252 = vrot.lane.b32.xlu2 %v4250_v11, %s5961_s3 }
0x3d55   :  { %v4180_v57 = vpop.permute.xlu1 %4179 }
0x3d56   :  { %v4182_v6 = vmul.f32 %v4180_v57, %v4171_v2 }
0x3d58   :  { %4184 = vrot.lane.b32.xlu0 %v4182_v6, %s5961_s3 }
0x3d74   :  { %v4253_v8 = vpop.permute.xlu2 %4252 }
0x3d75   :  { %v7342_v53 = vadd.f32 %v4253_v8, %v4245_v12 }
0x3d77   :  { %5812 = vtanh.f32 %v7342_v53  ;;  %v4381_v52 = vrot.slane %v7342_v53, 4 }
0x3d7d   :  { %v5813_v47 = vpop.eup %5812 }
0x3d7e   :  { %4258 = vrot.lane.b32.xlu1 %v5813_v47, %s5961_s3 }
0x3dca   :  { %v4185_v55 = vpop.permute.xlu0 %4184 }
0x3dcb   :  { %v7347_v36 = vadd.f32 %v4185_v55, %v4177_v19 }
0x3dcd   :  { %5814 = vtanh.f32 %v7347_v36  ;;  %v4311_v12 = vrot.slane %v7347_v36, 4  ;;  %v5954_v36 = vld [vmem:[%s7516_s12 + $0x18] sm:$0xff] }
0x3dd3   :  { %v5815_v24 = vpop.eup %5814 }
0x3dd4   :  { %4190 = vrot.lane.b32.xlu2 %v5815_v24, %s5961_s3 }
0x3df0   :  { %v4259_v27 = vpop.permute.xlu1 %4258 }
0x3df1   :  { %v4261_v33 = vmul.f32 %v4259_v27, %v4239_v56 }
0x3df3   :  { %4332 = vrot.lane.b32.xlu0 %v4261_v33, %s5962_s4 }
0x3e2e   :  { %v4191_v43 = vpop.permute.xlu2 %4190 }
0x3e2f   :  { %v4193_v25 = vmul.f32 %v4191_v43, %v4171_v2 }
0x3e31   :  { %v4264_v37 = vrot.slane %v4193_v25, 4  ;;  %v5955_v25 = vld [vmem:[%s7516_s12 + $0x10] sm:$0xff] }
0x3e33   :  { %4265 = vrot.lane.b32.xlu1 %v4264_v37, %s5962_s4  ;;  %v5956_v37 = vld [vmem:[%s7516_s12 + $0x8] sm:$0xff] }
0x3e65   :  { %v4333_v38 = vpop.permute.xlu0 %4332 }
0x3e66   :  { %5372 = vmatmul.msk.f32.vlgmr.msra.gmra.mxu2 %vm427_vm15, %v4333_v38  ;;  %v5957_v38 = vld [vmem:[%s7516_s12] sm:$0xff] }
0x3e67   :  { %4900 = vmatpush.msra.mxu2 %v7197_v17  ;;  %v7368_v17 = vld [vmem:[%s7515_s11 + $0x10] sm:$0xff] }
0x3e69   :  { %4901 = vmatpush.msra.mxu2 %v7203_v9 }
0x3e6b   :  { %4902 = vmatpush.msra.mxu2 %v7209_v14 }
0x3e6d   :  { %4903 = vmatpush.msra.mxu2 %v7215_v40  ;;  %v4330_v40 = vld [vmem:[#allocation4 + $0x30] sm:$0xf0] }
0x3ea5   :  { %v4266_v44 = vpop.permute.xlu1 %4265 }
0x3ea6   :  { %5370 = vmatmul.msk.f32.vlgmr.msra.gmra.mxu0 %vm427_vm15, %v4266_v44 }
0x3ea7   :  { %4833 = vmatpush.msra.mxu0 %v7362_v29 }
0x3ea9   :  { %4834 = vmatpush.msra.mxu0 %v7368_v17 }
0x3eab   :  { %4835 = vmatpush.msra.mxu0 %v7224_v54 }
0x3ead   :  { %4836 = vmatpush.msra.mxu0 %v7230_v31 }
0x3ee9   :  { %v4353_v9 = vpop.f32.mrf.mxu2 }
0x3eea   :  { %v4357_v14 = vrot.slane %v4353_v9, 4  ;;  %v5958_v9 = vld [vmem:[%s7515_s11 + $0x8] sm:$0xff] }
0x3eec   :  { %v4359_v41 = vadd.f32 %v4357_v14, %v4330_v40  ;;  %v5959_v14 = vld [vmem:[%s7515_s11] sm:$0xff]  ;;  %v4470_v40 = vld [vmem:[#allocation4 + $0x30] sm:$0xf] }
0x3eee   :  { %5816 = vtanh.f32 %v4359_v41  ;;  %v5373_v10 = vmul.f32 -1.442695, %v4359_v41 }
0x3ef0   :  { %5818 = vpow2.f32 %v5373_v10 }
0x3ef4   :  { %v5817_v30 = vpop.eup %5816 }
0x3ef5   :  { %4385 = vrot.lane.b32.xlu2 %v5817_v30, %s5961_s3 }
0x3ef6   :  { %v5819_v61 = vpop.eup %5818 }
0x3ef7   :  { %v4363_v54 = vadd.f32 1.0, %v5819_v61 }
0x3ef9   :  { %v4375_v42 = vand.u32 2147483648, %v4363_v54  ;;  %vm4369_vm3 = vweird.f32 %v4363_v54  ;;  %v4373_v58 = vand.u32 2147483647, %v4363_v54 }
0x3efb   :  { %v4376_v34 = vor.u32 1.1754944e-38, %v4375_v42  ;;  %vm4374_vm5 = vcmp.eq.f32.partialorder %v4373_v58, 8.507059e+37 }
0x3f23   :  { %v4286_v28 = vpop.f32.mrf.mxu0 }
0x3f24   :  { %v4289_v51 = vadd.f32 %v4286_v28, %v4262_v1 }
0x3f26   :  { %5820 = vtanh.f32 %v4289_v51  ;;  %v5371_v45 = vmul.f32 -1.442695, %v4289_v51 }
0x3f27   :  { %5822 = vrcp.f32 %v4363_v54 }
0x3f28   :  { %5824 = vpow2.f32 %v5371_v45 }
0x3f2c   :  { %v5821_v60 = vpop.eup %5820 }
0x3f2d   :  { %4315 = vrot.lane.b32.xlu0 %v5821_v60, %s5961_s3  ;;  %v5823_v31 = vpop.eup %5822 }
0x3f2e   :  { %v4365_v46 = vmul.f32 %v5823_v31, %v4363_v54  ;;  %vm4370_vm14 = vweird.f32 %v5823_v31  ;;  %v5825_v50 = vpop.eup %5824 }
0x3f2f   :  { %vm4371_vm4 = vmor %vm4369_vm3, %vm4370_vm14  ;;  %v4293_v56 = vadd.f32 1.0, %v5825_v50 }
0x3f30   :  { %v4366_v32 = vsub.f32 1.0, %v4365_v46 }
0x3f31   :  { %5826 = vrcp.f32 %v4293_v56  ;;  %v4305_v20 = vand.u32 2147483648, %v4293_v56  ;;  %vm4299_vm2 = vweird.f32 %v4293_v56  ;;  %v4303_v18 = vand.u32 2147483647, %v4293_v56 }
0x3f32   :  { %v4367_v23 = vmul.f32 %v5823_v31, %v4366_v32 }
0x3f33   :  { %v4306_v16 = vor.u32 1.1754944e-38, %v4305_v20  ;;  %vm4304_vm7 = vcmp.eq.f32.partialorder %v4303_v18, 8.507059e+37 }
0x3f34   :  { %v4368_v59 = vadd.f32 %v5823_v31, %v4367_v23 }
0x3f36   :  { %v4372_v7 = vsel %vm4371_vm4, %v5823_v31, %v4368_v59 }
0x3f37   :  { %v4377_v35 = vsel %vm4374_vm5, %v4376_v34, %v4372_v7  ;;  %v5827_v11 = vpop.eup %5826 }
0x3f38   :  { %v4295_v13 = vmul.f32 %v5827_v11, %v4293_v56  ;;  %vm4300_vm0 = vweird.f32 %v5827_v11  ;;  %v4383_v57 = vmul.f32 %v4381_v52, %v4377_v35 }
0x3f39   :  { %vm4301_vm6 = vmor %vm4299_vm2, %vm4300_vm0 }
0x3f3a   :  { %v4296_v21 = vsub.f32 1.0, %v4295_v13 }
0x3f3c   :  { %v4297_v26 = vmul.f32 %v5827_v11, %v4296_v21 }
0x3f3e   :  { %v4298_v63 = vadd.f32 %v5827_v11, %v4297_v26 }
0x3f40   :  { %v4302_v39 = vsel %vm4301_vm6, %v5827_v11, %v4298_v63 }
0x3f41   :  { %v4307_v48 = vsel %vm4304_vm7, %v4306_v16, %v4302_v39 }
0x3f42   :  { %v4313_v8 = vmul.f32 %v4311_v12, %v4307_v48 }
0x3f4f   :  { %v4386_v15 = vpop.permute.xlu2 %4385 }
0x3f50   :  { %v4388_v0 = vmul.f32 %v4386_v15, %v4377_v35 }
0x3f52   :  { %4390 = vrot.lane.b32.xlu1 %v4388_v0, %s5961_s3 }
0x3f9f   :  { %v4316_v49 = vpop.permute.xlu0 %4315 }
0x3fa0   :  { %v4318_v4 = vmul.f32 %v4316_v49, %v4307_v48 }
0x3fa2   :  { %4320 = vrot.lane.b32.xlu2 %v4318_v4, %s5961_s3 }
0x3fc4   :  { %v4391_v2 = vpop.permute.xlu1 %4390 }
0x3fc5   :  { %v7378_v6 = vadd.f32 %v4391_v2, %v4383_v57 }
0x3fc7   :  { %5828 = vtanh.f32 %v7378_v6  ;;  %v4519_v52 = vrot.slane %v7378_v6, 4 }
0x3fcd   :  { %v5829_v5 = vpop.eup %5828 }
0x3fce   :  { %4396 = vrot.lane.b32.xlu0 %v5829_v5, %s5961_s3 }
0x3ffc   :  { %v4321_v47 = vpop.permute.xlu2 %4320 }
0x3ffd   :  { %v7383_v62 = vadd.f32 %v4321_v47, %v4313_v8 }
0x3fff   :  { %5830 = vtanh.f32 %v7383_v62  ;;  %v4451_v8 = vrot.slane %v7383_v62, 4 }
0x4005   :  { %v5831_v19 = vpop.eup %5830 }
0x4006   :  { %4326 = vrot.lane.b32.xlu1 %v5831_v19, %s5961_s3 }
0x4040   :  { %v4397_v53 = vpop.permute.xlu0 %4396 }
0x4041   :  { %v4399_v55 = vmul.f32 %v4397_v53, %v4377_v35 }
0x4043   :  { %v4472_v24 = vrot.slane %v4399_v55, 4 }
0x4045   :  { %4473 = vrot.lane.b32.xlu2 %v4472_v24, %s5962_s4 }
0x4078   :  { %v4327_v27 = vpop.permute.xlu1 %4326 }
0x4079   :  { %v4329_v33 = vmul.f32 %v4327_v27, %v4307_v48 }
0x407b   :  { %4402 = vrot.lane.b32.xlu0 %v4329_v33, %s5962_s4 }
0x409f   :  { %v4474_v43 = vpop.permute.xlu2 %4473 }
0x40a0   :  { %5376 = vmatmul.msk.f32.vlgmr.msra.gmra.mxu3 %vm427_vm15, %v4474_v43 }
0x40a1   :  { %5041 = vmatpush.msra.mxu3 %v5954_v36 }
0x40a3   :  { %5042 = vmatpush.msra.mxu3 %v5955_v25 }
0x40a5   :  { %5043 = vmatpush.msra.mxu3 %v5956_v37 }
0x40a7   :  { %5044 = vmatpush.msra.mxu3 %v5957_v38  ;;  %v4606_v38 = vld [vmem:[#allocation4 + $0x40] sm:$0xf0] }
0x40ed   :  { %v4403_v44 = vpop.permute.xlu0 %4402 }
0x40ee   :  { %5374 = vmatmul.msk.f32.vlgmr.msra.gmra.mxu1 %vm427_vm15, %v4403_v44 }
0x40ef   :  { %4970 = vmatpush.msra.mxu1 %v7362_v29 }
0x40f1   :  { %4971 = vmatpush.msra.mxu1 %v7368_v17  ;;  %v4400_v17 = vld [vmem:[#allocation4 + $0x18] sm:$0xf0] }
0x40f3   :  { %4972 = vmatpush.msra.mxu1 %v5958_v9 }
0x40f5   :  { %4973 = vmatpush.msra.mxu1 %v5959_v14  ;;  %v4538_v14 = vld [vmem:[#allocation4] sm:$0xf] }
0x4123   :  { %v4494_v41 = vpop.f32.mrf.mxu3 }
0x4124   :  { %v4497_v30 = vadd.f32 %v4494_v41, %v4470_v40 }
0x4126   :  { %5832 = vtanh.f32 %v4497_v30  ;;  %v5377_v51 = vmul.f32 -1.442695, %v4497_v30 }
0x412c   :  { %v5833_v10 = vpop.eup %5832 }
0x412d   :  { %4523 = vrot.lane.b32.xlu1 %v5833_v10, %s5961_s3 }
0x416b   :  { %v4423_v29 = vpop.f32.mrf.mxu1 }
0x416c   :  { %v4427_v1 = vrot.slane %v4423_v29, 4 }
0x416e   :  { %v4429_v28 = vadd.f32 %v4427_v1, %v4400_v17 }
0x4170   :  { %5834 = vtanh.f32 %v4429_v28  ;;  %v5375_v45 = vmul.f32 -1.442695, %v4429_v28 }
0x4171   :  { %5836 = vpow2.f32 %v5377_v51 }
0x4176   :  { %v5835_v61 = vpop.eup %5834 }
0x4177   :  { %4455 = vrot.lane.b32.xlu2 %v5835_v61, %s5961_s3  ;;  %v5837_v60 = vpop.eup %5836 }
0x4178   :  { %v4501_v54 = vadd.f32 1.0, %v5837_v60 }
0x417a   :  { %5838 = vrcp.f32 %v4501_v54  ;;  %v4513_v42 = vand.u32 2147483648, %v4501_v54  ;;  %vm4507_vm9 = vweird.f32 %v4501_v54  ;;  %v4511_v58 = vand.u32 2147483647, %v4501_v54 }
0x417b   :  { %5840 = vpow2.f32 %v5375_v45 }
0x417c   :  { %v4514_v34 = vor.u32 1.1754944e-38, %v4513_v42  ;;  %vm4512_vm11 = vcmp.eq.f32.partialorder %v4511_v58, 8.507059e+37 }
0x4180   :  { %v5839_v31 = vpop.eup %5838 }
0x4181   :  { %v4503_v46 = vmul.f32 %v5839_v31, %v4501_v54  ;;  %vm4508_vm8 = vweird.f32 %v5839_v31  ;;  %v5841_v50 = vpop.eup %5840 }
0x4182   :  { %vm4509_vm10 = vmor %vm4507_vm9, %vm4508_vm8  ;;  %v4433_v56 = vadd.f32 1.0, %v5841_v50 }
0x4183   :  { %v4504_v32 = vsub.f32 1.0, %v4503_v46 }
0x4184   :  { %5842 = vrcp.f32 %v4433_v56  ;;  %v4445_v20 = vand.u32 2147483648, %v4433_v56  ;;  %vm4439_vm13 = vweird.f32 %v4433_v56  ;;  %v4443_v18 = vand.u32 2147483647, %v4433_v56 }
0x4185   :  { %v4505_v23 = vmul.f32 %v5839_v31, %v4504_v32 }
0x4186   :  { %v4446_v16 = vor.u32 1.1754944e-38, %v4445_v20  ;;  %vm4444_vm3 = vcmp.eq.f32.partialorder %v4443_v18, 8.507059e+37 }
0x4187   :  { %v4506_v59 = vadd.f32 %v5839_v31, %v4505_v23 }
0x4189   :  { %v4510_v7 = vsel %vm4509_vm10, %v5839_v31, %v4506_v59 }
0x418a   :  { %v4515_v15 = vsel %vm4512_vm11, %v4514_v34, %v4510_v7  ;;  %v5843_v11 = vpop.eup %5842 }
0x418b   :  { %v4435_v13 = vmul.f32 %v5843_v11, %v4433_v56  ;;  %vm4440_vm12 = vweird.f32 %v5843_v11  ;;  %v4521_v57 = vmul.f32 %v4519_v52, %v4515_v15 }
0x418c   :  { %vm4441_vm14 = vmor %vm4439_vm13, %vm4440_vm12 }
0x418d   :  { %v4436_v21 = vsub.f32 1.0, %v4435_v13 }
0x418f   :  { %v4437_v26 = vmul.f32 %v5843_v11, %v4436_v21 }
0x4191   :  { %v4438_v63 = vadd.f32 %v5843_v11, %v4437_v26 }
0x4193   :  { %v4442_v39 = vsel %vm4441_vm14, %v5843_v11, %v4438_v63 }
0x4194   :  { %v4447_v49 = vsel %vm4444_vm3, %v4446_v16, %v4442_v39 }
0x4195   :  { %v4453_v47 = vmul.f32 %v4451_v8, %v4447_v49 }
0x419f   :  { %v4524_v35 = vpop.permute.xlu1 %4523 }
0x41a0   :  { %v4526_v0 = vmul.f32 %v4524_v35, %v4515_v15 }
0x41a2   :  { %4528 = vrot.lane.b32.xlu0 %v4526_v0, %s5961_s3 }
0x41d1   :  { %v4456_v48 = vpop.permute.xlu2 %4455 }
0x41d2   :  { %v4458_v4 = vmul.f32 %v4456_v48, %v4447_v49 }
0x41d4   :  { %4460 = vrot.lane.b32.xlu1 %v4458_v4, %s5961_s3 }
0x4214   :  { %v4529_v2 = vpop.permute.xlu0 %4528 }
0x4215   :  { %v7416_v5 = vadd.f32 %v4529_v2, %v4521_v57 }
0x4217   :  { %5844 = vtanh.f32 %v7416_v5  ;;  %v4657_v18 = vrot.slane %v7416_v5, 4 }
0x421d   :  { %v5845_v12 = vpop.eup %5844 }
0x421e   :  { %4534 = vrot.lane.b32.xlu2 %v5845_v12, %s5961_s3 }
0x4246   :  { %v4461_v19 = vpop.permute.xlu1 %4460 }
0x4247   :  { %v7421_v53 = vadd.f32 %v4461_v19, %v4453_v47 }
0x4249   :  { %5846 = vtanh.f32 %v7421_v53  ;;  %v4587_v4 = vrot.slane %v7421_v53, 4 }
0x424f   :  { %v5847_v55 = vpop.eup %5846 }
0x4250   :  { %4466 = vrot.lane.b32.xlu0 %v5847_v55, %s5961_s3 }
0x4278   :  { %v4535_v6 = vpop.permute.xlu2 %4534 }
0x4279   :  { %v4537_v24 = vmul.f32 %v4535_v6, %v4515_v15 }
0x427b   :  { %4608 = vrot.lane.b32.xlu1 %v4537_v24, %s5962_s4  ;;  %v4746_v24 = vld [vmem:[#allocation4 + $0x40] sm:$0xf] }
0x42c2   :  { %v4467_v27 = vpop.permute.xlu0 %4466 }
0x42c3   :  { %v4469_v33 = vmul.f32 %v4467_v27, %v4447_v49 }
0x42c5   :  { %v4540_v43 = vrot.slane %v4469_v33, 4 }
0x42c7   :  { %4541 = vrot.lane.b32.xlu2 %v4540_v43, %s5962_s4 }
0x42ed   :  { %v4609_v36 = vpop.permute.xlu1 %4608 }
0x42ee   :  { %5380 = vmatmul.msk.f32.vlgmr.msrb.gmra.mxu2 %vm427_vm15, %v4609_v36 }
0x4321   :  { %v4542_v62 = vpop.permute.xlu2 %4541 }
0x4322   :  { %5378 = vmatmul.msk.f32.vlgmr.msrb.gmra.mxu0 %vm427_vm15, %v4542_v62 }
0x4371   :  { %v4629_v25 = vpop.f32.mrf.mxu2 }
0x4372   :  { %v4633_v37 = vrot.slane %v4629_v25, 4  ;;  %v4676_v25 = vld [vmem:[#allocation4] sm:$0xf0] }
0x4374   :  { %v4635_v44 = vadd.f32 %v4633_v37, %v4606_v38 }
0x4376   :  { %5848 = vtanh.f32 %v4635_v44  ;;  %v5381_v10 = vmul.f32 -1.442695, %v4635_v44 }
0x437c   :  { %v5849_v9 = vpop.eup %5848 }
0x437d   :  { %4661 = vrot.lane.b32.xlu0 %v5849_v9, %s5961_s3 }
0x439f   :  { %v4562_v40 = vpop.f32.mrf.mxu0 }
0x43a0   :  { %v4565_v41 = vadd.f32 %v4562_v40, %v4538_v14 }
0x43a2   :  { %5850 = vtanh.f32 %v4565_v41  ;;  %v5379_v23 = vmul.f32 -1.442695, %v4565_v41 }
0x43a3   :  { %5852 = vpow2.f32 %v5381_v10 }
0x43a8   :  { %v5851_v30 = vpop.eup %5850 }
0x43a9   :  { %4591 = vrot.lane.b32.xlu1 %v5851_v30, %s5961_s3  ;;  %v5853_v29 = vpop.eup %5852 }
0x43aa   :  { %v4639_v1 = vadd.f32 1.0, %v5853_v29 }
0x43ac   :  { %5854 = vrcp.f32 %v4639_v1  ;;  %v4651_v54 = vand.u32 2147483648, %v4639_v1  ;;  %vm4645_vm5 = vweird.f32 %v4639_v1  ;;  %v4649_v31 = vand.u32 2147483647, %v4639_v1 }
0x43ad   :  { %5856 = vpow2.f32 %v5379_v23 }
0x43ae   :  { %v4652_v32 = vor.u32 1.1754944e-38, %v4651_v54  ;;  %vm4650_vm2 = vcmp.eq.f32.partialorder %v4649_v31, 8.507059e+37 }
0x43b2   :  { %v5855_v17 = vpop.eup %5854 }
0x43b3   :  { %v4641_v28 = vmul.f32 %v5855_v17, %v4639_v1  ;;  %vm4646_vm4 = vweird.f32 %v5855_v17  ;;  %v5857_v7 = vpop.eup %5856 }
0x43b4   :  { %vm4647_vm0 = vmor %vm4645_vm5, %vm4646_vm4  ;;  %v4569_v34 = vadd.f32 1.0, %v5857_v7 }
0x43b5   :  { %v4642_v51 = vsub.f32 1.0, %v4641_v28 }
0x43b6   :  { %5858 = vrcp.f32 %v4569_v34  ;;  %v4581_v56 = vand.u32 2147483648, %v4569_v34  ;;  %vm4575_vm7 = vweird.f32 %v4569_v34  ;;  %v4579_v11 = vand.u32 2147483647, %v4569_v34 }
0x43b7   :  { %v4643_v61 = vmul.f32 %v5855_v17, %v4642_v51 }
0x43b8   :  { %v4582_v21 = vor.u32 1.1754944e-38, %v4581_v56  ;;  %vm4580_vm9 = vcmp.eq.f32.partialorder %v4579_v11, 8.507059e+37 }
0x43b9   :  { %v4644_v60 = vadd.f32 %v5855_v17, %v4643_v61 }
0x43bb   :  { %v4648_v46 = vsel %vm4647_vm0, %v5855_v17, %v4644_v60 }
0x43bc   :  { %v4653_v42 = vsel %vm4650_vm2, %v4652_v32, %v4648_v46  ;;  %v5859_v35 = vpop.eup %5858 }
0x43bd   :  { %v4571_v15 = vmul.f32 %v5859_v35, %v4569_v34  ;;  %vm4576_vm6 = vweird.f32 %v5859_v35  ;;  %v4659_v39 = vmul.f32 %v4657_v18, %v4653_v42 }
0x43be   :  { %vm4577_vm8 = vmor %vm4575_vm7, %vm4576_vm6 }
0x43bf   :  { %v4572_v0 = vsub.f32 1.0, %v4571_v15 }
0x43c1   :  { %v4573_v45 = vmul.f32 %v5859_v35, %v4572_v0 }
0x43c3   :  { %v4574_v50 = vadd.f32 %v5859_v35, %v4573_v45 }
0x43c5   :  { %v4578_v13 = vsel %vm4577_vm8, %v5859_v35, %v4574_v50 }
0x43c6   :  { %v4583_v63 = vsel %vm4580_vm9, %v4582_v21, %v4578_v13 }
0x43c7   :  { %v4589_v52 = vmul.f32 %v4587_v4, %v4583_v63 }
0x43ef   :  { %v4662_v59 = vpop.permute.xlu0 %4661 }
0x43f0   :  { %v4664_v58 = vmul.f32 %v4662_v59, %v4653_v42 }
0x43f2   :  { %4666 = vrot.lane.b32.xlu2 %v4664_v58, %s5961_s3 }
0x441b   :  { %v4592_v26 = vpop.permute.xlu1 %4591 }
0x441c   :  { %v4594_v20 = vmul.f32 %v4592_v26, %v4583_v63 }
0x441e   :  { %4596 = vrot.lane.b32.xlu0 %v4594_v20, %s5961_s3 }
0x444c   :  { %v4667_v16 = vpop.permute.xlu2 %4666 }
0x444d   :  { %v7434_v49 = vadd.f32 %v4667_v16, %v4659_v39 }
0x444f   :  { %5860 = vtanh.f32 %v7434_v49  ;;  %v4795_v11 = vrot.slane %v7434_v49, 4 }
0x4455   :  { %v5861_v48 = vpop.eup %5860 }
0x4456   :  { %4672 = vrot.lane.b32.xlu1 %v5861_v48, %s5961_s3 }
0x4490   :  { %v4597_v57 = vpop.permute.xlu0 %4596 }
0x4491   :  { %v7439_v2 = vadd.f32 %v4597_v57, %v4589_v52 }
0x4493   :  { %5862 = vtanh.f32 %v7439_v2  ;;  %v4727_v20 = vrot.slane %v7439_v2, 4 }
0x4499   :  { %v5863_v12 = vpop.eup %5862 }
0x449a   :  { %4602 = vrot.lane.b32.xlu2 %v5863_v12, %s5961_s3 }
0x44c8   :  { %v4673_v5 = vpop.permute.xlu1 %4672 }
0x44c9   :  { %v4675_v8 = vmul.f32 %v4673_v5, %v4653_v42 }
0x44cb   :  { %v4748_v47 = vrot.slane %v4675_v8, 4 }
0x44cd   :  { %4749 = vrot.lane.b32.xlu0 %v4748_v47, %s5962_s4 }
0x44f4   :  { %v4603_v19 = vpop.permute.xlu2 %4602 }
0x44f5   :  { %v4605_v55 = vmul.f32 %v4603_v19, %v4583_v63  ;;  %v4882_v19 = vld [vmem:[#allocation4 + $0x68] sm:$0xf0] }
0x44f7   :  { %4678 = vrot.lane.b32.xlu1 %v4605_v55, %s5962_s4 }
0x453f   :  { %v4750_v6 = vpop.permute.xlu0 %4749 }
0x4540   :  { %5384 = vmatmul.msk.f32.vlgmr.msrb.gmra.mxu3 %vm427_vm15, %v4750_v6 }
0x4569   :  { %v4679_v53 = vpop.permute.xlu1 %4678 }
0x456a   :  { %5382 = vmatmul.msk.f32.vlgmr.msrb.gmra.mxu1 %vm427_vm15, %v4679_v53  ;;  %v4814_v53 = vld [vmem:[#allocation4 + $0x60] sm:$0xf] }
0x45c3   :  { %v4770_v27 = vpop.f32.mrf.mxu3 }
0x45c4   :  { %v4773_v33 = vadd.f32 %v4770_v27, %v4746_v24 }
0x45c6   :  { %5864 = vtanh.f32 %v4773_v33  ;;  %v5385_v44 = vmul.f32 -1.442695, %v4773_v33 }
0x45cc   :  { %v5865_v43 = vpop.eup %5864 }
0x45cd   :  { %4799 = vrot.lane.b32.xlu2 %v5865_v43, %s5961_s3 }
0x45e7   :  { %v4699_v36 = vpop.f32.mrf.mxu1 }
0x45e8   :  { %v4703_v62 = vrot.slane %v4699_v36, 4 }
0x45ea   :  { %v4705_v37 = vadd.f32 %v4703_v62, %v4676_v25 }
0x45ec   :  { %5866 = vtanh.f32 %v4705_v37  ;;  %v5383_v31 = vmul.f32 -1.442695, %v4705_v37 }
0x45ed   :  { %5868 = vpow2.f32 %v5385_v44 }
0x45f2   :  { %v5867_v38 = vpop.eup %5866 }
0x45f3   :  { %4731 = vrot.lane.b32.xlu0 %v5867_v38, %s5961_s3  ;;  %v5869_v9 = vpop.eup %5868 }
0x45f4   :  { %v4777_v14 = vadd.f32 1.0, %v5869_v9 }
0x45f6   :  { %5870 = vrcp.f32 %v4777_v14  ;;  %v4789_v1 = vand.u32 2147483648, %v4777_v14  ;;  %vm4783_vm11 = vweird.f32 %v4777_v14  ;;  %v4787_v17 = vand.u32 2147483647, %v4777_v14 }
0x45f7   :  { %5872 = vpow2.f32 %v5383_v31 }
0x45f8   :  { %v4790_v51 = vor.u32 1.1754944e-38, %v4789_v1  ;;  %vm4788_vm13 = vcmp.eq.f32.partialorder %v4787_v17, 8.507059e+37 }
0x45fc   :  { %v5871_v40 = vpop.eup %5870 }
0x45fd   :  { %v4779_v41 = vmul.f32 %v5871_v40, %v4777_v14  ;;  %vm4784_vm10 = vweird.f32 %v5871_v40  ;;  %v5873_v46 = vpop.eup %5872 }
0x45fe   :  { %vm4785_vm12 = vmor %vm4783_vm11, %vm4784_vm10  ;;  %v4709_v32 = vadd.f32 1.0, %v5873_v46 }
0x45ff   :  { %v4780_v30 = vsub.f32 1.0, %v4779_v41 }
0x4600   :  { %5874 = vrcp.f32 %v4709_v32  ;;  %v4721_v34 = vand.u32 2147483648, %v4709_v32  ;;  %vm4715_vm3 = vweird.f32 %v4709_v32  ;;  %v4719_v35 = vand.u32 2147483647, %v4709_v32 }
0x4601   :  { %v4781_v10 = vmul.f32 %v5871_v40, %v4780_v30 }
0x4602   :  { %v4722_v0 = vor.u32 1.1754944e-38, %v4721_v34  ;;  %vm4720_vm5 = vcmp.eq.f32.partialorder %v4719_v35, 8.507059e+37 }
0x4603   :  { %v4782_v29 = vadd.f32 %v5871_v40, %v4781_v10 }
0x4605   :  { %v4786_v28 = vsel %vm4785_vm12, %v5871_v40, %v4782_v29 }
0x4606   :  { %v4791_v61 = vsel %vm4788_vm13, %v4790_v51, %v4786_v28  ;;  %v5875_v23 = vpop.eup %5874 }
0x4607   :  { %v4711_v59 = vmul.f32 %v5875_v23, %v4709_v32  ;;  %vm4716_vm14 = vweird.f32 %v5875_v23  ;;  %v4797_v13 = vmul.f32 %v4795_v11, %v4791_v61 }
0x4608   :  { %vm4717_vm4 = vmor %vm4715_vm3, %vm4716_vm14 }
0x4609   :  { %v4712_v42 = vsub.f32 1.0, %v4711_v59 }
0x460b   :  { %v4713_v58 = vmul.f32 %v5875_v23, %v4712_v42 }
0x460d   :  { %v4714_v7 = vadd.f32 %v5875_v23, %v4713_v58 }
0x460f   :  { %v4718_v15 = vsel %vm4717_vm4, %v5875_v23, %v4714_v7 }
0x4610   :  { %v4723_v50 = vsel %vm4720_vm5, %v4722_v0, %v4718_v15 }
0x4611   :  { %v4729_v18 = vmul.f32 %v4727_v20, %v4723_v50 }
0x4627   :  { %v4800_v60 = vpop.permute.xlu2 %4799 }
0x4628   :  { %v4802_v54 = vmul.f32 %v4800_v60, %v4791_v61 }
0x462a   :  { %4804 = vrot.lane.b32.xlu1 %v4802_v54, %s5961_s3 }
0x4665   :  { %v4732_v45 = vpop.permute.xlu0 %4731 }
0x4666   :  { %v4734_v56 = vmul.f32 %v4732_v45, %v4723_v50 }
0x4668   :  { %4736 = vrot.lane.b32.xlu2 %v4734_v56, %s5961_s3 }
0x469c   :  { %v4805_v21 = vpop.permute.xlu1 %4804 }
0x469d   :  { %v7452_v26 = vadd.f32 %v4805_v21, %v4797_v13 }
0x469f   :  { %5876 = vtanh.f32 %v7452_v26  ;;  %v4933_v35 = vrot.slane %v7452_v26, 4 }
0x46a5   :  { %v5877_v63 = vpop.eup %5876 }
0x46a6   :  { %4810 = vrot.lane.b32.xlu0 %v5877_v63, %s5961_s3 }
0x46c2   :  { %v4737_v39 = vpop.permute.xlu2 %4736 }
0x46c3   :  { %v7457_v16 = vadd.f32 %v4737_v39, %v4729_v18 }
0x46c5   :  { %5878 = vtanh.f32 %v7457_v16  ;;  %v4863_v56 = vrot.slane %v7457_v16, 4 }
0x46cb   :  { %v5879_v48 = vpop.eup %5878 }
0x46cc   :  { %4742 = vrot.lane.b32.xlu1 %v5879_v48, %s5961_s3 }
0x4718   :  { %v4811_v49 = vpop.permute.xlu0 %4810 }
0x4719   :  { %v4813_v4 = vmul.f32 %v4811_v49, %v4791_v61 }
0x471b   :  { %4884 = vrot.lane.b32.xlu2 %v4813_v4, %s5962_s4  ;;  %v5022_v4 = vld [vmem:[#allocation4 + $0x68] sm:$0xf] }
0x473e   :  { %v4743_v52 = vpop.permute.xlu1 %4742 }
0x473f   :  { %v4745_v57 = vmul.f32 %v4743_v52, %v4723_v50 }
0x4741   :  { %v4816_v12 = vrot.slane %v4745_v57, 4 }
0x4743   :  { %4817 = vrot.lane.b32.xlu0 %v4816_v12, %s5962_s4 }
0x4775   :  { %v4885_v5 = vpop.permute.xlu2 %4884 }
0x4776   :  { %5388 = vmatmul.msk.f32.vlgmr.msra.gmra.mxu2 %vm427_vm15, %v4885_v5 }
0x47b5   :  { %v4818_v2 = vpop.permute.xlu0 %4817 }
0x47b6   :  { %5386 = vmatmul.msk.f32.vlgmr.msra.gmra.mxu0 %vm427_vm15, %v4818_v2 }
0x47f9   :  { %v4905_v8 = vpop.f32.mrf.mxu2 }
0x47fa   :  { %v4909_v47 = vrot.slane %v4905_v8, 4  ;;  %v4952_v8 = vld [vmem:[#allocation4 + $0x60] sm:$0xf0] }
0x47fc   :  { %v4911_v55 = vadd.f32 %v4909_v47, %v4882_v19 }
0x47fe   :  { %5880 = vtanh.f32 %v4911_v55  ;;  %v5389_v43 = vmul.f32 -1.442695, %v4911_v55 }
0x4804   :  { %v5881_v6 = vpop.eup %5880 }
0x4805   :  { %4937 = vrot.lane.b32.xlu1 %v5881_v6, %s5961_s3 }
0x4833   :  { %v4838_v24 = vpop.f32.mrf.mxu0 }
0x4834   :  { %v4841_v27 = vadd.f32 %v4838_v24, %v4814_v53 }
0x4836   :  { %5882 = vtanh.f32 %v4841_v27  ;;  %v5387_v44 = vmul.f32 -1.442695, %v4841_v27 }
0x4837   :  { %5884 = vpow2.f32 %v5389_v43 }
0x483c   :  { %v5883_v33 = vpop.eup %5882 }
0x483d   :  { %4867 = vrot.lane.b32.xlu2 %v5883_v33, %s5961_s3  ;;  %v5885_v36 = vpop.eup %5884 }
0x483e   :  { %v4915_v62 = vadd.f32 1.0, %v5885_v36 }
0x4840   :  { %5886 = vrcp.f32 %v4915_v62  ;;  %v4927_v40 = vand.u32 2147483648, %v4915_v62  ;;  %vm4921_vm2 = vweird.f32 %v4915_v62  ;;  %v4925_v41 = vand.u32 2147483647, %v4915_v62 }
0x4841   :  { %5888 = vpow2.f32 %v5387_v44 }
0x4842   :  { %v4928_v29 = vor.u32 1.1754944e-38, %v4927_v40  ;;  %vm4926_vm7 = vcmp.eq.f32.partialorder %v4925_v41, 8.507059e+37 }
0x4846   :  { %v5887_v25 = vpop.eup %5886 }
0x4847   :  { %v4917_v37 = vmul.f32 %v5887_v25, %v4915_v62  ;;  %vm4922_vm0 = vweird.f32 %v5887_v25  ;;  %v5889_v30 = vpop.eup %5888 }
0x4848   :  { %vm4923_vm6 = vmor %vm4921_vm2, %vm4922_vm0  ;;  %v4845_v1 = vadd.f32 1.0, %v5889_v30  ;;  %vm5098_vm2 = vcmask 259076  }
0x4849   :  { %v4918_v38 = vsub.f32 1.0, %v4917_v37 }
0x484a   :  { %5890 = vrcp.f32 %v4845_v1  ;;  %v4857_v32 = vand.u32 2147483648, %v4845_v1  ;;  %vm4851_vm9 = vweird.f32 %v4845_v1  ;;  %v4855_v23 = vand.u32 2147483647, %v4845_v1 }
0x484b   :  { %v4919_v9 = vmul.f32 %v5887_v25, %v4918_v38 }
0x484c   :  { %v4858_v42 = vor.u32 1.1754944e-38, %v4857_v32  ;;  %vm4856_vm11 = vcmp.eq.f32.partialorder %v4855_v23, 8.507059e+37  ;;  %v5090_v32 = vrot.slane %v6887_v22, 2 }
0x484d   :  { %v4920_v14 = vadd.f32 %v5887_v25, %v4919_v9 }
0x484f   :  { %v4924_v10 = vsel %vm4923_vm6, %v5887_v25, %v4920_v14  ;;  %vm5125_vm6 = vcmask 254976  }
0x4850   :  { %v4929_v28 = vsel %vm4926_vm7, %v4928_v29, %v4924_v10  ;;  %v5891_v61 = vpop.eup %5890 }
0x4851   :  { %v4847_v60 = vmul.f32 %v5891_v61, %v4845_v1  ;;  %vm4852_vm8 = vweird.f32 %v5891_v61  ;;  %v4935_v15 = vmul.f32 %v4933_v35, %v4929_v28 }
0x4852   :  { %vm4853_vm10 = vmor %vm4851_vm9, %vm4852_vm8 }
0x4853   :  { %v4848_v54 = vsub.f32 1.0, %v4847_v60 }
0x4855   :  { %v4849_v31 = vmul.f32 %v5891_v61, %v4848_v54 }
0x4857   :  { %v4850_v46 = vadd.f32 %v5891_v61, %v4849_v31 }
0x4859   :  { %v4854_v59 = vsel %vm4853_vm10, %v5891_v61, %v4850_v46 }
0x485a   :  { %v4859_v7 = vsel %vm4856_vm11, %v4858_v42, %v4854_v59  ;;  %v5092_v59 = vsub.f32 %v6887_v22, %v5090_v32 }
0x485b   :  { %v4865_v11 = vmul.f32 %v4863_v56, %v4859_v7 }
0x485c   :  { %v5093_v42 = vmul.f32 %v5092_v59, %v5092_v59 }
0x4877   :  { %v4938_v17 = vpop.permute.xlu1 %4937 }
0x4878   :  { %v4940_v51 = vmul.f32 %v4938_v17, %v4929_v28 }
0x487a   :  { %4942 = vrot.lane.b32.xlu0 %v4940_v51, %s5961_s3 }
0x4897   :  { %v4868_v58 = vpop.permute.xlu2 %4867 }
0x4898   :  { %v4870_v34 = vmul.f32 %v4868_v58, %v4859_v7 }
0x489a   :  { %4872 = vrot.lane.b32.xlu1 %v4870_v34, %s5961_s3 }
0x48ec   :  { %v4943_v0 = vpop.permute.xlu0 %4942 }
0x48ed   :  { %v7470_v45 = vadd.f32 %v4943_v0, %v4935_v15  ;;  %v5117_v15 = vrot.slane %v6867_v3, 2 }
0x48ef   :  { %5892 = vtanh.f32 %v7470_v45  ;;  %v5071_v58 = vrot.slane %v7470_v45, 4 }
0x48f5   :  { %v5893_v50 = vpop.eup %5892 }
0x48f6   :  { %4948 = vrot.lane.b32.xlu2 %v5893_v50, %s5961_s3  ;;  %v5119_v50 = vsub.f32 %v6867_v3, %v5117_v15 }
0x48f8   :  { %v5120_v56 = vmul.f32 %v5119_v50, %v5119_v50 }
0x490c   :  { %v4873_v13 = vpop.permute.xlu1 %4872 }
0x490d   :  { %v7475_v21 = vadd.f32 %v4873_v13, %v4865_v11 }
0x490f   :  { %5894 = vtanh.f32 %v7475_v21  ;;  %v5003_v22 = vrot.slane %v7475_v21, 4 }
0x4915   :  { %v5895_v63 = vpop.eup %5894 }
0x4916   :  { %4878 = vrot.lane.b32.xlu0 %v5895_v63, %s5961_s3 }
0x4950   :  { %v4949_v26 = vpop.permute.xlu2 %4948 }
0x4951   :  { %v4951_v20 = vmul.f32 %v4949_v26, %v4929_v28 }
0x4953   :  { %v5024_v18 = vrot.slane %v4951_v20, 4 }
0x4955   :  { %5025 = vrot.lane.b32.xlu1 %v5024_v18, %s5962_s4 }
0x4988   :  { %v4879_v39 = vpop.permute.xlu0 %4878 }
0x4989   :  { %v4881_v48 = vmul.f32 %v4879_v39, %v4859_v7 }
0x498b   :  { %4954 = vrot.lane.b32.xlu2 %v4881_v48, %s5962_s4 }
0x49c7   :  { %v5026_v49 = vpop.permute.xlu1 %5025 }
0x49c8   :  { %5392 = vmatmul.msk.f32.vlgmr.msra.gmra.mxu3 %vm427_vm15, %v5026_v49 }
0x49e5   :  { %v4955_v16 = vpop.permute.xlu2 %4954 }
0x49e6   :  { %5390 = vmatmul.msk.f32.vlgmr.msra.gmra.mxu1 %vm427_vm15, %v4955_v16 }
0x4a4b   :  { %v5046_v52 = vpop.f32.mrf.mxu3 }
0x4a4c   :  { %v5049_v57 = vadd.f32 %v5046_v52, %v5022_v4 }
0x4a4e   :  { %5896 = vtanh.f32 %v5049_v57  ;;  %v5393_v55 = vmul.f32 -1.442695, %v5049_v57 }
0x4a54   :  { %v5897_v12 = vpop.eup %5896 }
0x4a55   :  { %5075 = vrot.lane.b32.xlu0 %v5897_v12, %s5961_s3 }
0x4a63   :  { %v4975_v5 = vpop.f32.mrf.mxu1 }
0x4a64   :  { %v4979_v2 = vrot.slane %v4975_v5, 4 }
0x4a66   :  { %v4981_v47 = vadd.f32 %v4979_v2, %v4952_v8 }
0x4a68   :  { %5898 = vtanh.f32 %v4981_v47  ;;  %v5391_v27 = vmul.f32 -1.442695, %v4981_v47 }
0x4a69   :  { %5900 = vpow2.f32 %v5393_v55 }
0x4a6e   :  { %v5899_v19 = vpop.eup %5898 }
0x4a6f   :  { %5007 = vrot.lane.b32.xlu1 %v5899_v19, %s5961_s3  ;;  %v5901_v6 = vpop.eup %5900 }
0x4a70   :  { %v5053_v53 = vadd.f32 1.0, %v5901_v6 }
0x4a72   :  { %5902 = vrcp.f32 %v5053_v53  ;;  %v5065_v38 = vand.u32 2147483648, %v5053_v53  ;;  %vm5059_vm12 = vweird.f32 %v5053_v53  ;;  %v5063_v44 = vand.u32 2147483647, %v5053_v53 }
0x4a73   :  { %5904 = vpow2.f32 %v5391_v27 }
0x4a74   :  { %v5066_v14 = vor.u32 1.1754944e-38, %v5065_v38  ;;  %vm5064_vm14 = vcmp.eq.f32.partialorder %v5063_v44, 8.507059e+37 }
0x4a78   :  { %v5903_v24 = vpop.eup %5902 }
0x4a79   :  { %v5055_v33 = vmul.f32 %v5903_v24, %v5053_v53  ;;  %v5905_v62 = vpop.eup %5904  ;;  %vm5060_vm15 = vweird.f32 %v5903_v24 }
0x4a7a   :  { %v4985_v37 = vadd.f32 1.0, %v5905_v62  ;;  %vm5061_vm13 = vmor %vm5059_vm12, %vm5060_vm15 }
0x4a7b   :  { %v5056_v43 = vsub.f32 1.0, %v5055_v33 }
0x4a7c   :  { %5906 = vrcp.f32 %v4985_v37  ;;  %v4997_v51 = vand.u32 2147483648, %v4985_v37  ;;  %vm4991_vm4 = vweird.f32 %v4985_v37  ;;  %v4995_v61 = vand.u32 2147483647, %v4985_v37 }
0x4a7d   :  { %v5057_v36 = vmul.f32 %v5903_v24, %v5056_v43 }
0x4a7e   :  { %v4998_v54 = vor.u32 1.1754944e-38, %v4997_v51  ;;  %vm4996_vm0 = vcmp.eq.f32.partialorder %v4995_v61, 8.507059e+37 }
0x4a7f   :  { %v5058_v25 = vadd.f32 %v5903_v24, %v5057_v36 }
0x4a81   :  { %v5062_v9 = vsel %vm5061_vm13, %v5903_v24, %v5058_v25 }
0x4a82   :  { %v5067_v40 = vsel %vm5064_vm14, %v5066_v14, %v5062_v9  ;;  %v5907_v10 = vpop.eup %5906  ;;  %vm5207_vm14 = vcmask 1041408  }
0x4a83   :  { %v4987_v29 = vmul.f32 %v5907_v10, %v4985_v37  ;;  %vm4992_vm3 = vweird.f32 %v5907_v10  ;;  %v5073_v7 = vmul.f32 %v5071_v58, %v5067_v40 }
0x4a84   :  { %vm4993_vm5 = vmor %vm4991_vm4, %vm4992_vm3  ;;  %vm5210_vm3 = vcmask 1045504   ;;  %vm5212_vm4 = vcmask 7168  }
0x4a85   :  { %v4988_v1 = vsub.f32 1.0, %v4987_v29 }
0x4a87   :  { %v4989_v17 = vmul.f32 %v5907_v10, %v4988_v1 }
0x4a89   :  { %v4990_v28 = vadd.f32 %v5907_v10, %v4989_v17 }
0x4a8b   :  { %v4994_v60 = vsel %vm4993_vm5, %v5907_v10, %v4990_v28 }
0x4a8c   :  { %v4999_v46 = vsel %vm4996_vm0, %v4998_v54, %v4994_v60 }
0x4a8d   :  { %v5005_v11 = vmul.f32 %v5003_v22, %v4999_v46 }
0x4ac7   :  { %v5076_v41 = vpop.permute.xlu0 %5075 }
0x4ac8   :  { %v5078_v30 = vmul.f32 %v5076_v41, %v5067_v40 }
0x4aca   :  { %5080 = vrot.lane.b32.xlu2 %v5078_v30, %s5961_s3 }
0x4ae1   :  { %v5008_v31 = vpop.permute.xlu1 %5007 }
0x4ae2   :  { %v5010_v23 = vmul.f32 %v5008_v31, %v4999_v46 }
0x4ae4   :  { %5012 = vrot.lane.b32.xlu0 %v5010_v23, %s5961_s3 }
0x4aec   :  { %5095 = vrot.lane.b32.xlu0 %v5093_v42, %s5962_s4 }
0x4b24   :  { %v5081_v34 = vpop.permute.xlu2 %5080 }
0x4b25   :  { %v5083_v35 = vadd.f32 %v5081_v34, %v5073_v7 }
0x4b27   :  { %5908 = vtanh.f32 %v5083_v35 }
0x4b2d   :  { %v5909_v0 = vpop.eup %5908 }
0x4b2e   :  { %5086 = vrot.lane.b32.xlu1 %v5909_v0, %s5961_s3 }
0x4b36   :  { %5122 = vrot.lane.b32.xlu1 %v5120_v56, %s5962_s4 }
0x4b56   :  { %v5013_v13 = vpop.permute.xlu0 %5012 }
0x4b57   :  { %v5015_v63 = vadd.f32 %v5013_v13, %v5005_v11 }
0x4b59   :  { %5910 = vtanh.f32 %v5015_v63 }
0x4b5e   :  { %v5096_v45 = vpop.permute.xlu0 %5095 }
0x4b5f   :  { %v5911_v26 = vpop.eup %5910  ;;  %v5099_v20 = vsel %vm5098_vm2, %v5096_v45, 0.0 }
0x4b60   :  { %5018 = vrot.lane.b32.xlu2 %v5911_v26, %s5961_s3  ;;  %5100 = vadd.xlane.f32.xlu1 %v5099_v20 }
0x4ba0   :  { %v5087_v18 = vpop.permute.xlu1 %5086 }
0x4ba1   :  { %v5089_v39 = vmul.f32 %v5087_v18, %v5067_v40 }
0x4ba3   :  { %v5172_v3 = vrot.slane %v5089_v39, 2 }
0x4ba5   :  { %v5174_v48 = vsub.f32 %v5089_v39, %v5172_v3 }
0x4ba7   :  { %v5175_v49 = vmul.f32 %v5174_v48, %v5174_v48 }
0x4ba8   :  { %v5123_v12 = vpop.permute.xlu1 %5122 }
0x4ba9   :  { %5177 = vrot.lane.b32.xlu2 %v5175_v49, %s5962_s4  ;;  %v5126_v5 = vsel %vm5125_vm6, %v5123_v12, 0.0 }
0x4bba   :  { %v5019_v21 = vpop.permute.xlu2 %5018 }
0x4bbb   :  { %v5021_v16 = vmul.f32 %v5019_v21, %v4999_v46 }
0x4bbd   :  { %v5145_v4 = vrot.slane %v5021_v16, 2 }
0x4bbf   :  { %v5147_v52 = vsub.f32 %v5021_v16, %v5145_v4 }
0x4bc1   :  { %v5148_v57 = vmul.f32 %v5147_v52, %v5147_v52 }
0x4bc3   :  { %5150 = vrot.lane.b32.xlu0 %v5148_v57, %s5962_s4 }
0x4bd2   :  { %5127 = vadd.xlane.f32.xlu2 %v5126_v5 }
0x4bd3   :  { %v5101_v6 = vpop.xlane.xlu1 %5100 }
0x4bd4   :  { %vm5109_vm8 = vcmp.eq.f32.partialorder %v5101_v6, inf  ;;  %v5112_v32 = vand.u32 2147483648, %v5101_v6  ;;  %vm5111_vm11 = vcmp.eq.f32.partialorder %v5101_v6, 0.0 }
0x4c03   :  { %v5178_v2 = vpop.permute.xlu2 %5177 }
0x4c04   :  { %v5180_v8 = vsel %vm5125_vm6, %v5178_v2, 0.0 }
0x4c05   :  { %5181 = vadd.xlane.f32.xlu0 %v5180_v8 }
0x4c35   :  { %v5151_v47 = vpop.permute.xlu0 %5150 }
0x4c36   :  { %v5153_v19 = vsel %vm5098_vm2, %v5151_v47, 0.0 }
0x4c37   :  { %5154 = vadd.xlane.f32.xlu2 %v5153_v19 }
0x4c45   :  { %v5128_v55 = vpop.xlane.xlu2 %5127 }
0x4c46   :  { %5912 = vrsqrt.f32 %v5128_v55  ;;  %vm5136_vm7 = vcmp.eq.f32.partialorder %v5128_v55, inf  ;;  %v5139_v54 = vand.u32 2147483648, %v5128_v55  ;;  %vm5138_vm9 = vcmp.eq.f32.partialorder %v5128_v55, 0.0 }
0x4c47   :  { %5914 = vrsqrt.f32 %v5101_v6 }
0x4c4c   :  { %v5913_v24 = vpop.eup %5912 }
0x4c4d   :  { %v5915_v27 = vpop.eup %5914  ;;  %v5130_v33 = vmul.f32 %v5913_v24, %v5128_v55 }
0x4c4e   :  { %v5103_v36 = vmul.f32 %v5915_v27, %v5101_v6 }
0x4c4f   :  { %v5131_v62 = vmul.f32 %v5913_v24, %v5130_v33 }
0x4c50   :  { %v5104_v37 = vmul.f32 %v5915_v27, %v5103_v36 }
0x4c51   :  { %v5132_v38 = vmul.f32 0.5, %v5131_v62 }
0x4c52   :  { %v5105_v9 = vmul.f32 0.5, %v5104_v37 }
0x4c53   :  { %v5133_v14 = vsub.f32 1.5, %v5132_v38 }
0x4c54   :  { %v5106_v41 = vsub.f32 1.5, %v5105_v9 }
0x4c55   :  { %v5134_v30 = vmul.f32 %v5913_v24, %v5133_v14 }
0x4c56   :  { %v5107_v29 = vmul.f32 %v5915_v27, %v5106_v41 }
0x4c57   :  { %v5135_v17 = vmul.f32 %v5134_v30, %v5128_v55 }
0x4c58   :  { %v5108_v51 = vmul.f32 %v5107_v29, %v5101_v6 }
0x4c59   :  { %v5137_v61 = vsel %vm5136_vm7, %v5128_v55, %v5135_v17 }
0x4c5a   :  { %v5110_v46 = vsel %vm5109_vm8, %v5101_v6, %v5108_v51  ;;  %v5140_v23 = vsel %vm5138_vm9, %v5139_v54, %v5137_v61 }
0x4c5b   :  { %v5113_v58 = vsel %vm5111_vm11, %v5112_v32, %v5110_v46  ;;  %v5141_v35 = vsub.f32 0.0, %v5140_v23 }
0x4c5c   :  { %v5114_v50 = vsub.f32 0.0, %v5113_v58 }
0x4c5d   :  { %v5142_v22 = vmul.f32 1.442695, %v5141_v35 }
0x4c5e   :  { %v5115_v63 = vmul.f32 1.442695, %v5114_v50 }
0x4c78   :  { %v5182_v53 = vpop.xlane.xlu0 %5181 }
0x4c79   :  { %5916 = vrsqrt.f32 %v5182_v53  ;;  %vm5190_vm10 = vcmp.eq.f32.partialorder %v5182_v53, inf  ;;  %v5193_v7 = vand.u32 2147483648, %v5182_v53  ;;  %vm5192_vm15 = vcmp.eq.f32.partialorder %v5182_v53, 0.0 }
0x4c7f   :  { %v5917_v43 = vpop.eup %5916 }
0x4c80   :  { %v5184_v25 = vmul.f32 %v5917_v43, %v5182_v53 }
0x4c82   :  { %v5185_v44 = vmul.f32 %v5917_v43, %v5184_v25 }
0x4c84   :  { %v5186_v40 = vmul.f32 0.5, %v5185_v44 }
0x4c86   :  { %v5187_v10 = vsub.f32 1.5, %v5186_v40 }
0x4c88   :  { %v5188_v28 = vmul.f32 %v5917_v43, %v5187_v10 }
0x4c8a   :  { %v5189_v60 = vmul.f32 %v5188_v28, %v5182_v53 }
0x4c8c   :  { %v5191_v42 = vsel %vm5190_vm10, %v5182_v53, %v5189_v60 }
0x4c8d   :  { %v5194_v15 = vsel %vm5192_vm15, %v5193_v7, %v5191_v42 }
0x4c8e   :  { %v5195_v11 = vsub.f32 0.0, %v5194_v15 }
0x4c90   :  { %v5196_v26 = vmul.f32 1.442695, %v5195_v11 }
0x4caa   :  { %v5155_v1 = vpop.xlane.xlu2 %5154 }
0x4cab   :  { %5918 = vrsqrt.f32 %v5155_v1  ;;  %vm5163_vm12 = vcmp.eq.f32.partialorder %v5155_v1, inf  ;;  %v5166_v20 = vand.u32 2147483648, %v5155_v1  ;;  %vm5165_vm13 = vcmp.eq.f32.partialorder %v5155_v1, 0.0 }
0x4cac   :  { %5920 = vpow2.f32 %v5142_v22 }
0x4cad   :  { %5922 = vpow2.f32 %v5115_v63 }
0x4cae   :  { %5924 = vpow2.f32 %v5196_v26 }
0x4cb1   :  { %v5919_v31 = vpop.eup %5918 }
0x4cb2   :  { %v5157_v59 = vmul.f32 %v5919_v31, %v5155_v1  ;;  %v5921_v49 = vpop.eup %5920 }
0x4cb3   :  { %v5923_v21 = vpop.eup %5922  ;;  %v5202_v16 = vrot.slane %v5921_v49, 6 }
0x4cb4   :  { %v5158_v34 = vmul.f32 %v5919_v31, %v5157_v59  ;;  %v5925_v4 = vpop.eup %5924  ;;  %v5199_v52 = vrot.slane %v5923_v21, 4 }
0x4cb5   :  { %v5205_v5 = vrot.slane %v5925_v4, 2 }
0x4cb6   :  { %v5159_v0 = vmul.f32 0.5, %v5158_v34  ;;  %v5208_v12 = vsel %vm5207_vm14, %v5199_v52, %v5202_v16 }
0x4cb8   :  { %v5160_v56 = vsub.f32 1.5, %v5159_v0 }
0x4cba   :  { %v5161_v13 = vmul.f32 %v5919_v31, %v5160_v56 }
0x4cbc   :  { %v5162_v45 = vmul.f32 %v5161_v13, %v5155_v1 }
0x4cbe   :  { %v5164_v18 = vsel %vm5163_vm12, %v5155_v1, %v5162_v45 }
0x4cbf   :  { %v5167_v39 = vsel %vm5165_vm13, %v5166_v20, %v5164_v18 }
0x4cc0   :  { %v5168_v3 = vsub.f32 0.0, %v5167_v39 }
0x4cc2   :  { %v5169_v48 = vmul.f32 1.442695, %v5168_v3 }
0x4cc4   :  { %5926 = vpow2.f32 %v5169_v48 }
0x4cca   :  { %v5927_v57 = vpop.eup %5926 }
0x4ccb   :  { %v5209_v2 = vsel %vm110_vm1, %v5208_v12, %v5927_v57 }
0x4ccc   :  { %v5211_v8 = vsel %vm5210_vm3, %v5209_v2, %v5205_v5 }
0x4ccd   :  { %5213 = vst.msk [vmem:[%s7518_s13] sm:$0xff] %vm5212_vm4, %v5211_v8 }

</bundles_post_ra>
